<compile_context>
chip_gen: v7x
topology: tpu7x:2x2x1
jax: 0.10.0
libtpu: 0.0.40
codegen_flags: <defaults>
</compile_context>

<pallas_src>
import functools

import jax
import jax.numpy as jnp
from jax.experimental import pallas as pl
from jax.experimental.pallas import tpu as pltpu


MATMUL_DTYPE = jnp.bfloat16   # MXU operand dtype; accumulation is always f32.


# ----------------------------------------------------------------------------
# DynaMixerOp on a stack of sequences x: (Bm, L, C); weights already (in, out)
# and bf16; biases f32 rows (1, n).  Traced inline inside the fused kernel.
# ----------------------------------------------------------------------------
def _mixer(x, wc, bc, wg, bg, wo, bo, *, num_head, reduced_dim, md):
    Bm, L, C = x.shape
    nh, rd = num_head, reduced_dim
    hd = C // nh

    # compress: one MXU matmul over all tokens -> (Bm*L, nh*rd)
    cw = jnp.dot(x.reshape(Bm * L, C).astype(md), wc,
                 preferred_element_type=jnp.float32) + bc
    # head-major rearrangement: (Bm, L, nh, rd) -> (Bm, nh, L, rd) -> (Bm*nh, L*rd)
    cw = cw.reshape(Bm, L, nh, rd).transpose(0, 2, 1, 3).reshape(Bm * nh, L * rd)

    # generate: one batched-over-heads MXU matmul -> (Bm*nh, L*L).  wg rows were
    # pre-permuted host-side so the flat order is (l_out, k): softmax over last axis.
    g = jnp.dot(cw.astype(md), wg, preferred_element_type=jnp.float32) + bg
    g = g.reshape(Bm * nh, L, L)                          # [g, l_out, k]
    g = g - jnp.max(g, axis=-1, keepdims=True)
    e = jnp.exp(g)
    att = e * pl.reciprocal(jnp.sum(e, axis=-1, keepdims=True), approx=True)

    # attention-apply on the MXU: y[g,l,d] = sum_k att[g,l,k] * x[g,k,d]
    xh = x.reshape(Bm, L, nh, hd).transpose(0, 2, 1, 3).reshape(Bm * nh, L, hd)
    y = jnp.einsum("glk,gkd->gld", att.astype(md), xh.astype(md),
                   preferred_element_type=jnp.float32)    # (Bm*nh, L, hd)
    y = y.reshape(Bm, nh, L, hd).transpose(0, 2, 1, 3).reshape(Bm * L, C)

    out = jnp.dot(y.astype(md), wo, preferred_element_type=jnp.float32) + bo
    return out.reshape(Bm, L, C)


# ----------------------------------------------------------------------------
# Fused DynaMixerBlock kernel: one grid step processes a (bb, H, W, C) batch block.
# ----------------------------------------------------------------------------
def _dynamixer_block_kernel(
        x_ref,
        hwc_ref, hbc_ref, hwg_ref, hbg_ref, hwo_ref, hbo_ref,     # mix_h params
        wwc_ref, wbc_ref, wwg_ref, wbg_ref, wwo_ref, wbo_ref,     # mix_w params
        wmlpc_ref, w1_ref, b1_ref, w2_ref, b2_ref, wproj_ref, bproj_ref,
        o_ref, *, num_head, reduced_dim):
    md = MATMUL_DTYPE
    bb, H, W, C = x_ref.shape
    x = x_ref[...].astype(jnp.float32)                    # (bb, H, W, C)

    mixer = functools.partial(_mixer, num_head=num_head, reduced_dim=reduced_dim, md=md)

    # mix over W: image rows are the sequences
    w_mix = mixer(x.reshape(bb * H, W, C),
                  wwc_ref[...], wbc_ref[...], wwg_ref[...],
                  wbg_ref[...], wwo_ref[...], wbo_ref[...]).reshape(bb, H, W, C)

    # mix over H: image columns are the sequences (transpose in VMEM, not via HBM)
    xt = x.transpose(0, 2, 1, 3).reshape(bb * W, H, C)
    h_mix = mixer(xt,
                  hwc_ref[...], hbc_ref[...], hwg_ref[...],
                  hbg_ref[...], hwo_ref[...], hbo_ref[...])
    h_mix = h_mix.reshape(bb, W, H, C).transpose(0, 2, 1, 3)

    # channel MLP (qkv_bias=False -> no bias)
    c_mix = jnp.dot(x.reshape(bb * H * W, C).astype(md), wmlpc_ref[...],
                    preferred_element_type=jnp.float32).reshape(bb, H, W, C)

    # reweight: spatial mean -> MLP -> softmax over the 3 branches
    # TODO(synk): FeedForward definition not given in the spec; assumed Linear-GELU(tanh)-Linear.
    a = jnp.mean(h_mix + w_mix + c_mix, axis=(1, 2))                       # (bb, C) f32
    z1 = jnp.dot(a.astype(md), w1_ref[...], preferred_element_type=jnp.float32) + b1_ref[...]
    z1 = jax.nn.gelu(z1, approximate=True)
    z2 = jnp.dot(z1.astype(md), w2_ref[...], preferred_element_type=jnp.float32) + b2_ref[...]
    # fc2 rows pre-permuted host-side so z2 lanes are branch-major: [h | w | c] blocks of C.
    ah, aw, ac = z2[:, 0:C], z2[:, C:2 * C], z2[:, 2 * C:3 * C]
    m = jnp.maximum(jnp.maximum(ah, aw), ac)
    eh, ew, ec = jnp.exp(ah - m), jnp.exp(aw - m), jnp.exp(ac - m)
    inv = pl.reciprocal(eh + ew + ec, approx=True)
    rh, rw, rc = eh * inv, ew * inv, ec * inv                              # (bb, C) each

    mixed = (h_mix * rh[:, None, None, :] + w_mix * rw[:, None, None, :]
             + c_mix * rc[:, None, None, :])
    out = jnp.dot(mixed.reshape(bb * H * W, C).astype(md), wproj_ref[...],
                  preferred_element_type=jnp.float32) + bproj_ref[...]
    # nn.Dropout(p=0.0) is identity.
    o_ref[...] = out.reshape(bb, H, W, C).astype(o_ref.dtype)


# ----------------------------------------------------------------------------
# Host glue: parameter layout prep (pure permutations/casts) + pallas_call.
# ----------------------------------------------------------------------------
def _prep_mixer_params(p, L, md):
    wc_t = p["wc"].T.astype(md)                                   # (C, nh*rd)
    bc = p["bc"][None, :].astype(jnp.float32)
    # permute generate output rows (k*L+l) -> (l*L+k) so the in-kernel reshape gives
    # [l_out, k] directly and softmax runs over the minor axis.
    L_rd = p["wg"].shape[1]
    wg_p = p["wg"].reshape(L, L, L_rd).transpose(1, 0, 2).reshape(L * L, L_rd)
    bg_p = p["bg"].reshape(L, L).T.reshape(L * L)
    wg_t = wg_p.T.astype(md)                                      # (L*rd, L*L)
    bg = bg_p[None, :].astype(jnp.float32)
    wo_t = p["wo"].T.astype(md)                                   # (C, C)
    bo = p["bo"][None, :].astype(jnp.float32)
    return [wc_t, bc, wg_t, bg, wo_t, bo]


def dynamixer_block(x, params, *, num_head, reduced_dim, block_b=None):
    B, H, W, C = x.shape
    Ch = params["fc1_w"].shape[0]
    md = MATMUL_DTYPE

    if block_b is None:
        # biggest batch block that still leaves >= 2 grid steps (dual-TC on v7x);
        # the cap keeps the (bb, H, W, C) activation blocks well inside VMEM.
        block_b = max(1, min(8, B // 2))
        while B % block_b:
            block_b -= 1

    mix_h_args = _prep_mixer_params(params["mix_h"], H, md)
    mix_w_args = _prep_mixer_params(params["mix_w"], W, md)

    wmlpc_t = params["mlp_c_w"].T.astype(md)
    w1_t = params["fc1_w"].T.astype(md)
    b1 = params["fc1_b"][None, :].astype(jnp.float32)
    # Re-order fc2 so the kernel's [h|w|c] lane blocks reproduce PyTorch's
    # reshape(B, C, 3).permute(2, 0, 1).  Pure parameter glue (no math change).
    w2p = params["fc2_w"].reshape(C, 3, Ch).transpose(1, 0, 2).reshape(3 * C, Ch)
    b2p = params["fc2_b"].reshape(C, 3).T.reshape(3 * C)
    w2_t = w2p.T.astype(md)
    b2 = b2p[None, :].astype(jnp.float32)
    wproj_t = params["proj_w"].T.astype(md)
    bproj = params["proj_b"][None, :].astype(jnp.float32)

    weight_args = (mix_h_args + mix_w_args
                   + [wmlpc_t, w1_t, b1, w2_t, b2, wproj_t, bproj])

    def full_spec(a):
        nd = a.ndim
        return pl.BlockSpec(a.shape, lambda i, _nd=nd: (0,) * _nd)

    xspec = pl.BlockSpec((block_b, H, W, C), lambda i: (i, 0, 0, 0))
    kern = functools.partial(_dynamixer_block_kernel,
                             num_head=num_head, reduced_dim=reduced_dim)
    return pl.pallas_call(
        kern,
        out_shape=jax.ShapeDtypeStruct((B, H, W, C), x.dtype),
        grid=(B // block_b,),
        in_specs=[xspec] + [full_spec(a) for a in weight_args],
        out_specs=xspec,
        compiler_params=pltpu.CompilerParams(dimension_semantics=("parallel",)),
    )(x, *weight_args)


# ----------------------------------------------------------------------------
# Pure-JAX reference (mirrors the PyTorch forward exactly) for validation.
# ----------------------------------------------------------------------------
def ref_dynamixer_op(x, p, num_head, rd):
    B, L, C = x.shape
    wts = x @ p["wc"].T + p["bc"]
    wts = wts.reshape(B, L, num_head, rd).transpose(0, 2, 1, 3).reshape(B, num_head, L * rd)
    wts = wts @ p["wg"].T + p["bg"]
    wts = jax.nn.softmax(wts.reshape(B, num_head, L, L), axis=-2)
    xr = x.reshape(B, L, num_head, C // num_head).transpose(0, 2, 3, 1)
    y = jnp.matmul(xr, wts)
    y = y.transpose(0, 3, 1, 2).reshape(B, L, C)
    return y @ p["wo"].T + p["bo"]


def ref_dynamixer_block(x, params, *, num_head, reduced_dim):
    B, H, W, C = x.shape
    h = ref_dynamixer_op(x.transpose(0, 2, 1, 3).reshape(-1, H, C),
                         params["mix_h"], num_head, reduced_dim)
    h = h.reshape(B, W, H, C).transpose(0, 2, 1, 3)
    w = ref_dynamixer_op(x.reshape(-1, W, C), params["mix_w"], num_head, reduced_dim)
    w = w.reshape(B, H, W, C)
    c = x @ params["mlp_c_w"].T
    a = (h + w + c).transpose(0, 3, 1, 2).reshape(B, C, -1).mean(-1)
    z = jax.nn.gelu(a @ params["fc1_w"].T + params["fc1_b"], approximate=True)
    z = z @ params["fc2_w"].T + params["fc2_b"]
    a3 = jax.nn.softmax(z.reshape(B, C, 3).transpose(2, 0, 1), axis=0)[:, :, None, None, :]
    out = h * a3[0] + w * a3[1] + c * a3[2]
    return out @ params["proj_w"].T + params["proj_b"]


# ----------------------------------------------------------------------------
# Deterministic parameter construction (shapes follow the PyTorch __init__).
# ----------------------------------------------------------------------------
def make_params(key, C, L, num_head, reduced_dim):
    ks = jax.random.split(key, 8)

    def lin(k, out_d, in_d, scale=0.05, bias=True):
        kw, kb = jax.random.split(k)
        wgt = scale * jax.random.normal(kw, (out_d, in_d), jnp.float32)
        b = scale * jax.random.normal(kb, (out_d,), jnp.float32) if bias else None
        return wgt, b

    def mix(k):
        k1, k2, k3 = jax.random.split(k, 3)
        wc, bc = lin(k1, num_head * reduced_dim, C)
        wg, bg = lin(k2, L * L, L * reduced_dim)
        wo, bo = lin(k3, C, C)
        return dict(wc=wc, bc=bc, wg=wg, bg=bg, wo=wo, bo=bo)

    p = {"mix_h": mix(ks[0]), "mix_w": mix(ks[1])}
    p["mlp_c_w"], _ = lin(ks[2], C, C, bias=False)
    p["fc1_w"], p["fc1_b"] = lin(ks[3], C // 4, C)
    p["fc2_w"], p["fc2_b"] = lin(ks[4], 3 * C, C // 4)
    p["proj_w"], p["proj_b"] = lin(ks[5], C, C)
    return p


if __name__ == "__main__":
    B, H, W, C = 2, 8, 8, 32          # num_patch = 8, hidden_dim = 32
    num_head, reduced_dim = 4, 2

    key = jax.random.PRNGKey(0)
    kp, kx = jax.random.split(key)
    params = make_params(kp, C, H, num_head, reduced_dim)
    x = jax.random.normal(kx, (B, H, W, C), jnp.float32)

    out = dynamixer_block(x, params, num_head=num_head, reduced_dim=reduced_dim)
    out = jax.block_until_ready(out)

    ref = jax.block_until_ready(
        ref_dynamixer_block(x, params, num_head=num_head, reduced_dim=reduced_dim))
    assert out.shape == (B, H, W, C)
    max_err = float(jnp.max(jnp.abs(out - ref)))
    # bf16 MXU operands + approx reciprocal -> loosened atol; accumulation stays f32.
    assert jnp.allclose(out, ref, rtol=2e-2, atol=1e-2), max_err

    print("KERNEL_OK")
</pallas_src>

<mosaic_0001>
module attributes {stable_mosaic.version = 11 : i64} {
  func.func @_dynamixer_block_kernel(%arg0: i32, %arg1: memref<1x8x8x32xf32, #tpu.memory_space<vmem>>, %arg2: memref<32x8xbf16, #tpu.memory_space<vmem>>, %arg3: memref<1x8xf32, #tpu.memory_space<vmem>>, %arg4: memref<16x64xbf16, #tpu.memory_space<vmem>>, %arg5: memref<1x64xf32, #tpu.memory_space<vmem>>, %arg6: memref<32x32xbf16, #tpu.memory_space<vmem>>, %arg7: memref<1x32xf32, #tpu.memory_space<vmem>>, %arg8: memref<32x8xbf16, #tpu.memory_space<vmem>>, %arg9: memref<1x8xf32, #tpu.memory_space<vmem>>, %arg10: memref<16x64xbf16, #tpu.memory_space<vmem>>, %arg11: memref<1x64xf32, #tpu.memory_space<vmem>>, %arg12: memref<32x32xbf16, #tpu.memory_space<vmem>>, %arg13: memref<1x32xf32, #tpu.memory_space<vmem>>, %arg14: memref<32x32xbf16, #tpu.memory_space<vmem>>, %arg15: memref<32x8xbf16, #tpu.memory_space<vmem>>, %arg16: memref<1x8xf32, #tpu.memory_space<vmem>>, %arg17: memref<8x96xbf16, #tpu.memory_space<vmem>>, %arg18: memref<1x96xf32, #tpu.memory_space<vmem>>, %arg19: memref<32x32xbf16, #tpu.memory_space<vmem>>, %arg20: memref<1x32xf32, #tpu.memory_space<vmem>>, %arg21: memref<1x8x8x32xf32, #tpu.memory_space<vmem>>) attributes {dimension_semantics = [#tpu.dimension_semantics<parallel>], iteration_bounds = array<i64: 2>, scalar_prefetch = 0 : i64, scratch_operands = 0 : i64, tpu.core_type = #tpu.core_type<tc>, window_params = [{transform_indices = @transform_0, window_bounds = array<i64: 1, 8, 8, 32>}, {pipeline_mode = #tpu.pipeline_mode<synchronous>, transform_indices = @transform_1, window_bounds = array<i64: 32, 8>}, {pipeline_mode = #tpu.pipeline_mode<synchronous>, transform_indices = @transform_2, window_bounds = array<i64: 1, 8>}, {pipeline_mode = #tpu.pipeline_mode<synchronous>, transform_indices = @transform_3, window_bounds = array<i64: 16, 64>}, {pipeline_mode = #tpu.pipeline_mode<synchronous>, transform_indices = @transform_4, window_bounds = array<i64: 1, 64>}, {pipeline_mode = #tpu.pipeline_mode<synchronous>, transform_indices = @transform_5, window_bounds = array<i64: 32, 32>}, {pipeline_mode = #tpu.pipeline_mode<synchronous>, transform_indices = @transform_6, window_bounds = array<i64: 1, 32>}, {pipeline_mode = #tpu.pipeline_mode<synchronous>, transform_indices = @transform_7, window_bounds = array<i64: 32, 8>}, {pipeline_mode = #tpu.pipeline_mode<synchronous>, transform_indices = @transform_8, window_bounds = array<i64: 1, 8>}, {pipeline_mode = #tpu.pipeline_mode<synchronous>, transform_indices = @transform_9, window_bounds = array<i64: 16, 64>}, {pipeline_mode = #tpu.pipeline_mode<synchronous>, transform_indices = @transform_10, window_bounds = array<i64: 1, 64>}, {pipeline_mode = #tpu.pipeline_mode<synchronous>, transform_indices = @transform_11, window_bounds = array<i64: 32, 32>}, {pipeline_mode = #tpu.pipeline_mode<synchronous>, transform_indices = @transform_12, window_bounds = array<i64: 1, 32>}, {pipeline_mode = #tpu.pipeline_mode<synchronous>, transform_indices = @transform_13, window_bounds = array<i64: 32, 32>}, {pipeline_mode = #tpu.pipeline_mode<synchronous>, transform_indices = @transform_14, window_bounds = array<i64: 32, 8>}, {pipeline_mode = #tpu.pipeline_mode<synchronous>, transform_indices = @transform_15, window_bounds = array<i64: 1, 8>}, {pipeline_mode = #tpu.pipeline_mode<synchronous>, transform_indices = @transform_16, window_bounds = array<i64: 8, 96>}, {pipeline_mode = #tpu.pipeline_mode<synchronous>, transform_indices = @transform_17, window_bounds = array<i64: 1, 96>}, {pipeline_mode = #tpu.pipeline_mode<synchronous>, transform_indices = @transform_18, window_bounds = array<i64: 32, 32>}, {pipeline_mode = #tpu.pipeline_mode<synchronous>, transform_indices = @transform_19, window_bounds = array<i64: 1, 32>}, {transform_indices = @transform_20, window_bounds = array<i64: 1, 8, 8, 32>}]} {
    %c0 = arith.constant 0 : index
    %c0_0 = arith.constant 0 : index
    %c0_1 = arith.constant 0 : index
    %c0_2 = arith.constant 0 : index
    %0 = vector.load %arg1[%c0, %c0_0, %c0_1, %c0_2] : memref<1x8x8x32xf32, #tpu.memory_space<vmem>>, vector<1x8x8x32xf32>
    %1 = vector.shape_cast %0 : vector<1x8x8x32xf32> to vector<8x8x32xf32>
    %c0_3 = arith.constant 0 : index
    %c0_4 = arith.constant 0 : index
    %2 = vector.load %arg8[%c0_3, %c0_4] : memref<32x8xbf16, #tpu.memory_space<vmem>>, vector<32x8xbf16>
    %c0_5 = arith.constant 0 : index
    %c0_6 = arith.constant 0 : index
    %3 = vector.load %arg9[%c0_5, %c0_6] : memref<1x8xf32, #tpu.memory_space<vmem>>, vector<1x8xf32>
    %c0_7 = arith.constant 0 : index
    %c0_8 = arith.constant 0 : index
    %4 = vector.load %arg10[%c0_7, %c0_8] : memref<16x64xbf16, #tpu.memory_space<vmem>>, vector<16x64xbf16>
    %c0_9 = arith.constant 0 : index
    %c0_10 = arith.constant 0 : index
    %5 = vector.load %arg11[%c0_9, %c0_10] : memref<1x64xf32, #tpu.memory_space<vmem>>, vector<1x64xf32>
    %c0_11 = arith.constant 0 : index
    %c0_12 = arith.constant 0 : index
    %6 = vector.load %arg12[%c0_11, %c0_12] : memref<32x32xbf16, #tpu.memory_space<vmem>>, vector<32x32xbf16>
    %c0_13 = arith.constant 0 : index
    %c0_14 = arith.constant 0 : index
    %7 = vector.load %arg13[%c0_13, %c0_14] : memref<1x32xf32, #tpu.memory_space<vmem>>, vector<1x32xf32>
    %8 = vector.shape_cast %1 : vector<8x8x32xf32> to vector<64x32xf32>
    %9 = arith.truncf %8 : vector<64x32xf32> to vector<64x32xbf16>
    %cst = arith.constant dense<0.000000e+00> : vector<64x8xf32>
    %10 = tpu.matmul %9, %2, %cst {dimension_numbers = #tpu.dot_dimension_numbers<[1], [0], [0], [1], [0, 0, 1, 1], [], []>} : vector<64x32xbf16>, vector<32x8xbf16>, vector<64x8xf32> -> vector<64x8xf32>
    %11 = vector.broadcast %3 : vector<1x8xf32> to vector<64x8xf32>
    %12 = arith.addf %10, %11 : vector<64x8xf32>
    %13 = vector.shape_cast %12 : vector<64x8xf32> to vector<8x8x4x2xf32>
    %14 = tpu.transpose %13, [0, 2, 1, 3] : vector<8x8x4x2xf32> -> vector<8x4x8x2xf32>
    %15 = vector.shape_cast %14 : vector<8x4x8x2xf32> to vector<32x16xf32>
    %16 = arith.truncf %15 : vector<32x16xf32> to vector<32x16xbf16>
    %cst_15 = arith.constant dense<0.000000e+00> : vector<32x64xf32>
    %17 = tpu.matmul %16, %4, %cst_15 {dimension_numbers = #tpu.dot_dimension_numbers<[1], [0], [0], [1], [0, 0, 1, 1], [], []>} : vector<32x16xbf16>, vector<16x64xbf16>, vector<32x64xf32> -> vector<32x64xf32>
    %18 = vector.broadcast %5 : vector<1x64xf32> to vector<32x64xf32>
    %19 = arith.addf %17, %18 : vector<32x64xf32>
    %20 = vector.shape_cast %19 : vector<32x64xf32> to vector<32x8x8xf32>
    %cst_16 = arith.constant dense<0xFF800000> : vector<32x8xf32>
    %21 = vector.multi_reduction <maximumf>, %20, %cst_16 [2] : vector<32x8x8xf32> to vector<32x8xf32>
    %22 = vector.shape_cast %21 : vector<32x8xf32> to vector<32x8x1xf32>
    %23 = vector.broadcast %22 : vector<32x8x1xf32> to vector<32x8x8xf32>
    %24 = arith.subf %20, %23 : vector<32x8x8xf32>
    %25 = math.exp %24 : vector<32x8x8xf32>
    %cst_17 = arith.constant dense<0.000000e+00> : vector<32x8xf32>
    %26 = vector.multi_reduction <add>, %25, %cst_17 [2] : vector<32x8x8xf32> to vector<32x8xf32>
    %27 = vector.shape_cast %26 : vector<32x8xf32> to vector<32x8x1xf32>
    %28 = tpu.reciprocal %27 {approx = true} : vector<32x8x1xf32> -> vector<32x8x1xf32>
    %29 = vector.broadcast %28 : vector<32x8x1xf32> to vector<32x8x8xf32>
    %30 = arith.mulf %25, %29 : vector<32x8x8xf32>
    %31 = vector.shape_cast %1 : vector<8x8x32xf32> to vector<8x8x4x8xf32>
    %32 = tpu.transpose %31, [0, 2, 1, 3] : vector<8x8x4x8xf32> -> vector<8x4x8x8xf32>
    %33 = vector.shape_cast %32 : vector<8x4x8x8xf32> to vector<32x8x8xf32>
    %34 = arith.truncf %30 : vector<32x8x8xf32> to vector<32x8x8xbf16>
    %35 = arith.truncf %33 : vector<32x8x8xf32> to vector<32x8x8xbf16>
    "tpu.trace_start"() <{level = 10 : i32, message = "glk,gkd->gld"}> : () -> ()
    %cst_18 = arith.constant dense<0.000000e+00> : vector<32x8x8xf32>
    %36 = tpu.matmul %34, %35, %cst_18 {dimension_numbers = #tpu.dot_dimension_numbers<[2], [1], [1], [2], [0, 0, 0, 1, 1, 2], [0], [0]>} : vector<32x8x8xbf16>, vector<32x8x8xbf16>, vector<32x8x8xf32> -> vector<32x8x8xf32>
    "tpu.trace_stop"() : () -> ()
    %37 = vector.shape_cast %36 : vector<32x8x8xf32> to vector<8x4x8x8xf32>
    %38 = tpu.transpose %37, [0, 2, 1, 3] : vector<8x4x8x8xf32> -> vector<8x8x4x8xf32>
    %39 = vector.shape_cast %38 : vector<8x8x4x8xf32> to vector<64x32xf32>
    %40 = arith.truncf %39 : vector<64x32xf32> to vector<64x32xbf16>
    %cst_19 = arith.constant dense<0.000000e+00> : vector<64x32xf32>
    %41 = tpu.matmul %40, %6, %cst_19 {dimension_numbers = #tpu.dot_dimension_numbers<[1], [0], [0], [1], [0, 0, 1, 1], [], []>} : vector<64x32xbf16>, vector<32x32xbf16>, vector<64x32xf32> -> vector<64x32xf32>
    %42 = vector.broadcast %7 : vector<1x32xf32> to vector<64x32xf32>
    %43 = arith.addf %41, %42 : vector<64x32xf32>
    %44 = vector.shape_cast %43 : vector<64x32xf32> to vector<8x8x32xf32>
    %45 = vector.shape_cast %44 : vector<8x8x32xf32> to vector<1x8x8x32xf32>
    %46 = tpu.transpose %0, [0, 2, 1, 3] : vector<1x8x8x32xf32> -> vector<1x8x8x32xf32>
    %47 = vector.shape_cast %46 : vector<1x8x8x32xf32> to vector<8x8x32xf32>
    %c0_20 = arith.constant 0 : index
    %c0_21 = arith.constant 0 : index
    %48 = vector.load %arg2[%c0_20, %c0_21] : memref<32x8xbf16, #tpu.memory_space<vmem>>, vector<32x8xbf16>
    %c0_22 = arith.constant 0 : index
    %c0_23 = arith.constant 0 : index
    %49 = vector.load %arg3[%c0_22, %c0_23] : memref<1x8xf32, #tpu.memory_space<vmem>>, vector<1x8xf32>
    %c0_24 = arith.constant 0 : index
    %c0_25 = arith.constant 0 : index
    %50 = vector.load %arg4[%c0_24, %c0_25] : memref<16x64xbf16, #tpu.memory_space<vmem>>, vector<16x64xbf16>
    %c0_26 = arith.constant 0 : index
    %c0_27 = arith.constant 0 : index
    %51 = vector.load %arg5[%c0_26, %c0_27] : memref<1x64xf32, #tpu.memory_space<vmem>>, vector<1x64xf32>
    %c0_28 = arith.constant 0 : index
    %c0_29 = arith.constant 0 : index
    %52 = vector.load %arg6[%c0_28, %c0_29] : memref<32x32xbf16, #tpu.memory_space<vmem>>, vector<32x32xbf16>
    %c0_30 = arith.constant 0 : index
    %c0_31 = arith.constant 0 : index
    %53 = vector.load %arg7[%c0_30, %c0_31] : memref<1x32xf32, #tpu.memory_space<vmem>>, vector<1x32xf32>
    %54 = vector.shape_cast %47 : vector<8x8x32xf32> to vector<64x32xf32>
    %55 = arith.truncf %54 : vector<64x32xf32> to vector<64x32xbf16>
    %cst_32 = arith.constant dense<0.000000e+00> : vector<64x8xf32>
    %56 = tpu.matmul %55, %48, %cst_32 {dimension_numbers = #tpu.dot_dimension_numbers<[1], [0], [0], [1], [0, 0, 1, 1], [], []>} : vector<64x32xbf16>, vector<32x8xbf16>, vector<64x8xf32> -> vector<64x8xf32>
    %57 = vector.broadcast %49 : vector<1x8xf32> to vector<64x8xf32>
    %58 = arith.addf %56, %57 : vector<64x8xf32>
    %59 = vector.shape_cast %58 : vector<64x8xf32> to vector<8x8x4x2xf32>
    %60 = tpu.transpose %59, [0, 2, 1, 3] : vector<8x8x4x2xf32> -> vector<8x4x8x2xf32>
    %61 = vector.shape_cast %60 : vector<8x4x8x2xf32> to vector<32x16xf32>
    %62 = arith.truncf %61 : vector<32x16xf32> to vector<32x16xbf16>
    %cst_33 = arith.constant dense<0.000000e+00> : vector<32x64xf32>
    %63 = tpu.matmul %62, %50, %cst_33 {dimension_numbers = #tpu.dot_dimension_numbers<[1], [0], [0], [1], [0, 0, 1, 1], [], []>} : vector<32x16xbf16>, vector<16x64xbf16>, vector<32x64xf32> -> vector<32x64xf32>
    %64 = vector.broadcast %51 : vector<1x64xf32> to vector<32x64xf32>
    %65 = arith.addf %63, %64 : vector<32x64xf32>
    %66 = vector.shape_cast %65 : vector<32x64xf32> to vector<32x8x8xf32>
    %cst_34 = arith.constant dense<0xFF800000> : vector<32x8xf32>
    %67 = vector.multi_reduction <maximumf>, %66, %cst_34 [2] : vector<32x8x8xf32> to vector<32x8xf32>
    %68 = vector.shape_cast %67 : vector<32x8xf32> to vector<32x8x1xf32>
    %69 = vector.broadcast %68 : vector<32x8x1xf32> to vector<32x8x8xf32>
    %70 = arith.subf %66, %69 : vector<32x8x8xf32>
    %71 = math.exp %70 : vector<32x8x8xf32>
    %cst_35 = arith.constant dense<0.000000e+00> : vector<32x8xf32>
    %72 = vector.multi_reduction <add>, %71, %cst_35 [2] : vector<32x8x8xf32> to vector<32x8xf32>
    %73 = vector.shape_cast %72 : vector<32x8xf32> to vector<32x8x1xf32>
    %74 = tpu.reciprocal %73 {approx = true} : vector<32x8x1xf32> -> vector<32x8x1xf32>
    %75 = vector.broadcast %74 : vector<32x8x1xf32> to vector<32x8x8xf32>
    %76 = arith.mulf %71, %75 : vector<32x8x8xf32>
    %77 = vector.shape_cast %47 : vector<8x8x32xf32> to vector<8x8x4x8xf32>
    %78 = tpu.transpose %77, [0, 2, 1, 3] : vector<8x8x4x8xf32> -> vector<8x4x8x8xf32>
    %79 = vector.shape_cast %78 : vector<8x4x8x8xf32> to vector<32x8x8xf32>
    %80 = arith.truncf %76 : vector<32x8x8xf32> to vector<32x8x8xbf16>
    %81 = arith.truncf %79 : vector<32x8x8xf32> to vector<32x8x8xbf16>
    "tpu.trace_start"() <{level = 10 : i32, message = "glk,gkd->gld"}> : () -> ()
    %cst_36 = arith.constant dense<0.000000e+00> : vector<32x8x8xf32>
    %82 = tpu.matmul %80, %81, %cst_36 {dimension_numbers = #tpu.dot_dimension_numbers<[2], [1], [1], [2], [0, 0, 0, 1, 1, 2], [0], [0]>} : vector<32x8x8xbf16>, vector<32x8x8xbf16>, vector<32x8x8xf32> -> vector<32x8x8xf32>
    "tpu.trace_stop"() : () -> ()
    %83 = vector.shape_cast %82 : vector<32x8x8xf32> to vector<8x4x8x8xf32>
    %84 = tpu.transpose %83, [0, 2, 1, 3] : vector<8x4x8x8xf32> -> vector<8x8x4x8xf32>
    %85 = vector.shape_cast %84 : vector<8x8x4x8xf32> to vector<64x32xf32>
    %86 = arith.truncf %85 : vector<64x32xf32> to vector<64x32xbf16>
    %cst_37 = arith.constant dense<0.000000e+00> : vector<64x32xf32>
    %87 = tpu.matmul %86, %52, %cst_37 {dimension_numbers = #tpu.dot_dimension_numbers<[1], [0], [0], [1], [0, 0, 1, 1], [], []>} : vector<64x32xbf16>, vector<32x32xbf16>, vector<64x32xf32> -> vector<64x32xf32>
    %88 = vector.broadcast %53 : vector<1x32xf32> to vector<64x32xf32>
    %89 = arith.addf %87, %88 : vector<64x32xf32>
    %90 = vector.shape_cast %89 : vector<64x32xf32> to vector<8x8x32xf32>
    %91 = vector.shape_cast %90 : vector<8x8x32xf32> to vector<1x8x8x32xf32>
    %92 = tpu.transpose %91, [0, 2, 1, 3] : vector<1x8x8x32xf32> -> vector<1x8x8x32xf32>
    %93 = vector.shape_cast %0 : vector<1x8x8x32xf32> to vector<64x32xf32>
    %94 = arith.truncf %93 : vector<64x32xf32> to vector<64x32xbf16>
    %c0_38 = arith.constant 0 : index
    %c0_39 = arith.constant 0 : index
    %95 = vector.load %arg14[%c0_38, %c0_39] : memref<32x32xbf16, #tpu.memory_space<vmem>>, vector<32x32xbf16>
    %cst_40 = arith.constant dense<0.000000e+00> : vector<64x32xf32>
    %96 = tpu.matmul %94, %95, %cst_40 {dimension_numbers = #tpu.dot_dimension_numbers<[1], [0], [0], [1], [0, 0, 1, 1], [], []>} : vector<64x32xbf16>, vector<32x32xbf16>, vector<64x32xf32> -> vector<64x32xf32>
    %97 = vector.shape_cast %96 : vector<64x32xf32> to vector<1x8x8x32xf32>
    %98 = arith.addf %92, %45 : vector<1x8x8x32xf32>
    %99 = arith.addf %98, %97 : vector<1x8x8x32xf32>
    %cst_41 = arith.constant dense<0.000000e+00> : vector<1x32xf32>
    %100 = vector.multi_reduction <add>, %99, %cst_41 [1, 2] : vector<1x8x8x32xf32> to vector<1x32xf32>
    %cst_42 = arith.constant 6.400000e+01 : f32
    %101 = vector.broadcast %cst_42 : f32 to vector<1x32xf32>
    %102 = arith.divf %100, %101 : vector<1x32xf32>
    %103 = arith.truncf %102 : vector<1x32xf32> to vector<1x32xbf16>
    %c0_43 = arith.constant 0 : index
    %c0_44 = arith.constant 0 : index
    %104 = vector.load %arg15[%c0_43, %c0_44] : memref<32x8xbf16, #tpu.memory_space<vmem>>, vector<32x8xbf16>
    %cst_45 = arith.constant dense<0.000000e+00> : vector<1x8xf32>
    %105 = tpu.matmul %103, %104, %cst_45 {dimension_numbers = #tpu.dot_dimension_numbers<[1], [0], [0], [1], [0, 0, 1, 1], [], []>} : vector<1x32xbf16>, vector<32x8xbf16>, vector<1x8xf32> -> vector<1x8xf32>
    %c0_46 = arith.constant 0 : index
    %c0_47 = arith.constant 0 : index
    %106 = vector.load %arg16[%c0_46, %c0_47] : memref<1x8xf32, #tpu.memory_space<vmem>>, vector<1x8xf32>
    %107 = arith.addf %105, %106 : vector<1x8xf32>
    %108 = arith.mulf %107, %107 : vector<1x8xf32>
    %109 = arith.mulf %107, %108 : vector<1x8xf32>
    %cst_48 = arith.constant 4.471500e-02 : f32
    %110 = vector.broadcast %cst_48 : f32 to vector<1x8xf32>
    %111 = arith.mulf %110, %109 : vector<1x8xf32>
    %112 = arith.addf %107, %111 : vector<1x8xf32>
    %cst_49 = arith.constant 0.797884583 : f32
    %113 = vector.broadcast %cst_49 : f32 to vector<1x8xf32>
    %114 = arith.mulf %113, %112 : vector<1x8xf32>
    %115 = math.tanh %114 : vector<1x8xf32>
    %cst_50 = arith.constant 1.000000e+00 : f32
    %116 = vector.broadcast %cst_50 : f32 to vector<1x8xf32>
    %117 = arith.addf %116, %115 : vector<1x8xf32>
    %cst_51 = arith.constant 5.000000e-01 : f32
    %118 = vector.broadcast %cst_51 : f32 to vector<1x8xf32>
    %119 = arith.mulf %118, %117 : vector<1x8xf32>
    %120 = arith.mulf %107, %119 : vector<1x8xf32>
    %121 = arith.truncf %120 : vector<1x8xf32> to vector<1x8xbf16>
    %c0_52 = arith.constant 0 : index
    %c0_53 = arith.constant 0 : index
    %122 = vector.load %arg17[%c0_52, %c0_53] : memref<8x96xbf16, #tpu.memory_space<vmem>>, vector<8x96xbf16>
    %cst_54 = arith.constant dense<0.000000e+00> : vector<1x96xf32>
    %123 = tpu.matmul %121, %122, %cst_54 {dimension_numbers = #tpu.dot_dimension_numbers<[1], [0], [0], [1], [0, 0, 1, 1], [], []>} : vector<1x8xbf16>, vector<8x96xbf16>, vector<1x96xf32> -> vector<1x96xf32>
    %c0_55 = arith.constant 0 : index
    %c0_56 = arith.constant 0 : index
    %124 = vector.load %arg18[%c0_55, %c0_56] : memref<1x96xf32, #tpu.memory_space<vmem>>, vector<1x96xf32>
    %125 = arith.addf %123, %124 : vector<1x96xf32>
    %126 = vector.extract_strided_slice %125 {offsets = [0, 0], sizes = [1, 32], strides = [1, 1]} : vector<1x96xf32> to vector<1x32xf32>
    %127 = vector.extract_strided_slice %125 {offsets = [0, 32], sizes = [1, 32], strides = [1, 1]} : vector<1x96xf32> to vector<1x32xf32>
    %128 = vector.extract_strided_slice %125 {offsets = [0, 64], sizes = [1, 32], strides = [1, 1]} : vector<1x96xf32> to vector<1x32xf32>
    %129 = arith.maximumf %126, %127 : vector<1x32xf32>
    %130 = arith.maximumf %129, %128 : vector<1x32xf32>
    %131 = arith.subf %126, %130 : vector<1x32xf32>
    %132 = math.exp %131 : vector<1x32xf32>
    %133 = arith.subf %127, %130 : vector<1x32xf32>
    %134 = math.exp %133 : vector<1x32xf32>
    %135 = arith.subf %128, %130 : vector<1x32xf32>
    %136 = math.exp %135 : vector<1x32xf32>
    %137 = arith.addf %132, %134 : vector<1x32xf32>
    %138 = arith.addf %137, %136 : vector<1x32xf32>
    %139 = tpu.reciprocal %138 {approx = true} : vector<1x32xf32> -> vector<1x32xf32>
    %140 = arith.mulf %132, %139 : vector<1x32xf32>
    %141 = arith.mulf %134, %139 : vector<1x32xf32>
    %142 = arith.mulf %136, %139 : vector<1x32xf32>
    %143 = vector.shape_cast %140 : vector<1x32xf32> to vector<1x1x1x32xf32>
    %144 = vector.broadcast %143 : vector<1x1x1x32xf32> to vector<1x8x8x32xf32>
    %145 = arith.mulf %92, %144 : vector<1x8x8x32xf32>
    %146 = vector.shape_cast %141 : vector<1x32xf32> to vector<1x1x1x32xf32>
    %147 = vector.broadcast %146 : vector<1x1x1x32xf32> to vector<1x8x8x32xf32>
    %148 = arith.mulf %45, %147 : vector<1x8x8x32xf32>
    %149 = arith.addf %145, %148 : vector<1x8x8x32xf32>
    %150 = vector.shape_cast %142 : vector<1x32xf32> to vector<1x1x1x32xf32>
    %151 = vector.broadcast %150 : vector<1x1x1x32xf32> to vector<1x8x8x32xf32>
    %152 = arith.mulf %97, %151 : vector<1x8x8x32xf32>
    %153 = arith.addf %149, %152 : vector<1x8x8x32xf32>
    %154 = vector.shape_cast %153 : vector<1x8x8x32xf32> to vector<64x32xf32>
    %155 = arith.truncf %154 : vector<64x32xf32> to vector<64x32xbf16>
    %c0_57 = arith.constant 0 : index
    %c0_58 = arith.constant 0 : index
    %156 = vector.load %arg19[%c0_57, %c0_58] : memref<32x32xbf16, #tpu.memory_space<vmem>>, vector<32x32xbf16>
    %cst_59 = arith.constant dense<0.000000e+00> : vector<64x32xf32>
    %157 = tpu.matmul %155, %156, %cst_59 {dimension_numbers = #tpu.dot_dimension_numbers<[1], [0], [0], [1], [0, 0, 1, 1], [], []>} : vector<64x32xbf16>, vector<32x32xbf16>, vector<64x32xf32> -> vector<64x32xf32>
    %c0_60 = arith.constant 0 : index
    %c0_61 = arith.constant 0 : index
    %158 = vector.load %arg20[%c0_60, %c0_61] : memref<1x32xf32, #tpu.memory_space<vmem>>, vector<1x32xf32>
    %159 = vector.broadcast %158 : vector<1x32xf32> to vector<64x32xf32>
    %160 = arith.addf %157, %159 : vector<64x32xf32>
    %161 = vector.shape_cast %160 : vector<64x32xf32> to vector<1x8x8x32xf32>
    %c0_62 = arith.constant 0 : index
    %c0_63 = arith.constant 0 : index
    %c0_64 = arith.constant 0 : index
    %c0_65 = arith.constant 0 : index
    %162 = vector.load %arg21[%c0_62, %c0_63, %c0_64, %c0_65] : memref<1x8x8x32xf32, #tpu.memory_space<vmem>>, vector<1x8x8x32xf32>
    tpu.vector_store %arg21[%c0_62, %c0_63, %c0_64, %c0_65], %161 {strides = array<i32>} : memref<1x8x8x32xf32, #tpu.memory_space<vmem>>, vector<1x8x8x32xf32>,
    return
  }
  func.func @transform_0(%arg0: i32) -> (i32, i32, i32, i32) {
    %c0_i32 = arith.constant 0 : i32
    %c0_i32_0 = arith.constant 0 : i32
    %c0_i32_1 = arith.constant 0 : i32
    %c0_i32_2 = arith.constant 0 : i32
    return %arg0, %c0_i32, %c0_i32_0, %c0_i32_1 : i32, i32, i32, i32
  }
  func.func @transform_1(%arg0: i32) -> (i32, i32) {
    %c0_i32 = arith.constant 0 : i32
    %c0_i32_0 = arith.constant 0 : i32
    %c0_i32_1 = arith.constant 0 : i32
    return %c0_i32, %c0_i32_0 : i32, i32
  }
  func.func @transform_2(%arg0: i32) -> (i32, i32) {
    %c0_i32 = arith.constant 0 : i32
    %c0_i32_0 = arith.constant 0 : i32
    %c0_i32_1 = arith.constant 0 : i32
    return %c0_i32, %c0_i32_0 : i32, i32
  }
  func.func @transform_3(%arg0: i32) -> (i32, i32) {
    %c0_i32 = arith.constant 0 : i32
    %c0_i32_0 = arith.constant 0 : i32
    %c0_i32_1 = arith.constant 0 : i32
    return %c0_i32, %c0_i32_0 : i32, i32
  }
  func.func @transform_4(%arg0: i32) -> (i32, i32) {
    %c0_i32 = arith.constant 0 : i32
    %c0_i32_0 = arith.constant 0 : i32
    %c0_i32_1 = arith.constant 0 : i32
    return %c0_i32, %c0_i32_0 : i32, i32
  }
  func.func @transform_5(%arg0: i32) -> (i32, i32) {
    %c0_i32 = arith.constant 0 : i32
    %c0_i32_0 = arith.constant 0 : i32
    %c0_i32_1 = arith.constant 0 : i32
    return %c0_i32, %c0_i32_0 : i32, i32
  }
  func.func @transform_6(%arg0: i32) -> (i32, i32) {
    %c0_i32 = arith.constant 0 : i32
    %c0_i32_0 = arith.constant 0 : i32
    %c0_i32_1 = arith.constant 0 : i32
    return %c0_i32, %c0_i32_0 : i32, i32
  }
  func.func @transform_7(%arg0: i32) -> (i32, i32) {
    %c0_i32 = arith.constant 0 : i32
    %c0_i32_0 = arith.constant 0 : i32
    %c0_i32_1 = arith.constant 0 : i32
    return %c0_i32, %c0_i32_0 : i32, i32
  }
  func.func @transform_8(%arg0: i32) -> (i32, i32) {
    %c0_i32 = arith.constant 0 : i32
    %c0_i32_0 = arith.constant 0 : i32
    %c0_i32_1 = arith.constant 0 : i32
    return %c0_i32, %c0_i32_0 : i32, i32
  }
  func.func @transform_9(%arg0: i32) -> (i32, i32) {
    %c0_i32 = arith.constant 0 : i32
    %c0_i32_0 = arith.constant 0 : i32
    %c0_i32_1 = arith.constant 0 : i32
    return %c0_i32, %c0_i32_0 : i32, i32
  }
  func.func @transform_10(%arg0: i32) -> (i32, i32) {
    %c0_i32 = arith.constant 0 : i32
    %c0_i32_0 = arith.constant 0 : i32
    %c0_i32_1 = arith.constant 0 : i32
    return %c0_i32, %c0_i32_0 : i32, i32
  }
  func.func @transform_11(%arg0: i32) -> (i32, i32) {
    %c0_i32 = arith.constant 0 : i32
    %c0_i32_0 = arith.constant 0 : i32
    %c0_i32_1 = arith.constant 0 : i32
    return %c0_i32, %c0_i32_0 : i32, i32
  }
  func.func @transform_12(%arg0: i32) -> (i32, i32) {
    %c0_i32 = arith.constant 0 : i32
    %c0_i32_0 = arith.constant 0 : i32
    %c0_i32_1 = arith.constant 0 : i32
    return %c0_i32, %c0_i32_0 : i32, i32
  }
  func.func @transform_13(%arg0: i32) -> (i32, i32) {
    %c0_i32 = arith.constant 0 : i32
    %c0_i32_0 = arith.constant 0 : i32
    %c0_i32_1 = arith.constant 0 : i32
    return %c0_i32, %c0_i32_0 : i32, i32
  }
  func.func @transform_14(%arg0: i32) -> (i32, i32) {
    %c0_i32 = arith.constant 0 : i32
    %c0_i32_0 = arith.constant 0 : i32
    %c0_i32_1 = arith.constant 0 : i32
    return %c0_i32, %c0_i32_0 : i32, i32
  }
  func.func @transform_15(%arg0: i32) -> (i32, i32) {
    %c0_i32 = arith.constant 0 : i32
    %c0_i32_0 = arith.constant 0 : i32
    %c0_i32_1 = arith.constant 0 : i32
    return %c0_i32, %c0_i32_0 : i32, i32
  }
  func.func @transform_16(%arg0: i32) -> (i32, i32) {
    %c0_i32 = arith.constant 0 : i32
    %c0_i32_0 = arith.constant 0 : i32
    %c0_i32_1 = arith.constant 0 : i32
    return %c0_i32, %c0_i32_0 : i32, i32
  }
  func.func @transform_17(%arg0: i32) -> (i32, i32) {
    %c0_i32 = arith.constant 0 : i32
    %c0_i32_0 = arith.constant 0 : i32
    %c0_i32_1 = arith.constant 0 : i32
    return %c0_i32, %c0_i32_0 : i32, i32
  }
  func.func @transform_18(%arg0: i32) -> (i32, i32) {
    %c0_i32 = arith.constant 0 : i32
    %c0_i32_0 = arith.constant 0 : i32
    %c0_i32_1 = arith.constant 0 : i32
    return %c0_i32, %c0_i32_0 : i32, i32
  }
  func.func @transform_19(%arg0: i32) -> (i32, i32) {
    %c0_i32 = arith.constant 0 : i32
    %c0_i32_0 = arith.constant 0 : i32
    %c0_i32_1 = arith.constant 0 : i32
    return %c0_i32, %c0_i32_0 : i32, i32
  }
  func.func @transform_20(%arg0: i32) -> (i32, i32, i32, i32) {
    %c0_i32 = arith.constant 0 : i32
    %c0_i32_0 = arith.constant 0 : i32
    %c0_i32_1 = arith.constant 0 : i32
    %c0_i32_2 = arith.constant 0 : i32
    return %arg0, %c0_i32, %c0_i32_0, %c0_i32_1 : i32, i32, i32, i32
  }
}

</mosaic_0001>

<bundles_post_ra>
// kernel: tpu_custom_call.1
= control target key start
LH: loop header
LB: loop body
LE: loop exit
PB: predicated region body
PF: predicated region fallthrough
CT: control target
= control target key end

     0   :  { %s22251_s0 = inlined_call_operand.hbm [shape: f32[2,8,8,32], index: 0, kind: input, shape index: {}]   ;;  %s22252_s1 = inlined_call_operand.vmem [shape: bf16[32,8], index: 1, kind: input, shape index: {}]   ;;  %s22253_s2 = inlined_call_operand.vmem [shape: f32[1,8], index: 2, kind: input, shape index: {}]   ;;  %s22254_s3 = inlined_call_operand.hbm [shape: bf16[16,64], index: 3, kind: input, shape index: {}]   ;;  %s22255_s4 = inlined_call_operand.vmem [shape: f32[1,64], index: 4, kind: input, shape index: {}]   ;;  %s22256_s5 = inlined_call_operand.vmem [shape: bf16[32,32], index: 5, kind: input, shape index: {}]   ;;  %s22257_s6 = inlined_call_operand.hbm [shape: f32[1,32], index: 6, kind: input, shape index: {}]   ;;  %s22258_s7 = inlined_call_operand.vmem [shape: bf16[32,8], index: 7, kind: input, shape index: {}]   ;;  %s22259_s8 = inlined_call_operand.vmem [shape: f32[1,8], index: 8, kind: input, shape index: {}]   ;;  %s22260_s9 = inlined_call_operand.vmem [shape: bf16[16,64], index: 9, kind: input, shape index: {}]   ;;  %s22261_s10 = inlined_call_operand.vmem [shape: f32[1,64], index: 10, kind: input, shape index: {}]   ;;  %s22262_s11 = inlined_call_operand.vmem [shape: bf16[32,32], index: 11, kind: input, shape index: {}]   ;;  %s22263_s12 = inlined_call_operand.vmem [shape: f32[1,32], index: 12, kind: input, shape index: {}]   ;;  %s22264_s13 = inlined_call_operand.vmem [shape: bf16[32,32], index: 13, kind: input, shape index: {}]   ;;  %s22265_s14 = inlined_call_operand.vmem [shape: bf16[32,8], index: 14, kind: input, shape index: {}]   ;;  %s22266_s15 = inlined_call_operand.vmem [shape: f32[1,8], index: 15, kind: input, shape index: {}]   ;;  %s22267_s16 = inlined_call_operand.vmem [shape: bf16[8,96], index: 16, kind: input, shape index: {}]   ;;  %s22268_s17 = inlined_call_operand.vmem [shape: f32[1,96], index: 17, kind: input, shape index: {}]   ;;  %s22269_s18 = inlined_call_operand.vmem [shape: bf16[32,32], index: 18, kind: input, shape index: {}]   ;;  %s22270_s19 = inlined_call_operand.vmem [shape: f32[1,32], index: 19, kind: input, shape index: {}]   ;;  %s22271_s20 = inlined_call_operand.hbm [shape: f32[2,8,8,32], index: 20, kind: output, shape index: {}]  }
   0x1   :  { %22386 = sst [smem:[#allocation53_spill]] %s22251_s0 }
   0x2   :  { %22387 = sst [smem:[#allocation54_spill]] %s22252_s1 }
   0x3   :  { %22388 = sst [smem:[#allocation55_spill]] %s22253_s2 }
   0x4   :  { %22389 = sst [smem:[#allocation56_spill]] %s22254_s3 }
   0x5   :  { %22390 = sst [smem:[#allocation57_spill]] %s22255_s4 }
   0x6   :  { %22391 = sst [smem:[#allocation58_spill]] %s22257_s6 }
   0x7   :  { %22392 = sst [smem:[#allocation59_spill]] %s22266_s15 }
   0x8   :  { %22393 = sst [smem:[#allocation60_spill]] %s22267_s16 }
   0x9   :  { %22394 = sst [smem:[#allocation61_spill]] %s22268_s17 }
   0xa   :  { %22395 = sst [smem:[#allocation62_spill]] %s22269_s18 }
   0xb   :  { %22396 = sst [smem:[#allocation63_spill]] %s22270_s19 }
   0xc   :  { %22397 = sst [smem:[#allocation64_spill]] %s22271_s20 }
   0xd   :  { %25 = vsyncpa [#allocation3], 0 }
   0xe   :  { %27 = vsyncpa [#allocation3 + $0x1], 0 }
   0xf   :  { %28 = vsyncpa [#allocation6], 0 }
  0x10   :  { %29 = vsyncpa [#allocation4], 0 }
  0x11   :  { %31 = vsyncpa [#allocation4 + $0x1], 0  ;;  %s17507_s1 = smov 0   ;;  %s17509_s22 = smov 0  }
  0x12   :  { %s17511_s23 = smov 0   ;;  %s17513_s24 = smov 0  }
  0x13 LB: > { %22398 = sst [smem:[#allocation12_spill]] %s17354_s1  ;;  %s17528_s2 = sadd.s32 4294967295, %s17366_s24   ;;  %s17366_s24 = sphi %s17513_s24, %s22656_s24   ;;  %s17362_s23 = sphi %s17511_s23, %s22655_s23   ;;  %s17358_s22 = sphi %s17509_s22, %s22654_s22   ;;  %s17354_s1 = sphi %s17507_s1, %s22653_s1  }
  0x14   : > { %s15586_s25 = sadd.s32 4294967294, %s17366_s24   ;;  %p57_p0 = scmp.ne.s32.totalorder %s17358_s22, %s17354_s1 }
  0x15   : > { %p22279_p1 = scmp.eq.s32.totalorder %s17528_s2, 0  ;;  %p486_p3 = scmp.eq.s32.totalorder %s15586_s25, 1 }
  0x16   : > { %p15587_p5 = scmp.ge.s32.totalorder %s17366_s24, 1  ;;  %p493_p7 = scmp.lt.s32.totalorder %s17366_s24, 3 }
  0x17   : > { %p17537_p4 = por %p22279_p1, %p57_p0  ;;  %p17542_p6 = por %p486_p3, %p57_p0 }
  0x18   : > { %p17547_p8 = pnand %p15587_p5, %p493_p7  ;;  %s17368_s28 = smov [#allocation5]  }
  0x19   : > { %s22399_s3 = scalar_select %p17537_p4, 1, 0 }
  0x1a   : > { %s22400_s26 = scalar_select %p17542_p6, 1, 0 }
  0x1b   : > { %s511_s4 = sshll.u32 %s17368_s28, 4  ;;  %p16560_p9 = pneg %p17547_p8  ;;  %s17551_s4 = int_to_ptr.vmem [resolvable:$true] %s511_s4 }
  0x1c   : > { %22401 = sst [smem:[#allocation13_spill]] %s22400_s26  ;;  %s17369_s30 = smov [#allocation7]  }
  0x1d   : > { %p17558_p11 = pnand %p16560_p9, %p22279_p1  ;;  %s531_s0 = sshll.u32 %s17369_s30, 4  ;;  %s17562_s0 = int_to_ptr.vmem [resolvable:$true] %s531_s0 }
  0x1e   : > { %s22404_s26 = sld [smem:[#allocation56_spill]] }
  0x1f   : > { %p17212_p13 = pneg %p17558_p11 }
  0x24   : > { %s17210_s28 = scalar_lea.hbm %s22404_s26, 128 }
  0x25   : > { %p17211_p12 = scmp.ne.s32.totalorder %s22404_s26, %s17210_s28  ;;  %p17217_p5 = scmp.lt.u32.totalorder %s17210_s28, %s22404_s26 }
  0x27   : > { %p17213_p0 = pnand %p17212_p13, %p17211_p12 }
  0x29   : > { %p17214_p3 = pneg %p17213_p0 }
  0x2b   : > { %p17219_p7 = pnand %p17217_p5, %p17214_p3 }
  0x2d   : > { %17222 = shalt.err (!%p17219_p7)
}
  0x2e   : > { %s17223_s30 = scalar_lea.vmem %s17551_s4, 128  ;;  %p17231_p2 = scmp.lt.s32.totalorder %s17551_s4, %s17551_s4 }
  0x2f   : > { %p17224_p9 = scmp.ne.s32.totalorder %s17551_s4, %s17223_s30  ;;  %p17232_p12 = scmp.lt.s32.totalorder %s17223_s30, %s17223_s30 }
  0x31   : > { %p17226_p10 = pnand %p17224_p9, %p17212_p13  ;;  %p17233_p0 = por %p17232_p12, %p17231_p2 }
  0x33   : > { %p17227_p1 = pneg %p17226_p10 }
  0x35   : > { %p17234_p6 = pnand %p17233_p0, %p17227_p1 }
  0x37   : > { %17237 = shalt.err (!%p17234_p6)
}
  0x38   : > { %s17370_s18 = smov 64   ;;  %s17371_s19 = smov 4  }
  0x39   : > { %16563 = dma.hbm_to_vmem [thread:$0]  (!%p17558_p11), %s22404_s26, 128, %s17551_s4, [#allocation6], %s17370_s18, %s17370_s18, %s17371_s19  }
  0x3a   : > { %s22405_s6 = sld [smem:[#allocation58_spill]] }
  0x40   : > { %s17238_s28 = scalar_lea.hbm %s22405_s6, 16 }
  0x41   : > { %p17239_p2 = scmp.ne.s32.totalorder %s22405_s6, %s17238_s28  ;;  %p17245_p10 = scmp.lt.u32.totalorder %s17238_s28, %s22405_s6 }
  0x43   : > { %p17241_p1 = pnand %p17239_p2, %p17212_p13 }
  0x45   : > { %p17242_p6 = pneg %p17241_p1 }
  0x47   : > { %p17247_p3 = pnand %p17245_p10, %p17242_p6 }
  0x49   : > { %17250 = shalt.err (!%p17247_p3)
}
  0x4a   : > { %s17251_s4 = scalar_lea.vmem %s17562_s0, 16  ;;  %s17258_s15 = scalar_lea.vmem %s17562_s0, 32 }
  0x4b   : > { %p17252_p5 = scmp.ne.s32.totalorder %s17562_s0, %s17251_s4  ;;  %p17259_p12 = scmp.lt.s32.totalorder %s17562_s0, %s17562_s0 }
  0x4c   : > { %p17260_p0 = scmp.lt.s32.totalorder %s17258_s15, %s17251_s4 }
  0x4d   : > { %p17254_p7 = pnand %p17252_p5, %p17212_p13 }
  0x4e   : > { %p17261_p2 = por %p17260_p0, %p17259_p12 }
  0x4f   : > { %p17255_p9 = pneg %p17254_p7 }
  0x51   : > { %p17262_p1 = pnand %p17261_p2, %p17255_p9 }
  0x53   : > { %17265 = shalt.err (!%p17262_p1)
}
  0x54   : > { %16566 = dma.hbm_to_vmem [thread:$0]  (!%p17558_p11), %s22405_s6, 16, %s17562_s0, [#allocation6]  }
  0x55   : > { %s17618_s18 = sadd.s32 1, %s17366_s24   ;;  %s44_s29 = sadd.s32 1, %s17362_s23 }
  0x56   : > { %s41_s19 = ssub.s32 %s17366_s24, %s17618_s18  ;;  %p51_p13 = scmp.ne.s32.totalorder %s17362_s23, %s17358_s22 }
  0x57   : > { %p42_p6 = scmp.eq.s32.totalorder %s41_s19, 0  ;;  %p52_p10 = scmp.eq.s32.totalorder %s17366_s24, 0 }
  0x58   : > { %p22406_p3 = scmp.eq.s32.totalorder %s17528_s2, 1  ;;  %p16577_p7 = scmp.lt.s32.totalorder %s17366_s24, 2 }
  0x59   : > { %s17634_s1 = scalar_select %p42_p6, %s17362_s23, %s44_s29  }
  0x5a   : > { %p17628_p5 = por %p22406_p3, %p51_p13  ;;  %p53_p9 = por %p52_p10, %p51_p13 }
  0x5b   : > { %s581_s21 = sand.u32 1, %s17362_s23   ;;  %s15889_s0 = sshll.u32 %s17366_s24, 10 }
  0x5c   : > { %s22407_s20 = scalar_select %p17628_p5, 1, 0 }
  0x5d   : > { %s15591_s25 = sshll.u32 %s581_s21, 6  ;;  %s22408_s4 = sld [smem:[#allocation53_spill]] }
  0x5e   : > { %s585_s16 = scalar_lea.vmem [#allocation2], %s15591_s25  ;;  %p17645_p11 = pnand %p16577_p7, %p53_p9 }
  0x5f   : > { %s592_s17 = sshll.u32 %s585_s16, 4  ;;  %s17649_s19 = scalar_lea.sflag [#allocation3], %s581_s21  ;;  %s17643_s17 = int_to_ptr.vmem [resolvable:$true] %s592_s17 }
  0x60   : > { %p17268_p0 = pneg %p17645_p11 }
  0x63   : > { %s17641_s15 = scalar_lea.hbm %s22408_s4, %s15889_s0  ;;  %s17271_s28 = scalar_lea.hbm %s22408_s4, 2048 }
  0x64   : > { %s17266_s6 = scalar_lea.hbm %s17641_s15, 1024  ;;  %p17272_p13 = scmp.lt.u32.totalorder %s17641_s15, %s22408_s4 }
  0x65   : > { %p17267_p12 = scmp.ne.s32.totalorder %s17641_s15, %s17266_s6  ;;  %p17273_p6 = scmp.lt.u32.totalorder %s17271_s28, %s17266_s6 }
  0x66   : > { %p17275_p3 = scmp.lt.u32.totalorder %s17266_s6, %s17641_s15 }
  0x67   : > { %p17269_p2 = pnand %p17268_p0, %p17267_p12  ;;  %p17274_p10 = por %p17273_p6, %p17272_p13 }
  0x69   : > { %p17270_p1 = pneg %p17269_p2  ;;  %p17276_p7 = por %p17275_p3, %p17274_p10 }
  0x6b   : > { %p17277_p9 = pnand %p17276_p7, %p17270_p1 }
  0x6d   : > { %17280 = shalt.err (!%p17277_p9)
}
  0x6e   : > { %s17281_s21 = scalar_lea.vmem %s17643_s17, 1024  ;;  %s17372_s25 = smov [#allocation2]  }
  0x6f   : > { %p17282_p12 = scmp.ne.s32.totalorder %s17643_s17, %s17281_s21  ;;  %s17286_s0 = sshll.u32 %s17372_s25, 4  ;;  %s17287_s0 = int_to_ptr.vmem [resolvable:$false] %s17286_s0 }
  0x70   : > { %s17288_s30 = scalar_lea.vmem %s17287_s0, 2048  ;;  %p17289_p4 = scmp.lt.s32.totalorder %s17643_s17, %s17287_s0 }
  0x71   : > { %p17284_p2 = pnand %p17282_p12, %p17268_p0  ;;  %p17290_p13 = scmp.lt.s32.totalorder %s17288_s30, %s17281_s21 }
  0x73   : > { %p17285_p5 = pneg %p17284_p2  ;;  %p17291_p6 = por %p17290_p13, %p17289_p4 }
  0x75   : > { %p17292_p10 = pnand %p17291_p6, %p17285_p5 }
  0x77   : > { %17295 = shalt.err (!%p17292_p10)
}
  0x78   : > { %s17373_s6 = smov 128   ;;  %s17374_s28 = smov 8  }
  0x79   : > { %16570 = dma.hbm_to_vmem [thread:$0]  (!%p17645_p11), %s17641_s15, 1024, %s17643_s17, %s17649_s19, %s17373_s6, %s17373_s6, %s17374_s28  }
  0x7a   : > { %604 = sbr.rel (%p17547_p8) target bundleno = 5054 (0x13be), region = 100 }
  0x81   : > { %s17680_s16 = sand.u32 1, %s17358_s22   ;;  %p22410_p4 = scmp.ne.s32.totalorder %s22399_s3, 0 }
  0x82   : > { %s22282_s21 = sshll.u32 %s17680_s16, 6  ;;  %s607_s25 = scalar_lea.sflag [#allocation3], %s17680_s16 }
  0x83   : > { %s17686_s0 = scalar_lea.vmem [#allocation2], %s22282_s21 }
  0x84   : > { %17341 = dma.done.wait (%p22410_p4), %s607_s25, 1024  }
  0x85   : > { %17343 = vsyncadd (%p22410_p4), %s607_s25, 4294966272  ;;  %p22411_p5 = scmp.eq.s32.totalorder %s17528_s2, 0 }
  0x87   : > { %17345 = dma.done.wait (%p22411_p5), [#allocation6], 144   ;;  %p22412_p8 = pmov %p22411_p5 }
  0x88   : > { %v16905_v0 = vld [vmem:[%s22258_s7] sm:$0xff]   ;;  %v16906_v1 = vld [vmem:[%s22258_s7 + $0x8] sm:$0xff]   ;;  %vm719_vm0 = vcmask 261120   ;;  %v678_v5 = vld [vmem:[%s17686_s0 + $0x10] sm:$0xff]  ;;  %s17375_s30 = smov 124   ;;  %s17376_s6 = smov 126   ;;  %v882_v33 = vlaneseq }
  0x89   : > { %17347 = vsyncadd (%p22412_p8), [#allocation6], 4294967152  ;;  %16066 = vmatprep.subr.bf16.mxu0 %v16905_v0  ;;  %v676_v2 = vld [vmem:[%s17686_s0] sm:$0xff]  ;;  %v677_v3 = vld [vmem:[%s17686_s0 + $0x8] sm:$0xff]  ;;  %s22283_s28 = smov 122   ;;  %s17380_s25 = smov 2  }
  0x8a   : > { %16067 = vmatpush3.bf16.msra.mxu0 %v16905_v0  ;;  %v17704_v4 = vpack.c.bf16 %v677_v3, %v676_v2  ;;  %v679_v6 = vld [vmem:[%s17686_s0 + $0x18] sm:$0xff]  ;;  %v680_v7 = vld [vmem:[%s17686_s0 + $0x20] sm:$0xff]  ;;  %v681_v8 = vld [vmem:[%s17686_s0 + $0x28] sm:$0xff]  ;;  %v17378_v31 = vmov 1983009808   ;;  %v17788_v37 = vshrl.u32 %v882_v33, 7 }
  0x8b   : > { %16068 = vmatprep.subr.bf16.mxu0 %v16906_v1  ;;  %v17712_v9 = vpack.c.bf16 %v679_v6, %v678_v5  ;;  %v17714_v10 = vpack.c.bf16 %v681_v8, %v680_v7  ;;  %v682_v11 = vld [vmem:[%s17686_s0 + $0x30] sm:$0xff]  ;;  %v683_v12 = vld [vmem:[%s17686_s0 + $0x38] sm:$0xff]  ;;  %v15599_v14 = vld [vmem:[%s22259_s8] ss:$0 sm:$0xff]  ;;  %v880_v32 = vunpack.c.l.s4 %v17378_v31  ;;  %v17379_v34 = vmov 1934713408  }
  0x8c   : > { %22413 = vst [vmem:[#allocation14_spill] sm:$0xff] %v17704_v4  ;;  %16070 = vmatprep.mubr.msk.bf16.mxu0 %vm719_vm0, %v17704_v4  ;;  %v17722_v13 = vpack.c.bf16 %v683_v12, %v682_v11  ;;  %v912_v35 = vunpack.c.l.s4 %v17379_v34  ;;  %22417 = vst [vmem:[#allocation18_spill] sm:$0xff] %v17788_v37  ;;  %s22293_s27 = smov 4   ;;  %s22291_s15 = smov 6   ;;  %vm2621_vm1 = vcmask 15360   ;;  %vm2626_vm2 = vcmask 31744  }
  0x8d   : > { %22414 = vst [vmem:[#allocation15_spill] sm:$0xff] %v17712_v9  ;;  %22415 = vst [vmem:[#allocation16_spill] sm:$0xff] %v17714_v10  ;;  %v881_v36 = vunpack.c.0.s8 %v880_v32  ;;  %s22384_s17 = smov 8   ;;  %s22289_s29 = smov 10   ;;  %vm2631_vm3 = vcmask 48128   ;;  %vm2636_vm4 = vcmask 64512  }
  0x8e   : > { %16069 = vmatpush3.bf16.msra.mxu0 %v16906_v1  ;;  %22416 = vst [vmem:[#allocation17_spill] sm:$0xff] %v17722_v13  ;;  %v913_v40 = vunpack.c.0.s8 %v912_v35  ;;  %s22285_s3 = smov 12   ;;  %s22287_s19 = smov 14   ;;  %vm2641_vm5 = vcmask 80896   ;;  %vm2646_vm6 = vcmask 97280   ;;  %vm2651_vm7 = vcmask 113664  }
  0x8f   : > { %v17791_v41 = vsub.s32 %v881_v36, %v17788_v37  ;;  %s17387_s21 = smov 120   ;;  %vm2670_vm8 = vcmask 130048   ;;  %vm4945_vm9 = vcmask 1043456   ;;  %vm17395_vm10 = vmmov 0   ;;  %p22645_p0 = scmp.ne.s32.totalorder %s22407_s20, 0 }
  0x90   : > { %v17794_v48 = vsub.s32 %v913_v40, %v17788_v37  ;;  %vm7615_vm11 = vcmask 195584  }
  0x91   : > { %16071 = vmatmul.mubr.msk.bf16.vlgmr.msra.gmra.mrb[0].mxu0 %vm719_vm0, %v17712_v9 }
  0x92   : > { %16074 = vmatprep.mubr.msk.bf16.mxu0 %vm719_vm0, %v17714_v10 }
  0x99   : > { %16075 = vmatmul.mubr.msk.bf16.gmra.mrb[4].mxu0 %vm719_vm0, %v17722_v13 }
 0x164   : > { %v16072_v15 = vpop.f32.mrb[0].mxu0 }
 0x165   : > { %v775_v16 = vadd.f32 %v16072_v15, %v15599_v14  ;;  %v766_v17 = vpop.f32.mrb[1].mxu0 }
 0x166   : > { %v16073_v18 = vpop.f32.mrb[2].mxu0  ;;  %v17736_v22 = vadd.f32 %v15599_v14, %v766_v17 }
 0x167   : > { %833 = vrot.lane.b32.xlu0 %v775_v16, %s17375_s30  ;;  %809 = vrot.lane.b32.xlu1 %v775_v16, %s17376_s6  ;;  %v769_v19 = vpop.f32.mrb[3].mxu0  ;;  %v17731_v20 = vadd.f32 %v16073_v18, %v15599_v14 }
 0x168   : > { %v17746_v26 = vadd.f32 %v15599_v14, %v769_v19 }
 0x16b   : > { %857 = vrot.lane.b32.xlu0 %v775_v16, %s22283_s28  ;;  %811 = vrot.lane.b32.xlu1 %v17731_v20, %s17376_s6 }
 0x16c   : > { %v16076_v21 = vpop.f32.mrb[4].mxu0 }
 0x16d   : > { %v782_v23 = vpop.f32.mrb[5].mxu0  ;;  %v17756_v27 = vadd.f32 %v16076_v21, %v15599_v14 }
 0x16e   : > { %v16077_v24 = vpop.f32.mrb[6].mxu0  ;;  %v17768_v29 = vadd.f32 %v15599_v14, %v782_v23 }
 0x16f   : > { %835 = vrot.lane.b32.xlu1 %v17731_v20, %s17375_s30  ;;  %805 = vrot.lane.b32.xlu0 %v17736_v22, %s17376_s6  ;;  %v785_v25 = vpop.f32.mrb[7].mxu0  ;;  %v17758_v28 = vadd.f32 %v16077_v24, %v15599_v14 }
 0x170   : > { %v17770_v30 = vadd.f32 %v15599_v14, %v785_v25 }
 0x173   : > { %859 = vrot.lane.b32.xlu1 %v17731_v20, %s22283_s28  ;;  %829 = vrot.lane.b32.xlu0 %v17736_v22, %s17375_s30 }
 0x177   : > { %831 = vrot.lane.b32.xlu1 %v17746_v26, %s17375_s30  ;;  %853 = vrot.lane.b32.xlu0 %v17736_v22, %s22283_s28 }
 0x17b   : > { %855 = vrot.lane.b32.xlu1 %v17746_v26, %s22283_s28  ;;  %807 = vrot.lane.b32.xlu0 %v17746_v26, %s17376_s6 }
 0x17f   : > { %819 = vrot.lane.b32.xlu1 %v17758_v28, %s17376_s6  ;;  %817 = vrot.lane.b32.xlu0 %v17756_v27, %s17376_s6 }
 0x183   : > { %843 = vrot.lane.b32.xlu1 %v17758_v28, %s17375_s30  ;;  %841 = vrot.lane.b32.xlu0 %v17756_v27, %s17375_s30 }
 0x187   : > { %815 = vrot.lane.b32.xlu1 %v17770_v30, %s17376_s6  ;;  %813 = vrot.lane.b32.xlu0 %v17768_v29, %s17376_s6 }
 0x18b   : > { %839 = vrot.lane.b32.xlu1 %v17770_v30, %s17375_s30  ;;  %837 = vrot.lane.b32.xlu0 %v17768_v29, %s17375_s30 }
 0x18f   : > { %863 = vrot.lane.b32.xlu1 %v17770_v30, %s22283_s28  ;;  %861 = vrot.lane.b32.xlu0 %v17768_v29, %s22283_s28 }
 0x193   : > { %867 = vrot.lane.b32.xlu1 %v17758_v28, %s22283_s28  ;;  %865 = vrot.lane.b32.xlu0 %v17756_v27, %s22283_s28  ;;  %s17388_s28 = smov 112  }
 0x1d9   : > { %v834_v38 = vpop.permute.xlu0 %833  ;;  %v810_v39 = vpop.permute.xlu1 %809 }
 0x1da   : > { %v1013_v42 = vcombine.low %v775_v16, %v834_v38  ;;  %v1014_v43 = vcombine.high %v775_v16, %v834_v38 }
 0x1dc   : > { %v1021_v49 = vrot.slane %v1013_v42, %v17791_v41  ;;  %v1028_v50 = vrot.slane %v1014_v43, %v17791_v41 }
 0x1dd   : > { %v858_v44 = vpop.permute.xlu0 %857  ;;  %v812_v45 = vpop.permute.xlu1 %811 }
 0x1de   : > { %v1029_v46 = vcombine.low %v810_v39, %v858_v44  ;;  %v1030_v47 = vcombine.high %v810_v39, %v858_v44 }
 0x1e0   : > { %v1037_v51 = vrot.slane %v1029_v46, %v17791_v41  ;;  %v1044_v52 = vrot.slane %v1030_v47, %v17791_v41 }
 0x1e1   : > { %v836_v53 = vpop.permute.xlu1 %835  ;;  %v806_v54 = vpop.permute.xlu0 %805 }
 0x1e2   : > { %v1045_v55 = vcombine.low %v1021_v49, %v1037_v51  ;;  %v1046_v56 = vcombine.high %v1021_v49, %v1037_v51  ;;  %v1061_v57 = vcombine.low %v1028_v50, %v1044_v52  ;;  %v1062_v58 = vcombine.high %v1028_v50, %v1044_v52 }
 0x1e3   : > { %v1081_v63 = vcombine.low %v17731_v20, %v836_v53  ;;  %v1082_v0 = vcombine.high %v17731_v20, %v836_v53 }
 0x1e4   : > { %v1053_v59 = vrot.slane %v1045_v55, %v17794_v48  ;;  %v1060_v60 = vrot.slane %v1046_v56, %v17794_v48  ;;  %v1069_v61 = vrot.slane %v1061_v57, %v17794_v48  ;;  %v1076_v62 = vrot.slane %v1062_v58, %v17794_v48 }
 0x1e5   : > { %v860_v1 = vpop.permute.xlu1 %859  ;;  %v830_v2 = vpop.permute.xlu0 %829  ;;  %v1089_v19 = vrot.slane %v1081_v63, %v17791_v41  ;;  %v1096_v20 = vrot.slane %v1082_v0, %v17791_v41 }
 0x1e6   : > { %v1557_v3 = vcombine.low %v1053_v59, %v1060_v60  ;;  %v15610_v5 = vcombine.high %v1053_v59, %v1060_v60  ;;  %v1573_v6 = vcombine.low %v1069_v61, %v1076_v62  ;;  %v15611_v7 = vcombine.high %v1069_v61, %v1076_v62 }
 0x1e7   : > { %v1097_v8 = vcombine.low %v812_v45, %v860_v1  ;;  %v1098_v11 = vcombine.high %v812_v45, %v860_v1  ;;  %v877_v12 = vcombine.low %v17736_v22, %v830_v2  ;;  %v878_v14 = vcombine.high %v17736_v22, %v830_v2 }
 0x1e8   : > { %v17809_v15 = vrot.slane %v1557_v3, %v17791_v41  ;;  %v17812_v16 = vrot.slane %v15610_v5, %v17791_v41  ;;  %v17815_v17 = vrot.slane %v1573_v6, %v17791_v41  ;;  %v17818_v18 = vrot.slane %v15611_v7, %v17791_v41 }
 0x1e9   : > { %v1105_v21 = vrot.slane %v1097_v8, %v17791_v41  ;;  %v1112_v22 = vrot.slane %v1098_v11, %v17791_v41  ;;  %v832_v23 = vpop.permute.xlu1 %831  ;;  %v854_v24 = vpop.permute.xlu0 %853  ;;  %v885_v31 = vrot.slane %v877_v12, %v17791_v41  ;;  %v892_v32 = vrot.slane %v878_v14, %v17791_v41 }
 0x1ea   : > { %v1589_v25 = vcombine.low %v17809_v15, %v17812_v16  ;;  %v1590_v38 = vcombine.high %v17809_v15, %v17812_v16  ;;  %v1605_v39 = vcombine.low %v17815_v17, %v17818_v18  ;;  %v893_v40 = vcombine.low %v806_v54, %v854_v24 }
 0x1eb   : > { %v1113_v33 = vcombine.low %v1089_v19, %v1105_v21  ;;  %v1114_v34 = vcombine.high %v1089_v19, %v1105_v21  ;;  %v1129_v35 = vcombine.low %v1096_v20, %v1112_v22  ;;  %v1130_v36 = vcombine.high %v1096_v20, %v1112_v22 }
 0x1ec   : > { %v894_v42 = vcombine.high %v806_v54, %v854_v24  ;;  %v945_v50 = vcombine.low %v17746_v26, %v832_v23  ;;  %v946_v51 = vcombine.high %v17746_v26, %v832_v23  ;;  %v901_v52 = vrot.slane %v893_v40, %v17791_v41 }
 0x1ed   : > { %v1121_v43 = vrot.slane %v1113_v33, %v17794_v48  ;;  %v1128_v44 = vrot.slane %v1114_v34, %v17794_v48  ;;  %v1137_v45 = vrot.slane %v1129_v35, %v17794_v48  ;;  %v1144_v46 = vrot.slane %v1130_v36, %v17794_v48  ;;  %v856_v47 = vpop.permute.xlu1 %855  ;;  %v808_v49 = vpop.permute.xlu0 %807 }
 0x1ee   : > { %v908_v53 = vrot.slane %v894_v42, %v17791_v41  ;;  %v909_v58 = vcombine.low %v885_v31, %v901_v52  ;;  %v910_v59 = vcombine.high %v885_v31, %v901_v52  ;;  %v1606_v8 = vcombine.high %v17815_v17, %v17818_v18 }
 0x1ef   : > { %v1625_v55 = vcombine.low %v1121_v43, %v1128_v44  ;;  %v15612_v54 = vcombine.high %v1121_v43, %v1128_v44  ;;  %v1641_v56 = vcombine.low %v1137_v45, %v1144_v46  ;;  %v15613_v57 = vcombine.high %v1137_v45, %v1144_v46 }
 0x1f0   : > { %v925_v60 = vcombine.low %v892_v32, %v908_v53  ;;  %v926_v61 = vcombine.high %v892_v32, %v908_v53  ;;  %v917_v3 = vrot.slane %v909_v58, %v17794_v48  ;;  %v924_v5 = vrot.slane %v910_v59, %v17794_v48 }
 0x1f1   : > { %v17841_v62 = vrot.slane %v1625_v55, %v17791_v41  ;;  %v17844_v63 = vrot.slane %v15612_v54, %v17791_v41  ;;  %v17847_v26 = vrot.slane %v1641_v56, %v17791_v41  ;;  %v17850_v0 = vrot.slane %v15613_v57, %v17791_v41  ;;  %v17852_v1 = vpop.permute.xlu1 %819  ;;  %v17854_v2 = vpop.permute.xlu0 %817 }
 0x1f2   : > { %v933_v6 = vrot.slane %v925_v60, %v17794_v48  ;;  %v940_v7 = vrot.slane %v926_v61, %v17794_v48  ;;  %v953_v12 = vrot.slane %v945_v50, %v17791_v41  ;;  %v960_v14 = vrot.slane %v946_v51, %v17791_v41 }
 0x1f3   : > { %v1657_v11 = vcombine.low %v17841_v62, %v17844_v63  ;;  %v1421_v15 = vcombine.low %v917_v3, %v924_v5  ;;  %v15606_v16 = vcombine.high %v917_v3, %v924_v5  ;;  %v1658_v21 = vcombine.high %v17841_v62, %v17844_v63 }
 0x1f4   : > { %v1437_v19 = vcombine.low %v933_v6, %v940_v7  ;;  %v15607_v20 = vcombine.high %v933_v6, %v940_v7  ;;  %v1673_v22 = vcombine.low %v17847_v26, %v17850_v0  ;;  %v961_v23 = vcombine.low %v808_v49, %v856_v47 }
 0x1f5   : > { %v962_v24 = vcombine.high %v808_v49, %v856_v47  ;;  %v844_v31 = vpop.permute.xlu1 %843  ;;  %v842_v32 = vpop.permute.xlu0 %841  ;;  %v1428_v33 = vrot.slane %v1421_v15, %v17791_v41  ;;  %v1436_v34 = vrot.slane %v15606_v16, %v17791_v41  ;;  %v1674_v40 = vcombine.high %v17847_v26, %v17850_v0 }
 0x1f6   : > { %v17873_v35 = vrot.slane %v1437_v19, %v17791_v41  ;;  %v17876_v36 = vrot.slane %v15607_v20, %v17791_v41  ;;  %v969_v42 = vrot.slane %v961_v23, %v17791_v41  ;;  %v17883_v44 = vrot.slane %v1589_v25, %v17794_v48 }
 0x1f7   : > { %v976_v43 = vrot.slane %v962_v24, %v17791_v41  ;;  %v1453_v45 = vcombine.low %v1428_v33, %v1436_v34  ;;  %v1353_v46 = vcombine.low %v17758_v28, %v844_v31  ;;  %v1354_v47 = vcombine.high %v17758_v28, %v844_v31 }
 0x1f8   : > { %v17888_v49 = vrot.slane %v1590_v38, %v17794_v48  ;;  %v977_v50 = vcombine.low %v953_v12, %v969_v42  ;;  %v978_v51 = vcombine.high %v953_v12, %v969_v42  ;;  %v1454_v56 = vcombine.high %v1428_v33, %v1436_v34 }
 0x1f9   : > { %v993_v52 = vcombine.low %v960_v14, %v976_v43  ;;  %v994_v53 = vcombine.high %v960_v14, %v976_v43  ;;  %v816_v55 = vpop.permute.xlu1 %815  ;;  %v814_v54 = vpop.permute.xlu0 %813  ;;  %v1469_v57 = vcombine.low %v17873_v35, %v17876_v36  ;;  %v1470_v25 = vcombine.high %v17873_v35, %v17876_v36 }
 0x1fa   : > { %v1285_v58 = vcombine.low %v17756_v27, %v842_v32  ;;  %v985_v28 = vrot.slane %v977_v50, %v17794_v48  ;;  %v992_v38 = vrot.slane %v978_v51, %v17794_v48  ;;  %v17900_v61 = vrot.slane %v1353_v46, %v17791_v41 }
 0x1fb   : > { %v1001_v59 = vrot.slane %v993_v52, %v17794_v48  ;;  %v1008_v60 = vrot.slane %v994_v53, %v17794_v48  ;;  %v17903_v3 = vrot.slane %v1354_v47, %v17791_v41  ;;  %v1286_v5 = vcombine.high %v17756_v27, %v842_v32 }
 0x1fc   : > { %v17907_v6 = vrot.slane %v1285_v58, %v17791_v41  ;;  %v1489_v7 = vcombine.low %v985_v28, %v992_v38  ;;  %v15608_v12 = vcombine.high %v985_v28, %v992_v38  ;;  %v1613_v35 = vrot.slane %v1605_v39, %v17794_v48 }
 0x1fd   : > { %v1505_v14 = vcombine.low %v1001_v59, %v1008_v60  ;;  %v15609_v15 = vcombine.high %v1001_v59, %v1008_v60  ;;  %v840_v16 = vpop.permute.xlu1 %839  ;;  %v838_v19 = vpop.permute.xlu0 %837  ;;  %v17922_v42 = vrot.slane %v1286_v5, %v17791_v41  ;;  %v1620_v36 = vrot.slane %v1606_v8, %v17794_v48 }
 0x1fe   : > { %v1217_v20 = vcombine.low %v17770_v30, %v840_v16  ;;  %v1218_v23 = vcombine.high %v17770_v30, %v840_v16  ;;  %v1149_v24 = vcombine.low %v17768_v29, %v838_v19  ;;  %v1150_v31 = vcombine.high %v17768_v29, %v838_v19 }
 0x1ff   : > { %v1496_v33 = vrot.slane %v1489_v7, %v17791_v41  ;;  %v1504_v27 = vrot.slane %v15608_v12, %v17791_v41  ;;  %v17916_v32 = vrot.slane %v1505_v14, %v17791_v41  ;;  %v17919_v34 = vrot.slane %v15609_v15, %v17791_v41 }
 0x200   : > { %v1225_v43 = vrot.slane %v1217_v20, %v17791_v41  ;;  %v17926_v30 = vrot.slane %v1453_v45, %v17794_v48  ;;  %v17929_v29 = vrot.slane %v1454_v56, %v17794_v48  ;;  %v1232_v50 = vrot.slane %v1218_v23, %v17791_v41 }
 0x201   : > { %v1521_v46 = vcombine.low %v1496_v33, %v1504_v27  ;;  %v1522_v47 = vcombine.high %v1496_v33, %v1504_v27  ;;  %v1157_v51 = vrot.slane %v1149_v24, %v17791_v41  ;;  %v864_v52 = vpop.permute.xlu1 %863  ;;  %v862_v53 = vpop.permute.xlu0 %861  ;;  %v1537_v60 = vcombine.low %v17916_v32, %v17919_v34 }
 0x202   : > { %v1233_v58 = vcombine.low %v816_v55, %v864_v52  ;;  %v1234_v28 = vcombine.high %v816_v55, %v864_v52  ;;  %v1165_v38 = vcombine.low %v814_v54, %v862_v53  ;;  %v1166_v59 = vcombine.high %v814_v54, %v862_v53 }
 0x203   : > { %v1538_v45 = vcombine.high %v17916_v32, %v17919_v34  ;;  %v1164_v56 = vrot.slane %v1150_v31, %v17791_v41  ;;  %v1529_v5 = vrot.slane %v1521_v46, %v17794_v48  ;;  %v1536_v54 = vrot.slane %v1522_v47, %v17794_v48 }
 0x204   : > { %v1241_v7 = vrot.slane %v1233_v58, %v17791_v41  ;;  %v1248_v12 = vrot.slane %v1234_v28, %v17791_v41  ;;  %v1173_v14 = vrot.slane %v1165_v38, %v17791_v41  ;;  %v1180_v55 = vrot.slane %v1166_v59, %v17791_v41 }
 0x205   : > { %v17948_v15 = vrot.slane %v1657_v11, %v17794_v48  ;;  %v15622_v16 = vcombine.low %v17926_v30, %v17929_v29  ;;  %v15624_v19 = vcombine.high %v17926_v30, %v17929_v29  ;;  %v1681_v32 = vrot.slane %v1673_v22, %v17794_v48 }
 0x206   : > { %v1249_v20 = vcombine.low %v1225_v43, %v1241_v7  ;;  %v1250_v23 = vcombine.high %v1225_v43, %v1241_v7  ;;  %v1265_v24 = vcombine.low %v1232_v50, %v1248_v12  ;;  %v1266_v31 = vcombine.high %v1232_v50, %v1248_v12 }
 0x207   : > { %v1181_v33 = vcombine.low %v1157_v51, %v1173_v14  ;;  %v1182_v27 = vcombine.high %v1157_v51, %v1173_v14  ;;  %v1197_v46 = vcombine.low %v1164_v56, %v1180_v55  ;;  %v1198_v47 = vcombine.high %v1164_v56, %v1180_v55 }
 0x208   : > { %v1257_v52 = vrot.slane %v1249_v20, %v17794_v48  ;;  %v1264_v53 = vrot.slane %v1250_v23, %v17794_v48  ;;  %v1273_v11 = vrot.slane %v1265_v24, %v17794_v48  ;;  %v1280_v58 = vrot.slane %v1266_v31, %v17794_v48 }
 0x209   : > { %v1189_v28 = vrot.slane %v1181_v33, %v17794_v48  ;;  %v1196_v30 = vrot.slane %v1182_v27, %v17794_v48  ;;  %v1205_v43 = vrot.slane %v1197_v46, %v17794_v48  ;;  %v1212_v29 = vrot.slane %v1198_v47, %v17794_v48  ;;  %v868_v27 = vpop.permute.xlu1 %867  ;;  %v866_v46 = vpop.permute.xlu0 %865 }
 0x20a   : > { %v1761_v50 = vcombine.low %v1257_v52, %v1264_v53  ;;  %v15616_v51 = vcombine.high %v1257_v52, %v1264_v53  ;;  %v1777_v38 = vcombine.low %v1273_v11, %v1280_v58  ;;  %v15617_v59 = vcombine.high %v1273_v11, %v1280_v58 }
 0x20b   : > { %v1693_v56 = vcombine.low %v1189_v28, %v1196_v30  ;;  %v15614_v7 = vcombine.high %v1189_v28, %v1196_v30  ;;  %v1709_v12 = vcombine.low %v1205_v43, %v1212_v29  ;;  %v15615_v14 = vcombine.high %v1205_v43, %v1212_v29 }
 0x20c   : > { %v17963_v55 = vrot.slane %v1761_v50, %v17791_v41  ;;  %v17966_v20 = vrot.slane %v15616_v51, %v17791_v41  ;;  %v17969_v23 = vrot.slane %v1777_v38, %v17791_v41  ;;  %v17972_v24 = vrot.slane %v15617_v59, %v17791_v41 }
 0x20d   : > { %v17975_v31 = vrot.slane %v1693_v56, %v17791_v41  ;;  %v17978_v33 = vrot.slane %v15614_v7, %v17791_v41  ;;  %v15626_v47 = vcombine.low %v1529_v5, %v1536_v54  ;;  %v15628_v52 = vcombine.high %v1529_v5, %v1536_v54 }
 0x20e   : > { %v17983_v11 = vrot.slane %v1709_v12, %v17791_v41  ;;  %v17986_v58 = vrot.slane %v15615_v14, %v17791_v41  ;;  %v17992_v28 = vrot.slane %v1658_v21, %v17794_v48  ;;  %v1369_v29 = vcombine.low %v17852_v1, %v868_v27 }
 0x20f   : > { %v1725_v43 = vcombine.low %v17975_v31, %v17978_v33  ;;  %v1370_v50 = vcombine.high %v17852_v1, %v868_v27  ;;  %v1301_v62 = vcombine.low %v17854_v2, %v866_v46  ;;  %v1302_v63 = vcombine.high %v17854_v2, %v866_v46 }
 0x210   : > { %v18007_v21 = vrot.slane %v15622_v16, %v17791_v41  ;;  %v18010_v51 = vrot.slane %v15624_v19, %v17791_v41  ;;  %v18013_v38 = vrot.slane %v15626_v47, %v17791_v41  ;;  %v18016_v59 = vrot.slane %v15628_v52, %v17791_v41 }
 0x211   : > { %v1377_v56 = vrot.slane %v1369_v29, %v17791_v41  ;;  %v1384_v1 = vrot.slane %v1370_v50, %v17791_v41  ;;  %v1309_v7 = vrot.slane %v1301_v62, %v17791_v41  ;;  %v1316_v2 = vrot.slane %v1302_v63, %v17791_v41 }
 0x212   : > { %v2029_v16 = vcombine.low %v18007_v21, %v18010_v51  ;;  %v2061_v19 = vcombine.low %v18013_v38, %v18016_v59  ;;  %v15630_v12 = vcombine.low %v17883_v44, %v17888_v49  ;;  %v15632_v14 = vcombine.high %v17883_v44, %v17888_v49 }
 0x213   : > { %v1385_v27 = vcombine.low %v17900_v61, %v1377_v56  ;;  %v1386_v46 = vcombine.high %v17900_v61, %v1377_v56  ;;  %v1401_v47 = vcombine.low %v17903_v3, %v1384_v1  ;;  %v1402_v52 = vcombine.high %v17903_v3, %v1384_v1 }
 0x214   : > { %v1317_v29 = vcombine.low %v17907_v6, %v1309_v7  ;;  %v1318_v50 = vcombine.high %v17907_v6, %v1309_v7  ;;  %v1333_v62 = vcombine.low %v17922_v42, %v1316_v2  ;;  %v1334_v63 = vcombine.high %v17922_v42, %v1316_v2 }
 0x215   : > { %v1393_v54 = vrot.slane %v1385_v27, %v17794_v48  ;;  %v1400_v44 = vrot.slane %v1386_v46, %v17794_v48  ;;  %v1409_v49 = vrot.slane %v1401_v47, %v17794_v48  ;;  %v1416_v61 = vrot.slane %v1402_v52, %v17794_v48 }
 0x216   : > { %v1325_v56 = vrot.slane %v1317_v29, %v17794_v48  ;;  %v1332_v3 = vrot.slane %v1318_v50, %v17794_v48  ;;  %v1341_v1 = vrot.slane %v1333_v62, %v17794_v48  ;;  %v1348_v6 = vrot.slane %v1334_v63, %v17794_v48 }
 0x217   : > { %v1897_v7 = vcombine.low %v1393_v54, %v1400_v44  ;;  %v15620_v5 = vcombine.high %v1393_v54, %v1400_v44  ;;  %v1913_v30 = vcombine.low %v1409_v49, %v1416_v61  ;;  %v15621_v42 = vcombine.high %v1409_v49, %v1416_v61 }
 0x218   : > { %v1829_v2 = vcombine.low %v1325_v56, %v1332_v3  ;;  %v15618_v27 = vcombine.high %v1325_v56, %v1332_v3  ;;  %v1845_v53 = vcombine.low %v1341_v1, %v1348_v6  ;;  %v15619_v46 = vcombine.high %v1341_v1, %v1348_v6 }
 0x219   : > { %v18047_v47 = vrot.slane %v1897_v7, %v17791_v41  ;;  %v18050_v52 = vrot.slane %v15620_v5, %v17791_v41  ;;  %v18053_v29 = vrot.slane %v1913_v30, %v17791_v41  ;;  %v18056_v50 = vrot.slane %v15621_v42, %v17791_v41 }
 0x21a   : > { %v1726_v54 = vcombine.high %v17975_v31, %v17978_v33  ;;  %v1741_v62 = vcombine.low %v17983_v11, %v17986_v58  ;;  %v18063_v63 = vrot.slane %v1829_v2, %v17791_v41  ;;  %v18066_v44 = vrot.slane %v15618_v27, %v17791_v41 }
 0x21b   : > { %v1929_v30 = vcombine.low %v18047_v47, %v18050_v52  ;;  %v18073_v49 = vrot.slane %v1845_v53, %v17791_v41  ;;  %v18076_v61 = vrot.slane %v15619_v46, %v17791_v41  ;;  %v1930_v56 = vcombine.high %v18047_v47, %v18050_v52 }
 0x21c   : > { %v1861_v6 = vcombine.low %v18063_v63, %v18066_v44  ;;  %v18087_v7 = vrot.slane %v2029_v16, %v17794_v48  ;;  %v18090_v53 = vrot.slane %v2061_v19, %v17794_v48  ;;  %v2109_v42 = vrot.slane %v15630_v12, %v17791_v41 }
 0x21d   : > { %v2125_v2 = vrot.slane %v15632_v14, %v17791_v41  ;;  %v15634_v27 = vcombine.low %v17948_v15, %v17992_v28  ;;  %v15636_v46 = vcombine.high %v17948_v15, %v17992_v28  ;;  %v2030_v1 = vcombine.high %v18007_v21, %v18010_v51 }
 0x21e   : > { %v2062_v16 = vcombine.high %v18013_v38, %v18016_v59  ;;  %v1862_v19 = vcombine.high %v18063_v63, %v18066_v44  ;;  %v2094_v15 = vcombine.high %v18087_v7, %v18090_v53  ;;  %v1477_v59 = vrot.slane %v1469_v57, %v17794_v48 }
 0x21f   : > { %v2165_v3 = vcombine.low %v2109_v42, %v2125_v2  ;;  %v2141_v28 = vrot.slane %v15634_v27, %v17791_v41  ;;  %v2157_v21 = vrot.slane %v15636_v46, %v17791_v41  ;;  %v2044_v51 = vrot.slane %v2030_v1, %v17794_v48 }
 0x220   : > { %v2166_v38 = vcombine.high %v2109_v42, %v2125_v2  ;;  %v1484_v14 = vrot.slane %v1470_v25, %v17794_v48  ;;  %v2076_v27 = vrot.slane %v2062_v16, %v17794_v48  ;;  %v1545_v1 = vrot.slane %v1537_v60, %v17794_v48 }
 0x221   : > { %v18124_v5 = vrot.slane %v2165_v3, %v17794_v48  ;;  %v2197_v12 = vcombine.low %v2141_v28, %v2157_v21  ;;  %v2198_v46 = vcombine.high %v2141_v28, %v2157_v21  ;;  %v1552_v57 = vrot.slane %v1538_v45, %v17794_v48 }
 0x222   : > { %v1688_v39 = vrot.slane %v1674_v40, %v17794_v48  ;;  %v15623_v34 = vcombine.low %v1477_v59, %v1484_v14  ;;  %v15625_v45 = vcombine.high %v1477_v59, %v1484_v14  ;;  %v2095_v42 = vcombine.low %v2044_v51, %v2076_v27 }
 0x223   : > { %v18144_v25 = vrot.slane %v2197_v12, %v17794_v48  ;;  %v2212_v60 = vrot.slane %v2198_v46, %v17794_v48  ;;  %v15627_v3 = vcombine.low %v1545_v1, %v1552_v57  ;;  %v15629_v17 = vcombine.high %v1545_v1, %v1552_v57 }
 0x224   : > { %v2180_v2 = vrot.slane %v2166_v38, %v17794_v48  ;;  %v1980_v22 = vrot.slane %v15623_v34, %v17791_v41  ;;  %v1996_v16 = vrot.slane %v15625_v45, %v17791_v41  ;;  %v2096_v14 = vcombine.high %v2044_v51, %v2076_v27 }
 0x225   : > { %v2230_v8 = vcombine.high %v18124_v5, %v18144_v25  ;;  %v2012_v26 = vrot.slane %v15627_v3, %v17791_v41  ;;  %v2028_v0 = vrot.slane %v15629_v17, %v17791_v41  ;;  %v15631_v28 = vcombine.low %v1613_v35, %v1620_v36 }
 0x226   : > { %v2231_v12 = vcombine.low %v2180_v2, %v2212_v60  ;;  %v2045_v21 = vcombine.low %v1980_v22, %v1996_v16  ;;  %v15633_v46 = vcombine.high %v1613_v35, %v1620_v36  ;;  %v15635_v1 = vcombine.low %v1681_v32, %v1688_v39 }
 0x227   : > { %v16645_v40 = vpack.i.bf16 %v2230_v8, %v2094_v15  ;;  %v2077_v59 = vcombine.low %v2012_v26, %v2028_v0  ;;  %v2116_v38 = vrot.slane %v15631_v28, %v17791_v41  ;;  %v15637_v57 = vcombine.high %v1681_v32, %v1688_v39 }
 0x228   : > { %v2046_v34 = vcombine.high %v1980_v22, %v1996_v16  ;;  %v2078_v45 = vcombine.high %v2012_v26, %v2028_v0  ;;  %v2232_v18 = vcombine.high %v2180_v2, %v2212_v60  ;;  %v2132_v15 = vrot.slane %v15633_v46, %v17791_v41 }
 0x229   : > { %16646 = vrot.lane.b32.xlu0 %v16645_v40, %s17380_s25  ;;  %v2085_v3 = vrot.slane %v2077_v59, %v17794_v48  ;;  %v2148_v51 = vrot.slane %v15635_v1, %v17791_v41  ;;  %v16650_v27 = vpack.i.bf16 %v2231_v12, %v2095_v42  ;;  %v2053_v17 = vrot.slane %v2045_v21, %v17794_v48 }
 0x22a   : > { %v2164_v35 = vrot.slane %v15637_v57, %v17791_v41  ;;  %v2092_v36 = vrot.slane %v2078_v45, %v17794_v48  ;;  %v16655_v8 = vpack.i.bf16 %v2232_v18, %v2096_v14  ;;  %v2181_v40 = vcombine.low %v2116_v38, %v2132_v15 }
 0x22b   : > { %v2060_v32 = vrot.slane %v2046_v34, %v17794_v48  ;;  %v1733_v60 = vrot.slane %v1725_v43, %v17794_v48  ;;  %v2097_v39 = vcombine.low %v2053_v17, %v2085_v3  ;;  %v2182_v2 = vcombine.high %v2116_v38, %v2132_v15 }
 0x22c   : > { %v2213_v42 = vcombine.low %v2148_v51, %v2164_v35  ;;  %v2214_v22 = vcombine.high %v2148_v51, %v2164_v35  ;;  %v2098_v16 = vcombine.high %v2053_v17, %v2085_v3  ;;  %v1740_v18 = vrot.slane %v1726_v54, %v17794_v48 }
 0x22d   : > { %16651 = vrot.lane.b32.xlu0 %v16650_v27, %s22293_s27  ;;  %v2099_v26 = vcombine.low %v2060_v32, %v2092_v36  ;;  %v22418_v0 = vcombine.low %v17963_v55, %v17966_v20  ;;  %v2189_v43 = vrot.slane %v2181_v40, %v17794_v48  ;;  %v22419_v21 = vcombine.high %v17963_v55, %v17966_v20 }
 0x22e   : > { %v2221_v14 = vrot.slane %v2213_v42, %v17794_v48  ;;  %v2228_v28 = vrot.slane %v2214_v22, %v17794_v48  ;;  %v2100_v46 = vcombine.high %v2060_v32, %v2092_v36  ;;  %v1869_v31 = vrot.slane %v1861_v6, %v17794_v48 }
 0x22f   : > { %v1801_v12 = vrot.slane %v22418_v0, %v17794_v48  ;;  %v1808_v59 = vrot.slane %v22419_v21, %v17794_v48  ;;  %v1876_v33 = vrot.slane %v1862_v19, %v17794_v48  ;;  %v15638_v54 = vcombine.low %v1733_v60, %v1740_v18 }
 0x230   : > { %v2233_v1 = vcombine.low %v2189_v43, %v2221_v14  ;;  %v2196_v38 = vrot.slane %v2182_v2, %v17794_v48  ;;  %v1937_v55 = vrot.slane %v1929_v30, %v17794_v48  ;;  %v1944_v20 = vrot.slane %v1930_v56, %v17794_v48 }
 0x231   : > { %16656 = vrot.lane.b32.xlu0 %v16655_v8, %s22291_s15  ;;  %v2245_v63 = vrot.slane %v15638_v54, %v17791_v41  ;;  %v15640_v44 = vcombine.high %v1733_v60, %v1740_v18  ;;  %v15642_v6 = vcombine.low %v1801_v12, %v1808_v59  ;;  %v15644_v19 = vcombine.high %v1801_v12, %v1808_v59 }
 0x232   : > { %v16660_v57 = vpack.i.bf16 %v2233_v1, %v2097_v39  ;;  %v2234_v34 = vcombine.high %v2189_v43, %v2221_v14  ;;  %v2235_v45 = vcombine.low %v2196_v38, %v2228_v28  ;;  %v2236_v3 = vcombine.high %v2196_v38, %v2228_v28 }
 0x233   : > { %v2261_v15 = vrot.slane %v15640_v44, %v17791_v41  ;;  %v2277_v51 = vrot.slane %v15642_v6, %v17791_v41  ;;  %v2293_v30 = vrot.slane %v15644_v19, %v17791_v41  ;;  %v15646_v27 = vcombine.low %v1869_v31, %v1876_v33 }
 0x234   : > { %v16665_v47 = vpack.i.bf16 %v2234_v34, %v2098_v16  ;;  %v15648_v52 = vcombine.high %v1869_v31, %v1876_v33  ;;  %v15650_v56 = vcombine.low %v1937_v55, %v1944_v20  ;;  %v15652_v17 = vcombine.high %v1937_v55, %v1944_v20 }
 0x235   : > { %16661 = vrot.lane.b32.xlu0 %v16660_v57, %s22384_s17  ;;  %v2301_v35 = vcombine.low %v2245_v63, %v2261_v15  ;;  %v2333_v36 = vcombine.low %v2277_v51, %v2293_v30  ;;  %v2381_v8 = vrot.slane %v15646_v27, %v17791_v41  ;;  %v2302_v40 = vcombine.high %v2245_v63, %v2261_v15 }
 0x236   : > { %v16670_v32 = vpack.i.bf16 %v2235_v45, %v2099_v26  ;;  %v2397_v60 = vrot.slane %v15648_v52, %v17791_v41  ;;  %v2413_v39 = vrot.slane %v15650_v56, %v17791_v41  ;;  %v2429_v42 = vrot.slane %v15652_v17, %v17791_v41 }
 0x237   : > { %v16675_v2 = vpack.i.bf16 %v2236_v3, %v2100_v46  ;;  %v18221_v22 = vrot.slane %v2301_v35, %v17794_v48  ;;  %v18224_v16 = vrot.slane %v2333_v36, %v17794_v48  ;;  %v2334_v18 = vcombine.high %v2277_v51, %v2293_v30 }
 0x238   : > { %v2437_v0 = vcombine.low %v2381_v8, %v2397_v60  ;;  %v2469_v12 = vcombine.low %v2413_v39, %v2429_v42  ;;  %v2438_v26 = vcombine.high %v2381_v8, %v2397_v60  ;;  %v1749_v43 = vrot.slane %v1741_v62, %v17794_v48 }
 0x239   : > { %16666 = vrot.lane.b32.xlu0 %v16665_v47, %s22289_s29  ;;  %v2365_v14 = vcombine.low %v18221_v22, %v18224_v16  ;;  %v2316_v28 = vrot.slane %v2302_v40, %v17794_v48  ;;  %v2470_v21 = vcombine.high %v2413_v39, %v2429_v42  ;;  %v22420_v59 = vcombine.high %v17983_v11, %v17986_v58 }
 0x23a   : > { %v18239_v31 = vrot.slane %v2437_v0, %v17794_v48  ;;  %v18242_v33 = vrot.slane %v2469_v12, %v17794_v48  ;;  %v2452_v54 = vrot.slane %v2438_v26, %v17794_v48  ;;  %v22421_v62 = vcombine.low %v17969_v23, %v17972_v24 }
 0x23b   : > { %v1756_v46 = vrot.slane %v22420_v59, %v17794_v48  ;;  %v2348_v38 = vrot.slane %v2334_v18, %v17794_v48  ;;  %v2484_v55 = vrot.slane %v2470_v21, %v17794_v48  ;;  %v22422_v11 = vcombine.high %v17969_v23, %v17972_v24 }
 0x23c   : > { %v1817_v1 = vrot.slane %v22421_v62, %v17794_v48  ;;  %v22423_v20 = vcombine.low %v18073_v49, %v18076_v61  ;;  %v2366_v44 = vcombine.high %v18221_v22, %v18224_v16  ;;  %v2502_v6 = vcombine.high %v18239_v31, %v18242_v33 }
 0x23d   : > { %v1824_v58 = vrot.slane %v22422_v11, %v17794_v48  ;;  %16671 = vrot.lane.b32.xlu0 %v16670_v32, %s22285_s3  ;;  %v2501_v19 = vcombine.low %v18239_v31, %v18242_v33  ;;  %v22424_v23 = vcombine.high %v18073_v49, %v18076_v61  ;;  %v2503_v57 = vcombine.low %v2452_v54, %v2484_v55 }
 0x23e   : > { %v1885_v63 = vrot.slane %v22423_v20, %v17794_v48  ;;  %v22425_v34 = vcombine.low %v18053_v29, %v18056_v50  ;;  %v22426_v3 = vcombine.high %v18053_v29, %v18056_v50  ;;  %v15639_v51 = vcombine.low %v1749_v43, %v1756_v46 }
 0x23f   : > { %v1892_v24 = vrot.slane %v22424_v23, %v17794_v48  ;;  %v16680_v30 = vpack.i.bf16 %v2502_v6, %v2366_v44  ;;  %v15641_v27 = vcombine.high %v1749_v43, %v1756_v46  ;;  %v15643_v47 = vcombine.low %v1817_v1, %v1824_v58 }
 0x240   : > { %v1953_v45 = vrot.slane %v22425_v34, %v17794_v48  ;;  %v1960_v15 = vrot.slane %v22426_v3, %v17794_v48  ;;  %v15645_v52 = vcombine.high %v1817_v1, %v1824_v58  ;;  %v2367_v56 = vcombine.low %v2316_v28, %v2348_v38 }
 0x241   : > { %v2252_v49 = vrot.slane %v15639_v51, %v17791_v41  ;;  %v15647_v61 = vcombine.low %v1885_v63, %v1892_v24  ;;  %16676 = vrot.lane.b32.xlu0 %v16675_v2, %s22287_s19  ;;  %16681 = vrot.lane.b32.xlu1 %v16680_v30, %s17380_s25  ;;  %v2268_v17 = vrot.slane %v15641_v27, %v17791_v41  ;;  %v16907_v2 = vld [vmem:[%s22260_s9] sm:$0xff]  }
 0x242   : > { %v2284_v35 = vrot.slane %v15643_v47, %v17791_v41  ;;  %v2300_v29 = vrot.slane %v15645_v52, %v17791_v41  ;;  %v15649_v36 = vcombine.high %v1885_v63, %v1892_v24  ;;  %v15651_v8 = vcombine.low %v1953_v45, %v1960_v15  ;;  %16078 = vmatprep.subr.bf16.mxu0 %v16907_v2  ;;  %v18304_v51 = vld [vmem:[%s17686_s0] sm:$0xff]  ;;  %v17196_v52 = vld [vmem:[%s17686_s0 + $0x8] sm:$0xff] }
 0x243   : > { %v2388_v50 = vrot.slane %v15647_v61, %v17791_v41  ;;  %v15653_v40 = vcombine.high %v1953_v45, %v1960_v15  ;;  %v16685_v32 = vpack.i.bf16 %v2503_v57, %v2367_v56  ;;  %v2504_v60 = vcombine.high %v2452_v54, %v2484_v55  ;;  %16079 = vmatpush3.bf16.msra.mxu0 %v16907_v2  ;;  %v18320_v61 = vld [vmem:[%s17686_s0 + $0x18] sm:$0xff] }
 0x244   : > { %v2317_v39 = vcombine.low %v2252_v49, %v2268_v17  ;;  %v2349_v42 = vcombine.low %v2284_v35, %v2300_v29  ;;  %v2404_v18 = vrot.slane %v15649_v36, %v17791_v41  ;;  %v2420_v0 = vrot.slane %v15651_v8, %v17791_v41 }
 0x245   : > { %v2436_v12 = vrot.slane %v15653_v40, %v17791_v41  ;;  %16686 = vrot.lane.b32.xlu1 %v16685_v32, %s22293_s27  ;;  %v2368_v26 = vcombine.high %v2316_v28, %v2348_v38  ;;  %v2318_v38 = vcombine.high %v2252_v49, %v2268_v17  ;;  %v2350_v20 = vcombine.high %v2284_v35, %v2300_v29  ;;  %v18313_v49 = vld [vmem:[%s17686_s0 + $0x10] sm:$0xff]  ;;  %v18327_v17 = vld [vmem:[%s17686_s0 + $0x20] sm:$0xff]  ;;  %s22328_s27 = smov 80  }
 0x246   : > { %v2325_v43 = vrot.slane %v2317_v39, %v17794_v48  ;;  %v2357_v21 = vrot.slane %v2349_v42, %v17794_v48  ;;  %v2453_v59 = vcombine.low %v2388_v50, %v2404_v18  ;;  %v2454_v55 = vcombine.high %v2388_v50, %v2404_v18  ;;  %3718 = vrot.lane.b32.xlu0 %v18304_v51, %s17387_s21 }
 0x247   : > { %v2485_v46 = vcombine.low %v2420_v0, %v2436_v12  ;;  %v16690_v54 = vpack.i.bf16 %v2504_v60, %v2368_v26  ;;  %v2486_v11 = vcombine.high %v2420_v0, %v2436_v12  ;;  %v2332_v57 = vrot.slane %v2318_v38, %v17794_v48 }
 0x248   : > { %v2461_v62 = vrot.slane %v2453_v59, %v17794_v48  ;;  %v2369_v58 = vcombine.low %v2325_v43, %v2357_v21  ;;  %v2468_v6 = vrot.slane %v2454_v55, %v17794_v48  ;;  %v2370_v24 = vcombine.high %v2325_v43, %v2357_v21 }
 0x249   : > { %v2493_v1 = vrot.slane %v2485_v46, %v17794_v48  ;;  %16691 = vrot.lane.b32.xlu1 %v16690_v54, %s22291_s15  ;;  %v2500_v23 = vrot.slane %v2486_v11, %v17794_v48  ;;  %v2364_v34 = vrot.slane %v2350_v20, %v17794_v48  ;;  %v22427_v26 = vcombine.low %v18124_v5, %v18144_v25  ;;  %s22324_s15 = smov 72  }
 0x24a   : > { %3720 = vrot.lane.b32.xlu0 %v17196_v52, %s17387_s21  ;;  %v22428_v21 = vcombine.low %v18087_v7, %v18090_v53 }
 0x24b   : > { %v2505_v28 = vcombine.low %v2461_v62, %v2493_v1  ;;  %v2506_v44 = vcombine.high %v2461_v62, %v2493_v1  ;;  %v2507_v3 = vcombine.low %v2468_v6, %v2500_v23  ;;  %v2371_v15 = vcombine.low %v2332_v57, %v2364_v34 }
 0x24c   : > { %v2508_v27 = vcombine.high %v2468_v6, %v2500_v23  ;;  %v2372_v47 = vcombine.high %v2332_v57, %v2364_v34 }
 0x24d   : > { %v16695_v63 = vpack.i.bf16 %v2505_v28, %v2369_v58  ;;  %v16700_v45 = vpack.i.bf16 %v2506_v44, %v2370_v24  ;;  %v16705_v30 = vpack.i.bf16 %v2507_v3, %v2371_v15 }
 0x24e   : > { %v16710_v56 = vpack.i.bf16 %v2508_v27, %v2372_v47  ;;  %3746 = vrot.lane.b32.xlu0 %v18313_v49, %s17388_s28 }
 0x24f   : > { %16696 = vrot.lane.b32.xlu1 %v16695_v63, %s22384_s17 }
 0x252   : > { %3724 = vrot.lane.b32.xlu0 %v18320_v61, %s17387_s21 }
 0x253   : > { %16701 = vrot.lane.b32.xlu1 %v16700_v45, %s22289_s29  ;;  %s22326_s29 = smov 88  }
 0x256   : > { %3750 = vrot.lane.b32.xlu0 %v18327_v17, %s17388_s28 }
 0x257   : > { %16706 = vrot.lane.b32.xlu1 %v16705_v30, %s22285_s3  ;;  %s17389_s3 = smov 104  }
 0x25b   : > { %16711 = vrot.lane.b32.xlu1 %v16710_v56, %s22287_s19  ;;  %s22332_s19 = smov 96  }
 0x25f   : > { %3742 = vrot.lane.b32.xlu1 %v18304_v51, %s17388_s28 }
 0x263   : > { %3766 = vrot.lane.b32.xlu1 %v18304_v51, %s17389_s3 }
 0x267   : > { %3744 = vrot.lane.b32.xlu1 %v17196_v52, %s17388_s28 }
 0x26b   : > { %3768 = vrot.lane.b32.xlu1 %v17196_v52, %s17389_s3 }
 0x26f   : > { %3722 = vrot.lane.b32.xlu1 %v18313_v49, %s17387_s21 }
 0x273   : > { %3770 = vrot.lane.b32.xlu1 %v18313_v49, %s17389_s3 }
 0x277   : > { %3748 = vrot.lane.b32.xlu1 %v18320_v61, %s17388_s28 }
 0x27b   : > { %3772 = vrot.lane.b32.xlu1 %v18320_v61, %s17389_s3 }
 0x27f   : > { %3726 = vrot.lane.b32.xlu1 %v18327_v17, %s17387_s21 }
 0x283   : > { %3774 = vrot.lane.b32.xlu1 %v18327_v17, %s17389_s3 }
 0x29b   : > { %v16647_v35 = vpop.permute.xlu0 %16646 }
 0x29c   : > { %v16649_v40 = vunpack.i.h.bf16 %v16647_v35  ;;  %v16648_v32 = vunpack.i.l.bf16 %v16647_v35 }
 0x29e   : > { %v2623_v43 = vsel %vm2621_vm1, %v22427_v26, %v16649_v40  ;;  %v2622_v59 = vsel %vm2621_vm1, %v22428_v21, %v16648_v32 }
 0x29f   : > { %v16652_v29 = vpop.permute.xlu0 %16651 }
 0x2a0   : > { %v16654_v60 = vunpack.i.h.bf16 %v16652_v29  ;;  %v16653_v39 = vunpack.i.l.bf16 %v16652_v29 }
 0x2a2   : > { %v2627_v62 = vsel %vm2626_vm2, %v2622_v59, %v16653_v39  ;;  %v2628_v1 = vsel %vm2626_vm2, %v2623_v43, %v16654_v60 }
 0x2a3   : > { %v16657_v50 = vpop.permute.xlu0 %16656 }
 0x2a4   : > { %v16659_v42 = vunpack.i.h.bf16 %v16657_v50  ;;  %v16658_v2 = vunpack.i.l.bf16 %v16657_v50 }
 0x2a6   : > { %v2632_v58 = vsel %vm2631_vm3, %v2627_v62, %v16658_v2  ;;  %v2633_v28 = vsel %vm2631_vm3, %v2628_v1, %v16659_v42 }
 0x2a7   : > { %v16662_v36 = vpop.permute.xlu0 %16661 }
 0x2a8   : > { %v16664_v18 = vunpack.i.h.bf16 %v16662_v36  ;;  %v16663_v0 = vunpack.i.l.bf16 %v16662_v36 }
 0x2aa   : > { %v2637_v5 = vsel %vm2636_vm4, %v2632_v58, %v16663_v0  ;;  %v2638_v25 = vsel %vm2636_vm4, %v2633_v28, %v16664_v18  ;;  %v22295_v58 = vmov 0.0  }
 0x2ab   : > { %v16667_v8 = vpop.permute.xlu0 %16666  ;;  %16084 = vmatprep.subr.bf16.mxu1 %v22295_v58  ;;  %16096 = vmatprep.subr.bf16.mxu0 %v22295_v58 }
 0x2ac   : > { %v16669_v46 = vunpack.i.h.bf16 %v16667_v8  ;;  %v16668_v54 = vunpack.i.l.bf16 %v16667_v8 }
 0x2ae   : > { %v2642_v38 = vsel %vm2641_vm5, %v2637_v5, %v16668_v54  ;;  %v2643_v20 = vsel %vm2641_vm5, %v2638_v25, %v16669_v46 }
 0x2af   : > { %v16672_v12 = vpop.permute.xlu0 %16671 }
 0x2b0   : > { %v16674_v55 = vunpack.i.h.bf16 %v16672_v12  ;;  %v16673_v11 = vunpack.i.l.bf16 %v16672_v12 }
 0x2b2   : > { %v2647_v6 = vsel %vm2646_vm6, %v2642_v38, %v16673_v11  ;;  %v2648_v23 = vsel %vm2646_vm6, %v2643_v20, %v16674_v55 }
 0x2b3   : > { %v16682_v7 = vpop.permute.xlu1 %16681  ;;  %v16677_v53 = vpop.permute.xlu0 %16676 }
 0x2b4   : > { %v16679_v63 = vunpack.i.h.bf16 %v16677_v53  ;;  %v16678_v44 = vunpack.i.l.bf16 %v16677_v53  ;;  %v16684_v27 = vunpack.i.h.bf16 %v16682_v7  ;;  %v16683_v47 = vunpack.i.l.bf16 %v16682_v7 }
 0x2b6   : > { %v2652_v24 = vsel %vm2651_vm7, %v2647_v6, %v16678_v44  ;;  %v2653_v57 = vsel %vm2651_vm7, %v2648_v23, %v16679_v63  ;;  %v2624_v40 = vsel %vm2621_vm1, %v2365_v14, %v16683_v47  ;;  %v2625_v32 = vsel %vm2621_vm1, %v2501_v19, %v16684_v27 }
 0x2b7   : > { %v16687_v34 = vpop.permute.xlu1 %16686  ;;  %v2656_v45 = vpack.c.bf16 %v2653_v57, %v2652_v24 }
 0x2b8   : > { %v16689_v52 = vunpack.i.h.bf16 %v16687_v34  ;;  %v16688_v56 = vunpack.i.l.bf16 %v16687_v34  ;;  %v3719_v28 = vpop.permute.xlu0 %3718 }
 0x2b9   : > { %16080 = vmatprep.mubr.msk.bf16.mxu0 %vm2670_vm8, %v2656_v45 }
 0x2ba   : > { %v2629_v42 = vsel %vm2626_vm2, %v2624_v40, %v16688_v56  ;;  %v2630_v2 = vsel %vm2626_vm2, %v2625_v32, %v16689_v52 }
 0x2bb   : > { %v16692_v3 = vpop.permute.xlu1 %16691 }
 0x2bc   : > { %v16694_v35 = vunpack.i.h.bf16 %v16692_v3  ;;  %v16693_v29 = vunpack.i.l.bf16 %v16692_v3 }
 0x2be   : > { %v2634_v12 = vsel %vm2631_vm3, %v2629_v42, %v16693_v29  ;;  %v2635_v26 = vsel %vm2631_vm3, %v2630_v2, %v16694_v35 }
 0x2c1   : > { %v16697_v15 = vpop.permute.xlu1 %16696 }
 0x2c2   : > { %v16699_v50 = vunpack.i.h.bf16 %v16697_v15  ;;  %v16698_v36 = vunpack.i.l.bf16 %v16697_v15 }
 0x2c4   : > { %v2639_v22 = vsel %vm2636_vm4, %v2634_v12, %v16698_v36  ;;  %v2640_v16 = vsel %vm2636_vm4, %v2635_v26, %v16699_v50 }
 0x2c5   : > { %v16702_v30 = vpop.permute.xlu1 %16701 }
 0x2c6   : > { %v16704_v60 = vunpack.i.h.bf16 %v16702_v30  ;;  %v16703_v39 = vunpack.i.l.bf16 %v16702_v30 }
 0x2c8   : > { %v2644_v31 = vsel %vm2641_vm5, %v2639_v22, %v16703_v39  ;;  %v2645_v33 = vsel %vm2641_vm5, %v2640_v16, %v16704_v60 }
 0x2c9   : > { %v16707_v8 = vpop.permute.xlu1 %16706 }
 0x2ca   : > { %v16709_v18 = vunpack.i.h.bf16 %v16707_v8  ;;  %v16708_v0 = vunpack.i.l.bf16 %v16707_v8 }
 0x2cc   : > { %v2649_v21 = vsel %vm2646_vm6, %v2644_v31, %v16708_v0  ;;  %v2650_v59 = vsel %vm2646_vm6, %v2645_v33, %v16709_v18  ;;  %v18415_v33 = vpop.permute.xlu0 %3720 }
 0x2cd   : > { %v16712_v14 = vpop.permute.xlu1 %16711 }
 0x2ce   : > { %v16714_v19 = vunpack.i.h.bf16 %v16712_v14  ;;  %v16713_v43 = vunpack.i.l.bf16 %v16712_v14 }
 0x2d0   : > { %v2654_v46 = vsel %vm2651_vm7, %v2649_v21, %v16713_v43  ;;  %v2655_v54 = vsel %vm2651_vm7, %v2650_v59, %v16714_v19  ;;  %v3747_v43 = vpop.permute.xlu0 %3746 }
 0x2d1   : > { %v2657_v62 = vpack.c.bf16 %v2655_v54, %v2654_v46  ;;  %v3743_v1 = vpop.permute.xlu1 %3742  ;;  %v3926_v59 = vcombine.low %v18313_v49, %v3747_v43 }
 0x2d2   : > { %v3790_v55 = vcombine.low %v18304_v51, %v3743_v1  ;;  %v3791_v11 = vcombine.high %v18304_v51, %v3743_v1 }
 0x2d3   : > { %16081 = vmatmul.mubr.msk.bf16.vlgmr.msra.gmra.mrb[8].mxu0 %vm2670_vm8, %v2657_v62  ;;  %v3927_v62 = vcombine.high %v18313_v49, %v3747_v43 }
 0x2d4   : > { %v3798_v25 = vrot.slane %v3790_v55, %v17791_v41  ;;  %v3805_v7 = vrot.slane %v3791_v11, %v17791_v41  ;;  %v3725_v1 = vpop.permute.xlu0 %3724  ;;  %v3934_v11 = vrot.slane %v3926_v59, %v17791_v41 }
 0x2d5   : > { %v3767_v5 = vpop.permute.xlu1 %3766 }
 0x2d6   : > { %v3806_v53 = vcombine.low %v3719_v28, %v3767_v5  ;;  %v3807_v38 = vcombine.high %v3719_v28, %v3767_v5  ;;  %v3941_v5 = vrot.slane %v3927_v62, %v17791_v41 }
 0x2d8   : > { %v3814_v20 = vrot.slane %v3806_v53, %v17791_v41  ;;  %v3821_v63 = vrot.slane %v3807_v38, %v17791_v41 }
 0x2d9   : > { %v18407_v42 = vpop.permute.xlu1 %3744 }
 0x2da   : > { %v3822_v44 = vcombine.low %v3798_v25, %v3814_v20  ;;  %v3823_v6 = vcombine.high %v3798_v25, %v3814_v20  ;;  %v3838_v51 = vcombine.low %v3805_v7, %v3821_v63  ;;  %v3839_v23 = vcombine.high %v3805_v7, %v3821_v63 }
 0x2dc   : > { %v3830_v24 = vrot.slane %v3822_v44, %v17794_v48  ;;  %v3837_v57 = vrot.slane %v3823_v6, %v17794_v48  ;;  %v3846_v34 = vrot.slane %v3838_v51, %v17794_v48  ;;  %v3853_v45 = vrot.slane %v3839_v23, %v17794_v48 }
 0x2dd   : > { %v18409_v26 = vpop.permute.xlu1 %3768 }
 0x2de   : > { %v4334_v3 = vcombine.low %v3830_v24, %v3837_v57  ;;  %v15658_v15 = vcombine.high %v3830_v24, %v3837_v57  ;;  %v4350_v30 = vcombine.low %v3846_v34, %v3853_v45  ;;  %v15659_v27 = vcombine.high %v3846_v34, %v3853_v45  ;;  %v3751_v24 = vpop.permute.xlu0 %3750 }
 0x2e0   : > { %v4341_v47 = vrot.slane %v4334_v3, %v17791_v41  ;;  %v4349_v52 = vrot.slane %v15658_v15, %v17791_v41  ;;  %v4357_v56 = vrot.slane %v4350_v30, %v17791_v41  ;;  %v4365_v35 = vrot.slane %v15659_v27, %v17791_v41 }
 0x2e1   : > { %v3723_v14 = vpop.permute.xlu1 %3722 }
 0x2e2   : > { %v4366_v29 = vcombine.low %v4341_v47, %v4349_v52  ;;  %v4382_v50 = vcombine.low %v4357_v56, %v4365_v35  ;;  %v4367_v36 = vcombine.high %v4341_v47, %v4349_v52  ;;  %v4383_v8 = vcombine.high %v4357_v56, %v4365_v35 }
 0x2e4   : > { %v4374_v40 = vrot.slane %v4366_v29, %v17794_v48  ;;  %v4390_v32 = vrot.slane %v4382_v50, %v17794_v48  ;;  %v4381_v60 = vrot.slane %v4367_v36, %v17794_v48  ;;  %v4397_v39 = vrot.slane %v4383_v8, %v17794_v48  ;;  %v18442_v8 = vld [vmem:[%s22261_s10] ss:$0 sm:$0xff] }
 0x2e5   : > { %v3771_v31 = vpop.permute.xlu1 %3770  ;;  %v4063_v36 = vcombine.high %v18327_v17, %v3751_v24 }
 0x2e6   : > { %v4398_v2 = vcombine.low %v4374_v40, %v4390_v32  ;;  %v4400_v18 = vcombine.low %v4381_v60, %v4397_v39  ;;  %v3942_v21 = vcombine.low %v3723_v14, %v3771_v31  ;;  %v3943_v54 = vcombine.high %v3723_v14, %v3771_v31 }
 0x2e7   : > { %v18427_v57 = vcombine.high %v4374_v40, %v4390_v32  ;;  %v18429_v34 = vcombine.high %v4381_v60, %v4397_v39  ;;  %v4077_v43 = vrot.slane %v4063_v36, %v17791_v41 }
 0x2e8   : > { %v4910_v0 = vpack.c.bf16 %v4398_v2, %v4398_v2  ;;  %v4912_v12 = vpack.c.bf16 %v4400_v18, %v4400_v18  ;;  %v3950_v55 = vrot.slane %v3942_v21, %v17791_v41  ;;  %v3957_v28 = vrot.slane %v3943_v54, %v17791_v41 }
 0x2e9   : > { %v3749_v19 = vpop.permute.xlu1 %3748 }
 0x2ea   : > { %v4947_v22 = vsel %vm4945_vm9, %v4910_v0, 0  ;;  %v5039_v16 = vsel %vm4945_vm9, %v4912_v12, 0  ;;  %v3994_v25 = vcombine.low %v18320_v61, %v3749_v19  ;;  %v3958_v38 = vcombine.low %v3934_v11, %v3950_v55 }
 0x2eb   : > { %16085 = vmatpush3.bf16.msra.mxu1 %v4947_v22  ;;  %16097 = vmatpush3.bf16.msra.mxu0 %v5039_v16  ;;  %v3959_v20 = vcombine.high %v3934_v11, %v3950_v55  ;;  %v3974_v63 = vcombine.low %v3941_v5, %v3957_v28  ;;  %v3975_v44 = vcombine.high %v3941_v5, %v3957_v28 }
 0x2ec   : > { %16090 = vmatprep.subr.bf16.mxu1 %v22295_v58  ;;  %16108 = vmatprep.subr.bf16.mxu0 %v22295_v58  ;;  %v3995_v6 = vcombine.high %v18320_v61, %v3749_v19  ;;  %v4002_v51 = vrot.slane %v3994_v25, %v17791_v41  ;;  %v3966_v45 = vrot.slane %v3958_v38, %v17794_v48 }
 0x2ed   : > { %v3773_v46 = vpop.permute.xlu1 %3772  ;;  %v3973_v3 = vrot.slane %v3959_v20, %v17794_v48  ;;  %v4062_v61 = vcombine.low %v18327_v17, %v3751_v24  ;;  %v3982_v47 = vrot.slane %v3974_v63, %v17794_v48  ;;  %v3989_v52 = vrot.slane %v3975_v44, %v17794_v48 }
 0x2ee   : > { %v4010_v7 = vcombine.low %v3725_v1, %v3773_v46  ;;  %v4011_v49 = vcombine.high %v3725_v1, %v3773_v46  ;;  %v4009_v30 = vrot.slane %v3995_v6, %v17791_v41 }
 0x2ef   : > { %v4470_v40 = vcombine.low %v3966_v45, %v3973_v3  ;;  %v15662_v32 = vcombine.high %v3966_v45, %v3973_v3  ;;  %v4070_v2 = vrot.slane %v4062_v61, %v17791_v41  ;;  %v4486_v0 = vcombine.low %v3982_v47, %v3989_v52 }
 0x2f0   : > { %v4018_v23 = vrot.slane %v4010_v7, %v17791_v41  ;;  %v4025_v27 = vrot.slane %v4011_v49, %v17791_v41  ;;  %v15663_v12 = vcombine.high %v3982_v47, %v3989_v52 }
 0x2f1   : > { %v3727_v53 = vpop.permute.xlu1 %3726  ;;  %v4477_v46 = vrot.slane %v4470_v40, %v17791_v41  ;;  %v4485_v54 = vrot.slane %v15662_v32, %v17791_v41  ;;  %v4493_v5 = vrot.slane %v4486_v0, %v17791_v41 }
 0x2f2   : > { %v4026_v56 = vcombine.low %v4002_v51, %v4018_v23  ;;  %v4027_v35 = vcombine.high %v4002_v51, %v4018_v23  ;;  %v4042_v60 = vcombine.low %v4009_v30, %v4025_v27  ;;  %v4043_v39 = vcombine.high %v4009_v30, %v4025_v27 }
 0x2f3   : > { %v4501_v25 = vrot.slane %v15663_v12, %v17791_v41  ;;  %v4502_v20 = vcombine.low %v4477_v46, %v4485_v54  ;;  %v4503_v6 = vcombine.high %v4477_v46, %v4485_v54 }
 0x2f4   : > { %v4034_v22 = vrot.slane %v4026_v56, %v17794_v48  ;;  %v4041_v16 = vrot.slane %v4027_v35, %v17794_v48  ;;  %v4050_v1 = vrot.slane %v4042_v60, %v17794_v48  ;;  %v4057_v55 = vrot.slane %v4043_v39, %v17794_v48 }
 0x2f5   : > { %v3775_v15 = vpop.permute.xlu1 %3774  ;;  %v4518_v44 = vcombine.low %v4493_v5, %v4501_v25  ;;  %v4519_v49 = vcombine.high %v4493_v5, %v4501_v25  ;;  %v18471_v24 = vrot.slane %v4502_v20, %v17794_v48  ;;  %v18479_v3 = vrot.slane %v4503_v6, %v17794_v48 }
 0x2f6   : > { %v4078_v29 = vcombine.low %v3727_v53, %v3775_v15  ;;  %v4079_v50 = vcombine.high %v3727_v53, %v3775_v15  ;;  %v4538_v11 = vcombine.low %v4034_v22, %v4041_v16  ;;  %v15664_v28 = vcombine.high %v4034_v22, %v4041_v16 }
 0x2f7   : > { %v4554_v51 = vcombine.low %v4050_v1, %v4057_v55  ;;  %v15665_v23 = vcombine.high %v4050_v1, %v4057_v55  ;;  %v18476_v45 = vrot.slane %v4518_v44, %v17794_v48  ;;  %v18482_v15 = vrot.slane %v4519_v49, %v17794_v48 }
 0x2f8   : > { %v4086_v31 = vrot.slane %v4078_v29, %v17791_v41  ;;  %v4093_v19 = vrot.slane %v4079_v50, %v17791_v41  ;;  %v4545_v52 = vrot.slane %v4538_v11, %v17791_v41  ;;  %v4553_v56 = vrot.slane %v15664_v28, %v17791_v41 }
 0x2f9   : > { %v4561_v35 = vrot.slane %v4554_v51, %v17791_v41  ;;  %v4569_v29 = vrot.slane %v15665_v23, %v17791_v41  ;;  %v18496_v50 = vcombine.low %v18471_v24, %v18476_v45  ;;  %v18500_v36 = vcombine.low %v18479_v3, %v18482_v15 }
 0x2fa   : > { %v4094_v7 = vcombine.low %v4070_v2, %v4086_v31  ;;  %v4095_v53 = vcombine.high %v4070_v2, %v4086_v31  ;;  %v4110_v38 = vcombine.low %v4077_v43, %v4093_v19  ;;  %v4111_v63 = vcombine.high %v4077_v43, %v4093_v19 }
 0x2fb   : > { %22429 = vst [vmem:[#allocation19_spill] sm:$0xff] %v18496_v50  ;;  %22430 = vst [vmem:[#allocation20_spill] sm:$0xff] %v18500_v36  ;;  %v4570_v40 = vcombine.low %v4545_v52, %v4553_v56  ;;  %v4571_v32 = vcombine.high %v4545_v52, %v4553_v56  ;;  %v4586_v2 = vcombine.low %v4561_v35, %v4569_v29 }
 0x2fc   : > { %v4102_v30 = vrot.slane %v4094_v7, %v17794_v48  ;;  %v4109_v27 = vrot.slane %v4095_v53, %v17794_v48  ;;  %v4118_v61 = vrot.slane %v4110_v38, %v17794_v48  ;;  %v4125_v47 = vrot.slane %v4111_v63, %v17794_v48 }
 0x2fd   : > { %v18505_v22 = vrot.slane %v4570_v40, %v17794_v48  ;;  %v18508_v16 = vrot.slane %v4571_v32, %v17794_v48 }
 0x2fe   : > { %v4606_v60 = vcombine.low %v4102_v30, %v4109_v27  ;;  %v15666_v39 = vcombine.high %v4102_v30, %v4109_v27  ;;  %v4622_v0 = vcombine.low %v4118_v61, %v4125_v47  ;;  %v15667_v12 = vcombine.high %v4118_v61, %v4125_v47 }
 0x2ff   : > { %22431 = vst [vmem:[#allocation21_spill] sm:$0xff] %v18505_v22  ;;  %22432 = vst [vmem:[#allocation22_spill] sm:$0xff] %v18508_v16 }
 0x300   : > { %v4613_v54 = vrot.slane %v4606_v60, %v17791_v41  ;;  %v4621_v1 = vrot.slane %v15666_v39, %v17791_v41  ;;  %v4629_v55 = vrot.slane %v4622_v0, %v17791_v41  ;;  %v4637_v11 = vrot.slane %v15667_v12, %v17791_v41 }
 0x302   : > { %v4654_v28 = vcombine.low %v4629_v55, %v4637_v11  ;;  %v4639_v5 = vcombine.high %v4613_v54, %v4621_v1  ;;  %v4655_v25 = vcombine.high %v4629_v55, %v4637_v11 }
 0x304   : > { %v18543_v53 = vrot.slane %v4654_v28, %v17794_v48  ;;  %v18546_v38 = vrot.slane %v4639_v5, %v17794_v48  ;;  %v18549_v20 = vrot.slane %v4655_v25, %v17794_v48 }
 0x306   : > { %22437 = vst [vmem:[#allocation27_spill] sm:$0xff] %v18543_v53  ;;  %22438 = vst [vmem:[#allocation28_spill] sm:$0xff] %v18546_v38  ;;  %v18561_v44 = vcombine.low %v18546_v38, %v18549_v20 }
 0x307   : > { %22439 = vst [vmem:[#allocation29_spill] sm:$0xff] %v18549_v20 }
 0x308   : > { %22441 = vst [vmem:[#allocation31_spill] sm:$0xff] %v18561_v44 }
 0x3a6   : > { %v16082_v18 = vpop.f32.mrb[8].mxu0 }
 0x3a7   : > { %v18448_v17 = vadd.f32 %v16082_v18, %v18442_v8  ;;  %v2711_v14 = vpop.f32.mrb[9].mxu0  ;;  %v4587_v18 = vcombine.high %v4561_v35, %v4569_v29 }
 0x3a8   : > { %v18454_v21 = vadd.f32 %v18442_v8, %v2711_v14  ;;  %v16083_v59 = vpop.f32.mrb[10].mxu0  ;;  %v18513_v14 = vrot.slane %v4586_v2, %v17794_v48 }
 0x3a9   : > { %2734 = vrot.lane.b32.xlu1 %v18448_v17, %s17387_s21  ;;  %v18460_v62 = vpop.f32.mrb[11].mxu0  ;;  %v18516_v31 = vrot.slane %v4587_v18, %v17794_v48  ;;  %v18521_v19 = vadd.f32 %v16083_v59, %v18442_v8  ;;  %v4638_v59 = vcombine.low %v4613_v54, %v4621_v1 }
 0x3aa   : > { %2730 = vrot.lane.b32.xlu0 %v18454_v21, %s17387_s21  ;;  %v18525_v43 = vcombine.low %v18505_v22, %v18513_v14  ;;  %v18581_v6 = vadd.f32 %v18442_v8, %v18460_v62 }
 0x3ab   : > { %22433 = vst [vmem:[#allocation23_spill] sm:$0xff] %v18516_v31  ;;  %v18529_v46 = vcombine.low %v18508_v16, %v18516_v31  ;;  %v18540_v7 = vrot.slane %v4638_v59, %v17794_v48 }
 0x3ac   : > { %22434 = vst [vmem:[#allocation24_spill] sm:$0xff] %v18525_v43 }
 0x3ad   : > { %2746 = vrot.lane.b32.xlu1 %v18448_v17, %s17388_s28  ;;  %22435 = vst [vmem:[#allocation25_spill] sm:$0xff] %v18529_v46  ;;  %22436 = vst [vmem:[#allocation26_spill] sm:$0xff] %v18540_v7  ;;  %v18557_v63 = vcombine.low %v18540_v7, %v18543_v53 }
 0x3ae   : > { %2754 = vrot.lane.b32.xlu0 %v18454_v21, %s17389_s3 }
 0x3af   : > { %22440 = vst [vmem:[#allocation30_spill] sm:$0xff] %v18557_v63 }
 0x3b1   : > { %2758 = vrot.lane.b32.xlu1 %v18448_v17, %s17389_s3 }
 0x3b2   : > { %2778 = vrot.lane.b32.xlu0 %v18454_v21, %s22326_s29 }
 0x3b5   : > { %2770 = vrot.lane.b32.xlu1 %v18448_v17, %s22332_s19 }
 0x3b6   : > { %2802 = vrot.lane.b32.xlu0 %v18454_v21, %s22324_s15 }
 0x3b9   : > { %2782 = vrot.lane.b32.xlu1 %v18448_v17, %s22326_s29 }
 0x3ba   : > { %2736 = vrot.lane.b32.xlu0 %v18521_v19, %s17387_s21 }
 0x3bd   : > { %2794 = vrot.lane.b32.xlu1 %v18448_v17, %s22328_s27 }
 0x3be   : > { %2760 = vrot.lane.b32.xlu0 %v18521_v19, %s17389_s3 }
 0x3c1   : > { %2806 = vrot.lane.b32.xlu1 %v18448_v17, %s22324_s15 }
 0x3c2   : > { %2772 = vrot.lane.b32.xlu0 %v18521_v19, %s22332_s19 }
 0x3c5   : > { %2742 = vrot.lane.b32.xlu1 %v18454_v21, %s17388_s28 }
 0x3c6   : > { %2784 = vrot.lane.b32.xlu0 %v18521_v19, %s22326_s29 }
 0x3c9   : > { %2766 = vrot.lane.b32.xlu1 %v18454_v21, %s22332_s19 }
 0x3ca   : > { %2796 = vrot.lane.b32.xlu0 %v18521_v19, %s22328_s27 }
 0x3cd   : > { %2790 = vrot.lane.b32.xlu1 %v18454_v21, %s22328_s27 }
 0x3ce   : > { %2808 = vrot.lane.b32.xlu0 %v18521_v19, %s22324_s15 }
 0x3d1   : > { %2748 = vrot.lane.b32.xlu1 %v18521_v19, %s17388_s28 }
 0x3d2   : > { %2744 = vrot.lane.b32.xlu0 %v18581_v6, %s17388_s28 }
 0x3d5   : > { %2732 = vrot.lane.b32.xlu1 %v18581_v6, %s17387_s21 }
 0x3d6   : > { %2768 = vrot.lane.b32.xlu0 %v18581_v6, %s22332_s19  ;;  %s22539_s19 = smov 4  }
 0x3d9   : > { %2756 = vrot.lane.b32.xlu1 %v18581_v6, %s17389_s3 }
 0x3da   : > { %2792 = vrot.lane.b32.xlu0 %v18581_v6, %s22328_s27  ;;  %s22511_s27 = sld [smem:[#allocation55_spill]] }
 0x3dd   : > { %2780 = vrot.lane.b32.xlu1 %v18581_v6, %s22326_s29  ;;  %s22491_s29 = sld [smem:[#allocation54_spill]] }
 0x3e1   : > { %2804 = vrot.lane.b32.xlu1 %v18581_v6, %s22324_s15  ;;  %s22540_s15 = smov 6  }
 0x41b   : > { %v2735_v8 = vpop.permute.xlu1 %2734 }
 0x41c   : > { %v2731_v62 = vpop.permute.xlu0 %2730 }
 0x41f   : > { %v2747_v49 = vpop.permute.xlu1 %2746 }
 0x420   : > { %v2755_v51 = vpop.permute.xlu0 %2754  ;;  %v3086_v35 = vcombine.low %v18448_v17, %v2747_v49  ;;  %v3087_v60 = vcombine.high %v18448_v17, %v2747_v49 }
 0x422   : > { %v3094_v18 = vrot.slane %v3086_v35, %v17791_v41  ;;  %v3101_v59 = vrot.slane %v3087_v60, %v17791_v41 }
 0x423   : > { %v2759_v23 = vpop.permute.xlu1 %2758 }
 0x424   : > { %v18599_v30 = vpop.permute.xlu0 %2778  ;;  %v3102_v56 = vcombine.low %v2735_v8, %v2759_v23  ;;  %v3103_v40 = vcombine.high %v2735_v8, %v2759_v23 }
 0x426   : > { %v3110_v39 = vrot.slane %v3102_v56, %v17791_v41  ;;  %v3117_v54 = vrot.slane %v3103_v40, %v17791_v41 }
 0x427   : > { %v2771_v27 = vpop.permute.xlu1 %2770 }
 0x428   : > { %v18601_v61 = vpop.permute.xlu0 %2802  ;;  %v3151_v28 = vcombine.high %v3094_v18, %v3110_v39  ;;  %v3150_v8 = vcombine.low %v3094_v18, %v3110_v39  ;;  %v2831_v39 = vcombine.high %v2731_v62, %v2755_v51  ;;  %v3167_v37 = vcombine.high %v3101_v59, %v3117_v54 }
 0x42a   : > { %v3165_v60 = vrot.slane %v3151_v28, %v17794_v48 }
 0x42b   : > { %v2783_v47 = vpop.permute.xlu1 %2782 }
 0x42c   : > { %v18603_v52 = vpop.permute.xlu0 %2736 }
 0x42f   : > { %v2795_v29 = vpop.permute.xlu1 %2794 }
 0x430   : > { %v18606_v32 = vpop.permute.xlu0 %2760  ;;  %v3118_v2 = vcombine.low %v2771_v27, %v2795_v29  ;;  %v3119_v0 = vcombine.high %v2771_v27, %v2795_v29  ;;  %v2830_v29 = vcombine.low %v2731_v62, %v2755_v51 }
 0x432   : > { %v3126_v5 = vrot.slane %v3118_v2, %v17791_v41  ;;  %v3133_v49 = vrot.slane %v3119_v0, %v17791_v41 }
 0x433   : > { %v2807_v12 = vpop.permute.xlu1 %2806 }
 0x434   : > { %v3134_v1 = vcombine.low %v2783_v47, %v2807_v12  ;;  %v3135_v55 = vcombine.high %v2783_v47, %v2807_v12  ;;  %v18612_v11 = vpop.permute.xlu0 %2772  ;;  %v3166_v47 = vcombine.low %v3101_v59, %v3117_v54 }
 0x436   : > { %v3142_v17 = vrot.slane %v3134_v1, %v17791_v41  ;;  %v3149_v25 = vrot.slane %v3135_v55, %v17791_v41  ;;  %v3158_v1 = vrot.slane %v3150_v8, %v17794_v48  ;;  %v3174_v8 = vrot.slane %v3166_v47, %v17794_v48 }
 0x437   : > { %v2743_v23 = vpop.permute.xlu1 %2742 }
 0x438   : > { %v18619_v27 = vpop.permute.xlu0 %2784  ;;  %v3183_v56 = vcombine.high %v3126_v5, %v3142_v17  ;;  %v3182_v35 = vcombine.low %v3126_v5, %v3142_v17  ;;  %v3198_v40 = vcombine.low %v3133_v49, %v3149_v25  ;;  %v3199_v12 = vcombine.high %v3133_v49, %v3149_v25 }
 0x439   : > { %v2814_v18 = vcombine.low %v18454_v21, %v2743_v23  ;;  %v2862_v5 = vcombine.low %v18599_v30, %v18601_v61  ;;  %v18637_v49 = vrot.slane %v2830_v29, %v17791_v41  ;;  %v2815_v62 = vcombine.high %v18454_v21, %v2743_v23 }
 0x43a   : > { %v3197_v2 = vrot.slane %v3183_v56, %v17794_v48  ;;  %v3190_v55 = vrot.slane %v3182_v35, %v17794_v48  ;;  %v3206_v58 = vrot.slane %v3198_v40, %v17794_v48  ;;  %v3213_v51 = vrot.slane %v3199_v12, %v17794_v48 }
 0x43b   : > { %v2767_v0 = vpop.permute.xlu1 %2766  ;;  %v18650_v40 = vrot.slane %v2831_v39, %v17791_v41  ;;  %v18653_v47 = vrot.slane %v2814_v18, %v17791_v41  ;;  %v3181_v23 = vrot.slane %v3167_v37, %v17794_v48  ;;  %v2863_v29 = vcombine.high %v18599_v30, %v18601_v61 }
 0x43c   : > { %v18629_v17 = vpop.permute.xlu0 %2796  ;;  %v18631_v25 = vcombine.high %v3165_v60, %v3197_v2  ;;  %v18633_v28 = vcombine.high %v3158_v1, %v3190_v55  ;;  %v18645_v56 = vcombine.low %v3158_v1, %v3190_v55  ;;  %v18647_v35 = vcombine.high %v3174_v8, %v3206_v58 }
 0x43d   : > { %v2870_v12 = vrot.slane %v2862_v5, %v17791_v41  ;;  %v3238_v39 = vcombine.low %v18603_v52, %v18606_v32  ;;  %v18664_v18 = vrot.slane %v2815_v62, %v17791_v41  ;;  %v3254_v5 = vcombine.low %v18612_v11, %v18629_v17 }
 0x43e   : > { %v3415_v54 = vsel %vm2636_vm4, %v18631_v25, -inf  ;;  %v3409_v59 = vsel %vm2636_vm4, %v18633_v28, -inf  ;;  %v3406_v30 = vsel %vm2636_vm4, %v18645_v56, -inf  ;;  %v3421_v61 = vsel %vm2636_vm4, %v18647_v35, -inf }
 0x43f   : > { %3416 = vmax.xlane.f32.xlu1 %v3415_v54  ;;  %v2791_v21 = vpop.permute.xlu1 %2790  ;;  %3410 = vmax.xlane.f32.xlu0 %v3409_v59  ;;  %v18668_v59 = vcombine.low %v3181_v23, %v3213_v51  ;;  %v2877_v10 = vrot.slane %v2863_v29, %v17791_v41  ;;  %v18707_v46 = vrot.slane %v3254_v5, %v17791_v41 }
 0x440   : > { %v2846_v1 = vcombine.low %v2767_v0, %v2791_v21  ;;  %v2847_v55 = vcombine.high %v2767_v0, %v2791_v21  ;;  %v18659_v13 = vpop.permute.xlu0 %2808  ;;  %v18675_v0 = vcombine.high %v3181_v23, %v3213_v51  ;;  %v18689_v23 = vrot.slane %v3238_v39, %v17791_v41 }
 0x441   : > { %v3270_v54 = vcombine.low %v18619_v27, %v18659_v13  ;;  %22442 = vst [vmem:[#allocation32_spill] sm:$0xff] %v18668_v59  ;;  %v3424_v29 = vsel %vm2636_vm4, %v18668_v59, -inf  ;;  %v18717_v36 = vcombine.low %v3174_v8, %v3206_v58 }
 0x442   : > { %v2854_v37 = vrot.slane %v2846_v1, %v17791_v41  ;;  %v18680_v62 = vrot.slane %v2847_v55, %v17791_v41  ;;  %v2878_v1 = vcombine.low %v18653_v47, %v18637_v49  ;;  %v18694_v55 = vcombine.low %v3165_v60, %v3197_v2 }
 0x443   : > { %3407 = vmax.xlane.f32.xlu1 %v3406_v30  ;;  %v2749_v21 = vpop.permute.xlu1 %2748  ;;  %3422 = vmax.xlane.f32.xlu0 %v3421_v61  ;;  %v18692_v44 = vrot.slane %v3270_v54, %v17791_v41  ;;  %v2895_v30 = vcombine.high %v18664_v18, %v18650_v40  ;;  %v3427_v63 = vsel %vm2636_vm4, %v18675_v0, -inf }
 0x444   : > { %v3222_v9 = vcombine.low %v18521_v19, %v2749_v21  ;;  %v18686_v4 = vpop.permute.xlu0 %2744  ;;  %v2910_v51 = vcombine.low %v2854_v37, %v2870_v12  ;;  %v2886_v2 = vrot.slane %v2878_v1, %v17794_v48  ;;  %v3412_v1 = vsel %vm2636_vm4, %v18694_v55, -inf }
 0x445   : > { %v2911_v50 = vcombine.high %v2854_v37, %v2870_v12  ;;  %v3223_v38 = vcombine.high %v18521_v19, %v2749_v21  ;;  %v3239_v12 = vcombine.high %v18603_v52, %v18606_v32  ;;  %v3271_v19 = vcombine.high %v18619_v27, %v18659_v13 }
 0x446   : > { %v18699_v61 = vrot.slane %v3222_v9, %v17791_v41  ;;  %v2918_v39 = vrot.slane %v2910_v51, %v17794_v48  ;;  %v2927_v9 = vcombine.high %v18680_v62, %v2877_v10  ;;  %v3319_v51 = vcombine.high %v18707_v46, %v18692_v44 }
 0x447   : > { %3425 = vmax.xlane.f32.xlu1 %v3424_v29  ;;  %v18709_v60 = vpop.permute.xlu1 %2732  ;;  %3428 = vmax.xlane.f32.xlu0 %v3427_v63  ;;  %v18724_v29 = vrot.slane %v2895_v30, %v17794_v48  ;;  %v3418_v37 = vsel %vm2636_vm4, %v18717_v36, -inf  ;;  %v3255_v52 = vcombine.high %v18612_v11, %v18629_v17  ;;  %v3237_v13 = vrot.slane %v3223_v38, %v17791_v41 }
 0x448   : > { %v3287_v54 = vcombine.high %v18699_v61, %v18689_v23  ;;  %v18715_v43 = vpop.permute.xlu0 %2768  ;;  %v18721_v5 = vcombine.high %v2886_v2, %v2918_v39  ;;  %v2941_v63 = vrot.slane %v2927_v9, %v17794_v48  ;;  %v2879_v9 = vcombine.high %v18653_v47, %v18637_v49 }
 0x449   : > { %v3333_v21 = vrot.slane %v3319_v51, %v17794_v48  ;;  %v2925_v49 = vrot.slane %v2911_v50, %v17794_v48  ;;  %v2926_v47 = vcombine.low %v18680_v62, %v2877_v10  ;;  %v2894_v10 = vcombine.low %v18664_v18, %v18650_v40 }
 0x44a   : > { %v3361_v58 = vsel %vm2636_vm4, %v18721_v5, -inf  ;;  %v18735_v8 = vcombine.low %v18724_v29, %v2941_v63  ;;  %v3301_v30 = vrot.slane %v3287_v54, %v17794_v48  ;;  %v18751_v54 = vcombine.low %v2886_v2, %v2918_v39 }
 0x44b   : > { %v18730_v20 = vpop.permute.xlu1 %2756  ;;  %3413 = vmax.xlane.f32.xlu0 %v3412_v1  ;;  %3362 = vmax.xlane.f32.xlu1 %v3361_v58  ;;  %v2950_v39 = vcombine.low %v18581_v6, %v18686_v4  ;;  %v2893_v50 = vrot.slane %v2879_v9, %v17794_v48  ;;  %v3253_v11 = vrot.slane %v3239_v12, %v17791_v41 }
 0x44c   : > { %v2966_v1 = vcombine.low %v18709_v60, %v18730_v20  ;;  %v18749_v7 = vpop.permute.xlu0 %2792  ;;  %v3376_v27 = vsel %vm2636_vm4, %v18735_v8, -inf  ;;  %v18762_v51 = vcombine.high %v3301_v30, %v3333_v21  ;;  %v3285_v38 = vrot.slane %v3271_v19, %v17791_v41 }
 0x44d   : > { %v2982_v17 = vcombine.low %v18715_v43, %v18749_v7  ;;  %v3358_v2 = vsel %vm2636_vm4, %v18751_v54, -inf  ;;  %v18778_v58 = vcombine.high %v2893_v50, %v2925_v49  ;;  %v2934_v9 = vrot.slane %v2926_v47, %v17794_v48 }
 0x44e   : > { %v18774_v62 = vrot.slane %v2966_v1, %v17791_v41  ;;  %v3302_v40 = vcombine.low %v3237_v13, %v3253_v11  ;;  %v3303_v18 = vcombine.high %v3237_v13, %v3253_v11  ;;  %v3439_v19 = vsel %vm2636_vm4, %v18762_v51, -inf }
 0x44f   : > { %v18758_v32 = vpop.permute.xlu1 %2780  ;;  %3419 = vmax.xlane.f32.xlu0 %v3418_v37  ;;  %3377 = vmax.xlane.f32.xlu1 %v3376_v27  ;;  %v3269_v37 = vrot.slane %v3255_v52, %v17791_v41  ;;  %v2958_v1 = vrot.slane %v2950_v39, %v17791_v41  ;;  %v2902_v53 = vrot.slane %v2894_v10, %v17794_v48 }
 0x450   : > { %v2990_v52 = vrot.slane %v2982_v17, %v17791_v41  ;;  %v3310_v39 = vrot.slane %v3302_v40, %v17794_v48  ;;  %v18799_v59 = vcombine.low %v3301_v30, %v3333_v21 }
 0x451   : > { %v3334_v16 = vcombine.low %v3269_v37, %v3285_v38  ;;  %v3335_v47 = vcombine.high %v3269_v37, %v3285_v38  ;;  %v3014_v13 = vcombine.low %v2958_v1, %v18774_v62  ;;  %v18795_v31 = vcombine.high %v2902_v53, %v2934_v9 }
 0x453   : > { %v18782_v12 = vpop.permute.xlu1 %2804  ;;  %3359 = vmax.xlane.f32.xlu0 %v3358_v2  ;;  %3440 = vmax.xlane.f32.xlu1 %v3439_v19  ;;  %v3367_v2 = vsel %vm2636_vm4, %v18778_v58, -inf  ;;  %v3317_v19 = vrot.slane %v3303_v18, %v17794_v48  ;;  %v3342_v38 = vrot.slane %v3334_v16, %v17794_v48  ;;  %v3349_v17 = vrot.slane %v3335_v47, %v17794_v48 }
 0x454   : > { %v2998_v27 = vcombine.low %v18758_v32, %v18782_v12  ;;  %v3373_v37 = vsel %vm2636_vm4, %v18795_v31, -inf  ;;  %v3022_v22 = vrot.slane %v3014_v13, %v17794_v48  ;;  %v3286_v47 = vcombine.low %v18699_v61, %v18689_v23 }
 0x455   : > { %v18810_v40 = vcombine.low %v3310_v39, %v3342_v38  ;;  %v18812_v30 = vcombine.low %v3317_v19, %v3349_v17  ;;  %v3318_v13 = vcombine.low %v18707_v46, %v18692_v44  ;;  %v18840_v44 = vcombine.high %v3310_v39, %v3342_v38 }
 0x456   : > { %v3006_v11 = vrot.slane %v2998_v27, %v17791_v41  ;;  %v18806_v27 = vcombine.high %v18724_v29, %v2941_v63  ;;  %v18822_v63 = vcombine.low %v2893_v50, %v2925_v49 }
 0x457   : > { %3368 = vmax.xlane.f32.xlu0 %v3367_v2  ;;  %v3326_v49 = vrot.slane %v3318_v13, %v17794_v48  ;;  %v2951_v13 = vcombine.high %v18581_v6, %v18686_v4  ;;  %v18889_v6 = vld [vmem:[%s17686_s0 + $0x30] sm:$0xff] }
 0x458   : > { %v3046_v10 = vcombine.low %v2990_v52, %v3006_v11  ;;  %v3379_v18 = vsel %vm2636_vm4, %v18806_v27, -inf  ;;  %v3047_v61 = vcombine.high %v2990_v52, %v3006_v11 }
 0x45a   : > { %v3054_v2 = vrot.slane %v3046_v10, %v17794_v48  ;;  %v18830_v10 = vcombine.low %v2902_v53, %v2934_v9  ;;  %v3015_v53 = vcombine.high %v2958_v1, %v18774_v62  ;;  %v3445_v9 = vsel %vm2636_vm4, %v18840_v44, -inf }
 0x45b   : > { %3374 = vmax.xlane.f32.xlu0 %v3373_v37  ;;  %v3294_v37 = vrot.slane %v3286_v47, %v17794_v48  ;;  %v2983_v47 = vcombine.high %v18715_v43, %v18749_v7 }
 0x45c   : > { %v18814_v21 = vcombine.high %v3022_v22, %v3054_v2  ;;  %v18816_v16 = vcombine.low %v3022_v22, %v3054_v2  ;;  %v3364_v22 = vsel %vm2636_vm4, %v18822_v63, -inf  ;;  %v3370_v50 = vsel %vm2636_vm4, %v18830_v10, -inf }
 0x45d   : > { %v18836_v23 = vcombine.high %v3294_v37, %v3326_v49  ;;  %v18845_v2 = vcombine.high %v3317_v19, %v3349_v17  ;;  %v3029_v52 = vrot.slane %v3015_v53, %v17794_v48  ;;  %v18864_v1 = vcombine.low %v3294_v37, %v3326_v49 }
 0x45e   : > { %v3385_v29 = vsel %vm2636_vm4, %v18814_v21, -inf  ;;  %v2999_v19 = vcombine.high %v18758_v32, %v18782_v12  ;;  %v2967_v17 = vcombine.high %v18709_v60, %v18730_v20  ;;  %v3436_v37 = vsel %vm2636_vm4, %v18799_v59, -inf }
 0x45f   : > { %3380 = vmax.xlane.f32.xlu0 %v3379_v18  ;;  %3386 = vmax.xlane.f32.xlu1 %v3385_v29  ;;  %v3433_v46 = vsel %vm2636_vm4, %v18836_v23, -inf  ;;  %v3061_v18 = vrot.slane %v3047_v61, %v17794_v48  ;;  %v18849_v29 = vld [vmem:[%s17686_s0 + $0x28] sm:$0xff]  ;;  %v3451_v11 = vsel %vm2636_vm4, %v18845_v2, -inf  ;;  %v3430_v38 = vsel %vm2636_vm4, %v18864_v1, -inf }
 0x460   : > { %v2981_v32 = vrot.slane %v2967_v17, %v17791_v41  ;;  %v2997_v12 = vrot.slane %v2983_v47, %v17791_v41  ;;  %v2965_v49 = vrot.slane %v2951_v13, %v17791_v41  ;;  %v3382_v61 = vsel %vm2636_vm4, %v18816_v16, -inf }
 0x461   : > { %v18856_v39 = vcombine.high %v3029_v52, %v3061_v18 }
 0x462   : > { %v3030_v60 = vcombine.low %v2965_v49, %v2981_v32 }
 0x463   : > { %3365 = vmax.xlane.f32.xlu0 %v3364_v22  ;;  %v3391_v62 = vsel %vm2636_vm4, %v18856_v39, -inf  ;;  %v3013_v22 = vrot.slane %v2999_v19, %v17791_v41  ;;  %v3031_v19 = vcombine.high %v2965_v49, %v2981_v32 }
 0x464   : > { %v3038_v43 = vrot.slane %v3030_v60, %v17794_v48 }
 0x465   : > { %v3062_v20 = vcombine.low %v2997_v12, %v3013_v22  ;;  %v3045_v17 = vrot.slane %v3031_v19, %v17794_v48 }
 0x467   : > { %3371 = vmax.xlane.f32.xlu0 %v3370_v50  ;;  %v3070_v50 = vrot.slane %v3062_v20, %v17794_v48 }
 0x469   : > { %v18884_v7 = vcombine.high %v3038_v43, %v3070_v50 }
 0x46b   : > { %3434 = vmax.xlane.f32.xlu0 %v3433_v46  ;;  %v3397_v4 = vsel %vm2636_vm4, %v18884_v7, -inf  ;;  %v18895_v46 = vcombine.low %v3029_v52, %v3061_v18 }
 0x46d   : > { %v3388_v53 = vsel %vm2636_vm4, %v18895_v46, -inf }
 0x46f   : > { %3446 = vmax.xlane.f32.xlu0 %v3445_v9  ;;  %v18899_v9 = vcombine.low %v3038_v43, %v3070_v50 }
 0x470   : > { %3752 = vrot.lane.b32.xlu1 %v18849_v29, %s17388_s28 }
 0x473   : > { %3452 = vmax.xlane.f32.xlu0 %v3451_v11  ;;  %v3394_v11 = vsel %vm2636_vm4, %v18899_v9, -inf }
 0x474   : > { %3776 = vrot.lane.b32.xlu1 %v18849_v29, %s17389_s3 }
 0x477   : > { %3392 = vmax.xlane.f32.xlu0 %v3391_v62  ;;  %v3063_v62 = vcombine.high %v2997_v12, %v3013_v22 }
 0x48d   : > { %3728 = vrot.lane.b32.xlu0 %v18849_v29, %s17387_s21 }
 0x498   : > { %3431 = vmax.xlane.f32.xlu1 %v3430_v38  ;;  %v3077_v38 = vrot.slane %v3063_v62, %v17794_v48 }
 0x49a   : > { %v18905_v52 = vcombine.high %v3045_v17, %v3077_v38  ;;  %v18913_v32 = vcombine.low %v3045_v17, %v3077_v38 }
 0x49c   : > { %3437 = vmax.xlane.f32.xlu1 %v3436_v37  ;;  %v3403_v22 = vsel %vm2636_vm4, %v18905_v52, -inf }
 0x4ac   : > { %3398 = vmax.xlane.f32.xlu0 %v3397_v4 }
 0x4ad   : > { %3730 = vrot.lane.b32.xlu1 %v18889_v6, %s17387_s21 }
 0x4b0   : > { %3383 = vmax.xlane.f32.xlu0 %v3382_v61 }
 0x4b4   : > { %3389 = vmax.xlane.f32.xlu0 %v3388_v53 }
 0x4b8   : > { %3395 = vmax.xlane.f32.xlu0 %v3394_v11 }
 0x4cc   : > { %v3417_v47 = vpop.xlane.xlu1 %3416  ;;  %v3411_v18 = vpop.xlane.xlu0 %3410 }
 0x4cd   : > { %v3473_v13 = vsub.f32 %v18631_v25, %v3417_v47  ;;  %v3471_v37 = vsub.f32 %v18633_v28, %v3411_v18  ;;  %v3400_v25 = vsel %vm2636_vm4, %v18913_v32, -inf }
 0x4cf   : > { %v3524_v20 = vmul.f32 1.442695, %v3473_v13  ;;  %v3520_v60 = vmul.f32 1.442695, %v3471_v37 }
 0x4d0   : > { %v18909_v50 = vpop.xlane.xlu1 %3407  ;;  %v3423_v43 = vpop.xlane.xlu0 %3422 }
 0x4d1   : > { %16929 = vpow2.f32 %v3524_v20  ;;  %v3475_v12 = vsub.f32 %v18647_v35, %v3423_v43  ;;  %3404 = vmax.xlane.f32.xlu1 %v3403_v22 }
 0x4d2   : > { %16931 = vpow2.f32 %v3520_v60 }
 0x4d3   : > { %v3528_v49 = vmul.f32 1.442695, %v3475_v12 }
 0x4d4   : > { %v3429_v4 = vpop.xlane.xlu0 %3428  ;;  %v18919_v61 = vpop.xlane.xlu1 %3425 }
 0x4d5   : > { %v3477_v28 = vsub.f32 %v18675_v0, %v3429_v4  ;;  %3401 = vmax.xlane.f32.xlu1 %v3400_v25  ;;  %16933 = vpow2.f32 %v3528_v49 }
 0x4d7   : > { %v3532_v53 = vmul.f32 1.442695, %v3477_v28 }
 0x4d8   : > { %v18921_v11 = vpop.xlane.xlu0 %3413  ;;  %v3363_v19 = vpop.xlane.xlu1 %3362 }
 0x4d9   : > { %16935 = vpow2.f32 %v3532_v53  ;;  %v3455_v47 = vsub.f32 %v18721_v5, %v3363_v19 }
 0x4db   : > { %v18923_v62 = vpop.eup %16929  ;;  %v3488_v43 = vmul.f32 1.442695, %v3455_v47 }
 0x4dc   : > { %22443 = vst [vmem:[#allocation33_spill] sm:$0xff] %v18923_v62  ;;  %v18925_v35 = vpop.eup %16931  ;;  %v18927_v38 = vpop.xlane.xlu0 %3419  ;;  %v3607_v17 = vsel %vm2636_vm4, %v18923_v62, 0.0 }
 0x4dd   : > { %22444 = vst [vmem:[#allocation34_spill] sm:$0xff] %v18925_v35  ;;  %3608 = vadd.xlane.f32.xlu1 %v3607_v17  ;;  %v3601_v0 = vsel %vm2636_vm4, %v18925_v35, 0.0  ;;  %v18939_v60 = vpop.xlane.xlu1 %3377  ;;  %v22448_v35 = vmov 0.0  }
 0x4de   : > { %3602 = vadd.xlane.f32.xlu0 %v3601_v0  ;;  %16086 = vmatprep.mubr.msk.bf16.mxu1 %vm17395_vm10, %v22448_v35 }
 0x4df   : > { %v18934_v18 = vpop.eup %16933  ;;  %16098 = vmatprep.mubr.msk.bf16.mxu0 %vm17395_vm10, %v22448_v35 }
 0x4e0   : > { %22445 = vst [vmem:[#allocation35_spill] sm:$0xff] %v18934_v18  ;;  %v3360_v13 = vpop.xlane.xlu0 %3359  ;;  %v3613_v20 = vsel %vm2636_vm4, %v18934_v18, 0.0 }
 0x4e1   : > { %v3454_v37 = vsub.f32 %v18751_v54, %v3360_v13  ;;  %v18946_v25 = vpop.xlane.xlu1 %3440 }
 0x4e2   : > { %3614 = vadd.xlane.f32.xlu0 %v3613_v20 }
 0x4e3   : > { %v3486_v22 = vmul.f32 1.442695, %v3454_v37  ;;  %v18941_v12 = vpop.eup %16935 }
 0x4e4   : > { %22446 = vst [vmem:[#allocation36_spill] sm:$0xff] %v18941_v12  ;;  %v3369_v49 = vpop.xlane.xlu0 %3368  ;;  %v3619_v5 = vsel %vm2636_vm4, %v18941_v12, 0.0 }
 0x4e5   : > { %16937 = vpow2.f32 %v3486_v22  ;;  %v3457_v4 = vsub.f32 %v18778_v58, %v3369_v49 }
 0x4e6   : > { %3620 = vadd.xlane.f32.xlu0 %v3619_v5  ;;  %16939 = vpow2.f32 %v3488_v43 }
 0x4e7   : > { %v3492_v54 = vmul.f32 1.442695, %v3457_v4 }
 0x4e8   : > { %v3375_v28 = vpop.xlane.xlu0 %3374 }
 0x4e9   : > { %v3459_v53 = vsub.f32 %v18795_v31, %v3375_v28  ;;  %16941 = vpow2.f32 %v3492_v54 }
 0x4eb   : > { %v3496_v19 = vmul.f32 1.442695, %v3459_v53 }
 0x4ec   : > { %v3387_v17 = vpop.xlane.xlu1 %3386  ;;  %v3381_v0 = vpop.xlane.xlu0 %3380 }
 0x4ed   : > { %16943 = vpow2.f32 %v3496_v19  ;;  %v3463_v47 = vsub.f32 %v18814_v21, %v3387_v17  ;;  %v3461_v58 = vsub.f32 %v18806_v27, %v3381_v0 }
 0x4ef   : > { %v18951_v13 = vpop.eup %16937  ;;  %v3500_v37 = vmul.f32 1.442695, %v3461_v58  ;;  %v3504_v20 = vmul.f32 1.442695, %v3463_v47 }
 0x4f0   : > { %v3366_v43 = vpop.xlane.xlu0 %3365  ;;  %v3550_v22 = vsel %vm2636_vm4, %v18951_v13, 0.0  ;;  %v18955_v49 = vpop.eup %16939 }
 0x4f1   : > { %v3456_v31 = vsub.f32 %v18822_v63, %v3366_v43  ;;  %3551 = vadd.xlane.f32.xlu1 %v3550_v22  ;;  %16945 = vpow2.f32 %v3500_v37  ;;  %v3553_v27 = vsel %vm2636_vm4, %v18955_v49, 0.0 }
 0x4f2   : > { %16947 = vpow2.f32 %v3504_v20 }
 0x4f3   : > { %v3490_v4 = vmul.f32 1.442695, %v3456_v31  ;;  %v18960_v21 = vpop.eup %16941 }
 0x4f4   : > { %v3372_v5 = vpop.xlane.xlu0 %3371  ;;  %v3559_v63 = vsel %vm2636_vm4, %v18960_v21, 0.0 }
 0x4f5   : > { %16949 = vpow2.f32 %v3490_v4  ;;  %v3458_v54 = vsub.f32 %v18830_v10, %v3372_v5  ;;  %3554 = vadd.xlane.f32.xlu1 %v3553_v27  ;;  %v3753_v4 = vpop.permute.xlu1 %3752 }
 0x4f7   : > { %v18963_v28 = vpop.eup %16943  ;;  %v3494_v53 = vmul.f32 1.442695, %v3458_v54 }
 0x4f8   : > { %v3435_v19 = vpop.xlane.xlu0 %3434  ;;  %v3565_v17 = vsel %vm2636_vm4, %v18963_v28, 0.0 }
 0x4f9   : > { %16951 = vpow2.f32 %v3494_v53  ;;  %v3479_v0 = vsub.f32 %v18836_v23, %v3435_v19  ;;  %3560 = vadd.xlane.f32.xlu1 %v3559_v63  ;;  %3566 = vadd.xlane.f32.xlu0 %v3565_v17  ;;  %v4130_v63 = vcombine.low %v18849_v29, %v3753_v4  ;;  %v4131_v17 = vcombine.high %v18849_v29, %v3753_v4 }
 0x4fb   : > { %v3536_v47 = vmul.f32 1.442695, %v3479_v0  ;;  %v18970_v58 = vpop.eup %16945  ;;  %v4138_v18 = vrot.slane %v4130_v63, %v17791_v41 }
 0x4fc   : > { %v18972_v10 = vpop.xlane.xlu0 %3446  ;;  %v3571_v37 = vsel %vm2636_vm4, %v18970_v58, 0.0  ;;  %v18976_v20 = vpop.eup %16947 }
 0x4fd   : > { %16953 = vpow2.f32 %v3536_v47  ;;  %3572 = vadd.xlane.f32.xlu1 %v3571_v37  ;;  %v3577_v31 = vsel %vm2636_vm4, %v18976_v20, 0.0  ;;  %v3777_v47 = vpop.permute.xlu1 %3776 }
 0x4ff   : > { %v18978_v43 = vpop.eup %16949 }
 0x500   : > { %v18980_v22 = vpop.xlane.xlu0 %3452  ;;  %v3556_v23 = vsel %vm2636_vm4, %v18978_v43, 0.0 }
 0x501   : > { %3557 = vadd.xlane.f32.xlu0 %v3556_v23  ;;  %3578 = vadd.xlane.f32.xlu1 %v3577_v31 }
 0x503   : > { %v18986_v5 = vpop.eup %16951 }
 0x504   : > { %v3393_v27 = vpop.xlane.xlu0 %3392  ;;  %v3562_v54 = vsel %vm2636_vm4, %v18986_v5, 0.0 }
 0x505   : > { %v3465_v53 = vsub.f32 %v18856_v39, %v3393_v27  ;;  %3563 = vadd.xlane.f32.xlu0 %v3562_v54  ;;  %v4145_v39 = vrot.slane %v4131_v17, %v17791_v41 }
 0x507   : > { %v18991_v19 = vpop.eup %16953  ;;  %v3508_v0 = vmul.f32 1.442695, %v3465_v53 }
 0x508   : > { %22447 = vst [vmem:[#allocation37_spill] sm:$0xff] %v18991_v19  ;;  %v3729_v37 = vpop.permute.xlu0 %3728  ;;  %v3625_v23 = vsel %vm2636_vm4, %v18991_v19, 0.0 }
 0x509   : > { %16955 = vpow2.f32 %v3508_v0  ;;  %v4146_v31 = vcombine.low %v3729_v37, %v3777_v47  ;;  %v4147_v12 = vcombine.high %v3729_v37, %v3777_v47  ;;  %3626 = vadd.xlane.f32.xlu0 %v3625_v23 }
 0x50b   : > { %v4154_v27 = vrot.slane %v4146_v31, %v17791_v41  ;;  %v4161_v54 = vrot.slane %v4147_v12, %v17791_v41 }
 0x50d   : > { %v4162_v62 = vcombine.low %v4138_v18, %v4154_v27  ;;  %v4163_v29 = vcombine.high %v4138_v18, %v4154_v27  ;;  %v4178_v4 = vcombine.low %v4145_v39, %v4161_v54  ;;  %v4179_v53 = vcombine.high %v4145_v39, %v4161_v54 }
 0x50f   : > { %v4170_v0 = vrot.slane %v4162_v62, %v17794_v48  ;;  %v4177_v63 = vrot.slane %v4163_v29, %v17794_v48  ;;  %v4186_v17 = vrot.slane %v4178_v4, %v17794_v48  ;;  %v4193_v47 = vrot.slane %v4179_v53, %v17794_v48 }
 0x511   : > { %v4674_v12 = vcombine.low %v4170_v0, %v4177_v63  ;;  %v15668_v37 = vcombine.high %v4170_v0, %v4177_v63  ;;  %v4690_v18 = vcombine.low %v4186_v17, %v4193_v47  ;;  %v15669_v23 = vcombine.high %v4186_v17, %v4193_v47 }
 0x513   : > { %v19009_v31 = vpop.eup %16955  ;;  %v4681_v39 = vrot.slane %v4674_v12, %v17791_v41  ;;  %v4689_v27 = vrot.slane %v15668_v37, %v17791_v41  ;;  %v4697_v54 = vrot.slane %v4690_v18, %v17791_v41  ;;  %v4705_v62 = vrot.slane %v15669_v23, %v17791_v41 }
 0x514   : > { %v3583_v29 = vsel %vm2636_vm4, %v19009_v31, 0.0  ;;  %v3481_v23 = vsub.f32 %v18762_v51, %v18946_v25 }
 0x515   : > { %3584 = vadd.xlane.f32.xlu1 %v3583_v29  ;;  %v4706_v4 = vcombine.low %v4681_v39, %v4689_v27  ;;  %v4722_v53 = vcombine.low %v4697_v54, %v4705_v62  ;;  %v4707_v19 = vcombine.high %v4681_v39, %v4689_v27  ;;  %v4723_v0 = vcombine.high %v4697_v54, %v4705_v62 }
 0x516   : > { %v3540_v39 = vmul.f32 1.442695, %v3481_v23  ;;  %v19061_v23 = vld [vmem:[%s17686_s0 + $0x38] sm:$0xff] }
 0x517   : > { %v19018_v63 = vrot.slane %v4706_v4, %v17794_v48  ;;  %v19021_v17 = vrot.slane %v4722_v53, %v17794_v48  ;;  %v19024_v47 = vrot.slane %v4707_v19, %v17794_v48  ;;  %v19027_v12 = vrot.slane %v4723_v0, %v17794_v48 }
 0x518   : > { %v3483_v19 = vsub.f32 %v18840_v44, %v18972_v10  ;;  %16957 = vpow2.f32 %v3540_v39 }
 0x519   : > { %22449 = vst [vmem:[#allocation38_spill] sm:$0xff] %v19018_v63  ;;  %22450 = vst [vmem:[#allocation39_spill] sm:$0xff] %v19021_v17  ;;  %v19031_v37 = vcombine.low %v19018_v63, %v19021_v17  ;;  %v19035_v18 = vcombine.low %v19024_v47, %v19027_v12 }
 0x51a   : > { %22451 = vst [vmem:[#allocation40_spill] sm:$0xff] %v19024_v47  ;;  %22452 = vst [vmem:[#allocation41_spill] sm:$0xff] %v19027_v12  ;;  %v3544_v62 = vmul.f32 1.442695, %v3483_v19 }
 0x51b   : > { %22453 = vst [vmem:[#allocation42_spill] sm:$0xff] %v19031_v37  ;;  %22454 = vst [vmem:[#allocation43_spill] sm:$0xff] %v19035_v18  ;;  %v19076_v18 = vld [vmem:[%s17686_s0 + $0x8] sm:$0xff] }
 0x51c   : > { %22457 = vst [vmem:[#allocation46_spill] sm:$0xff] %v19076_v18  ;;  %v3858_v37 = vcombine.low %v19076_v18, %v18407_v42 }
 0x522   : > { %v19044_v4 = vpop.eup %16957 }
 0x523   : > { %22455 = vst [vmem:[#allocation44_spill] sm:$0xff] %v19044_v4  ;;  %v3631_v51 = vsel %vm2636_vm4, %v19044_v4, 0.0 }
 0x525   : > { %v19056_v10 = vpop.xlane.xlu1 %3431 }
 0x526   : > { %3778 = vrot.lane.b32.xlu1 %v18889_v6, %s17389_s3 }
 0x529   : > { %v19058_v0 = vpop.xlane.xlu1 %3437 }
 0x52d   : > { %v19067_v39 = vpop.permute.xlu1 %3730 }
 0x539   : > { %v3399_v27 = vpop.xlane.xlu0 %3398 }
 0x53a   : > { %v3467_v54 = vsub.f32 %v18884_v7, %v3399_v27 }
 0x53c   : > { %v3512_v29 = vmul.f32 1.442695, %v3467_v54 }
 0x53d   : > { %v3384_v54 = vpop.xlane.xlu0 %3383 }
 0x53e   : > { %16959 = vpow2.f32 %v3512_v29 }
 0x53f   : > { %16961 = vpow2.f32 %v3544_v62  ;;  %v3462_v62 = vsub.f32 %v18816_v16, %v3384_v54  ;;  %v3859_v16 = vcombine.high %v19076_v18, %v18407_v42 }
 0x548   : > { %v19046_v53 = vpop.eup %16959 }
 0x549   : > { %v3589_v25 = vsel %vm2636_vm4, %v19046_v53, 0.0  ;;  %v19052_v44 = vpop.eup %16961 }
 0x54a   : > { %22456 = vst [vmem:[#allocation45_spill] sm:$0xff] %v19052_v44  ;;  %3632 = vadd.xlane.f32.xlu1 %v3631_v51  ;;  %3590 = vadd.xlane.f32.xlu0 %v3589_v25  ;;  %v3637_v7 = vsel %vm2636_vm4, %v19052_v44, 0.0  ;;  %v19071_v51 = vpop.xlane.xlu0 %3389  ;;  %v3460_v25 = vsub.f32 %v18735_v8, %v18939_v60  ;;  %v3874_v44 = vcombine.low %v18415_v33, %v18409_v26 }
 0x54b   : > { %v3866_v60 = vrot.slane %v3858_v37, %v17791_v41 }
 0x54c   : > { %v3882_v54 = vrot.slane %v3874_v44, %v17791_v41 }
 0x54e   : > { %3638 = vadd.xlane.f32.xlu1 %v3637_v7  ;;  %v3502_v7 = vmul.f32 1.442695, %v3462_v62  ;;  %v3873_v62 = vrot.slane %v3859_v16, %v17791_v41 }
 0x55e   : > { %v3405_v19 = vpop.xlane.xlu1 %3404 }
 0x55f   : > { %3756 = vrot.lane.b32.xlu1 %v19061_v23, %s17388_s28  ;;  %v3469_v27 = vsub.f32 %v18905_v52, %v3405_v19  ;;  %v3498_v52 = vmul.f32 1.442695, %v3460_v25  ;;  %v3875_v19 = vcombine.high %v18415_v33, %v18409_v26  ;;  %v3890_v26 = vcombine.low %v3866_v60, %v3882_v54 }
 0x560   : > { %3754 = vrot.lane.b32.xlu0 %v18889_v6, %s17388_s28  ;;  %v3891_v33 = vcombine.high %v3866_v60, %v3882_v54 }
 0x561   : > { %v3516_v29 = vmul.f32 1.442695, %v3469_v27  ;;  %v19086_v27 = vpop.xlane.xlu0 %3395  ;;  %v3898_v16 = vrot.slane %v3890_v26, %v17794_v48 }
 0x562   : > { %v19088_v8 = vpop.xlane.xlu1 %3401 }
 0x563   : > { %16963 = vpow2.f32 %v3516_v29  ;;  %v3889_v29 = vrot.slane %v3875_v19, %v17791_v41  ;;  %v3905_v19 = vrot.slane %v3891_v33, %v17794_v48 }
 0x564   : > { %16965 = vpow2.f32 %v3502_v7 }
 0x565   : > { %16967 = vpow2.f32 %v3498_v52  ;;  %v3906_v18 = vcombine.low %v3873_v62, %v3889_v29  ;;  %v3907_v4 = vcombine.high %v3873_v62, %v3889_v29  ;;  %v3442_v62 = vsel %vm2636_vm4, %v18810_v40, -inf }
 0x566   : > { %v15660_v26 = vcombine.high %v3898_v16, %v3905_v19 }
 0x567   : > { %v3914_v12 = vrot.slane %v3906_v18, %v17794_v48  ;;  %v3921_v60 = vrot.slane %v3907_v4, %v17794_v48 }
 0x569   : > { %v15661_v33 = vcombine.high %v3914_v12, %v3921_v60 }
 0x56a   : > { %v19094_v25 = vpop.xlane.xlu1 %3608 }
 0x56b   : > { %22458 = vst [vmem:[#allocation47_spill] sm:$0xff] %v19094_v25  ;;  %v19096_v7 = vpop.xlane.xlu0 %3602 }
 0x56d   : > { %v19098_v42 = vpop.eup %16963 }
 0x56e   : > { %v3595_v37 = vsel %vm2636_vm4, %v19098_v42, 0.0  ;;  %v19102_v44 = vpop.eup %16965 }
 0x56f   : > { %22459 = vst [vmem:[#allocation48_spill] sm:$0xff] %v19102_v44  ;;  %v19104_v52 = vpop.xlane.xlu0 %3614  ;;  %v3574_v29 = vsel %vm2636_vm4, %v19102_v44, 0.0  ;;  %v19114_v63 = vpop.eup %16967  ;;  %v4911_v44 = vpack.c.bf16 %v18427_v57, %v18427_v57 }
 0x570   : > { %22460 = vst [vmem:[#allocation49_spill] sm:$0xff] %v19104_v52  ;;  %v3568_v18 = vsel %vm2636_vm4, %v19114_v63, 0.0 }
 0x571   : > { %v4993_v57 = vsel %vm4945_vm9, %v4911_v44, 0 }
 0x573   : > { %v19116_v17 = vpop.xlane.xlu0 %3620 }
 0x574   : > { %22461 = vst [vmem:[#allocation50_spill] sm:$0xff] %v19116_v17 }
 0x57e   : > { %v3552_v47 = vpop.xlane.xlu1 %3551 }
 0x57f   : > { %16969 = vrcp.f32 %v3552_v47  ;;  %3596 = vadd.xlane.f32.xlu0 %v3595_v37  ;;  %v4402_v47 = vcombine.low %v3898_v16, %v3905_v19  ;;  %v4418_v37 = vcombine.low %v3914_v12, %v3921_v60  ;;  %v3448_v16 = vsel %vm2636_vm4, %v18812_v30, -inf }
 0x580   : > { %v4433_v60 = vrot.slane %v15661_v33, %v17791_v41 }
 0x581   : > { %v4409_v25 = vrot.slane %v4402_v47, %v17791_v41  ;;  %v4425_v19 = vrot.slane %v4418_v37, %v17791_v41  ;;  %v4913_v37 = vpack.c.bf16 %v18429_v34, %v18429_v34 }
 0x582   : > { %v3555_v54 = vpop.xlane.xlu1 %3554 }
 0x583   : > { %16971 = vrcp.f32 %v3555_v54  ;;  %3443 = vmax.xlane.f32.xlu0 %v3442_v62  ;;  %3575 = vadd.xlane.f32.xlu1 %v3574_v29  ;;  %v4417_v54 = vrot.slane %v15660_v26, %v17791_v41  ;;  %v4450_v17 = vcombine.low %v4425_v19, %v4433_v60 }
 0x585   : > { %v4434_v26 = vcombine.low %v4409_v25, %v4417_v54  ;;  %v4458_v44 = vrot.slane %v4450_v17, %v17794_v48 }
 0x586   : > { %v3561_v4 = vpop.xlane.xlu1 %3560  ;;  %v3567_v62 = vpop.xlane.xlu0 %3566 }
 0x587   : > { %3569 = vadd.xlane.f32.xlu0 %v3568_v18  ;;  %16973 = vrcp.f32 %v3561_v4  ;;  %v4442_v33 = vrot.slane %v4434_v26, %v17794_v48 }
 0x589   : > { %v16970_v52 = vpop.eup %16969 }
 0x58a   : > { %v3678_v12 = vmul.f32 %v16970_v52, %v18951_v13  ;;  %v3573_v34 = vpop.xlane.xlu1 %3572 }
 0x58b   : > { %3449 = vmax.xlane.f32.xlu0 %v3448_v16 }
 0x58c   : > { %v4878_v29 = vpack.c.bf16 %v3678_v12, %v3678_v12  ;;  %v4435_v12 = vcombine.high %v4409_v25, %v4417_v54 }
 0x58d   : > { %v16972_v18 = vpop.eup %16971 }
 0x58e   : > { %16087 = vmatmul.mubr.msk.bf16.vlgmr.msra.gmra.mrb[0].mxu1 %vm2636_vm4, %v4878_v29  ;;  %v3558_v47 = vpop.xlane.xlu0 %3557  ;;  %v3679_v13 = vmul.f32 %v16972_v18, %v18955_v49  ;;  %v4451_v29 = vcombine.high %v4425_v19, %v4433_v60  ;;  %v5085_v49 = vsel %vm4945_vm9, %v4913_v37, 0  ;;  %v4467_v18 = vcombine.high %v4442_v33, %v4458_v44 }
 0x58f   : > { %16091 = vmatpush3.bf16.msra.mxu1 %v4993_v57  ;;  %16975 = vrcp.f32 %v3558_v47  ;;  %16092 = vmatprep.mubr.msk.bf16.mxu1 %vm17395_vm10, %v22448_v35  ;;  %v4449_v47 = vrot.slane %v4435_v12, %v17794_v48 }
 0x590   : > { %16102 = vmatprep.subr.bf16.mxu1 %v22448_v35  ;;  %16977 = vrcp.f32 %v3567_v62  ;;  %v4879_v4 = vpack.c.bf16 %v3679_v13, %v3679_v13  ;;  %v4466_v62 = vcombine.low %v4442_v33, %v4458_v44  ;;  %v4465_v25 = vrot.slane %v4451_v29, %v17794_v48 }
 0x591   : > { %v16974_v16 = vpop.eup %16973  ;;  %v4915_v60 = vpack.c.bf16 %v4467_v18, %v4467_v18 }
 0x592   : > { %v3564_v52 = vpop.xlane.xlu0 %3563  ;;  %v3681_v17 = vmul.f32 %v16974_v16, %v18960_v21  ;;  %v4914_v19 = vpack.c.bf16 %v4466_v62, %v4466_v62  ;;  %v4468_v33 = vcombine.low %v4449_v47, %v4465_v25 }
 0x593   : > { %16979 = vrcp.f32 %v3564_v52  ;;  %v5177_v44 = vsel %vm4945_vm9, %v4915_v60, 0 }
 0x594   : > { %3780 = vrot.lane.b32.xlu1 %v19061_v23, %s17389_s3  ;;  %16981 = vrcp.f32 %v3573_v34  ;;  %v4881_v52 = vpack.c.bf16 %v3681_v17, %v3681_v17  ;;  %v5131_v21 = vsel %vm4945_vm9, %v4914_v19, 0  ;;  %v4916_v29 = vpack.c.bf16 %v4468_v33, %v4468_v33  ;;  %v22462_v33 = vld [vmem:[#allocation21_spill] sm:$0xff] }
 0x596   : > { %16093 = vmatmul.mubr.msk.bf16.vlgmr.msra.gmra.mrb[4].mxu1 %vm2636_vm4, %v4879_v4  ;;  %v4469_v4 = vcombine.high %v4449_v47, %v4465_v25 }
 0x597   : > { %16103 = vmatpush3.bf16.msra.mxu1 %v5085_v49  ;;  %16104 = vmatprep.mubr.msk.bf16.mxu1 %vm17395_vm10, %v22448_v35  ;;  %v3464_v49 = vsub.f32 %v18895_v46, %v19071_v51  ;;  %v4535_v46 = vcombine.high %v18471_v24, %v18476_v45  ;;  %v3485_v24 = vsub.f32 %v18845_v2, %v18980_v22 }
 0x598   : > { %16114 = vmatprep.subr.bf16.mxu1 %v22448_v35  ;;  %v4917_v62 = vpack.c.bf16 %v4469_v4, %v4469_v4 }
 0x599   : > { %v16976_v57 = vpop.eup %16975  ;;  %v4919_v45 = vpack.c.bf16 %v4535_v46, %v4535_v46 }
 0x59a   : > { %v3680_v54 = vmul.f32 %v16976_v57, %v18978_v43  ;;  %v16978_v26 = vpop.eup %16977  ;;  %v3579_v43 = vpop.xlane.xlu1 %3578  ;;  %v3506_v57 = vmul.f32 1.442695, %v3464_v49  ;;  %v5269_v47 = vsel %vm4945_vm9, %v4917_v62, 0 }
 0x59b   : > { %v3683_v12 = vmul.f32 %v16978_v26, %v18963_v28  ;;  %16983 = vrcp.f32 %v3579_v43  ;;  %v3470_v28 = vsub.f32 %v18645_v56, %v18909_v50  ;;  %v3474_v50 = vsub.f32 %v18717_v36, %v18927_v38 }
 0x59c   : > { %v4880_v13 = vpack.c.bf16 %v3680_v54, %v3680_v54  ;;  %16985 = vpow2.f32 %v3506_v57  ;;  %v4537_v36 = vcombine.high %v18479_v3, %v18482_v15  ;;  %v3548_v38 = vmul.f32 1.442695, %v3485_v24 }
 0x59d   : > { %v16980_v37 = vpop.eup %16979  ;;  %v4883_v34 = vpack.c.bf16 %v3683_v12, %v3683_v12  ;;  %v3518_v25 = vmul.f32 1.442695, %v3470_v28  ;;  %v3526_v60 = vmul.f32 1.442695, %v3474_v50  ;;  %v3466_v26 = vsub.f32 %v18899_v9, %v19086_v27 }
 0x59e   : > { %16099 = vmatmul.mubr.msk.bf16.vlgmr.msra.gmra.mrb[12].mxu0 %vm2636_vm4, %v4880_v13  ;;  %16105 = vmatmul.mubr.msk.bf16.vlgmr.msra.gmra.mrb[8].mxu1 %vm2636_vm4, %v4881_v52  ;;  %v3682_v16 = vmul.f32 %v16980_v37, %v18986_v5  ;;  %v16982_v17 = vpop.eup %16981  ;;  %v5223_v5 = vsel %vm4945_vm9, %v4916_v29, 0  ;;  %v5361_v2 = vsel %vm4945_vm9, %v4919_v45, 0  ;;  %v4921_v3 = vpack.c.bf16 %v4537_v36, %v4537_v36 }
 0x59f   : > { %16109 = vmatpush3.bf16.msra.mxu0 %v5131_v21  ;;  %16115 = vmatpush3.bf16.msra.mxu1 %v5177_v44  ;;  %v3685_v56 = vmul.f32 %v16982_v17, %v18970_v58  ;;  %v3478_v58 = vsub.f32 %v18864_v1, %v19056_v10  ;;  %v3510_v15 = vmul.f32 1.442695, %v3466_v26  ;;  %v3468_v9 = vsub.f32 %v18913_v32, %v19088_v8 }
 0x5a0   : > { %16110 = vmatprep.mubr.msk.bf16.mxu0 %vm17395_vm10, %v22448_v35  ;;  %16116 = vmatprep.mubr.msk.bf16.mxu1 %vm17395_vm10, %v22448_v35  ;;  %v4882_v18 = vpack.c.bf16 %v3682_v16, %v3682_v16  ;;  %v5453_v52 = vsel %vm4945_vm9, %v4921_v3, 0  ;;  %v3472_v37 = vsub.f32 %v18694_v55, %v18921_v11  ;;  %v4603_v21 = vcombine.high %v22462_v33, %v18513_v14  ;;  %v22463_v11 = vld [vmem:[#allocation32_spill] sm:$0xff] }
 0x5a1   : > { %3732 = vrot.lane.b32.xlu0 %v19061_v23, %s17387_s21  ;;  %16120 = vmatprep.subr.bf16.mxu0 %v22448_v35  ;;  %v4885_v54 = vpack.c.bf16 %v3685_v56, %v3685_v56  ;;  %v3534_v22 = vmul.f32 1.442695, %v3478_v58  ;;  %v3476_v44 = vsub.f32 %v22463_v11, %v18919_v61 }
 0x5a2   : > { %16126 = vmatprep.subr.bf16.mxu1 %v22448_v35  ;;  %v3585_v51 = vpop.xlane.xlu1 %3584  ;;  %v3522_v4 = vmul.f32 1.442695, %v3472_v37  ;;  %v4923_v14 = vpack.c.bf16 %v4603_v21, %v4603_v21 }
 0x5a3   : > { %16987 = vrcp.f32 %v3585_v51  ;;  %v3530_v49 = vmul.f32 1.442695, %v3476_v44 }
 0x5a4   : > { %16989 = vpow2.f32 %v3518_v25  ;;  %v5545_v61 = vsel %vm4945_vm9, %v4923_v14, 0  ;;  %v19256_v25 = vpop.xlane.xlu0 %3626 }
 0x5a5   : > { %v16984_v19 = vpop.eup %16983  ;;  %16991 = vpow2.f32 %v3526_v60 }
 0x5a6   : > { %16111 = vmatmul.mubr.msk.bf16.vlgmr.msra.gmra.mrb[16].mxu0 %vm2636_vm4, %v4882_v18  ;;  %16117 = vmatmul.mubr.msk.bf16.vlgmr.msra.gmra.mrb[12].mxu1 %vm2636_vm4, %v4883_v34  ;;  %v3687_v1 = vmul.f32 %v16984_v19, %v18976_v20  ;;  %16993 = vpow2.f32 %v3548_v38  ;;  %v19199_v10 = vpop.eup %16985  ;;  %v3514_v20 = vmul.f32 1.442695, %v3468_v9  ;;  %v3779_v45 = vpop.permute.xlu1 %3778 }
 0x5a7   : > { %16121 = vmatpush3.bf16.msra.mxu0 %v5223_v5  ;;  %16127 = vmatpush3.bf16.msra.mxu1 %v5269_v47  ;;  %16995 = vpow2.f32 %v3534_v22  ;;  %v3580_v32 = vsel %vm2636_vm4, %v19199_v10, 0.0  ;;  %v4214_v19 = vcombine.low %v19067_v39, %v3779_v45  ;;  %v4215_v60 = vcombine.high %v19067_v39, %v3779_v45 }
 0x5a8   : > { %16128 = vmatprep.mubr.msk.bf16.mxu1 %vm17395_vm10, %v22448_v35  ;;  %16138 = vmatprep.subr.bf16.mxu1 %v22448_v35  ;;  %v4887_v27 = vpack.c.bf16 %v3687_v1, %v3687_v1  ;;  %16997 = vpow2.f32 %v3510_v15 }
 0x5a9   : > { %16122 = vmatprep.mubr.msk.bf16.mxu0 %vm17395_vm10, %v22448_v35  ;;  %16132 = vmatprep.subr.bf16.mxu0 %v22448_v35  ;;  %16999 = vpow2.f32 %v3514_v20  ;;  %v4222_v26 = vrot.slane %v4214_v19, %v17791_v41 }
 0x5aa   : > { %17001 = vpow2.f32 %v3522_v4 }
 0x5ab   : > { %17003 = vpow2.f32 %v3530_v49 }
 0x5ad   : > { %v16988_v13 = vpop.eup %16987 }
 0x5ae   : > { %16129 = vmatmul.mubr.msk.bf16.vlgmr.msra.gmra.mrb[16].mxu1 %vm2636_vm4, %v4885_v54  ;;  %v19211_v8 = vpop.eup %16989  ;;  %v3689_v55 = vmul.f32 %v16988_v13, %v19009_v31  ;;  %v3480_v31 = vsub.f32 %v18799_v59, %v19058_v0  ;;  %v22464_v13 = vld [vmem:[#allocation23_spill] sm:$0xff] }
 0x5af   : > { %16139 = vmatpush3.bf16.msra.mxu1 %v5361_v2  ;;  %16140 = vmatprep.mubr.msk.bf16.mxu1 %vm17395_vm10, %v22448_v35  ;;  %v19217_v43 = vpop.eup %16991  ;;  %v3598_v16 = vsel %vm2636_vm4, %v19211_v8, 0.0  ;;  %v4229_v2 = vrot.slane %v4215_v60, %v17791_v41 }
 0x5b0   : > { %16150 = vmatprep.subr.bf16.mxu1 %v22448_v35  ;;  %v19221_v12 = vpop.eup %16993  ;;  %v4889_v29 = vpack.c.bf16 %v3689_v55, %v3689_v55  ;;  %v3610_v34 = vsel %vm2636_vm4, %v19217_v43, 0.0  ;;  %v3538_v59 = vmul.f32 1.442695, %v3480_v31 }
 0x5b1   : > { %v19227_v62 = vpop.eup %16995  ;;  %v3643_v18 = vsel %vm2636_vm4, %v19221_v12, 0.0 }
 0x5b2   : > { %v19235_v17 = vpop.eup %16997  ;;  %v3622_v0 = vsel %vm2636_vm4, %v19227_v62, 0.0  ;;  %17005 = vpow2.f32 %v3538_v59 }
 0x5b3   : > { %v3586_v5 = vsel %vm2636_vm4, %v19235_v17, 0.0  ;;  %v19242_v28 = vpop.eup %16999 }
 0x5b4   : > { %v3592_v57 = vsel %vm2636_vm4, %v19242_v28, 0.0  ;;  %v19246_v47 = vpop.eup %17001 }
 0x5b5   : > { %v3604_v46 = vsel %vm2636_vm4, %v19246_v47, 0.0  ;;  %v19250_v51 = vpop.eup %17003 }
 0x5b6   : > { %16141 = vmatmul.mubr.msk.bf16.vlgmr.msra.gmra.mrb[20].mxu1 %vm2636_vm4, %v4887_v27  ;;  %v3616_v56 = vsel %vm2636_vm4, %v19250_v51, 0.0 }
 0x5b7   : > { %16151 = vmatpush3.bf16.msra.mxu1 %v5453_v52  ;;  %16152 = vmatprep.mubr.msk.bf16.mxu1 %vm17395_vm10, %v22448_v35  ;;  %v22465_v52 = vld [vmem:[#allocation22_spill] sm:$0xff] }
 0x5b8   : > { %3581 = vadd.xlane.f32.xlu1 %v3580_v32  ;;  %16162 = vmatprep.subr.bf16.mxu1 %v22448_v35  ;;  %v4605_v39 = vcombine.high %v22465_v52, %v22464_v13 }
 0x5ba   : > { %v4925_v14 = vpack.c.bf16 %v4605_v39, %v4605_v39  ;;  %v22468_v39 = vld [vmem:[#allocation47_spill] sm:$0xff] }
 0x5bc   : > { %3599 = vadd.xlane.f32.xlu1 %v3598_v16  ;;  %v19254_v50 = vpop.eup %17005 }
 0x5bd   : > { %v3628_v24 = vsel %vm2636_vm4, %v19254_v50, 0.0 }
 0x5be   : > { %16153 = vmatmul.mubr.msk.bf16.vlgmr.msra.gmra.mrb[24].mxu1 %vm2636_vm4, %v4889_v29 }
 0x5bf   : > { %16163 = vmatpush3.bf16.msra.mxu1 %v5545_v61  ;;  %16164 = vmatprep.mubr.msk.bf16.mxu1 %vm17395_vm10, %v22448_v35 }
 0x5c0   : > { %3644 = vadd.xlane.f32.xlu0 %v3643_v18  ;;  %3611 = vadd.xlane.f32.xlu1 %v3610_v34 }
 0x5c1   : > { %16174 = vmatprep.subr.bf16.mxu1 %v22448_v35 }
 0x5c4   : > { %3623 = vadd.xlane.f32.xlu1 %v3622_v0  ;;  %3587 = vadd.xlane.f32.xlu0 %v3586_v5  ;;  %v5637_v5 = vsel %vm4945_vm9, %v4925_v14, 0  ;;  %v22471_v14 = vld [vmem:[#allocation34_spill] sm:$0xff] }
 0x5c8   : > { %3593 = vadd.xlane.f32.xlu0 %v3592_v57 }
 0x5cc   : > { %3605 = vadd.xlane.f32.xlu0 %v3604_v46 }
 0x5d0   : > { %3617 = vadd.xlane.f32.xlu0 %v3616_v56 }
 0x5d4   : > { %3629 = vadd.xlane.f32.xlu0 %v3628_v24 }
 0x5d7   : > { %v3591_v54 = vpop.xlane.xlu0 %3590 }
 0x5d8   : > { %17007 = vrcp.f32 %v3591_v54  ;;  %v19304_v54 = vpop.xlane.xlu1 %3632 }
 0x5db   : > { %v3755_v58 = vpop.permute.xlu0 %3754 }
 0x5dc   : > { %v4198_v36 = vcombine.low %v18889_v6, %v3755_v58  ;;  %v4199_v38 = vcombine.high %v18889_v6, %v3755_v58  ;;  %v19306_v60 = vpop.xlane.xlu1 %3638 }
 0x5de   : > { %v4206_v1 = vrot.slane %v4198_v36, %v17791_v41  ;;  %v4213_v22 = vrot.slane %v4199_v38, %v17791_v41 }
 0x5e0   : > { %v4230_v3 = vcombine.low %v4206_v1, %v4222_v26  ;;  %v4231_v15 = vcombine.high %v4206_v1, %v4222_v26  ;;  %v4246_v9 = vcombine.low %v4213_v22, %v4229_v2  ;;  %v4247_v27 = vcombine.high %v4213_v22, %v4229_v2  ;;  %v3757_v38 = vpop.permute.xlu1 %3756  ;;  %v22466_v1 = vld [vmem:[#allocation27_spill] sm:$0xff]  ;;  %v22467_v22 = vld [vmem:[#allocation26_spill] sm:$0xff] }
 0x5e2   : > { %v4238_v37 = vrot.slane %v4230_v3, %v17794_v48  ;;  %v4245_v20 = vrot.slane %v4231_v15, %v17794_v48  ;;  %v4254_v6 = vrot.slane %v4246_v9, %v17794_v48  ;;  %v4261_v33 = vrot.slane %v4247_v27, %v17794_v48  ;;  %v17008_v21 = vpop.eup %17007 }
 0x5e3   : > { %v3691_v4 = vmul.f32 %v17008_v21, %v19046_v53  ;;  %v4671_v3 = vcombine.high %v22467_v22, %v22466_v1 }
 0x5e4   : > { %v4742_v32 = vcombine.low %v4238_v37, %v4245_v20  ;;  %v15670_v55 = vcombine.high %v4238_v37, %v4245_v20  ;;  %v4758_v11 = vcombine.low %v4254_v6, %v4261_v33  ;;  %v15671_v44 = vcombine.high %v4254_v6, %v4261_v33 }
 0x5e5   : > { %v4891_v61 = vpack.c.bf16 %v3691_v4, %v3691_v4  ;;  %v4927_v52 = vpack.c.bf16 %v4671_v3, %v4671_v3  ;;  %v4266_v6 = vcombine.low %v19061_v23, %v3757_v38  ;;  %v4267_v33 = vcombine.high %v19061_v23, %v3757_v38 }
 0x5e6   : > { %v4749_v16 = vrot.slane %v4742_v32, %v17791_v41  ;;  %v4757_v29 = vrot.slane %v15670_v55, %v17791_v41  ;;  %v4765_v49 = vrot.slane %v4758_v11, %v17791_v41  ;;  %v4773_v31 = vrot.slane %v15671_v44, %v17791_v41  ;;  %v22470_v11 = vld [vmem:[#allocation28_spill] sm:$0xff] }
 0x5e7   : > { %16165 = vmatmul.mubr.msk.bf16.vlgmr.msra.gmra.mrb[28].mxu1 %vm2636_vm4, %v4891_v61  ;;  %v5729_v32 = vsel %vm4945_vm9, %v4927_v52, 0 }
 0x5e8   : > { %v4774_v18 = vcombine.low %v4749_v16, %v4757_v29  ;;  %v4790_v34 = vcombine.low %v4765_v49, %v4773_v31  ;;  %v4775_v59 = vcombine.high %v4749_v16, %v4757_v29  ;;  %v4791_v0 = vcombine.high %v4765_v49, %v4773_v31  ;;  %16175 = vmatpush3.bf16.msra.mxu1 %v5637_v5 }
 0x5e9   : > { %16176 = vmatprep.mubr.msk.bf16.mxu1 %vm17395_vm10, %v22448_v35  ;;  %16186 = vmatprep.subr.bf16.mxu1 %v22448_v35  ;;  %v4274_v49 = vrot.slane %v4266_v6, %v17791_v41  ;;  %v4281_v31 = vrot.slane %v4267_v33, %v17791_v41 }
 0x5ea   : > { %v19284_v53 = vrot.slane %v4774_v18, %v17794_v48  ;;  %v19287_v57 = vrot.slane %v4790_v34, %v17794_v48  ;;  %v19290_v46 = vrot.slane %v4775_v59, %v17794_v48  ;;  %v19294_v56 = vrot.slane %v4791_v0, %v17794_v48  ;;  %v22472_v59 = vld [vmem:[#allocation49_spill] sm:$0xff] }
 0x5ec   : > { %v19298_v24 = vcombine.low %v19284_v53, %v19287_v57  ;;  %v19302_v45 = vcombine.low %v19290_v46, %v19294_v56 }
 0x60c   : > { %v3597_v19 = vpop.xlane.xlu0 %3596 }
 0x60d   : > { %17009 = vrcp.f32 %v3597_v19 }
 0x60e   : > { %17011 = vrcp.f32 %v19096_v7 }
 0x610   : > { %v3444_v58 = vpop.xlane.xlu0 %3443  ;;  %v3576_v15 = vpop.xlane.xlu1 %3575 }
 0x611   : > { %v3482_v36 = vsub.f32 %v18810_v40, %v3444_v58 }
 0x613   : > { %v3542_v26 = vmul.f32 1.442695, %v3482_v36 }
 0x614   : > { %v3570_v2 = vpop.xlane.xlu0 %3569  ;;  %v3781_v37 = vpop.permute.xlu1 %3780 }
 0x615   : > { %17013 = vpow2.f32 %v3542_v26 }
 0x616   : > { %17015 = vrcp.f32 %v3570_v2  ;;  %v22473_v2 = vld [vmem:[#allocation19_spill] sm:$0xff] }
 0x617   : > { %v17010_v9 = vpop.eup %17009  ;;  %17017 = vrcp.f32 %v22468_v39  ;;  %v4918_v1 = vpack.c.bf16 %v22473_v2, %v22473_v2  ;;  %v22481_v2 = vld [vmem:[#allocation40_spill] sm:$0xff] }
 0x618   : > { %v3450_v27 = vpop.xlane.xlu0 %3449  ;;  %v3693_v13 = vmul.f32 %v17010_v9, %v19098_v42  ;;  %v17012_v20 = vpop.eup %17011  ;;  %17019 = vrcp.f32 %v3576_v15  ;;  %v22469_v42 = vld [vmem:[#allocation29_spill] sm:$0xff] }
 0x619   : > { %v3484_v7 = vsub.f32 %v18812_v30, %v3450_v27  ;;  %v4673_v44 = vcombine.high %v22470_v11, %v22469_v42  ;;  %v3695_v16 = vmul.f32 %v17012_v20, %v22471_v14 }
 0x61a   : > { %v4893_v40 = vpack.c.bf16 %v3693_v13, %v3693_v13 }
 0x61b   : > { %v3546_v21 = vmul.f32 1.442695, %v3484_v7  ;;  %v4929_v5 = vpack.c.bf16 %v4673_v44, %v4673_v44  ;;  %v4895_v22 = vpack.c.bf16 %v3695_v16, %v3695_v16  ;;  %v22474_v7 = vld [vmem:[#allocation39_spill] sm:$0xff]  ;;  %v22477_v16 = vld [vmem:[#allocation48_spill] sm:$0xff] }
 0x61c   : > { %16177 = vmatmul.mubr.msk.bf16.vlgmr.msra.gmra.mrb[32].mxu1 %vm2636_vm4, %v4893_v40  ;;  %v3733_v55 = vpop.permute.xlu0 %3732 }
 0x61d   : > { %17021 = vpow2.f32 %v3546_v21  ;;  %16187 = vmatpush3.bf16.msra.mxu1 %v5729_v32  ;;  %v4282_v30 = vcombine.low %v3733_v55, %v3781_v37  ;;  %v4283_v4 = vcombine.high %v3733_v55, %v3781_v37  ;;  %16188 = vmatprep.mubr.msk.bf16.mxu1 %vm17395_vm10, %v22448_v35  ;;  %v5821_v39 = vsel %vm4945_vm9, %v4929_v5, 0  ;;  %v22476_v55 = vld [vmem:[#allocation33_spill] sm:$0xff]  ;;  %v22479_v5 = vld [vmem:[#allocation20_spill] sm:$0xff] }
 0x61e   : > { %16198 = vmatprep.subr.bf16.mxu1 %v22448_v35  ;;  %17023 = vrcp.f32 %v22472_v59  ;;  %v5315_v32 = vsel %vm4945_vm9, %v4918_v1, 0 }
 0x61f   : > { %v19325_v29 = vpop.eup %17013  ;;  %v4290_v61 = vrot.slane %v4282_v30, %v17791_v41  ;;  %v4297_v18 = vrot.slane %v4283_v4, %v17791_v41 }
 0x620   : > { %v17016_v34 = vpop.eup %17015  ;;  %v3634_v0 = vsel %vm2636_vm4, %v19325_v29, 0.0 }
 0x621   : > { %v4298_v19 = vcombine.low %v4274_v49, %v4290_v61  ;;  %v4299_v58 = vcombine.high %v4274_v49, %v4290_v61  ;;  %v4314_v36 = vcombine.low %v4281_v31, %v4297_v18  ;;  %v4315_v38 = vcombine.high %v4281_v31, %v4297_v18  ;;  %3635 = vadd.xlane.f32.xlu1 %v3634_v0  ;;  %v17018_v3 = vpop.eup %17017  ;;  %v22478_v18 = vld [vmem:[#allocation50_spill] sm:$0xff] }
 0x622   : > { %v3684_v26 = vmul.f32 %v17016_v34, %v19114_v63  ;;  %v22475_v63 = vld [vmem:[#allocation38_spill] sm:$0xff]  ;;  %v17020_v40 = vpop.eup %17019  ;;  %v3697_v42 = vmul.f32 %v17018_v3, %v22476_v55  ;;  %17025 = vrcp.f32 %v22478_v18 }
 0x623   : > { %v4306_v15 = vrot.slane %v4298_v19, %v17794_v48  ;;  %v4313_v9 = vrot.slane %v4299_v58, %v17794_v48  ;;  %v4322_v27 = vrot.slane %v4314_v36, %v17794_v48  ;;  %v4329_v13 = vrot.slane %v4315_v38, %v17794_v48  ;;  %v17205_v18 = vld [vmem:[%s17686_s0 + $0x10] sm:$0xff] }
 0x624   : > { %v4884_v52 = vpack.c.bf16 %v3684_v26, %v3684_v26  ;;  %16189 = vmatmul.mubr.msk.bf16.vlgmr.msra.gmra.mrb[36].mxu1 %vm2636_vm4, %v4895_v22  ;;  %v4739_v37 = vcombine.high %v22475_v63, %v22474_v7  ;;  %v3686_v49 = vmul.f32 %v17020_v40, %v22477_v16  ;;  %v4920_v19 = vpack.c.bf16 %v22479_v5, %v22479_v5  ;;  %v22480_v26 = vld [vmem:[#allocation41_spill] sm:$0xff] }
 0x625   : > { %v4810_v20 = vcombine.low %v4306_v15, %v4313_v9  ;;  %v15672_v6 = vcombine.high %v4306_v15, %v4313_v9  ;;  %v4826_v33 = vcombine.low %v4322_v27, %v4329_v13  ;;  %v15673_v21 = vcombine.high %v4322_v27, %v4329_v13  ;;  %16199 = vmatpush3.bf16.msra.mxu1 %v5821_v39  ;;  %v22482_v39 = vld [vmem:[#allocation35_spill] sm:$0xff] }
 0x626   : > { %16123 = vmatmul.mubr.msk.bf16.vlgmr.msra.gmra.mrb[20].mxu0 %vm2636_vm4, %v4884_v52  ;;  %16200 = vmatprep.mubr.msk.bf16.mxu1 %vm17395_vm10, %v22448_v35  ;;  %v4931_v31 = vpack.c.bf16 %v4739_v37, %v4739_v37  ;;  %v4897_v58 = vpack.c.bf16 %v3697_v42, %v3697_v42  ;;  %v4741_v1 = vcombine.high %v22481_v2, %v22480_v26  ;;  %v5407_v52 = vsel %vm4945_vm9, %v4920_v19, 0  ;;  %v17207_v19 = vld [vmem:[%s17686_s0 + $0x20] sm:$0xff] }
 0x627   : > { %v19350_v11 = vpop.eup %17021  ;;  %16133 = vmatpush3.bf16.msra.mxu0 %v5315_v32  ;;  %16134 = vmatprep.mubr.msk.bf16.mxu0 %vm17395_vm10, %v22448_v35  ;;  %v4817_v44 = vrot.slane %v4810_v20, %v17791_v41  ;;  %v4825_v30 = vrot.slane %v15672_v6, %v17791_v41  ;;  %v4833_v4 = vrot.slane %v4826_v33, %v17791_v41  ;;  %17027 = vrcp.f32 %v19256_v25  ;;  %v22483_v32 = vld [vmem:[#allocation36_spill] sm:$0xff] }
 0x628   : > { %v3640_v14 = vsel %vm2636_vm4, %v19350_v11, 0.0  ;;  %16144 = vmatprep.subr.bf16.mxu0 %v22448_v35  ;;  %16210 = vmatprep.subr.bf16.mxu1 %v22448_v35  ;;  %v4841_v61 = vrot.slane %v15673_v21, %v17791_v41  ;;  %v17024_v0 = vpop.eup %17023  ;;  %v4886_v15 = vpack.c.bf16 %v3686_v49, %v3686_v49  ;;  %v5913_v9 = vsel %vm4945_vm9, %v4931_v31, 0  ;;  %v22485_v31 = vld [vmem:[#allocation44_spill] sm:$0xff] }
 0x629   : > { %3641 = vadd.xlane.f32.xlu0 %v3640_v14  ;;  %v4842_v34 = vcombine.low %v4817_v44, %v4825_v30  ;;  %v4843_v59 = vcombine.high %v4817_v44, %v4825_v30  ;;  %v3699_v7 = vmul.f32 %v17024_v0, %v22482_v39  ;;  %v4933_v40 = vpack.c.bf16 %v4741_v1, %v4741_v1  ;;  %v22486_v0 = vld [vmem:[#allocation46_spill] sm:$0xff] }
 0x62a   : > { %v4858_v36 = vcombine.low %v4833_v4, %v4841_v61  ;;  %v4859_v38 = vcombine.high %v4833_v4, %v4841_v61  ;;  %v4807_v21 = vcombine.high %v19284_v53, %v19287_v57  ;;  %17029 = vrcp.f32 %v19304_v54  ;;  %v22484_v57 = vld [vmem:[#allocation37_spill] sm:$0xff] }
 0x62b   : > { %v4850_v22 = vrot.slane %v4842_v34, %v17794_v48  ;;  %v19370_v3 = vrot.slane %v4843_v59, %v17794_v48  ;;  %v4899_v20 = vpack.c.bf16 %v3699_v7, %v3699_v7  ;;  %v6005_v33 = vsel %vm4945_vm9, %v4933_v40, 0  ;;  %v17206_v59 = vld [vmem:[%s17686_s0 + $0x18] sm:$0xff] }
 0x62c   : > { %16201 = vmatmul.mubr.msk.bf16.vlgmr.msra.gmra.mrb[40].mxu1 %vm2636_vm4, %v4897_v58  ;;  %v4866_v27 = vrot.slane %v4858_v36, %v17794_v48  ;;  %v19376_v13 = vrot.slane %v4859_v38, %v17794_v48  ;;  %v17026_v6 = vpop.eup %17025  ;;  %v4935_v25 = vpack.c.bf16 %v4807_v21, %v4807_v21  ;;  %v4809_v53 = vcombine.high %v19290_v46, %v19294_v56  ;;  %v17208_v58 = vld [vmem:[%s17686_s0 + $0x30] sm:$0xff]  ;;  %v17209_v38 = vld [vmem:[%s17686_s0 + $0x28] sm:$0xff] }
 0x62d   : > { %16211 = vmatpush3.bf16.msra.mxu1 %v5913_v9  ;;  %16212 = vmatprep.mubr.msk.bf16.mxu1 %vm17395_vm10, %v22448_v35  ;;  %v3701_v55 = vmul.f32 %v17026_v6, %v22483_v32  ;;  %17031 = vrcp.f32 %v19306_v60  ;;  %v17204_v60 = vld [vmem:[%s17686_s0] sm:$0xff]  ;;  %v7739_v5 = vcombine.low %v22486_v0, %v17206_v59  ;;  %v7755_v36 = vcombine.low %v17207_v19, %v17208_v58  ;;  %s22543_s0 = smov 10  }
 0x62e   : > { %16135 = vmatmul.mubr.msk.bf16.vlgmr.msra.gmra.mrb[24].mxu0 %vm2636_vm4, %v4886_v15  ;;  %16222 = vmatprep.subr.bf16.mxu1 %v22448_v35  ;;  %v19384_v63 = vcombine.low %v4850_v22, %v4866_v27  ;;  %v19390_v37 = vcombine.low %v19370_v3, %v19376_v13  ;;  %v6097_v30 = vsel %vm4945_vm9, %v4935_v25, 0  ;;  %v4937_v4 = vpack.c.bf16 %v4809_v53, %v4809_v53 }
 0x62f   : > { %16145 = vmatpush3.bf16.msra.mxu0 %v5407_v52  ;;  %16146 = vmatprep.mubr.msk.bf16.mxu0 %vm17395_vm10, %v22448_v35  ;;  %v4901_v42 = vpack.c.bf16 %v3701_v55, %v3701_v55  ;;  %v4875_v56 = vcombine.high %v4850_v22, %v4866_v27  ;;  %v7723_v34 = vcombine.low %v17204_v60, %v17205_v18 }
 0x630   : > { %16156 = vmatprep.subr.bf16.mxu0 %v22448_v35  ;;  %v6189_v46 = vsel %vm4945_vm9, %v4937_v4, 0  ;;  %v7771_v26 = vcombine.low %v17209_v38, %v19061_v23  ;;  %v7747_v9 = vrot.slane %v7739_v5, %v17791_v41  ;;  %v7763_v27 = vrot.slane %v7755_v36, %v17791_v41 }
 0x631   : > { %v17028_v44 = vpop.eup %17027  ;;  %v4939_v2 = vpack.c.bf16 %v4875_v56, %v4875_v56  ;;  %v7731_v15 = vrot.slane %v7723_v34, %v17791_v41  ;;  %v4877_v7 = vcombine.high %v19370_v3, %v19376_v13  ;;  %v7724_v32 = vcombine.high %v17204_v60, %v17205_v18  ;;  %v16908_v56 = vld [vmem:[%s22491_s29] sm:$0xff]  }
 0x632   : > { %v3703_v54 = vmul.f32 %v17028_v44, %v22484_v57  ;;  %v7779_v52 = vrot.slane %v7771_v26, %v17791_v41  ;;  %v7740_v55 = vcombine.high %v22486_v0, %v17206_v59  ;;  %v7756_v25 = vcombine.high %v17207_v19, %v17208_v58  ;;  %v22488_v57 = vld [vmem:[#allocation24_spill] sm:$0xff] }
 0x633   : > { %v6281_v39 = vsel %vm4945_vm9, %v4939_v2, 0  ;;  %v4941_v3 = vpack.c.bf16 %v4877_v7, %v4877_v7  ;;  %v7788_v18 = vcombine.high %v7731_v15, %v7747_v9 }
 0x634   : > { %16213 = vmatmul.mubr.msk.bf16.vlgmr.msra.gmra.mrb[44].mxu1 %vm2636_vm4, %v4899_v20  ;;  %v17030_v14 = vpop.eup %17029  ;;  %v4903_v16 = vpack.c.bf16 %v3703_v54, %v3703_v54  ;;  %v22487_v20 = vld [vmem:[#allocation45_spill] sm:$0xff]  ;;  %v7819_v21 = vcombine.low %v7763_v27, %v7779_v52  ;;  %v4922_v54 = vpack.c.bf16 %v22488_v57, %v22488_v57  ;;  %v7820_v34 = vcombine.high %v7763_v27, %v7779_v52 }
 0x635   : > { %16223 = vmatpush3.bf16.msra.mxu1 %v6005_v33  ;;  %16224 = vmatprep.mubr.msk.bf16.mxu1 %vm17395_vm10, %v22448_v35  ;;  %v3705_v61 = vmul.f32 %v17030_v14, %v22485_v31  ;;  %v7787_v33 = vcombine.low %v7731_v15, %v7747_v9  ;;  %v6373_v31 = vsel %vm4945_vm9, %v4941_v3, 0  ;;  %v19474_v36 = vrot.slane %v7788_v18, %v17794_v48  ;;  %v16909_v27 = vld [vmem:[%s22491_s29 + $0x8] sm:$0xff]  }
 0x636   : > { %16234 = vmatprep.subr.bf16.mxu1 %v22448_v35  ;;  %v19447_v14 = vrot.slane %v7819_v21, %v17794_v48 }
 0x637   : > { %v4905_v1 = vpack.c.bf16 %v3705_v61, %v3705_v61  ;;  %v17032_v22 = vpop.eup %17031  ;;  %v19444_v4 = vrot.slane %v7787_v33, %v17794_v48  ;;  %v5499_v61 = vsel %vm4945_vm9, %v4922_v54, 0  ;;  %22494 = vst [vmem:[#allocation27_spill] sm:$0xff] %v19474_v36 }
 0x638   : > { %v3707_v6 = vmul.f32 %v17032_v22, %v22487_v20  ;;  %22490 = vst [vmem:[#allocation32_spill] sm:$0xff] %v19447_v14 }
 0x639   : > { %22489 = vst [vmem:[#allocation21_spill] sm:$0xff] %v19444_v4  ;;  %v19464_v59 = vcombine.low %v19444_v4, %v19447_v14  ;;  %v19470_v0 = vcombine.high %v19444_v4, %v19447_v14 }
 0x63b   : > { %22492 = vst [vmem:[#allocation23_spill] sm:$0xff] %v19464_v59  ;;  %22493 = vst [vmem:[#allocation22_spill] sm:$0xff] %v19470_v0  ;;  %v7872_v2 = vpack.c.bf16 %v19470_v0, %v19464_v59 }
 0x63c   : > { %16225 = vmatmul.mubr.msk.bf16.vlgmr.msra.gmra.mrb[48].mxu1 %vm2636_vm4, %v4901_v42  ;;  %v7772_v42 = vcombine.high %v17209_v38, %v19061_v23  ;;  %v19477_v38 = vrot.slane %v7820_v34, %v17794_v48 }
 0x63d   : > { %16235 = vmatpush3.bf16.msra.mxu1 %v6097_v30  ;;  %16236 = vmatprep.mubr.msk.bf16.mxu1 %vm17395_vm10, %v22448_v35  ;;  %v4907_v30 = vpack.c.bf16 %v3707_v6, %v3707_v6 }
 0x63e   : > { %16246 = vmatprep.subr.bf16.mxu1 %v22448_v35  ;;  %22495 = vst [vmem:[#allocation26_spill] sm:$0xff] %v19477_v38  ;;  %v19501_v20 = vcombine.high %v19474_v36, %v19477_v38 }
 0x640   : > { %22500 = vst [vmem:[#allocation34_spill] sm:$0xff] %v19501_v20 }
 0x644   : > { %16237 = vmatmul.mubr.msk.bf16.vlgmr.msra.gmra.mrb[52].mxu1 %vm2636_vm4, %v4903_v16  ;;  %v7738_v16 = vrot.slane %v7724_v32, %v17791_v41 }
 0x645   : > { %16247 = vmatpush3.bf16.msra.mxu1 %v6189_v46  ;;  %v3582_v49 = vpop.xlane.xlu1 %3581  ;;  %16248 = vmatprep.mubr.msk.bf16.mxu1 %vm17395_vm10, %v22448_v35  ;;  %v7754_v46 = vrot.slane %v7740_v55, %v17791_v41 }
 0x646   : > { %17033 = vrcp.f32 %v3582_v49  ;;  %16258 = vmatprep.subr.bf16.mxu1 %v22448_v35  ;;  %v7786_v49 = vrot.slane %v7772_v42, %v17791_v41 }
 0x647   : > { %v7803_v5 = vcombine.low %v7738_v16, %v7754_v46  ;;  %v7804_v6 = vcombine.high %v7738_v16, %v7754_v46 }
 0x649   : > { %v3600_v15 = vpop.xlane.xlu1 %3599 }
 0x64c   : > { %16249 = vmatmul.mubr.msk.bf16.vlgmr.msra.gmra.mrb[56].mxu1 %vm2636_vm4, %v4905_v1  ;;  %v19483_v1 = vrot.slane %v7803_v5, %v17794_v48 }
 0x64d   : > { %16259 = vmatpush3.bf16.msra.mxu1 %v6281_v39  ;;  %v3645_v40 = vpop.xlane.xlu0 %3644  ;;  %16260 = vmatprep.mubr.msk.bf16.mxu1 %vm17395_vm10, %v22448_v35  ;;  %v22498_v39 = vld [vmem:[#allocation25_spill] sm:$0xff]  ;;  %v3612_v5 = vpop.xlane.xlu1 %3611 }
 0x64e   : > { %16270 = vmatprep.subr.bf16.mxu1 %v22448_v35  ;;  %17035 = vrcp.f32 %v3645_v40  ;;  %22496 = vst [vmem:[#allocation47_spill] sm:$0xff] %v19483_v1  ;;  %v4924_v7 = vpack.c.bf16 %v22498_v39, %v22498_v39 }
 0x650   : > { %v17034_v44 = vpop.eup %17033  ;;  %v5591_v42 = vsel %vm4945_vm9, %v4924_v7, 0 }
 0x651   : > { %v3588_v13 = vpop.xlane.xlu0 %3587  ;;  %v3688_v53 = vmul.f32 %v17034_v44, %v19199_v10  ;;  %v7770_v10 = vrot.slane %v7756_v25, %v17791_v41 }
 0x652   : > { %17037 = vrcp.f32 %v3588_v13  ;;  %v19517_v13 = vrot.slane %v7804_v6, %v17794_v48 }
 0x653   : > { %v4888_v23 = vpack.c.bf16 %v3688_v53, %v3688_v53  ;;  %v7835_v19 = vcombine.low %v7770_v10, %v7786_v49  ;;  %v7836_v33 = vcombine.high %v7770_v10, %v7786_v49 }
 0x654   : > { %16261 = vmatmul.mubr.msk.bf16.vlgmr.msra.gmra.mrb[60].mxu1 %vm2636_vm4, %v4907_v30  ;;  %22503 = vst [vmem:[#allocation39_spill] sm:$0xff] %v19517_v13 }
 0x655   : > { %16271 = vmatpush3.bf16.msra.mxu1 %v6373_v31  ;;  %16147 = vmatmul.mubr.msk.bf16.vlgmr.msra.gmra.mrb[28].mxu0 %vm2636_vm4, %v4888_v23  ;;  %v3594_v60 = vpop.xlane.xlu0 %3593  ;;  %v19486_v22 = vrot.slane %v7835_v19, %v17794_v48  ;;  %v19520_v30 = vrot.slane %v7836_v33, %v17794_v48  ;;  %v22505_v23 = vld [vmem:[#allocation30_spill] sm:$0xff] }
 0x656   : > { %16157 = vmatpush3.bf16.msra.mxu0 %v5499_v61  ;;  %16272 = vmatprep.mubr.msk.bf16.mxu1 %vm17395_vm10, %v22448_v35  ;;  %17039 = vrcp.f32 %v3594_v60 }
 0x657   : > { %16288 = vmatprep.subr.bf16.mxu1 %v16908_v56  ;;  %16158 = vmatprep.mubr.msk.bf16.mxu0 %vm17395_vm10, %v22448_v35  ;;  %22497 = vst [vmem:[#allocation29_spill] sm:$0xff] %v19486_v22  ;;  %17041 = vrcp.f32 %v3600_v15  ;;  %v19506_v21 = vcombine.low %v19483_v1, %v19486_v22  ;;  %v19510_v32 = vcombine.high %v19483_v1, %v19486_v22  ;;  %22504 = vst [vmem:[#allocation38_spill] sm:$0xff] %v19520_v30 }
 0x658   : > { %16168 = vmatprep.subr.bf16.mxu0 %v22448_v35  ;;  %v17036_v58 = vpop.eup %17035  ;;  %v19534_v10 = vcombine.low %v19517_v13, %v19520_v30  ;;  %v19538_v49 = vcombine.high %v19517_v13, %v19520_v30 }
 0x659   : > { %v3709_v26 = vmul.f32 %v17036_v58, %v19221_v12  ;;  %v19495_v12 = vcombine.low %v19474_v36, %v19477_v38  ;;  %22501 = vst [vmem:[#allocation49_spill] sm:$0xff] %v19506_v21  ;;  %22502 = vst [vmem:[#allocation19_spill] sm:$0xff] %v19510_v32  ;;  %v3606_v53 = vpop.xlane.xlu0 %3605  ;;  %v7874_v54 = vpack.c.bf16 %v19510_v32, %v19506_v21 }
 0x65a   : > { %17043 = vrcp.f32 %v3606_v53  ;;  %22506 = vst [vmem:[#allocation33_spill] sm:$0xff] %v19534_v10  ;;  %22507 = vst [vmem:[#allocation48_spill] sm:$0xff] %v19538_v49  ;;  %v7875_v34 = vpack.c.bf16 %v19538_v49, %v19534_v10 }
 0x65b   : > { %v4909_v9 = vpack.c.bf16 %v3709_v26, %v3709_v26  ;;  %22499 = vst [vmem:[#allocation28_spill] sm:$0xff] %v19495_v12  ;;  %v7873_v3 = vpack.c.bf16 %v19501_v20, %v19495_v12  ;;  %17045 = vrcp.f32 %v3612_v5  ;;  %v3624_v5 = vpop.xlane.xlu1 %3623 }
 0x65c   : > { %v17038_v52 = vpop.eup %17037 }
 0x65d   : > { %16273 = vmatmul.mubr.msk.bf16.vlgmr.msra.gmra.mrb[64].mxu1 %vm2636_vm4, %v4909_v9  ;;  %v3690_v40 = vmul.f32 %v17038_v52, %v19235_v17 }
 0x65e   : > { %16289 = vmatpush3.bf16.msra.mxu1 %v16908_v56  ;;  %16292 = vmatprep.mubr.msk.bf16.mxu1 %vm719_vm0, %v7872_v2  ;;  %v4926_v56 = vpack.c.bf16 %v22505_v23, %v22505_v23  ;;  %v22508_v2 = vld [vmem:[#allocation31_spill] sm:$0xff] }
 0x65f   : > { %16290 = vmatprep.subr.bf16.mxu1 %v16909_v27  ;;  %v4890_v17 = vpack.c.bf16 %v3690_v40, %v3690_v40  ;;  %v4928_v15 = vpack.c.bf16 %v22508_v2, %v22508_v2 }
 0x660   : > { %v17040_v55 = vpop.eup %17039  ;;  %v5683_v60 = vsel %vm4945_vm9, %v4926_v56, 0  ;;  %v22509_v56 = vld [vmem:[#allocation42_spill] sm:$0xff] }
 0x661   : > { %v4983_v25 = vpop.f32.mrb[0].mxu1  ;;  %16159 = vmatmul.mubr.msk.bf16.vlgmr.msra.gmra.mrb[32].mxu0 %vm2636_vm4, %v4890_v17  ;;  %v3692_v46 = vmul.f32 %v17040_v55, %v19242_v28  ;;  %v17042_v28 = vpop.eup %17041  ;;  %v5775_v40 = vsel %vm4945_vm9, %v4928_v15, 0 }
 0x662   : > { %v16088_v44 = vpop.f32.mrb[1].mxu1  ;;  %16169 = vmatpush3.bf16.msra.mxu0 %v5591_v42  ;;  %16291 = vmatpush3.bf16.msra.mxu1 %v16909_v27  ;;  %v3694_v26 = vmul.f32 %v17042_v28, %v19211_v8  ;;  %v3618_v27 = vpop.xlane.xlu0 %3617 }
 0x663   : > { %v4986_v57 = vpop.f32.mrb[2].mxu1  ;;  %16170 = vmatprep.mubr.msk.bf16.mxu0 %vm17395_vm10, %v22448_v35  ;;  %16180 = vmatprep.subr.bf16.mxu0 %v22448_v35  ;;  %v4892_v31 = vpack.c.bf16 %v3692_v46, %v3692_v46  ;;  %17047 = vrcp.f32 %v3618_v27 }
 0x664   : > { %v16089_v16 = vpop.f32.mrb[3].mxu1  ;;  %16306 = vmatprep.subr.bf16.mxu1 %v22448_v35  ;;  %v17044_v9 = vpop.eup %17043  ;;  %v4894_v52 = vpack.c.bf16 %v3694_v26, %v3694_v26  ;;  %17049 = vrcp.f32 %v3624_v5 }
 0x665   : > { %16293 = vmatmul.mubr.msk.bf16.vlgmr.msra.gmra.mrb[68].mxu1 %vm719_vm0, %v7873_v3  ;;  %v3696_v53 = vmul.f32 %v17044_v9, %v19246_v47 }
 0x666   : > { %16296 = vmatprep.mubr.msk.bf16.mxu1 %vm719_vm0, %v7874_v54 }
 0x667   : > { %v4896_v47 = vpack.c.bf16 %v3696_v53, %v3696_v53 }
 0x669   : > { %v5029_v61 = vpop.f32.mrb[4].mxu1  ;;  %16171 = vmatmul.mubr.msk.bf16.vlgmr.msra.gmra.mrb[36].mxu0 %vm2636_vm4, %v4892_v31  ;;  %v4930_v31 = vpack.c.bf16 %v22509_v56, %v22509_v56 }
 0x66a   : > { %v16094_v18 = vpop.f32.mrb[5].mxu1  ;;  %16181 = vmatpush3.bf16.msra.mxu0 %v5683_v60  ;;  %16182 = vmatprep.mubr.msk.bf16.mxu0 %vm17395_vm10, %v22448_v35 }
 0x66b   : > { %v5032_v19 = vpop.f32.mrb[6].mxu1  ;;  %16192 = vmatprep.subr.bf16.mxu0 %v22448_v35 }
 0x66c   : > { %v16095_v58 = vpop.f32.mrb[7].mxu1 }
 0x66d   : > { %16297 = vmatmul.mubr.msk.bf16.gmra.mrb[72].mxu1 %vm719_vm0, %v7875_v34  ;;  %v17046_v34 = vpop.eup %17045 }
 0x66e   : > { %16308 = vmatprep.mubr.msk.bf16.mxu1 %vm17395_vm10, %v22448_v35 }
 0x671   : > { %v5075_v39 = vpop.f32.mrb[12].mxu0  ;;  %v5121_v7 = vpop.f32.mrb[8].mxu1  ;;  %16183 = vmatmul.mubr.msk.bf16.vlgmr.msra.gmra.mrb[40].mxu0 %vm2636_vm4, %v4894_v52  ;;  %v5867_v52 = vsel %vm4945_vm9, %v4930_v31, 0 }
 0x672   : > { %v6415_v6 = vcombine.low %v4983_v25, %v5075_v39  ;;  %v6416_v33 = vcombine.high %v4983_v25, %v5075_v39  ;;  %v6431_v17 = vcombine.low %v5029_v61, %v5121_v7  ;;  %v6432_v8 = vcombine.high %v5029_v61, %v5121_v7  ;;  %v16100_v55 = vpop.f32.mrb[13].mxu0  ;;  %v16106_v42 = vpop.f32.mrb[9].mxu1  ;;  %16193 = vmatpush3.bf16.msra.mxu0 %v5775_v40 }
 0x673   : > { %v5078_v44 = vpop.f32.mrb[14].mxu0  ;;  %v5124_v3 = vpop.f32.mrb[10].mxu1  ;;  %16194 = vmatprep.mubr.msk.bf16.mxu0 %vm17395_vm10, %v22448_v35  ;;  %16204 = vmatprep.subr.bf16.mxu0 %v22448_v35  ;;  %v3698_v55 = vmul.f32 %v17046_v34, %v19217_v43 }
 0x674   : > { %v6423_v57 = vrot.slane %v6415_v6, %v17791_v41  ;;  %v6430_v54 = vrot.slane %v6416_v33, %v17791_v41  ;;  %v6439_v25 = vrot.slane %v6431_v17, %v17791_v41  ;;  %v6446_v16 = vrot.slane %v6432_v8, %v17791_v41  ;;  %v16101_v46 = vpop.f32.mrb[15].mxu0  ;;  %v16107_v23 = vpop.f32.mrb[11].mxu1 }
 0x675   : > { %v4898_v43 = vpack.c.bf16 %v3698_v55, %v3698_v55 }
 0x676   : > { %v6447_v28 = vcombine.low %v6423_v57, %v6439_v25  ;;  %v6448_v61 = vcombine.high %v6423_v57, %v6439_v25  ;;  %v6463_v60 = vcombine.low %v6430_v54, %v6446_v16  ;;  %v6464_v18 = vcombine.high %v6430_v54, %v6446_v16  ;;  %v22510_v25 = vld [vmem:[#allocation43_spill] sm:$0xff] }
 0x677   : > { %v4932_v16 = vpack.c.bf16 %v22510_v25, %v22510_v25 }
 0x678   : > { %v6455_v19 = vrot.slane %v6447_v28, %v17794_v48  ;;  %v6462_v58 = vrot.slane %v6448_v61, %v17794_v48  ;;  %v6471_v26 = vrot.slane %v6463_v60, %v17794_v48  ;;  %v6478_v2 = vrot.slane %v6464_v18, %v17794_v48 }
 0x679   : > { %v19570_v15 = vpop.f32.mrb[16].mxu0  ;;  %v19572_v9 = vpop.f32.mrb[12].mxu1  ;;  %16195 = vmatmul.mubr.msk.bf16.vlgmr.msra.gmra.mrb[44].mxu0 %vm2636_vm4, %v4896_v47 }
 0x67a   : > { %v6959_v39 = vcombine.low %v6455_v19, %v6462_v58  ;;  %v15706_v7 = vcombine.high %v6455_v19, %v6462_v58  ;;  %v6975_v27 = vcombine.low %v6471_v26, %v6478_v2  ;;  %v15707_v40 = vcombine.high %v6471_v26, %v6478_v2  ;;  %v16112_v6 = vpop.f32.mrb[17].mxu0  ;;  %v16118_v33 = vpop.f32.mrb[13].mxu1  ;;  %16205 = vmatpush3.bf16.msra.mxu0 %v5867_v52 }
 0x67b   : > { %v5170_v17 = vpop.f32.mrb[18].mxu0  ;;  %v5216_v8 = vpop.f32.mrb[14].mxu1  ;;  %16206 = vmatprep.mubr.msk.bf16.mxu0 %vm17395_vm10, %v22448_v35  ;;  %16216 = vmatprep.subr.bf16.mxu0 %v22448_v35  ;;  %v5959_v19 = vsel %vm4945_vm9, %v4932_v16, 0 }
 0x67c   : > { %v6966_v42 = vrot.slane %v6959_v39, %v17791_v41  ;;  %v6974_v44 = vrot.slane %v15706_v7, %v17791_v41  ;;  %v6982_v3 = vrot.slane %v6975_v27, %v17791_v41  ;;  %v6990_v53 = vrot.slane %v15707_v40, %v17791_v41  ;;  %v16113_v57 = vpop.f32.mrb[19].mxu0  ;;  %v16119_v54 = vpop.f32.mrb[15].mxu1 }
 0x67d   : > { %v17048_v47 = vpop.eup %17047  ;;  %v3630_v40 = vpop.xlane.xlu0 %3629  ;;  %v4934_v17 = vpack.c.bf16 %v19298_v24, %v19298_v24  ;;  %v4936_v24 = vpack.c.bf16 %v19302_v45, %v19302_v45 }
 0x67e   : > { %v6991_v46 = vcombine.low %v6966_v42, %v6974_v44  ;;  %v7007_v23 = vcombine.low %v6982_v3, %v6990_v53  ;;  %v6992_v56 = vcombine.high %v6966_v42, %v6974_v44  ;;  %v7008_v31 = vcombine.high %v6982_v3, %v6990_v53  ;;  %v17050_v55 = vpop.eup %17049 }
 0x67f   : > { %v3700_v33 = vmul.f32 %v17048_v47, %v19250_v51  ;;  %17051 = vrcp.f32 %v3630_v40  ;;  %v6051_v44 = vsel %vm4945_vm9, %v4934_v17, 0  ;;  %v3702_v51 = vmul.f32 %v17050_v55, %v19227_v62 }
 0x680   : > { %v19587_v28 = vrot.slane %v6991_v46, %v17794_v48  ;;  %v19590_v61 = vrot.slane %v7007_v23, %v17794_v48  ;;  %v19593_v60 = vrot.slane %v6992_v56, %v17794_v48  ;;  %v19596_v18 = vrot.slane %v7008_v31, %v17794_v48 }
 0x681   : > { %v19598_v34 = vpop.f32.mrb[16].mxu1  ;;  %16207 = vmatmul.mubr.msk.bf16.vlgmr.msra.gmra.mrb[48].mxu0 %vm2636_vm4, %v4898_v43  ;;  %v4900_v8 = vpack.c.bf16 %v3700_v33, %v3700_v33  ;;  %v4902_v54 = vpack.c.bf16 %v3702_v51, %v3702_v51  ;;  %v6143_v56 = vsel %vm4945_vm9, %v4936_v24, 0  ;;  %v4938_v47 = vpack.c.bf16 %v19384_v63, %v19384_v63 }
 0x682   : > { %v6499_v5 = vcombine.low %v19572_v9, %v19598_v34  ;;  %v6500_v58 = vcombine.high %v19572_v9, %v19598_v34  ;;  %v16130_v26 = vpop.f32.mrb[17].mxu1  ;;  %v7024_v2 = vcombine.high %v19587_v28, %v19590_v61  ;;  %v7025_v52 = vcombine.low %v19593_v60, %v19596_v18  ;;  %16217 = vmatpush3.bf16.msra.mxu0 %v5959_v19 }
 0x683   : > { %v5308_v39 = vpop.f32.mrb[18].mxu1  ;;  %16218 = vmatprep.mubr.msk.bf16.mxu0 %vm17395_vm10, %v22448_v35  ;;  %v7026_v7 = vcombine.high %v19593_v60, %v19596_v18  ;;  %16228 = vmatprep.subr.bf16.mxu0 %v22448_v35  ;;  %v6235_v26 = vsel %vm4945_vm9, %v4938_v47, 0  ;;  %v4940_v63 = vpack.c.bf16 %v19390_v37, %v19390_v37 }
 0x684   : > { %v16131_v6 = vpop.f32.mrb[19].mxu1 }
 0x689   : > { %v19620_v42 = vpop.f32.mrb[20].mxu1  ;;  %16219 = vmatmul.mubr.msk.bf16.vlgmr.msra.gmra.mrb[52].mxu0 %vm2636_vm4, %v4900_v8  ;;  %v17052_v25 = vpop.eup %17051 }
 0x68a   : > { %v16142_v3 = vpop.f32.mrb[21].mxu1  ;;  %16229 = vmatpush3.bf16.msra.mxu0 %v6051_v44  ;;  %16230 = vmatprep.mubr.msk.bf16.mxu0 %vm17395_vm10, %v22448_v35  ;;  %v3704_v43 = vmul.f32 %v17052_v25, %v19254_v50  ;;  %v6327_v44 = vsel %vm4945_vm9, %v4940_v63, 0 }
 0x68b   : > { %v5400_v53 = vpop.f32.mrb[22].mxu1  ;;  %16240 = vmatprep.subr.bf16.mxu0 %v22448_v35 }
 0x68c   : > { %v16143_v57 = vpop.f32.mrb[23].mxu1  ;;  %v4904_v19 = vpack.c.bf16 %v3704_v43, %v3704_v43 }
 0x691   : > { %v19630_v16 = vpop.f32.mrb[24].mxu1  ;;  %16231 = vmatmul.mubr.msk.bf16.vlgmr.msra.gmra.mrb[56].mxu0 %vm2636_vm4, %v4902_v54 }
 0x692   : > { %v6567_v46 = vcombine.low %v19620_v42, %v19630_v16  ;;  %v6568_v23 = vcombine.high %v19620_v42, %v19630_v16  ;;  %v16154_v31 = vpop.f32.mrb[25].mxu1  ;;  %16241 = vmatpush3.bf16.msra.mxu0 %v6143_v56  ;;  %16242 = vmatprep.mubr.msk.bf16.mxu0 %vm17395_vm10, %v22448_v35 }
 0x693   : > { %v5492_v62 = vpop.f32.mrb[26].mxu1  ;;  %16252 = vmatprep.subr.bf16.mxu0 %v22448_v35 }
 0x694   : > { %v16155_v45 = vpop.f32.mrb[27].mxu1 }
 0x699   : > { %16243 = vmatmul.mubr.msk.bf16.vlgmr.msra.gmra.mrb[60].mxu0 %vm2636_vm4, %v4904_v19 }
 0x69a   : > { %16253 = vmatpush3.bf16.msra.mxu0 %v6235_v26  ;;  %16254 = vmatprep.mubr.msk.bf16.mxu0 %vm17395_vm10, %v22448_v35 }
 0x69b   : > { %16264 = vmatprep.subr.bf16.mxu0 %v22448_v35 }
 0x6ae   : > { %v3636_v39 = vpop.xlane.xlu1 %3635 }
 0x6af   : > { %17053 = vrcp.f32 %v3636_v39 }
 0x6b6   : > { %v3642_v40 = vpop.xlane.xlu0 %3641 }
 0x6b7   : > { %17055 = vrcp.f32 %v3642_v40  ;;  %v6507_v40 = vrot.slane %v6499_v5, %v17791_v41 }
 0x6b9   : > { %v17054_v6 = vpop.eup %17053 }
 0x6ba   : > { %v3706_v50 = vmul.f32 %v17054_v6, %v19325_v29  ;;  %v19652_v33 = vpop.f32.mrb[28].mxu1  ;;  %v6514_v6 = vrot.slane %v6500_v58, %v17791_v41 }
 0x6bb   : > { %v16166_v8 = vpop.f32.mrb[29].mxu1 }
 0x6bc   : > { %v4906_v17 = vpack.c.bf16 %v3706_v50, %v3706_v50  ;;  %v5584_v55 = vpop.f32.mrb[30].mxu1 }
 0x6bd   : > { %v16167_v3 = vpop.f32.mrb[31].mxu1 }
 0x6be   : > { %16255 = vmatmul.mubr.msk.bf16.vlgmr.msra.gmra.mrb[64].mxu0 %vm2636_vm4, %v4906_v17 }
 0x6bf   : > { %16265 = vmatpush3.bf16.msra.mxu0 %v6327_v44  ;;  %16266 = vmatprep.mubr.msk.bf16.mxu0 %vm17395_vm10, %v22448_v35 }
 0x6c1   : > { %v17056_v53 = vpop.eup %17055 }
 0x6c2   : > { %v3708_v29 = vmul.f32 %v17056_v53, %v19350_v11 }
 0x6c4   : > { %v4908_v57 = vpack.c.bf16 %v3708_v29, %v3708_v29 }
 0x6c6   : > { %16267 = vmatmul.mubr.msk.bf16.vlgmr.msra.gmra.mrb[68].mxu0 %vm2636_vm4, %v4908_v57 }
 0x6ef   : > { %v19660_v37 = vpop.f32.mrb[32].mxu1 }
 0x6f0   : > { %v6635_v51 = vcombine.low %v19652_v33, %v19660_v37  ;;  %v6636_v24 = vcombine.high %v19652_v33, %v19660_v37  ;;  %v16178_v54 = vpop.f32.mrb[33].mxu1 }
 0x6f1   : > { %v5676_v25 = vpop.f32.mrb[34].mxu1 }
 0x6f2   : > { %v16179_v56 = vpop.f32.mrb[35].mxu1  ;;  %v6650_v18 = vrot.slane %v6636_v24, %v17791_v41 }
 0x6f7   : > { %v19666_v31 = vpop.f32.mrb[36].mxu1 }
 0x6f8   : > { %v16190_v62 = vpop.f32.mrb[37].mxu1 }
 0x6f9   : > { %v5259_v45 = vpop.f32.mrb[20].mxu0  ;;  %v5768_v43 = vpop.f32.mrb[38].mxu1 }
 0x6fa   : > { %v6483_v11 = vcombine.low %v19570_v15, %v5259_v45  ;;  %v6484_v47 = vcombine.high %v19570_v15, %v5259_v45  ;;  %v16124_v19 = vpop.f32.mrb[21].mxu0  ;;  %v16191_v26 = vpop.f32.mrb[39].mxu1 }
 0x6fb   : > { %v5262_v39 = vpop.f32.mrb[22].mxu0 }
 0x6fc   : > { %v6491_v50 = vrot.slane %v6483_v11, %v17791_v41  ;;  %v6498_v63 = vrot.slane %v6484_v47, %v17791_v41  ;;  %v16125_v17 = vpop.f32.mrb[23].mxu0 }
 0x6fe   : > { %v6515_v8 = vcombine.low %v6491_v50, %v6507_v40  ;;  %v6516_v15 = vcombine.high %v6491_v50, %v6507_v40  ;;  %v6531_v55 = vcombine.low %v6498_v63, %v6514_v6  ;;  %v6532_v44 = vcombine.high %v6498_v63, %v6514_v6 }
 0x6ff   : > { %v19680_v3 = vpop.f32.mrb[40].mxu1 }
 0x700   : > { %v6523_v53 = vrot.slane %v6515_v8, %v17794_v48  ;;  %v6530_v5 = vrot.slane %v6516_v15, %v17794_v48  ;;  %v6539_v29 = vrot.slane %v6531_v55, %v17794_v48  ;;  %v6546_v9 = vrot.slane %v6532_v44, %v17794_v48  ;;  %v16202_v34 = vpop.f32.mrb[41].mxu1 }
 0x701   : > { %v19686_v58 = vpop.f32.mrb[24].mxu0  ;;  %v5860_v25 = vpop.f32.mrb[42].mxu1 }
 0x702   : > { %v7027_v56 = vcombine.low %v6523_v53, %v6530_v5  ;;  %v15708_v62 = vcombine.high %v6523_v53, %v6530_v5  ;;  %v7043_v45 = vcombine.low %v6539_v29, %v6546_v9  ;;  %v15709_v43 = vcombine.high %v6539_v29, %v6546_v9  ;;  %v16136_v11 = vpop.f32.mrb[25].mxu0  ;;  %v16203_v47 = vpop.f32.mrb[43].mxu1 }
 0x703   : > { %v5354_v19 = vpop.f32.mrb[26].mxu0 }
 0x704   : > { %v7034_v26 = vrot.slane %v7027_v56, %v17791_v41  ;;  %v7042_v39 = vrot.slane %v15708_v62, %v17791_v41  ;;  %v7050_v40 = vrot.slane %v7043_v45, %v17791_v41  ;;  %v7058_v6 = vrot.slane %v15709_v43, %v17791_v41  ;;  %v16137_v50 = vpop.f32.mrb[27].mxu0 }
 0x706   : > { %v7059_v63 = vcombine.low %v7034_v26, %v7042_v39  ;;  %v7075_v17 = vcombine.low %v7050_v40, %v7058_v6  ;;  %v7060_v8 = vcombine.high %v7034_v26, %v7042_v39  ;;  %v7076_v15 = vcombine.high %v7050_v40, %v7058_v6 }
 0x707   : > { %v19696_v55 = vpop.f32.mrb[44].mxu1 }
 0x708   : > { %v16214_v44 = vpop.f32.mrb[45].mxu1  ;;  %v19699_v53 = vrot.slane %v7059_v63, %v17794_v48  ;;  %v19702_v5 = vrot.slane %v7075_v17, %v17794_v48  ;;  %v7074_v29 = vrot.slane %v7060_v8, %v17794_v48  ;;  %v7090_v9 = vrot.slane %v7076_v15, %v17794_v48 }
 0x709   : > { %v5952_v34 = vpop.f32.mrb[46].mxu1 }
 0x70a   : > { %v16215_v25 = vpop.f32.mrb[47].mxu1  ;;  %v7092_v56 = vcombine.high %v19699_v53, %v19702_v5  ;;  %v7093_v62 = vcombine.low %v7074_v29, %v7090_v9  ;;  %v7094_v45 = vcombine.high %v7074_v29, %v7090_v9 }
 0x70c   : > { %v19713_v11 = vpack.i.bf16 %v7092_v56, %v7024_v2  ;;  %v19718_v47 = vpack.i.bf16 %v7093_v62, %v7025_v52  ;;  %v19723_v19 = vpack.i.bf16 %v7094_v45, %v7026_v7 }
 0x70f   : > { %v19725_v26 = vpop.f32.mrb[48].mxu1 }
 0x710   : > { %v16226_v2 = vpop.f32.mrb[49].mxu1 }
 0x711   : > { %v6044_v6 = vpop.f32.mrb[50].mxu1 }
 0x712   : > { %v16227_v50 = vpop.f32.mrb[51].mxu1 }
 0x717   : > { %v19731_v63 = vpop.f32.mrb[52].mxu1 }
 0x718   : > { %v16238_v52 = vpop.f32.mrb[53].mxu1 }
 0x719   : > { %v6136_v17 = vpop.f32.mrb[54].mxu1  ;;  %v6575_v52 = vrot.slane %v6567_v46, %v17791_v41 }
 0x71a   : > { %v16239_v8 = vpop.f32.mrb[55].mxu1  ;;  %v6582_v17 = vrot.slane %v6568_v23, %v17791_v41 }
 0x71f   : > { %v19733_v15 = vpop.f32.mrb[56].mxu1 }
 0x720   : > { %v16250_v7 = vpop.f32.mrb[57].mxu1 }
 0x721   : > { %v6228_v44 = vpop.f32.mrb[58].mxu1 }
 0x722   : > { %v16251_v29 = vpop.f32.mrb[59].mxu1 }
 0x727   : > { %v19739_v9 = vpop.f32.mrb[60].mxu1 }
 0x728   : > { %v5443_v34 = vpop.f32.mrb[28].mxu0  ;;  %v16262_v25 = vpop.f32.mrb[61].mxu1 }
 0x729   : > { %v6551_v56 = vcombine.low %v19686_v58, %v5443_v34  ;;  %v6552_v62 = vcombine.high %v19686_v58, %v5443_v34  ;;  %v16148_v45 = vpop.f32.mrb[29].mxu0  ;;  %v6320_v2 = vpop.f32.mrb[62].mxu1 }
 0x72a   : > { %v5446_v6 = vpop.f32.mrb[30].mxu0  ;;  %v16263_v50 = vpop.f32.mrb[63].mxu1 }
 0x72b   : > { %v6559_v8 = vrot.slane %v6551_v56, %v17791_v41  ;;  %v6566_v7 = vrot.slane %v6552_v62, %v17791_v41  ;;  %v16149_v44 = vpop.f32.mrb[31].mxu0 }
 0x72d   : > { %v6583_v58 = vcombine.low %v6559_v8, %v6575_v52  ;;  %v6584_v29 = vcombine.high %v6559_v8, %v6575_v52  ;;  %v6599_v34 = vcombine.low %v6566_v7, %v6582_v17  ;;  %v6600_v25 = vcombine.high %v6566_v7, %v6582_v17 }
 0x72f   : > { %v6591_v45 = vrot.slane %v6583_v58, %v17794_v48  ;;  %v6598_v2 = vrot.slane %v6584_v29, %v17794_v48  ;;  %v6607_v46 = vrot.slane %v6599_v34, %v17794_v48  ;;  %v6614_v6 = vrot.slane %v6600_v25, %v17794_v48 }
 0x730   : > { %v19757_v56 = vpop.f32.mrb[64].mxu1 }
 0x731   : > { %v7095_v50 = vcombine.low %v6591_v45, %v6598_v2  ;;  %v15710_v42 = vcombine.high %v6591_v45, %v6598_v2  ;;  %v7111_v16 = vcombine.low %v6607_v46, %v6614_v6  ;;  %v15711_v23 = vcombine.high %v6607_v46, %v6614_v6  ;;  %v16274_v17 = vpop.f32.mrb[65].mxu1 }
 0x732   : > { %v6412_v29 = vpop.f32.mrb[66].mxu1  ;;  %v19770_v17 = vld [vmem:[%s22511_s27] ss:$0 sm:$0xff]  ;;  %s22512_s27 = smov 122  }
 0x733   : > { %v7102_v8 = vrot.slane %v7095_v50, %v17791_v41  ;;  %v7110_v7 = vrot.slane %v15710_v42, %v17791_v41  ;;  %v7118_v44 = vrot.slane %v7111_v16, %v17791_v41  ;;  %v7126_v58 = vrot.slane %v15711_v23, %v17791_v41  ;;  %v16275_v34 = vpop.f32.mrb[67].mxu1 }
 0x734   : > { %v5535_v25 = vpop.f32.mrb[32].mxu0 }
 0x735   : > { %v7127_v45 = vcombine.low %v7102_v8, %v7110_v7  ;;  %v7143_v2 = vcombine.low %v7118_v44, %v7126_v58  ;;  %v7128_v46 = vcombine.high %v7102_v8, %v7110_v7  ;;  %v7144_v6 = vcombine.high %v7118_v44, %v7126_v58  ;;  %v16160_v27 = vpop.f32.mrb[33].mxu0 }
 0x736   : > { %v5538_v43 = vpop.f32.mrb[34].mxu0 }
 0x737   : > { %v19773_v50 = vrot.slane %v7127_v45, %v17794_v48  ;;  %v19776_v42 = vrot.slane %v7143_v2, %v17794_v48  ;;  %v19779_v16 = vrot.slane %v7128_v46, %v17794_v48  ;;  %v19782_v23 = vrot.slane %v7144_v6, %v17794_v48  ;;  %v16161_v8 = vpop.f32.mrb[35].mxu0 }
 0x738   : > { %v16294_v27 = vpop.f32.mrb[68].mxu1 }
 0x739   : > { %v19793_v29 = vadd.f32 %v16294_v27, %v19770_v17  ;;  %v7940_v34 = vpop.f32.mrb[69].mxu1  ;;  %v6643_v27 = vrot.slane %v6635_v51, %v17791_v41 }
 0x73a   : > { %v16295_v45 = vpop.f32.mrb[70].mxu1  ;;  %v19800_v6 = vadd.f32 %v19770_v17, %v7940_v34 }
 0x73b   : > { %8007 = vrot.lane.b32.xlu0 %v19793_v29, %s17375_s30  ;;  %7983 = vrot.lane.b32.xlu1 %v19793_v29, %s17376_s6  ;;  %v7943_v2 = vpop.f32.mrb[71].mxu1  ;;  %v19819_v33 = vadd.f32 %v16295_v45, %v19770_v17 }
 0x73c   : > { %v5627_v46 = vpop.f32.mrb[36].mxu0  ;;  %v19840_v57 = vadd.f32 %v19770_v17, %v7943_v2 }
 0x73d   : > { %v6619_v8 = vcombine.low %v5535_v25, %v5627_v46  ;;  %v6620_v52 = vcombine.high %v5535_v25, %v5627_v46  ;;  %v16172_v62 = vpop.f32.mrb[37].mxu0 }
 0x73e   : > { %v5630_v58 = vpop.f32.mrb[38].mxu0 }
 0x73f   : > { %v6627_v60 = vrot.slane %v6619_v8, %v17791_v41  ;;  %v6634_v40 = vrot.slane %v6620_v52, %v17791_v41  ;;  %8031 = vrot.lane.b32.xlu0 %v19793_v29, %s22512_s27  ;;  %7979 = vrot.lane.b32.xlu1 %v19800_v6, %s17376_s6  ;;  %v16173_v62 = vpop.f32.mrb[39].mxu0 }
 0x740   : > { %v16298_v25 = vpop.f32.mrb[72].mxu1 }
 0x741   : > { %v6651_v34 = vcombine.low %v6627_v60, %v6643_v27  ;;  %v6652_v51 = vcombine.high %v6627_v60, %v6643_v27  ;;  %v6667_v58 = vcombine.low %v6634_v40, %v6650_v18  ;;  %v6668_v46 = vcombine.high %v6634_v40, %v6650_v18  ;;  %v19816_v39 = vpop.f32.mrb[73].mxu1 }
 0x742   : > { %v19821_v37 = vpop.f32.mrb[74].mxu1 }
 0x743   : > { %v6659_v24 = vrot.slane %v6651_v34, %v17794_v48  ;;  %v6666_v52 = vrot.slane %v6652_v51, %v17794_v48  ;;  %v6675_v8 = vrot.slane %v6667_v58, %v17794_v48  ;;  %v6682_v62 = vrot.slane %v6668_v46, %v17794_v48  ;;  %8003 = vrot.lane.b32.xlu0 %v19800_v6, %s17375_s30  ;;  %v19829_v60 = vpop.f32.mrb[75].mxu1 }
 0x744   : > { %7985 = vrot.lane.b32.xlu1 %v19819_v33, %s17376_s6  ;;  %v5719_v40 = vpop.f32.mrb[40].mxu0 }
 0x745   : > { %v7163_v18 = vcombine.low %v6659_v24, %v6666_v52  ;;  %v15712_v45 = vcombine.high %v6659_v24, %v6666_v52  ;;  %v7179_v27 = vcombine.low %v6675_v8, %v6682_v62  ;;  %v15713_v44 = vcombine.high %v6675_v8, %v6682_v62  ;;  %v16184_v34 = vpop.f32.mrb[41].mxu0 }
 0x746   : > { %v5722_v7 = vpop.f32.mrb[42].mxu0  ;;  %v19845_v62 = vadd.f32 %v16298_v25, %v19770_v17 }
 0x747   : > { %v7170_v51 = vrot.slane %v7163_v18, %v17791_v41  ;;  %v7178_v58 = vrot.slane %v15712_v45, %v17791_v41  ;;  %v7186_v46 = vrot.slane %v7179_v27, %v17791_v41  ;;  %v7194_v43 = vrot.slane %v15713_v44, %v17791_v41  ;;  %8027 = vrot.lane.b32.xlu0 %v19800_v6, %s22512_s27  ;;  %v16185_v54 = vpop.f32.mrb[43].mxu0 }
 0x748   : > { %8009 = vrot.lane.b32.xlu1 %v19819_v33, %s17375_s30 }
 0x749   : > { %v7195_v24 = vcombine.low %v7170_v51, %v7178_v58  ;;  %v7211_v7 = vcombine.low %v7186_v46, %v7194_v43  ;;  %v7196_v52 = vcombine.high %v7170_v51, %v7178_v58  ;;  %v7212_v8 = vcombine.high %v7186_v46, %v7194_v43 }
 0x74a   : > { %v22513_v58 = vcombine.low %v19666_v31, %v19680_v3 }
 0x74b   : > { %7981 = vrot.lane.b32.xlu0 %v19840_v57, %s17376_s6  ;;  %v19850_v44 = vrot.slane %v7195_v24, %v17794_v48  ;;  %v19853_v54 = vrot.slane %v7211_v7, %v17794_v48  ;;  %v7210_v2 = vrot.slane %v7196_v52, %v17794_v48  ;;  %v7226_v18 = vrot.slane %v7212_v8, %v17794_v48 }
 0x74c   : > { %8033 = vrot.lane.b32.xlu1 %v19819_v33, %s22512_s27  ;;  %v5811_v43 = vpop.f32.mrb[44].mxu0  ;;  %v6711_v46 = vrot.slane %v22513_v58, %v17791_v41  ;;  %v22514_v24 = vcombine.high %v19666_v31, %v19680_v3  ;;  %v22515_v58 = vcombine.high %v19773_v50, %v19776_v42  ;;  %v22516_v31 = vcombine.low %v19779_v16, %v19782_v23 }
 0x74d   : > { %v6687_v45 = vcombine.low %v5719_v40, %v5811_v43  ;;  %v6688_v25 = vcombine.high %v5719_v40, %v5811_v43  ;;  %v16196_v27 = vpop.f32.mrb[45].mxu0  ;;  %v7228_v34 = vcombine.high %v19850_v44, %v19853_v54  ;;  %v7229_v51 = vcombine.low %v7210_v2, %v7226_v18 }
 0x74e   : > { %v6718_v7 = vrot.slane %v22514_v24, %v17791_v41  ;;  %v5814_v52 = vpop.f32.mrb[46].mxu0  ;;  %v7230_v8 = vcombine.high %v7210_v2, %v7226_v18  ;;  %v22517_v2 = vcombine.high %v19779_v16, %v19782_v23  ;;  %v19900_v16 = vadd.f32 %v19770_v17, %v19816_v39 }
 0x74f   : > { %v6695_v43 = vrot.slane %v6687_v45, %v17791_v41  ;;  %v6702_v27 = vrot.slane %v6688_v25, %v17791_v41  ;;  %7991 = vrot.lane.b32.xlu0 %v19845_v62, %s17376_s6  ;;  %v16197_v30 = vpop.f32.mrb[47].mxu0  ;;  %v19878_v13 = vpack.i.bf16 %v7228_v34, %v22515_v58  ;;  %v19883_v3 = vpack.i.bf16 %v7229_v51, %v22516_v31 }
 0x750   : > { %8005 = vrot.lane.b32.xlu1 %v19840_v57, %s17375_s30  ;;  %v19890_v18 = vpack.i.bf16 %v7230_v8, %v22517_v2  ;;  %v19906_v31 = vadd.f32 %v19821_v37, %v19770_v17 }
 0x751   : > { %v6719_v45 = vcombine.low %v6695_v43, %v6711_v46  ;;  %v6720_v30 = vcombine.high %v6695_v43, %v6711_v46  ;;  %v6735_v25 = vcombine.low %v6702_v27, %v6718_v7  ;;  %v6736_v24 = vcombine.high %v6702_v27, %v6718_v7 }
 0x753   : > { %v6727_v34 = vrot.slane %v6719_v45, %v17794_v48  ;;  %v6734_v52 = vrot.slane %v6720_v30, %v17794_v48  ;;  %v6743_v58 = vrot.slane %v6735_v25, %v17794_v48  ;;  %v6750_v51 = vrot.slane %v6736_v24, %v17794_v48  ;;  %8015 = vrot.lane.b32.xlu0 %v19845_v62, %s17375_s30 }
 0x754   : > { %8029 = vrot.lane.b32.xlu1 %v19840_v57, %s22512_s27  ;;  %v5903_v23 = vpop.f32.mrb[48].mxu0 }
 0x755   : > { %v7231_v46 = vcombine.low %v6727_v34, %v6734_v52  ;;  %v15714_v7 = vcombine.high %v6727_v34, %v6734_v52  ;;  %v7247_v8 = vcombine.low %v6743_v58, %v6750_v51  ;;  %v15715_v43 = vcombine.high %v6743_v58, %v6750_v51  ;;  %v16208_v27 = vpop.f32.mrb[49].mxu0 }
 0x756   : > { %v5906_v2 = vpop.f32.mrb[50].mxu0 }
 0x757   : > { %v7238_v45 = vrot.slane %v7231_v46, %v17791_v41  ;;  %v7246_v30 = vrot.slane %v15714_v7, %v17791_v41  ;;  %v7254_v39 = vrot.slane %v7247_v8, %v17791_v41  ;;  %v7262_v25 = vrot.slane %v15715_v43, %v17791_v41  ;;  %7987 = vrot.lane.b32.xlu0 %v19900_v16, %s17376_s6  ;;  %v16209_v24 = vpop.f32.mrb[51].mxu0 }
 0x758   : > { %7993 = vrot.lane.b32.xlu1 %v19906_v31, %s17376_s6 }
 0x759   : > { %v7263_v34 = vcombine.low %v7238_v45, %v7246_v30  ;;  %v7279_v52 = vcombine.low %v7254_v39, %v7262_v25  ;;  %v7264_v37 = vcombine.high %v7238_v45, %v7246_v30  ;;  %v7280_v58 = vcombine.high %v7254_v39, %v7262_v25 }
 0x75a   : > { %v19938_v25 = vadd.f32 %v19770_v17, %v19829_v60 }
 0x75b   : > { %8011 = vrot.lane.b32.xlu0 %v19900_v16, %s17375_s30  ;;  %v19919_v51 = vrot.slane %v7263_v34, %v17794_v48  ;;  %v19922_v46 = vrot.slane %v7279_v52, %v17794_v48  ;;  %v19925_v7 = vrot.slane %v7264_v37, %v17794_v48  ;;  %v19928_v8 = vrot.slane %v7280_v58, %v17794_v48 }
 0x75c   : > { %8017 = vrot.lane.b32.xlu1 %v19906_v31, %s17375_s30  ;;  %v5995_v43 = vpop.f32.mrb[52].mxu0  ;;  %v22519_v58 = vcombine.high %v19696_v55, %v19725_v26 }
 0x75d   : > { %v6755_v27 = vcombine.low %v5903_v23, %v5995_v43  ;;  %v6756_v2 = vcombine.high %v5903_v23, %v5995_v43  ;;  %v16220_v45 = vpop.f32.mrb[53].mxu0  ;;  %v7296_v30 = vcombine.high %v19919_v51, %v19922_v46  ;;  %v22518_v23 = vcombine.low %v19696_v55, %v19725_v26 }
 0x75e   : > { %v5998_v24 = vpop.f32.mrb[54].mxu0  ;;  %v6786_v43 = vrot.slane %v22519_v58, %v17791_v41 }
 0x75f   : > { %v6779_v37 = vrot.slane %v22518_v23, %v17791_v41  ;;  %v6763_v17 = vrot.slane %v6755_v27, %v17791_v41  ;;  %v6770_v60 = vrot.slane %v6756_v2, %v17791_v41  ;;  %8035 = vrot.lane.b32.xlu0 %v19900_v16, %s22512_s27  ;;  %v16221_v45 = vpop.f32.mrb[55].mxu0 }
 0x760   : > { %7989 = vrot.lane.b32.xlu1 %v19938_v25, %s17376_s6  ;;  %s22362_s6 = smov 24  }
 0x761   : > { %v6787_v24 = vcombine.low %v6763_v17, %v6779_v37  ;;  %v6788_v52 = vcombine.high %v6763_v17, %v6779_v37  ;;  %v6803_v40 = vcombine.low %v6770_v60, %v6786_v43  ;;  %v6804_v23 = vcombine.high %v6770_v60, %v6786_v43 }
 0x763   : > { %v6795_v34 = vrot.slane %v6787_v24, %v17794_v48  ;;  %v6802_v55 = vrot.slane %v6788_v52, %v17794_v48  ;;  %v6811_v26 = vrot.slane %v6803_v40, %v17794_v48  ;;  %v6818_v27 = vrot.slane %v6804_v23, %v17794_v48  ;;  %8039 = vrot.lane.b32.xlu0 %v19845_v62, %s22512_s27 }
 0x764   : > { %8013 = vrot.lane.b32.xlu1 %v19938_v25, %s17375_s30  ;;  %v6087_v2 = vpop.f32.mrb[56].mxu0  ;;  %s17396_s30 = smov 16  }
 0x765   : > { %v7299_v58 = vcombine.low %v6795_v34, %v6802_v55  ;;  %v15716_v45 = vcombine.high %v6795_v34, %v6802_v55  ;;  %v7315_v37 = vcombine.low %v6811_v26, %v6818_v27  ;;  %v15717_v17 = vcombine.high %v6811_v26, %v6818_v27  ;;  %v16232_v43 = vpop.f32.mrb[57].mxu0 }
 0x766   : > { %v6090_v60 = vpop.f32.mrb[58].mxu0 }
 0x767   : > { %v7306_v24 = vrot.slane %v7299_v58, %v17791_v41  ;;  %v7314_v52 = vrot.slane %v15716_v45, %v17791_v41  ;;  %v7322_v40 = vrot.slane %v7315_v37, %v17791_v41  ;;  %v7330_v23 = vrot.slane %v15717_v17, %v17791_v41  ;;  %16716 = vrot.lane.b32.xlu0 %v19713_v11, %s22384_s17  ;;  %v16233_v39 = vpop.f32.mrb[59].mxu0 }
 0x768   : > { %8037 = vrot.lane.b32.xlu1 %v19938_v25, %s22512_s27 }
 0x769   : > { %v7331_v34 = vcombine.low %v7306_v24, %v7314_v52  ;;  %v7347_v55 = vcombine.low %v7322_v40, %v7330_v23  ;;  %v7332_v26 = vcombine.high %v7306_v24, %v7314_v52  ;;  %v7348_v27 = vcombine.high %v7322_v40, %v7330_v23 }
 0x76a   : > { %v22520_v52 = vcombine.low %v19731_v63, %v19733_v15  ;;  %v22521_v23 = vcombine.high %v19731_v63, %v19733_v15  ;;  %v22522_v63 = vcombine.low %v19925_v7, %v19928_v8 }
 0x76b   : > { %16726 = vrot.lane.b32.xlu0 %v19718_v47, %s17396_s30  ;;  %v19977_v58 = vrot.slane %v7331_v34, %v17794_v48  ;;  %v19980_v45 = vrot.slane %v7347_v55, %v17794_v48  ;;  %v7346_v11 = vrot.slane %v7332_v26, %v17794_v48  ;;  %v7362_v39 = vrot.slane %v7348_v27, %v17794_v48 }
 0x76c   : > { %8041 = vrot.lane.b32.xlu1 %v19906_v31, %s22512_s27  ;;  %v6179_v37 = vpop.f32.mrb[60].mxu0  ;;  %v6847_v40 = vrot.slane %v22520_v52, %v17791_v41  ;;  %v6854_v34 = vrot.slane %v22521_v23, %v17791_v41  ;;  %s22545_s27 = smov 12  }
 0x76d   : > { %v6823_v17 = vcombine.low %v6087_v2, %v6179_v37  ;;  %v6824_v43 = vcombine.high %v6087_v2, %v6179_v37  ;;  %v16244_v60 = vpop.f32.mrb[61].mxu0  ;;  %v7364_v47 = vcombine.high %v19977_v58, %v19980_v45  ;;  %v7365_v24 = vcombine.low %v7346_v11, %v7362_v39 }
 0x76e   : > { %v6182_v55 = vpop.f32.mrb[62].mxu0  ;;  %v7366_v26 = vcombine.high %v7346_v11, %v7362_v39  ;;  %v22523_v11 = vcombine.high %v19925_v7, %v19928_v8 }
 0x76f   : > { %v6831_v27 = vrot.slane %v6823_v17, %v17791_v41  ;;  %v6838_v37 = vrot.slane %v6824_v43, %v17791_v41  ;;  %16736 = vrot.lane.b32.xlu0 %v19723_v19, %s22362_s6  ;;  %v16245_v60 = vpop.f32.mrb[63].mxu0  ;;  %v16745_v52 = vpack.i.bf16 %v7364_v47, %v7296_v30  ;;  %v16755_v15 = vpack.i.bf16 %v7365_v24, %v22522_v63 }
 0x770   : > { %16721 = vrot.lane.b32.xlu1 %v19878_v13, %s22384_s17  ;;  %v16765_v39 = vpack.i.bf16 %v7366_v26, %v22523_v11 }
 0x771   : > { %v6855_v17 = vcombine.low %v6831_v27, %v6847_v40  ;;  %v6856_v43 = vcombine.high %v6831_v27, %v6847_v40  ;;  %v6871_v23 = vcombine.low %v6838_v37, %v6854_v34  ;;  %v6872_v19 = vcombine.high %v6838_v37, %v6854_v34 }
 0x773   : > { %v6863_v55 = vrot.slane %v6855_v17, %v17794_v48  ;;  %v6870_v60 = vrot.slane %v6856_v43, %v17794_v48  ;;  %v6879_v30 = vrot.slane %v6871_v23, %v17794_v48  ;;  %v6886_v47 = vrot.slane %v6872_v19, %v17794_v48  ;;  %16746 = vrot.lane.b32.xlu0 %v16745_v52, %s22384_s17 }
 0x774   : > { %16731 = vrot.lane.b32.xlu1 %v19883_v3, %s17396_s30 }
 0x775   : > { %v7367_v13 = vcombine.low %v6863_v55, %v6870_v60  ;;  %v15718_v7 = vcombine.high %v6863_v55, %v6870_v60  ;;  %v7383_v8 = vcombine.low %v6879_v30, %v6886_v47  ;;  %v15719_v24 = vcombine.high %v6879_v30, %v6886_v47  ;;  %v16919_v60 = vld [vmem:[%s22262_s11 + $0x8] sm:$0xff]  }
 0x777   : > { %v7374_v40 = vrot.slane %v7367_v13, %v17791_v41  ;;  %v7382_v34 = vrot.slane %v15718_v7, %v17791_v41  ;;  %v7390_v26 = vrot.slane %v7383_v8, %v17791_v41  ;;  %v7398_v27 = vrot.slane %v15719_v24, %v17791_v41  ;;  %16756 = vrot.lane.b32.xlu0 %v16755_v15, %s17396_s30 }
 0x778   : > { %16741 = vrot.lane.b32.xlu1 %v19890_v18, %s22362_s6 }
 0x779   : > { %v7399_v37 = vcombine.low %v7374_v40, %v7382_v34  ;;  %v7415_v52 = vcombine.low %v7390_v26, %v7398_v27  ;;  %v7400_v3 = vcombine.high %v7374_v40, %v7382_v34  ;;  %v7416_v63 = vcombine.high %v7390_v26, %v7398_v27 }
 0x77a   : > { %v22526_v27 = vcombine.low %v19739_v9, %v19757_v56 }
 0x77b   : > { %16766 = vrot.lane.b32.xlu0 %v16765_v39, %s22362_s6  ;;  %v20029_v11 = vrot.slane %v7399_v37, %v17794_v48  ;;  %v20032_v17 = vrot.slane %v7415_v52, %v17794_v48  ;;  %v7414_v43 = vrot.slane %v7400_v3, %v17794_v48  ;;  %v7430_v23 = vrot.slane %v7416_v63, %v17794_v48  ;;  %v16918_v39 = vld [vmem:[%s22262_s11] sm:$0xff]  }
 0x77c   : > { %16276 = vmatprep.subr.bf16.mxu0 %v16918_v39  ;;  %v6915_v37 = vrot.slane %v22526_v27, %v17791_v41  ;;  %v22527_v52 = vcombine.high %v19739_v9, %v19757_v56 }
 0x77d   : > { %22524 = vst [vmem:[#allocation50_spill] sm:$0xff] %v20029_v11  ;;  %22525 = vst [vmem:[#allocation20_spill] sm:$0xff] %v20032_v17  ;;  %v7432_v15 = vcombine.high %v20029_v11, %v20032_v17  ;;  %v7433_v18 = vcombine.low %v7414_v43, %v7430_v23  ;;  %v7434_v19 = vcombine.high %v7414_v43, %v7430_v23  ;;  %16277 = vmatpush3.bf16.msra.mxu0 %v16918_v39 }
 0x77e   : > { %16278 = vmatprep.subr.bf16.mxu0 %v16919_v60  ;;  %v6922_v3 = vrot.slane %v22527_v52, %v17791_v41 }
 0x781   : > { %16279 = vmatpush3.bf16.msra.mxu0 %v16919_v60 }
 0x791   : > { %v6271_v30 = vpop.f32.mrb[64].mxu0 }
 0x792   : > { %v16256_v47 = vpop.f32.mrb[65].mxu0 }
 0x793   : > { %v6274_v13 = vpop.f32.mrb[66].mxu0 }
 0x794   : > { %v16257_v7 = vpop.f32.mrb[67].mxu0 }
 0x799   : > { %v6363_v8 = vpop.f32.mrb[68].mxu0 }
 0x79a   : > { %v6891_v24 = vcombine.low %v6271_v30, %v6363_v8  ;;  %v6892_v40 = vcombine.high %v6271_v30, %v6363_v8  ;;  %v16268_v34 = vpop.f32.mrb[69].mxu0 }
 0x79b   : > { %v6366_v26 = vpop.f32.mrb[70].mxu0 }
 0x79c   : > { %v6899_v63 = vrot.slane %v6891_v24, %v17791_v41  ;;  %v6906_v43 = vrot.slane %v6892_v40, %v17791_v41  ;;  %v16269_v23 = vpop.f32.mrb[71].mxu0 }
 0x79e   : > { %v6923_v39 = vcombine.low %v6899_v63, %v6915_v37  ;;  %v6924_v60 = vcombine.high %v6899_v63, %v6915_v37  ;;  %v6939_v30 = vcombine.low %v6906_v43, %v6922_v3  ;;  %v6940_v47 = vcombine.high %v6906_v43, %v6922_v3 }
 0x7a0   : > { %v6931_v13 = vrot.slane %v6923_v39, %v17794_v48  ;;  %v6938_v7 = vrot.slane %v6924_v60, %v17794_v48  ;;  %v6947_v8 = vrot.slane %v6939_v30, %v17794_v48  ;;  %v6954_v34 = vrot.slane %v6940_v47, %v17794_v48 }
 0x7a2   : > { %v7435_v26 = vcombine.low %v6931_v13, %v6938_v7  ;;  %v15720_v9 = vcombine.high %v6931_v13, %v6938_v7  ;;  %v7451_v56 = vcombine.low %v6947_v8, %v6954_v34  ;;  %v15721_v27 = vcombine.high %v6947_v8, %v6954_v34 }
 0x7a4   : > { %v7442_v24 = vrot.slane %v7435_v26, %v17791_v41  ;;  %v7450_v40 = vrot.slane %v15720_v9, %v17791_v41  ;;  %v7458_v37 = vrot.slane %v7451_v56, %v17791_v41  ;;  %v7466_v52 = vrot.slane %v15721_v27, %v17791_v41 }
 0x7a6   : > { %v7467_v3 = vcombine.low %v7442_v24, %v7450_v40  ;;  %v7483_v63 = vcombine.low %v7458_v37, %v7466_v52  ;;  %v7468_v43 = vcombine.high %v7442_v24, %v7450_v40  ;;  %v7484_v23 = vcombine.high %v7458_v37, %v7466_v52 }
 0x7a8   : > { %v20065_v39 = vrot.slane %v7467_v3, %v17794_v48  ;;  %v20068_v60 = vrot.slane %v7483_v63, %v17794_v48  ;;  %v7482_v30 = vrot.slane %v7468_v43, %v17794_v48  ;;  %v7498_v47 = vrot.slane %v7484_v23, %v17794_v48 }
 0x7aa   : > { %22528 = vst [vmem:[#allocation41_spill] sm:$0xff] %v20065_v39  ;;  %22529 = vst [vmem:[#allocation40_spill] sm:$0xff] %v20068_v60  ;;  %v7500_v13 = vcombine.high %v20065_v39, %v20068_v60  ;;  %v7501_v7 = vcombine.low %v7482_v30, %v7498_v47  ;;  %v7502_v8 = vcombine.high %v7482_v30, %v7498_v47 }
 0x7ac   : > { %v16750_v26 = vpack.i.bf16 %v7500_v13, %v7432_v15  ;;  %v16760_v9 = vpack.i.bf16 %v7501_v7, %v7433_v18  ;;  %v16770_v56 = vpack.i.bf16 %v7502_v8, %v7434_v19 }
 0x7ad   : > { %v7984_v27 = vpop.permute.xlu1 %7983  ;;  %v8008_v24 = vpop.permute.xlu0 %8007 }
 0x7ae   : > { %16751 = vrot.lane.b32.xlu1 %v16750_v26, %s22384_s17  ;;  %v8187_v40 = vcombine.low %v19793_v29, %v8008_v24  ;;  %v8188_v37 = vcombine.high %v19793_v29, %v8008_v24 }
 0x7b0   : > { %v8195_v23 = vrot.slane %v8187_v40, %v17791_v41  ;;  %v8202_v15 = vrot.slane %v8188_v37, %v17791_v41 }
 0x7b1   : > { %v7980_v52 = vpop.permute.xlu1 %7979  ;;  %v8032_v3 = vpop.permute.xlu0 %8031 }
 0x7b2   : > { %16761 = vrot.lane.b32.xlu1 %v16760_v9, %s17396_s30  ;;  %v8203_v63 = vcombine.low %v7984_v27, %v8032_v3  ;;  %v8204_v43 = vcombine.high %v7984_v27, %v8032_v3 }
 0x7b4   : > { %v8211_v18 = vrot.slane %v8203_v63, %v17791_v41  ;;  %v8218_v19 = vrot.slane %v8204_v43, %v17791_v41 }
 0x7b5   : > { %v8004_v30 = vpop.permute.xlu0 %8003 }
 0x7b6   : > { %16771 = vrot.lane.b32.xlu1 %v16770_v56, %s22362_s6  ;;  %v8219_v47 = vcombine.low %v8195_v23, %v8211_v18  ;;  %v8220_v13 = vcombine.high %v8195_v23, %v8211_v18  ;;  %v8235_v29 = vcombine.low %v8202_v15, %v8218_v19  ;;  %v8236_v7 = vcombine.high %v8202_v15, %v8218_v19  ;;  %v7986_v8 = vpop.permute.xlu1 %7985  ;;  %s22546_s6 = smov 14  }
 0x7b7   : > { %v8051_v40 = vcombine.low %v19800_v6, %v8004_v30  ;;  %v8052_v37 = vcombine.high %v19800_v6, %v8004_v30 }
 0x7b8   : > { %v8227_v26 = vrot.slane %v8219_v47, %v17794_v48  ;;  %v8234_v9 = vrot.slane %v8220_v13, %v17794_v48  ;;  %v8243_v27 = vrot.slane %v8235_v29, %v17794_v48  ;;  %v8250_v24 = vrot.slane %v8236_v7, %v17794_v48 }
 0x7b9   : > { %v8028_v3 = vpop.permute.xlu0 %8027  ;;  %v8059_v6 = vrot.slane %v8051_v40, %v17791_v41  ;;  %v8066_v30 = vrot.slane %v8052_v37, %v17791_v41 }
 0x7ba   : > { %v8731_v63 = vcombine.low %v8227_v26, %v8234_v9  ;;  %v15740_v56 = vcombine.high %v8227_v26, %v8234_v9  ;;  %v8747_v43 = vcombine.low %v8243_v27, %v8250_v24  ;;  %v15741_v23 = vcombine.high %v8243_v27, %v8250_v24  ;;  %v8010_v18 = vpop.permute.xlu1 %8009 }
 0x7bb   : > { %v8255_v15 = vcombine.low %v19819_v33, %v8010_v18  ;;  %v8067_v19 = vcombine.low %v7980_v52, %v8028_v3  ;;  %v8068_v47 = vcombine.high %v7980_v52, %v8028_v3 }
 0x7bc   : > { %v8738_v13 = vrot.slane %v8731_v63, %v17791_v41  ;;  %v8746_v29 = vrot.slane %v15740_v56, %v17791_v41  ;;  %v8754_v7 = vrot.slane %v8747_v43, %v17791_v41  ;;  %v8762_v55 = vrot.slane %v15741_v23, %v17791_v41 }
 0x7bd   : > { %v8075_v26 = vrot.slane %v8067_v19, %v17791_v41  ;;  %v8082_v9 = vrot.slane %v8068_v47, %v17791_v41  ;;  %v20100_v27 = vpop.permute.xlu0 %7981  ;;  %v8256_v23 = vcombine.high %v19819_v33, %v8010_v18  ;;  %v8263_v40 = vrot.slane %v8255_v15, %v17791_v41 }
 0x7be   : > { %v8763_v24 = vcombine.low %v8738_v13, %v8746_v29  ;;  %v8764_v52 = vcombine.high %v8738_v13, %v8746_v29  ;;  %v8034_v3 = vpop.permute.xlu1 %8033  ;;  %v8779_v43 = vcombine.low %v8754_v7, %v8762_v55  ;;  %v8780_v22 = vcombine.high %v8754_v7, %v8762_v55 }
 0x7bf   : > { %v8083_v63 = vcombine.low %v8059_v6, %v8075_v26  ;;  %v8084_v34 = vcombine.high %v8059_v6, %v8075_v26  ;;  %v8099_v56 = vcombine.low %v8066_v30, %v8082_v9  ;;  %v8100_v2 = vcombine.high %v8066_v30, %v8082_v9 }
 0x7c0   : > { %v20111_v29 = vrot.slane %v8763_v24, %v17794_v48  ;;  %v20114_v6 = vrot.slane %v8764_v52, %v17794_v48  ;;  %v8271_v55 = vcombine.low %v7986_v8, %v8034_v3  ;;  %v8272_v33 = vcombine.high %v7986_v8, %v8034_v3 }
 0x7c1   : > { %v8091_v37 = vrot.slane %v8083_v63, %v17794_v48  ;;  %v8098_v19 = vrot.slane %v8084_v34, %v17794_v48  ;;  %v8107_v47 = vrot.slane %v8099_v56, %v17794_v48  ;;  %v8114_v1 = vrot.slane %v8100_v2, %v17794_v48  ;;  %v20108_v13 = vpop.permute.xlu0 %7991 }
 0x7c2   : > { %v8006_v18 = vpop.permute.xlu1 %8005  ;;  %v20117_v34 = vrot.slane %v8779_v43, %v17794_v48  ;;  %v8270_v2 = vrot.slane %v8256_v23, %v17791_v41  ;;  %v8279_v9 = vrot.slane %v8271_v55, %v17791_v41  ;;  %v8286_v24 = vrot.slane %v8272_v33, %v17791_v41 }
 0x7c3   : > { %v8595_v15 = vcombine.low %v8091_v37, %v8098_v19  ;;  %v15736_v7 = vcombine.high %v8091_v37, %v8098_v19  ;;  %v8611_v30 = vcombine.low %v8107_v47, %v8114_v1  ;;  %v15737_v26 = vcombine.high %v8107_v47, %v8114_v1 }
 0x7c4   : > { %v8287_v1 = vcombine.low %v8263_v40, %v8279_v9  ;;  %v8288_v37 = vcombine.high %v8263_v40, %v8279_v9  ;;  %v8303_v43 = vcombine.low %v8270_v2, %v8286_v24  ;;  %v8304_v19 = vcombine.high %v8270_v2, %v8286_v24 }
 0x7c5   : > { %v8602_v63 = vrot.slane %v8595_v15, %v17791_v41  ;;  %v8610_v52 = vrot.slane %v15736_v7, %v17791_v41  ;;  %v8618_v8 = vrot.slane %v8611_v30, %v17791_v41  ;;  %v8626_v3 = vrot.slane %v15737_v26, %v17791_v41  ;;  %v20126_v56 = vpop.permute.xlu0 %8015 }
 0x7c6   : > { %v8030_v47 = vpop.permute.xlu1 %8029  ;;  %v20129_v23 = vrot.slane %v8780_v22, %v17794_v48  ;;  %v8119_v33 = vcombine.low %v19840_v57, %v8006_v18  ;;  %v8295_v7 = vrot.slane %v8287_v1, %v17794_v48  ;;  %v8302_v30 = vrot.slane %v8288_v37, %v17794_v48 }
 0x7c7   : > { %v8627_v55 = vcombine.low %v8602_v63, %v8610_v52  ;;  %v8311_v26 = vrot.slane %v8303_v43, %v17794_v48  ;;  %v8318_v40 = vrot.slane %v8304_v19, %v17794_v48  ;;  %v8628_v9 = vcombine.high %v8602_v63, %v8610_v52 }
 0x7c8   : > { %v8643_v2 = vcombine.low %v8618_v8, %v8626_v3  ;;  %v8644_v24 = vcombine.high %v8618_v8, %v8626_v3  ;;  %v8120_v22 = vcombine.high %v19840_v57, %v8006_v18  ;;  %v8799_v36 = vcombine.low %v8295_v7, %v8302_v30 }
 0x7c9   : > { %v20139_v38 = vpop.permute.xlu0 %7987  ;;  %v15742_v14 = vcombine.high %v8295_v7, %v8302_v30  ;;  %v8815_v49 = vcombine.low %v8311_v26, %v8318_v40  ;;  %v15743_v10 = vcombine.high %v8311_v26, %v8318_v40  ;;  %v20144_v1 = vrot.slane %v8627_v55, %v17794_v48 }
 0x7ca   : > { %v20141_v15 = vpop.permute.xlu1 %7993  ;;  %v8135_v37 = vcombine.low %v20100_v27, %v8030_v47  ;;  %v8136_v43 = vcombine.high %v20100_v27, %v8030_v47  ;;  %v8806_v57 = vrot.slane %v8799_v36, %v17791_v41  ;;  %v8127_v3 = vrot.slane %v8119_v33, %v17791_v41 }
 0x7cb   : > { %v8814_v18 = vrot.slane %v15742_v14, %v17791_v41  ;;  %v8822_v52 = vrot.slane %v8815_v49, %v17791_v41  ;;  %v8830_v8 = vrot.slane %v15743_v10, %v17791_v41  ;;  %v8134_v19 = vrot.slane %v8120_v22, %v17791_v41 }
 0x7cc   : > { %v8143_v55 = vrot.slane %v8135_v37, %v17791_v41  ;;  %v8150_v7 = vrot.slane %v8136_v43, %v17791_v41  ;;  %v20159_v47 = vrot.slane %v8628_v9, %v17794_v48  ;;  %v20162_v36 = vrot.slane %v8643_v2, %v17794_v48 }
 0x7cd   : > { %v8012_v27 = vpop.permute.xlu0 %8011  ;;  %v20165_v14 = vrot.slane %v8644_v24, %v17794_v48  ;;  %v8831_v49 = vcombine.low %v8806_v57, %v8814_v18  ;;  %v8832_v22 = vcombine.high %v8806_v57, %v8814_v18  ;;  %v8847_v37 = vcombine.low %v8822_v52, %v8830_v8 }
 0x7ce   : > { %v8018_v10 = vpop.permute.xlu1 %8017  ;;  %v8151_v30 = vcombine.low %v8127_v3, %v8143_v55  ;;  %v8152_v33 = vcombine.high %v8127_v3, %v8143_v55  ;;  %v8167_v26 = vcombine.low %v8134_v19, %v8150_v7  ;;  %v8168_v40 = vcombine.high %v8134_v19, %v8150_v7 }
 0x7cf   : > { %v8459_v43 = vcombine.low %v19845_v62, %v20126_v56  ;;  %v8460_v9 = vcombine.high %v19845_v62, %v20126_v56  ;;  %v20176_v3 = vrot.slane %v8831_v49, %v17794_v48  ;;  %v8848_v19 = vcombine.high %v8822_v52, %v8830_v8 }
 0x7d0   : > { %v8159_v2 = vrot.slane %v8151_v30, %v17794_v48  ;;  %v8166_v63 = vrot.slane %v8152_v33, %v17794_v48  ;;  %v8175_v24 = vrot.slane %v8167_v26, %v17794_v48  ;;  %v8182_v4 = vrot.slane %v8168_v40, %v17794_v48 }
 0x7d1   : > { %v8527_v57 = vcombine.low %v19906_v31, %v8018_v10  ;;  %v8528_v18 = vcombine.high %v19906_v31, %v8018_v10  ;;  %v8036_v7 = vpop.permute.xlu0 %8035  ;;  %v20183_v33 = vrot.slane %v8832_v22, %v17794_v48  ;;  %v20186_v26 = vrot.slane %v8847_v37, %v17794_v48 }
 0x7d2   : > { %v20180_v55 = vpop.permute.xlu1 %7989  ;;  %v8663_v62 = vcombine.low %v8159_v2, %v8166_v63  ;;  %v15738_v56 = vcombine.high %v8159_v2, %v8166_v63  ;;  %v8679_v30 = vcombine.low %v8175_v24, %v8182_v4  ;;  %v15739_v32 = vcombine.high %v8175_v24, %v8182_v4 }
 0x7d3   : > { %v8323_v49 = vcombine.low %v19900_v16, %v8012_v27  ;;  %v8324_v52 = vcombine.high %v19900_v16, %v8012_v27  ;;  %v20203_v10 = vrot.slane %v8848_v19, %v17794_v48  ;;  %v8467_v40 = vrot.slane %v8459_v43, %v17791_v41 }
 0x7d4   : > { %v20191_v8 = vrot.slane %v8663_v62, %v17791_v41  ;;  %v20194_v31 = vrot.slane %v15738_v56, %v17791_v41  ;;  %v20197_v63 = vrot.slane %v8679_v30, %v17791_v41  ;;  %v20200_v4 = vrot.slane %v15739_v32, %v17791_v41 }
 0x7d5   : > { %v8339_v22 = vcombine.low %v20139_v38, %v8036_v7  ;;  %v8340_v16 = vcombine.high %v20139_v38, %v8036_v7  ;;  %v8474_v2 = vrot.slane %v8460_v9, %v17791_v41  ;;  %v20214_v24 = vrot.slane %v8527_v57, %v17791_v41  ;;  %v8040_v7 = vpop.permute.xlu0 %8039 }
 0x7d6   : > { %v20208_v27 = vpop.permute.xlu1 %8013  ;;  %v8695_v37 = vcombine.low %v20191_v8, %v20194_v31  ;;  %v20217_v32 = vrot.slane %v8528_v18, %v17791_v41  ;;  %v8331_v19 = vrot.slane %v8323_v49, %v17791_v41  ;;  %v8338_v43 = vrot.slane %v8324_v52, %v17791_v41 }
 0x7d7   : > { %v8347_v62 = vrot.slane %v8339_v22, %v17791_v41  ;;  %v8354_v38 = vrot.slane %v8340_v16, %v17791_v41  ;;  %v8696_v56 = vcombine.high %v20191_v8, %v20194_v31  ;;  %v8711_v9 = vcombine.low %v20197_v63, %v20200_v4 }
 0x7d8   : > { %v8712_v57 = vcombine.high %v20197_v63, %v20200_v4  ;;  %v8391_v18 = vcombine.low %v19938_v25, %v20208_v27  ;;  %v20232_v16 = vrot.slane %v8695_v37, %v17794_v48  ;;  %v8392_v8 = vcombine.high %v19938_v25, %v20208_v27 }
 0x7d9   : > { %v8355_v30 = vcombine.low %v8331_v19, %v8347_v62  ;;  %v8356_v49 = vcombine.high %v8331_v19, %v8347_v62  ;;  %v8371_v52 = vcombine.low %v8338_v43, %v8354_v38  ;;  %v8372_v21 = vcombine.high %v8338_v43, %v8354_v38 }
 0x7da   : > { %v8038_v22 = vpop.permute.xlu1 %8037  ;;  %v8475_v31 = vcombine.low %v20108_v13, %v8040_v7  ;;  %v8476_v20 = vcombine.high %v20108_v13, %v8040_v7 }
 0x7db   : > { %v8363_v63 = vrot.slane %v8355_v30, %v17794_v48  ;;  %v8370_v4 = vrot.slane %v8356_v49, %v17794_v48  ;;  %v8379_v12 = vrot.slane %v8371_v52, %v17794_v48  ;;  %v8386_v19 = vrot.slane %v8372_v21, %v17794_v48 }
 0x7dc   : > { %v8483_v43 = vrot.slane %v8475_v31, %v17791_v41  ;;  %v8490_v37 = vrot.slane %v8476_v20, %v17791_v41  ;;  %v8407_v62 = vcombine.low %v20180_v55, %v8038_v22  ;;  %v8408_v25 = vcombine.high %v20180_v55, %v8038_v22 }
 0x7dd   : > { %v8867_v27 = vcombine.low %v8363_v63, %v8370_v4  ;;  %v15744_v38 = vcombine.high %v8363_v63, %v8370_v4  ;;  %v8883_v0 = vcombine.low %v8379_v12, %v8386_v19  ;;  %v15745_v13 = vcombine.high %v8379_v12, %v8386_v19 }
 0x7de   : > { %v8491_v7 = vcombine.low %v8467_v40, %v8483_v43  ;;  %v8492_v30 = vcombine.high %v8467_v40, %v8483_v43  ;;  %v8507_v17 = vcombine.low %v8474_v2, %v8490_v37  ;;  %v8508_v49 = vcombine.high %v8474_v2, %v8490_v37 }
 0x7df   : > { %v8874_v52 = vrot.slane %v8867_v27, %v17791_v41  ;;  %v8882_v21 = vrot.slane %v15744_v38, %v17791_v41  ;;  %v8890_v31 = vrot.slane %v8883_v0, %v17791_v41  ;;  %v8898_v20 = vrot.slane %v15745_v13, %v17791_v41 }
 0x7e0   : > { %v8499_v11 = vrot.slane %v8491_v7, %v17794_v48  ;;  %v8506_v55 = vrot.slane %v8492_v30, %v17794_v48  ;;  %v8515_v22 = vrot.slane %v8507_v17, %v17794_v48  ;;  %v8522_v12 = vrot.slane %v8508_v49, %v17794_v48 }
 0x7e1   : > { %v8899_v63 = vcombine.low %v8874_v52, %v8882_v21  ;;  %v8900_v40 = vcombine.high %v8874_v52, %v8882_v21  ;;  %v8915_v4 = vcombine.low %v8890_v31, %v8898_v20  ;;  %v8916_v2 = vcombine.high %v8890_v31, %v8898_v20  ;;  %v16717_v21 = vpop.permute.xlu0 %16716 }
 0x7e2   : > { %v9003_v19 = vcombine.low %v8499_v11, %v8506_v55  ;;  %v15748_v43 = vcombine.high %v8499_v11, %v8506_v55  ;;  %v9019_v37 = vcombine.low %v8515_v22, %v8522_v12  ;;  %v15749_v27 = vcombine.high %v8515_v22, %v8522_v12 }
 0x7e3   : > { %v20255_v0 = vrot.slane %v8696_v56, %v17794_v48  ;;  %v20258_v38 = vrot.slane %v8711_v9, %v17794_v48  ;;  %v20261_v13 = vrot.slane %v8712_v57, %v17794_v48  ;;  %v8399_v17 = vrot.slane %v8391_v18, %v17791_v41 }
 0x7e4   : > { %v9010_v7 = vrot.slane %v9003_v19, %v17791_v41  ;;  %v9018_v30 = vrot.slane %v15748_v43, %v17791_v41  ;;  %v9026_v49 = vrot.slane %v9019_v37, %v17791_v41  ;;  %v9034_v11 = vrot.slane %v15749_v27, %v17791_v41 }
 0x7e5   : > { %v20269_v52 = vrot.slane %v8899_v63, %v17794_v48  ;;  %v8406_v56 = vrot.slane %v8392_v8, %v17791_v41  ;;  %v8415_v9 = vrot.slane %v8407_v62, %v17791_v41  ;;  %v8422_v57 = vrot.slane %v8408_v25, %v17791_v41  ;;  %v8042_v8 = vpop.permute.xlu1 %8041 }
 0x7e6   : > { %v20275_v18 = vrot.slane %v8900_v40, %v17794_v48  ;;  %v20278_v31 = vrot.slane %v8915_v4, %v17794_v48  ;;  %v20281_v20 = vrot.slane %v8916_v2, %v17794_v48  ;;  %v9035_v55 = vcombine.low %v9010_v7, %v9018_v30 }
 0x7e7   : > { %v8423_v22 = vcombine.low %v8399_v17, %v8415_v9  ;;  %v8424_v12 = vcombine.high %v8399_v17, %v8415_v9  ;;  %v8439_v63 = vcombine.low %v8406_v56, %v8422_v57  ;;  %v8440_v19 = vcombine.high %v8406_v56, %v8422_v57 }
 0x7e8   : > { %v9036_v43 = vcombine.high %v9010_v7, %v9018_v30  ;;  %v9051_v62 = vcombine.low %v9026_v49, %v9034_v11  ;;  %v16719_v37 = vunpack.i.h.bf16 %v16717_v21  ;;  %v16718_v25 = vunpack.i.l.bf16 %v16717_v21  ;;  %v16727_v21 = vpop.permute.xlu0 %16726 }
 0x7e9   : > { %v8431_v27 = vrot.slane %v8423_v22, %v17794_v48  ;;  %v8438_v40 = vrot.slane %v8424_v12, %v17794_v48  ;;  %v8447_v4 = vrot.slane %v8439_v63, %v17794_v48  ;;  %v8454_v60 = vrot.slane %v8440_v19, %v17794_v48 }
 0x7ea   : > { %v20288_v2 = vrot.slane %v9035_v55, %v17794_v48  ;;  %v9052_v39 = vcombine.high %v9026_v49, %v9034_v11  ;;  %v8543_v17 = vcombine.low %v20141_v15, %v8042_v8  ;;  %v8544_v56 = vcombine.high %v20141_v15, %v8042_v8 }
 0x7eb   : > { %v8935_v7 = vcombine.low %v8431_v27, %v8438_v40  ;;  %v15746_v30 = vcombine.high %v8431_v27, %v8438_v40  ;;  %v8951_v9 = vcombine.low %v8447_v4, %v8454_v60  ;;  %v15747_v57 = vcombine.high %v8447_v4, %v8454_v60 }
 0x7ec   : > { %v20293_v22 = vrot.slane %v9036_v43, %v17794_v48  ;;  %v20296_v12 = vrot.slane %v9051_v62, %v17794_v48  ;;  %v8551_v63 = vrot.slane %v8543_v17, %v17791_v41  ;;  %v8558_v55 = vrot.slane %v8544_v56, %v17791_v41  ;;  %v16737_v35 = vpop.permute.xlu0 %16736 }
 0x7ed   : > { %v8942_v49 = vrot.slane %v8935_v7, %v17791_v41  ;;  %v8950_v11 = vrot.slane %v15746_v30, %v17791_v41  ;;  %v8958_v15 = vrot.slane %v8951_v9, %v17791_v41  ;;  %v8966_v19 = vrot.slane %v15747_v57, %v17791_v41  ;;  %v16722_v57 = vpop.permute.xlu1 %16721 }
 0x7ee   : > { %22530 = vst [vmem:[#allocation35_spill] sm:$0xff] %v20296_v12  ;;  %v8559_v60 = vcombine.low %v20214_v24, %v8551_v63  ;;  %v8560_v8 = vcombine.high %v20214_v24, %v8551_v63  ;;  %v8575_v43 = vcombine.low %v20217_v32, %v8558_v55  ;;  %v8576_v62 = vcombine.high %v20217_v32, %v8558_v55 }
 0x7ef   : > { %v20309_v27 = vrot.slane %v9052_v39, %v17794_v48  ;;  %v8967_v40 = vcombine.low %v8942_v49, %v8950_v11  ;;  %v22531_v4 = vcombine.low %v19699_v53, %v19702_v5  ;;  %v16729_v56 = vunpack.i.h.bf16 %v16727_v21 }
 0x7f0   : > { %v8567_v7 = vrot.slane %v8559_v60, %v17794_v48  ;;  %v8574_v30 = vrot.slane %v8560_v8, %v17794_v48  ;;  %v8583_v24 = vrot.slane %v8575_v43, %v17794_v48  ;;  %v8590_v9 = vrot.slane %v8576_v62, %v17794_v48 }
 0x7f1   : > { %v7600_v17 = vsel %vm2636_vm4, %v22531_v4, %v16719_v37  ;;  %v8968_v32 = vcombine.high %v8942_v49, %v8950_v11  ;;  %v8983_v63 = vcombine.low %v8958_v15, %v8966_v19  ;;  %v8984_v39 = vcombine.high %v8958_v15, %v8966_v19 }
 0x7f2   : > { %v16728_v55 = vunpack.i.l.bf16 %v16727_v21  ;;  %v9071_v59 = vcombine.low %v8567_v7, %v8574_v30  ;;  %v15750_v12 = vcombine.high %v8567_v7, %v8574_v30  ;;  %v9087_v53 = vcombine.low %v8583_v24, %v8590_v9 }
 0x7f3   : > { %v15751_v5 = vcombine.high %v8583_v24, %v8590_v9  ;;  %v20320_v37 = vrot.slane %v8967_v40, %v17794_v48  ;;  %v22532_v60 = vcombine.low %v19587_v28, %v19590_v61  ;;  %v16724_v43 = vunpack.i.h.bf16 %v16722_v57 }
 0x7f4   : > { %v16723_v62 = vunpack.i.l.bf16 %v16722_v57  ;;  %v20327_v49 = vrot.slane %v9071_v59, %v17791_v41  ;;  %v20330_v21 = vrot.slane %v15750_v12, %v17791_v41  ;;  %v20333_v11 = vrot.slane %v9087_v53, %v17791_v41 }
 0x7f5   : > { %v7599_v8 = vsel %vm2636_vm4, %v22532_v60, %v16718_v25  ;;  %v20336_v15 = vrot.slane %v15751_v5, %v17791_v41  ;;  %v20339_v19 = vrot.slane %v8968_v32, %v17794_v48  ;;  %v20342_v28 = vrot.slane %v8983_v63, %v17794_v48  ;;  %v16732_v32 = vpop.permute.xlu1 %16731 }
 0x7f6   : > { %v20345_v61 = vrot.slane %v8984_v39, %v17794_v48  ;;  %v16738_v59 = vunpack.i.l.bf16 %v16737_v35  ;;  %v7607_v25 = vsel %vm2670_vm8, %v7599_v8, %v16728_v55  ;;  %v7608_v12 = vsel %vm2670_vm8, %v7600_v17, %v16729_v56  ;;  %v16747_v56 = vpop.permute.xlu0 %16746 }
 0x7f7   : > { %v22533_v40 = vcombine.low %v19773_v50, %v19776_v42  ;;  %v22534_v7 = vcombine.low %v19850_v44, %v19853_v54  ;;  %v9103_v24 = vcombine.low %v20327_v49, %v20330_v21  ;;  %v16739_v9 = vunpack.i.h.bf16 %v16737_v35 }
 0x7f8   : > { %v15752_v57 = vcombine.low %v20144_v1, %v20159_v47  ;;  %v15754_v17 = vcombine.high %v20144_v1, %v20159_v47  ;;  %v9104_v50 = vcombine.high %v20327_v49, %v20330_v21  ;;  %v7616_v54 = vsel %vm7615_vm11, %v7607_v25, %v16738_v59 }
 0x7f9   : > { %v7601_v4 = vsel %vm2636_vm4, %v22533_v40, %v16723_v62  ;;  %v7602_v30 = vsel %vm2636_vm4, %v22534_v7, %v16724_v43  ;;  %v15756_v1 = vcombine.low %v20232_v16, %v20255_v0  ;;  %v15758_v47 = vcombine.high %v20232_v16, %v20255_v0 }
 0x7fa   : > { %v9147_v35 = vrot.slane %v15752_v57, %v17791_v41  ;;  %v9163_v63 = vrot.slane %v15754_v17, %v17791_v41  ;;  %v22535_v39 = vcombine.low %v20111_v29, %v20114_v6  ;;  %v22536_v53 = vcombine.high %v20111_v29, %v20114_v6 }
 0x7fb   : > { %v15764_v60 = vcombine.low %v20176_v3, %v20183_v33  ;;  %v15766_v8 = vcombine.high %v20176_v3, %v20183_v33  ;;  %v9179_v43 = vrot.slane %v15756_v1, %v17791_v41  ;;  %v9195_v16 = vrot.slane %v15758_v47, %v17791_v41  ;;  %v16757_v3 = vpop.permute.xlu0 %16756 }
 0x7fc   : > { %v9283_v55 = vrot.slane %v22535_v39, %v17791_v41  ;;  %v9299_v5 = vrot.slane %v22536_v53, %v17791_v41  ;;  %v9203_v0 = vcombine.low %v9147_v35, %v9163_v63  ;;  %v16734_v62 = vunpack.i.h.bf16 %v16732_v32 }
 0x7fd   : > { %v9315_v59 = vrot.slane %v15764_v60, %v17791_v41  ;;  %v9331_v25 = vrot.slane %v15766_v8, %v17791_v41  ;;  %v16733_v7 = vunpack.i.l.bf16 %v16732_v32  ;;  %v7617_v29 = vsel %vm7615_vm11, %v7608_v12, %v16739_v9  ;;  %v16742_v9 = vpop.permute.xlu1 %16741 }
 0x7fe   : > { %v9339_v40 = vcombine.low %v9283_v55, %v9299_v5  ;;  %v20394_v6 = vrot.slane %v9203_v0, %v17794_v48  ;;  %v9235_v57 = vcombine.low %v9179_v43, %v9195_v16  ;;  %v16749_v17 = vunpack.i.h.bf16 %v16747_v56 }
 0x7ff   : > { %v9371_v1 = vcombine.low %v9315_v59, %v9331_v25  ;;  %v7609_v47 = vsel %vm2670_vm8, %v7601_v4, %v16733_v7  ;;  %v7610_v39 = vsel %vm2670_vm8, %v7602_v30, %v16734_v62  ;;  %v16748_v32 = vunpack.i.l.bf16 %v16747_v56 }
 0x800   : > { %v20397_v33 = vrot.slane %v9339_v40, %v17794_v48  ;;  %v20402_v53 = vrot.slane %v9235_v57, %v17794_v48  ;;  %v9204_v60 = vcombine.high %v9147_v35, %v9163_v63  ;;  %v9236_v12 = vcombine.high %v9179_v43, %v9195_v16 }
 0x801   : > { %v20405_v8 = vrot.slane %v9371_v1, %v17794_v48  ;;  %v22537_v0 = vcombine.low %v19977_v58, %v19980_v45  ;;  %v9340_v44 = vcombine.high %v9283_v55, %v9299_v5  ;;  %v9372_v42 = vcombine.high %v9315_v59, %v9331_v25  ;;  %v16767_v59 = vpop.permute.xlu0 %16766 }
 0x802   : > { %v9268_v4 = vcombine.high %v20394_v6, %v20402_v53  ;;  %v9218_v30 = vrot.slane %v9204_v60, %v17794_v48  ;;  %v9250_v56 = vrot.slane %v9236_v12, %v17794_v48  ;;  %v7624_v35 = vpack.c.bf16 %v7617_v29, %v7616_v54 }
 0x803   : > { %v7604_v40 = vsel %vm2636_vm4, %v22537_v0, %v16749_v17  ;;  %v9404_v63 = vcombine.high %v20397_v33, %v20405_v8  ;;  %v9354_v43 = vrot.slane %v9340_v44, %v17794_v48  ;;  %v9386_v16 = vrot.slane %v9372_v42, %v17794_v48 }
 0x804   : > { %v16744_v58 = vunpack.i.h.bf16 %v16742_v9  ;;  %v9269_v45 = vcombine.low %v9218_v30, %v9250_v56  ;;  %16280 = vmatprep.mubr.msk.bf16.mxu0 %vm719_vm0, %v7624_v35  ;;  %v16743_v55 = vunpack.i.l.bf16 %v16742_v9  ;;  %v16759_v5 = vunpack.i.h.bf16 %v16757_v3 }
 0x805   : > { %v16758_v62 = vunpack.i.l.bf16 %v16757_v3  ;;  %v16775_v25 = vpack.i.bf16 %v9404_v63, %v9268_v4  ;;  %v22538_v7 = vcombine.low %v19919_v51, %v19922_v46  ;;  %v9405_v29 = vcombine.low %v9354_v43, %v9386_v16 }
 0x806   : > { %v7619_v57 = vsel %vm7615_vm11, %v7610_v39, %v16744_v58  ;;  %v7618_v44 = vsel %vm7615_vm11, %v7609_v47, %v16743_v55  ;;  %v7612_v17 = vsel %vm2670_vm8, %v7604_v40, %v16759_v5  ;;  %v9270_v1 = vcombine.high %v9218_v30, %v9250_v56 }
 0x807   : > { %v7603_v54 = vsel %vm2636_vm4, %v22538_v7, %v16748_v32  ;;  %16776 = vrot.lane.b32.xlu0 %v16775_v25, %s17380_s25  ;;  %v7625_v3 = vpack.c.bf16 %v7619_v57, %v7618_v44  ;;  %v9406_v60 = vcombine.high %v9354_v43, %v9386_v16  ;;  %v16769_v12 = vunpack.i.h.bf16 %v16767_v59 }
 0x808   : > { %v7611_v42 = vsel %vm2670_vm8, %v7603_v54, %v16758_v62  ;;  %v16768_v9 = vunpack.i.l.bf16 %v16767_v59  ;;  %v16780_v0 = vpack.i.bf16 %v9405_v29, %v9269_v45  ;;  %v15753_v51 = vcombine.low %v20162_v36, %v20165_v14 }
 0x809   : > { %v15755_v46 = vcombine.high %v20162_v36, %v20165_v14  ;;  %v15757_v47 = vcombine.low %v20258_v38, %v20261_v13  ;;  %v7621_v32 = vsel %vm7615_vm11, %v7612_v17, %v16769_v12  ;;  %v15759_v40 = vcombine.high %v20258_v38, %v20261_v13  ;;  %16281 = vmatmul.mubr.msk.bf16.vlgmr.msra.gmra.mrb[72].mxu0 %vm719_vm0, %v7625_v3 }
 0x80a   : > { %v7620_v39 = vsel %vm7615_vm11, %v7611_v42, %v16768_v9  ;;  %v15761_v4 = vcombine.low %v20117_v34, %v20129_v23  ;;  %v9154_v30 = vrot.slane %v15753_v51, %v17791_v41  ;;  %v15763_v14 = vcombine.high %v20117_v34, %v20129_v23 }
 0x80b   : > { %v9170_v56 = vrot.slane %v15755_v46, %v17791_v41  ;;  %v9186_v36 = vrot.slane %v15757_v47, %v17791_v41  ;;  %16781 = vrot.lane.b32.xlu0 %v16780_v0, %s22539_s19  ;;  %v9202_v35 = vrot.slane %v15759_v40, %v17791_v41  ;;  %v15765_v13 = vcombine.low %v20186_v26, %v20203_v10 }
 0x80c   : > { %v9290_v38 = vrot.slane %v15761_v4, %v17791_v41  ;;  %v15767_v63 = vcombine.high %v20186_v26, %v20203_v10  ;;  %v16785_v43 = vpack.i.bf16 %v9406_v60, %v9270_v1  ;;  %v9306_v58 = vrot.slane %v15763_v14, %v17791_v41 }
 0x80d   : > { %v9219_v16 = vcombine.low %v9154_v30, %v9170_v56  ;;  %v7626_v45 = vpack.c.bf16 %v7621_v32, %v7620_v39  ;;  %v9251_v55 = vcombine.low %v9186_v36, %v9202_v35  ;;  %v9322_v34 = vrot.slane %v15765_v13, %v17791_v41 }
 0x80e   : > { %v9338_v23 = vrot.slane %v15767_v63, %v17791_v41  ;;  %v9252_v5 = vcombine.high %v9186_v36, %v9202_v35  ;;  %v9111_v62 = vrot.slane %v9103_v24, %v17794_v48  ;;  %v9118_v26 = vrot.slane %v9104_v50, %v17794_v48 }
 0x80f   : > { %v9355_v10 = vcombine.low %v9290_v38, %v9306_v58  ;;  %16284 = vmatprep.mubr.msk.bf16.mxu0 %vm719_vm0, %v7626_v45  ;;  %v9220_v59 = vcombine.high %v9154_v30, %v9170_v56  ;;  %16786 = vrot.lane.b32.xlu0 %v16785_v43, %s22540_s15  ;;  %v9227_v25 = vrot.slane %v9219_v16, %v17794_v48 }
 0x810   : > { %v9259_v7 = vrot.slane %v9251_v55, %v17794_v48  ;;  %v9387_v54 = vcombine.low %v9322_v34, %v9338_v23  ;;  %v9388_v29 = vcombine.high %v9322_v34, %v9338_v23  ;;  %v20470_v57 = vrot.slane %v9252_v5, %v17794_v48 }
 0x811   : > { %v9356_v24 = vcombine.high %v9290_v38, %v9306_v58  ;;  %v15768_v49 = vcombine.low %v20269_v52, %v20275_v18  ;;  %v15770_v21 = vcombine.high %v20269_v52, %v20275_v18  ;;  %v22541_v50 = vcombine.low %v20333_v11, %v20336_v15 }
 0x812   : > { %v9271_v42 = vcombine.low %v9227_v25, %v9259_v7  ;;  %v9363_v17 = vrot.slane %v9355_v10, %v17794_v48  ;;  %v9395_v1 = vrot.slane %v9387_v54, %v17794_v48  ;;  %v9234_v3 = vrot.slane %v9220_v59, %v17794_v48 }
 0x813   : > { %v20480_v44 = vrot.slane %v22541_v50, %v17794_v48  ;;  %v9402_v60 = vrot.slane %v9388_v29, %v17794_v48  ;;  %v9419_v12 = vrot.slane %v15768_v49, %v17791_v41  ;;  %v9435_v9 = vrot.slane %v15770_v21, %v17791_v41 }
 0x814   : > { %v22542_v52 = vcombine.high %v20333_v11, %v20336_v15  ;;  %v9407_v0 = vcombine.low %v9363_v17, %v9395_v1  ;;  %v15772_v51 = vcombine.low %v20320_v37, %v20339_v19  ;;  %v15774_v46 = vcombine.high %v20320_v37, %v20339_v19 }
 0x815   : > { %v9272_v47 = vcombine.high %v9227_v25, %v9259_v7  ;;  %v9273_v39 = vcombine.low %v9234_v3, %v20470_v57  ;;  %v9370_v32 = vrot.slane %v9356_v24, %v17794_v48  ;;  %v15776_v40 = vcombine.low %v20288_v2, %v20293_v22 }
 0x816   : > { %v20492_v18 = vrot.slane %v22542_v52, %v17794_v48  ;;  %v16790_v4 = vpack.i.bf16 %v9407_v0, %v9271_v42  ;;  %v9274_v11 = vcombine.high %v9234_v3, %v20470_v57  ;;  %v9451_v15 = vrot.slane %v15772_v51, %v17791_v41 }
 0x817   : > { %v9467_v30 = vrot.slane %v15774_v46, %v17791_v41  ;;  %v9408_v56 = vcombine.high %v9363_v17, %v9395_v1  ;;  %v9409_v36 = vcombine.low %v9370_v32, %v9402_v60  ;;  %v9475_v14 = vcombine.low %v9419_v12, %v9435_v9  ;;  %v22544_v17 = vld [vmem:[#allocation35_spill] sm:$0xff] }
 0x818   : > { %v9555_v37 = vrot.slane %v15776_v40, %v17791_v41  ;;  %16791 = vrot.lane.b32.xlu0 %v16790_v4, %s22384_s17  ;;  %v15778_v35 = vcombine.high %v20288_v2, %v20293_v22  ;;  %v15780_v38 = vcombine.low %v9111_v62, %v9118_v26  ;;  %v15782_v13 = vcombine.high %v9111_v62, %v9118_v26 }
 0x819   : > { %v9507_v19 = vcombine.low %v9451_v15, %v9467_v30  ;;  %v16795_v63 = vpack.i.bf16 %v9408_v56, %v9272_v47  ;;  %v9508_v43 = vcombine.high %v9451_v15, %v9467_v30  ;;  %v15769_v16 = vcombine.low %v20278_v31, %v20281_v20 }
 0x81a   : > { %v15771_v58 = vcombine.high %v20278_v31, %v20281_v20  ;;  %v9571_v55 = vrot.slane %v15778_v35, %v17791_v41  ;;  %v9587_v34 = vrot.slane %v15780_v38, %v17791_v41  ;;  %v9603_v23 = vrot.slane %v15782_v13, %v17791_v41 }
 0x81b   : > { %v20514_v45 = vrot.slane %v9507_v19, %v17794_v48  ;;  %v16800_v2 = vpack.i.bf16 %v9409_v36, %v9273_v39  ;;  %v9410_v22 = vcombine.high %v9370_v32, %v9402_v60  ;;  %v20520_v5 = vrot.slane %v9475_v14, %v17794_v48  ;;  %v16920_v14 = vld [vmem:[#allocation5] sm:$0xff]  }
 0x81c   : > { %v9476_v62 = vcombine.high %v9419_v12, %v9435_v9  ;;  %16796 = vrot.lane.b32.xlu0 %v16795_v63, %s22543_s0  ;;  %v9611_v26 = vcombine.low %v9555_v37, %v9571_v55  ;;  %v9643_v10 = vcombine.low %v9587_v34, %v9603_v23  ;;  %v9522_v31 = vrot.slane %v9508_v43, %v17794_v48 }
 0x81d   : > { %v9612_v20 = vcombine.high %v9555_v37, %v9571_v55  ;;  %v9644_v59 = vcombine.high %v9587_v34, %v9603_v23  ;;  %v20525_v25 = vrot.slane %v15769_v16, %v17791_v41  ;;  %v20528_v7 = vrot.slane %v15771_v58, %v17791_v41  ;;  %16300 = vmatprep.subr.bf16.mxu0 %v16920_v14 }
 0x81e   : > { %v15773_v54 = vcombine.low %v20342_v28, %v20345_v61  ;;  %v9540_v29 = vcombine.high %v20520_v5, %v20514_v45  ;;  %v20535_v57 = vrot.slane %v9611_v26, %v17794_v48  ;;  %v20538_v24 = vrot.slane %v9643_v10, %v17794_v48  ;;  %16301 = vmatpush3.bf16.msra.mxu0 %v16920_v14  ;;  %v22549_v26 = vld [vmem:[#allocation41_spill] sm:$0xff]  ;;  %v22550_v10 = vld [vmem:[#allocation40_spill] sm:$0xff] }
 0x81f   : > { %v15775_v49 = vcombine.high %v20342_v28, %v20345_v61  ;;  %v9626_v21 = vrot.slane %v9612_v20, %v17794_v48  ;;  %v9658_v50 = vrot.slane %v9644_v59, %v17794_v48  ;;  %v15777_v1 = vcombine.low %v22544_v17, %v20309_v27 }
 0x820   : > { %v20545_v42 = vrot.slane %v15773_v54, %v17791_v41  ;;  %16801 = vrot.lane.b32.xlu0 %v16800_v2, %s22545_s27  ;;  %v9676_v3 = vcombine.high %v20535_v57, %v20538_v24  ;;  %v15779_v28 = vcombine.high %v22544_v17, %v20309_v27  ;;  %v15781_v61 = vcombine.low %v20480_v44, %v20492_v18  ;;  %v16752_v12 = vpop.permute.xlu1 %16751  ;;  %v22552_v17 = vld [vmem:[#allocation50_spill] sm:$0xff] }
 0x821   : > { %v20553_v60 = vrot.slane %v15775_v49, %v17791_v41  ;;  %v16805_v9 = vpack.i.bf16 %v9410_v22, %v9274_v11  ;;  %v9490_v52 = vrot.slane %v9476_v62, %v17794_v48  ;;  %v9562_v0 = vrot.slane %v15777_v1, %v17791_v41  ;;  %v22547_v22 = vld [vmem:[#allocation23_spill] sm:$0xff]  ;;  %v22553_v1 = vld [vmem:[#allocation20_spill] sm:$0xff] }
 0x822   : > { %v16810_v51 = vpack.i.bf16 %v9676_v3, %v9540_v29  ;;  %v9677_v46 = vcombine.low %v9626_v21, %v9658_v50  ;;  %v9491_v47 = vcombine.low %v20525_v25, %v20528_v7  ;;  %v9578_v39 = vrot.slane %v15779_v28, %v17791_v41 }
 0x823   : > { %v9678_v32 = vcombine.high %v9626_v21, %v9658_v50  ;;  %v9523_v27 = vcombine.low %v20545_v42, %v20553_v60  ;;  %v9594_v40 = vrot.slane %v15781_v61, %v17791_v41  ;;  %v15783_v4 = vcombine.high %v20480_v44, %v20492_v18 }
 0x824   : > { %16806 = vrot.lane.b32.xlu0 %v16805_v9, %s22546_s6  ;;  %16811 = vrot.lane.b32.xlu1 %v16810_v51, %s17380_s25  ;;  %v9541_v11 = vcombine.low %v9490_v52, %v9522_v31  ;;  %v9627_v15 = vcombine.low %v9562_v0, %v9578_v39  ;;  %v16762_v30 = vpop.permute.xlu1 %16761  ;;  %v9542_v56 = vcombine.high %v9490_v52, %v9522_v31  ;;  %v16754_v19 = vunpack.i.h.bf16 %v16752_v12  ;;  %s22574_s25 = smov 72  }
 0x825   : > { %v9610_v36 = vrot.slane %v15783_v4, %v17791_v41  ;;  %v9499_v38 = vrot.slane %v9491_v47, %v17794_v48  ;;  %v9531_v13 = vrot.slane %v9523_v27, %v17794_v48  ;;  %v9524_v18 = vcombine.high %v20545_v42, %v20553_v60 }
 0x826   : > { %v16815_v37 = vpack.i.bf16 %v9677_v46, %v9541_v11  ;;  %v16820_v35 = vpack.i.bf16 %v9678_v32, %v9542_v56  ;;  %v9635_v44 = vrot.slane %v9627_v15, %v17794_v48  ;;  %v16753_v43 = vunpack.i.l.bf16 %v16752_v12  ;;  %v22557_v56 = vld [vmem:[#allocation34_spill] sm:$0xff] }
 0x827   : > { %v9659_v63 = vcombine.low %v9594_v40, %v9610_v36  ;;  %v16764_v16 = vunpack.i.h.bf16 %v16762_v30  ;;  %v9660_v34 = vcombine.high %v9594_v40, %v9610_v36  ;;  %v16763_v23 = vunpack.i.l.bf16 %v16762_v30 }
 0x828   : > { %16816 = vrot.lane.b32.xlu1 %v16815_v37, %s22539_s19  ;;  %v16772_v58 = vpop.permute.xlu1 %16771  ;;  %10908 = vrot.lane.b32.xlu0 %v22547_v22, %s17388_s28  ;;  %v22548_v62 = vmov 0.0   ;;  %v22551_v31 = vcombine.low %v22549_v26, %v22550_v10  ;;  %v9267_v54 = vcombine.low %v20394_v6, %v20402_v53  ;;  %v9403_v29 = vcombine.low %v20397_v33, %v20405_v8  ;;  %s22569_s19 = sld [smem:[#allocation57_spill]] }
 0x829   : > { %v9667_v55 = vrot.slane %v9659_v63, %v17794_v48  ;;  %v16774_v2 = vunpack.i.h.bf16 %v16772_v58  ;;  %16312 = vmatprep.subr.bf16.mxu0 %v22548_v62  ;;  %v16773_v59 = vunpack.i.l.bf16 %v16772_v58  ;;  %v9543_v49 = vcombine.low %v9499_v38, %v9531_v13 }
 0x82a   : > { %v7606_v20 = vsel %vm2636_vm4, %v22551_v31, %v16754_v19  ;;  %v9628_v50 = vcombine.high %v9562_v0, %v9578_v39  ;;  %v22554_v3 = vcombine.low %v22552_v17, %v22553_v1  ;;  %v9539_v61 = vcombine.low %v20520_v5, %v20514_v45  ;;  %v22555_v0 = vld [vmem:[#allocation22_spill] sm:$0xff]  ;;  %v22558_v19 = vld [vmem:[#allocation49_spill] sm:$0xff] }
 0x82b   : > { %v9679_v21 = vcombine.low %v9635_v44, %v9667_v55  ;;  %v7614_v42 = vsel %vm2670_vm8, %v7606_v20, %v16764_v16  ;;  %v9675_v12 = vcombine.low %v20535_v57, %v20538_v24  ;;  %v9492_v9 = vcombine.high %v20525_v25, %v20528_v7  ;;  %v22556_v25 = vld [vmem:[#allocation28_spill] sm:$0xff] }
 0x82c   : > { %16821 = vrot.lane.b32.xlu1 %v16820_v35, %s22540_s15  ;;  %v7605_v60 = vsel %vm2636_vm4, %v22554_v3, %v16753_v43  ;;  %v7623_v28 = vsel %vm7615_vm11, %v7614_v42, %v16774_v2  ;;  %10886 = vrot.lane.b32.xlu0 %v22555_v0, %s17387_s21  ;;  %v9680_v46 = vcombine.high %v9635_v44, %v9667_v55  ;;  %s22571_s15 = smov 96  }
 0x82d   : > { %v7613_v52 = vsel %vm2670_vm8, %v7605_v60, %v16763_v23  ;;  %v16825_v51 = vpack.i.bf16 %v9679_v21, %v9543_v49  ;;  %v9674_v47 = vrot.slane %v9660_v34, %v17794_v48  ;;  %v9544_v27 = vcombine.high %v9499_v38, %v9531_v13  ;;  %v22559_v38 = vld [vmem:[#allocation19_spill] sm:$0xff] }
 0x82e   : > { %v7622_v39 = vsel %vm7615_vm11, %v7613_v52, %v16773_v59  ;;  %v9538_v40 = vrot.slane %v9524_v18, %v17794_v48  ;;  %v9642_v4 = vrot.slane %v9628_v50, %v17794_v48  ;;  %v9506_v11 = vrot.slane %v9492_v9, %v17794_v48 }
 0x82f   : > { %v7627_v32 = vpack.c.bf16 %v7623_v28, %v7622_v39  ;;  %v16830_v7 = vpack.i.bf16 %v9680_v46, %v9544_v27 }
 0x830   : > { %16826 = vrot.lane.b32.xlu1 %v16825_v51, %s22384_s17  ;;  %10912 = vrot.lane.b32.xlu0 %v22556_v25, %s17388_s28  ;;  %v9681_v15 = vcombine.low %v9642_v4, %v9674_v47  ;;  %v9545_v30 = vcombine.low %v9506_v11, %v9538_v40  ;;  %v9682_v14 = vcombine.high %v9642_v4, %v9674_v47 }
 0x831   : > { %16285 = vmatmul.mubr.msk.bf16.gmra.mrb[76].mxu0 %vm719_vm0, %v7627_v32  ;;  %v9546_v37 = vcombine.high %v9506_v11, %v9538_v40 }
 0x832   : > { %v16835_v36 = vpack.i.bf16 %v9681_v15, %v9545_v30 }
 0x833   : > { %v16840_v35 = vpack.i.bf16 %v9682_v14, %v9546_v37 }
 0x834   : > { %16831 = vrot.lane.b32.xlu1 %v16830_v7, %s22543_s0  ;;  %10890 = vrot.lane.b32.xlu0 %v22557_v56, %s17387_s21  ;;  %s22572_s0 = smov 80  }
 0x838   : > { %16836 = vrot.lane.b32.xlu1 %v16835_v36, %s22545_s27  ;;  %10916 = vrot.lane.b32.xlu0 %v22558_v19, %s17388_s28  ;;  %s22573_s27 = smov 88  }
 0x83c   : > { %16841 = vrot.lane.b32.xlu1 %v16840_v35, %s22546_s6  ;;  %10894 = vrot.lane.b32.xlu0 %v22559_v38, %s17387_s21 }
 0x840   : > { %10884 = vrot.lane.b32.xlu1 %v22547_v22, %s17387_s21 }
 0x844   : > { %10932 = vrot.lane.b32.xlu1 %v22547_v22, %s17389_s3 }
 0x848   : > { %10910 = vrot.lane.b32.xlu1 %v22555_v0, %s17388_s28 }
 0x84c   : > { %10934 = vrot.lane.b32.xlu1 %v22555_v0, %s17389_s3 }
 0x850   : > { %10888 = vrot.lane.b32.xlu1 %v22556_v25, %s17387_s21 }
 0x854   : > { %10936 = vrot.lane.b32.xlu1 %v22556_v25, %s17389_s3 }
 0x858   : > { %10914 = vrot.lane.b32.xlu1 %v22557_v56, %s17388_s28 }
 0x85c   : > { %10938 = vrot.lane.b32.xlu1 %v22557_v56, %s17389_s3 }
 0x860   : > { %10892 = vrot.lane.b32.xlu1 %v22558_v19, %s17387_s21 }
 0x864   : > { %10940 = vrot.lane.b32.xlu1 %v22558_v19, %s17389_s3 }
 0x868   : > { %10918 = vrot.lane.b32.xlu1 %v22559_v38, %s17388_s28 }
 0x86c   : > { %10942 = vrot.lane.b32.xlu1 %v22559_v38, %s17389_s3 }
 0x879   : > { %v16777_v13 = vpop.permute.xlu0 %16776 }
 0x87a   : > { %v16779_v16 = vunpack.i.h.bf16 %v16777_v13  ;;  %v16778_v58 = vunpack.i.l.bf16 %v16777_v13 }
 0x87c   : > { %v9796_v20 = vsel %vm2621_vm1, %v9403_v29, %v16779_v16  ;;  %v9795_v59 = vsel %vm2621_vm1, %v9267_v54, %v16778_v58 }
 0x87d   : > { %v16782_v63 = vpop.permute.xlu0 %16781 }
 0x87e   : > { %v16784_v55 = vunpack.i.h.bf16 %v16782_v63  ;;  %v16783_v34 = vunpack.i.l.bf16 %v16782_v63 }
 0x880   : > { %v9799_v50 = vsel %vm2626_vm2, %v9795_v59, %v16783_v34  ;;  %v9800_v42 = vsel %vm2626_vm2, %v9796_v20, %v16784_v55 }
 0x881   : > { %v16787_v44 = vpop.permute.xlu0 %16786 }
 0x882   : > { %v16789_v23 = vunpack.i.h.bf16 %v16787_v44  ;;  %v16788_v2 = vunpack.i.l.bf16 %v16787_v44 }
 0x884   : > { %v9803_v3 = vsel %vm2631_vm3, %v9799_v50, %v16788_v2  ;;  %v9804_v60 = vsel %vm2631_vm3, %v9800_v42, %v16789_v23 }
 0x88a   : > { %v16792_v18 = vpop.permute.xlu0 %16791 }
 0x88b   : > { %v16794_v26 = vunpack.i.h.bf16 %v16792_v18  ;;  %v16793_v10 = vunpack.i.l.bf16 %v16792_v18 }
 0x88d   : > { %v9807_v33 = vsel %vm2636_vm4, %v9803_v3, %v16793_v10  ;;  %v9808_v8 = vsel %vm2636_vm4, %v9804_v60, %v16794_v26 }
 0x88e   : > { %v16797_v43 = vpop.permute.xlu0 %16796 }
 0x88f   : > { %v16799_v49 = vunpack.i.h.bf16 %v16797_v43  ;;  %v16798_v21 = vunpack.i.l.bf16 %v16797_v43 }
 0x891   : > { %v9811_v53 = vsel %vm2641_vm5, %v9807_v33, %v16798_v21  ;;  %v9812_v54 = vsel %vm2641_vm5, %v9808_v8, %v16799_v49 }
 0x892   : > { %v16802_v31 = vpop.permute.xlu0 %16801 }
 0x893   : > { %v16804_v17 = vunpack.i.h.bf16 %v16802_v31  ;;  %v16803_v1 = vunpack.i.l.bf16 %v16802_v31 }
 0x895   : > { %v9815_v52 = vsel %vm2646_vm6, %v9811_v53, %v16803_v1  ;;  %v9816_v51 = vsel %vm2646_vm6, %v9812_v54, %v16804_v17 }
 0x896   : > { %v16812_v29 = vpop.permute.xlu1 %16811  ;;  %v16807_v6 = vpop.permute.xlu0 %16806 }
 0x897   : > { %v16809_v28 = vunpack.i.h.bf16 %v16807_v6  ;;  %v16808_v9 = vunpack.i.l.bf16 %v16807_v6  ;;  %v16814_v7 = vunpack.i.h.bf16 %v16812_v29  ;;  %v16813_v11 = vunpack.i.l.bf16 %v16812_v29  ;;  %v22568_v6 = vld [vmem:[#allocation21_spill] sm:$0xff] }
 0x899   : > { %v9819_v46 = vsel %vm2651_vm7, %v9815_v52, %v16808_v9  ;;  %v9820_v47 = vsel %vm2651_vm7, %v9816_v51, %v16809_v28  ;;  %v9797_v63 = vsel %vm2621_vm1, %v9539_v61, %v16813_v11  ;;  %v9798_v44 = vsel %vm2621_vm1, %v9675_v12, %v16814_v7 }
 0x89a   : > { %v16817_v39 = vpop.permute.xlu1 %16816  ;;  %v9823_v32 = vpack.c.bf16 %v9820_v47, %v9819_v46  ;;  %v10909_v29 = vpop.permute.xlu0 %10908 }
 0x89b   : > { %v16819_v15 = vunpack.i.h.bf16 %v16817_v39  ;;  %v16818_v30 = vunpack.i.l.bf16 %v16817_v39  ;;  %v15788_v53 = vcombine.low %v22568_v6, %v10909_v29  ;;  %v10957_v54 = vcombine.high %v22547_v22, %v10909_v29 }
 0x89c   : > { %16302 = vmatprep.mubr.msk.bf16.mxu0 %vm2670_vm8, %v9823_v32 }
 0x89d   : > { %v9801_v16 = vsel %vm2626_vm2, %v9797_v63, %v16818_v30  ;;  %v9802_v58 = vsel %vm2626_vm2, %v9798_v44, %v16819_v15  ;;  %v10964_v51 = vrot.slane %v15788_v53, %v17791_v41  ;;  %v10971_v46 = vrot.slane %v10957_v54, %v17791_v41 }
 0x89e   : > { %v16822_v27 = vpop.permute.xlu1 %16821 }
 0x89f   : > { %v16824_v36 = vunpack.i.h.bf16 %v16822_v27  ;;  %v16823_v14 = vunpack.i.l.bf16 %v16822_v27 }
 0x8a1   : > { %v9805_v23 = vsel %vm2631_vm3, %v9801_v16, %v16823_v14  ;;  %v9806_v2 = vsel %vm2631_vm3, %v9802_v58, %v16824_v36 }
 0x8a2   : > { %v16827_v40 = vpop.permute.xlu1 %16826 }
 0x8a3   : > { %v16829_v37 = vunpack.i.h.bf16 %v16827_v40  ;;  %v16828_v35 = vunpack.i.l.bf16 %v16827_v40 }
 0x8a5   : > { %v9809_v45 = vsel %vm2636_vm4, %v9805_v23, %v16828_v35  ;;  %v9810_v5 = vsel %vm2636_vm4, %v9806_v2, %v16829_v37 }
 0x8a6   : > { %v16832_v4 = vpop.permute.xlu1 %16831 }
 0x8a7   : > { %v16834_v18 = vunpack.i.h.bf16 %v16832_v4  ;;  %v16833_v43 = vunpack.i.l.bf16 %v16832_v4 }
 0x8a9   : > { %v9813_v57 = vsel %vm2641_vm5, %v9809_v45, %v16833_v43  ;;  %v9814_v24 = vsel %vm2641_vm5, %v9810_v5, %v16834_v18 }
 0x8aa   : > { %v16837_v13 = vpop.permute.xlu1 %16836 }
 0x8ab   : > { %v16839_v55 = vunpack.i.h.bf16 %v16837_v13  ;;  %v16838_v34 = vunpack.i.l.bf16 %v16837_v13 }
 0x8ad   : > { %v9817_v10 = vsel %vm2646_vm6, %v9813_v57, %v16838_v34  ;;  %v9818_v31 = vsel %vm2646_vm6, %v9814_v24, %v16839_v55 }
 0x8ae   : > { %v16842_v61 = vpop.permute.xlu1 %16841 }
 0x8af   : > { %v16844_v12 = vunpack.i.h.bf16 %v16842_v61  ;;  %v16843_v26 = vunpack.i.l.bf16 %v16842_v61  ;;  %v15784_v61 = vld [vmem:[%s22569_s19] ss:$0 sm:$0xff] }
 0x8b1   : > { %v9821_v20 = vsel %vm2651_vm7, %v9817_v10, %v16843_v26  ;;  %v9822_v59 = vsel %vm2651_vm7, %v9818_v31, %v16844_v12 }
 0x8b2   : > { %v9824_v49 = vpack.c.bf16 %v9822_v59, %v9821_v20  ;;  %v10885_v8 = vpop.permute.xlu1 %10884 }
 0x8b4   : > { %16303 = vmatmul.mubr.msk.bf16.vlgmr.msra.gmra.mrb[80].mxu0 %vm2670_vm8, %v9824_v49 }
 0x8b5   : > { %16314 = vmatprep.mubr.msk.bf16.mxu0 %vm17395_vm10, %v22548_v62 }
 0x8b6   : > { %v10933_v28 = vpop.permute.xlu1 %10932 }
 0x8b7   : > { %v10972_v9 = vcombine.low %v10885_v8, %v10933_v28  ;;  %v10973_v52 = vcombine.high %v10885_v8, %v10933_v28 }
 0x8b9   : > { %v10980_v47 = vrot.slane %v10972_v9, %v17791_v41  ;;  %v10987_v39 = vrot.slane %v10973_v52, %v17791_v41 }
 0x8ba   : > { %v20801_v28 = vpop.permute.xlu1 %10910 }
 0x8bb   : > { %v10988_v32 = vcombine.low %v10964_v51, %v10980_v47  ;;  %v10989_v27 = vcombine.high %v10964_v51, %v10980_v47  ;;  %v11004_v40 = vcombine.low %v10971_v46, %v10987_v39  ;;  %v11005_v4 = vcombine.high %v10971_v46, %v10987_v39 }
 0x8bd   : > { %v10996_v7 = vrot.slane %v10988_v32, %v17794_v48  ;;  %v11003_v11 = vrot.slane %v10989_v27, %v17794_v48  ;;  %v11012_v22 = vrot.slane %v11004_v40, %v17794_v48  ;;  %v11019_v15 = vrot.slane %v11005_v4, %v17794_v48  ;;  %v20815_v32 = vpop.permute.xlu0 %10886 }
 0x8be   : > { %v20803_v9 = vpop.permute.xlu1 %10934 }
 0x8bf   : > { %v11500_v30 = vcombine.low %v10996_v7, %v11003_v11  ;;  %v15796_v36 = vcombine.high %v10996_v7, %v11003_v11  ;;  %v11516_v14 = vcombine.low %v11012_v22, %v11019_v15  ;;  %v15797_v37 = vcombine.high %v11012_v22, %v11019_v15 }
 0x8c1   : > { %v11507_v35 = vrot.slane %v11500_v30, %v17791_v41  ;;  %v11515_v13 = vrot.slane %v15796_v36, %v17791_v41  ;;  %v11523_v63 = vrot.slane %v11516_v14, %v17791_v41  ;;  %v11531_v44 = vrot.slane %v15797_v37, %v17791_v41  ;;  %v20817_v27 = vpop.permute.xlu0 %10912 }
 0x8c2   : > { %v20805_v52 = vpop.permute.xlu1 %10888 }
 0x8c3   : > { %v11532_v18 = vcombine.low %v11507_v35, %v11515_v13  ;;  %v11548_v43 = vcombine.low %v11523_v63, %v11531_v44  ;;  %v11533_v24 = vcombine.high %v11507_v35, %v11515_v13  ;;  %v11549_v12 = vcombine.high %v11523_v63, %v11531_v44 }
 0x8c5   : > { %v11540_v16 = vrot.slane %v11532_v18, %v17794_v48  ;;  %v11556_v58 = vrot.slane %v11548_v43, %v17794_v48  ;;  %v11547_v20 = vrot.slane %v11533_v24, %v17794_v48  ;;  %v11563_v59 = vrot.slane %v11549_v12, %v17794_v48  ;;  %v20821_v4 = vpop.permute.xlu0 %10890 }
 0x8c6   : > { %v20807_v51 = vpop.permute.xlu1 %10936 }
 0x8c7   : > { %v11564_v55 = vcombine.low %v11540_v16, %v11556_v58  ;;  %v11565_v34 = vcombine.high %v11540_v16, %v11556_v58  ;;  %v20739_v8 = vcombine.low %v11547_v20, %v11563_v59  ;;  %v20741_v29 = vcombine.high %v11547_v20, %v11563_v59 }
 0x8c9   : > { %v12076_v23 = vpack.c.bf16 %v11564_v55, %v11564_v55  ;;  %v12077_v2 = vpack.c.bf16 %v11565_v34, %v11565_v34  ;;  %22570 = vst [vmem:[#allocation31_spill] sm:$0xff] %v20741_v29  ;;  %v20825_v11 = vpop.permute.xlu0 %10916 }
 0x8ca   : > { %v20809_v46 = vpop.permute.xlu1 %10914  ;;  %22578 = vst [vmem:[#allocation23_spill] sm:$0xff] %v20825_v11 }
 0x8cb   : > { %v12112_v45 = vsel %vm4945_vm9, %v12076_v23, 0  ;;  %v12158_v5 = vsel %vm4945_vm9, %v12077_v2, 0 }
 0x8cc   : > { %16307 = vmatpush3.bf16.msra.mxu1 %v12112_v45  ;;  %16313 = vmatpush3.bf16.msra.mxu0 %v12158_v5 }
 0x8cd   : > { %16318 = vmatprep.subr.bf16.mxu1 %v22548_v62  ;;  %16324 = vmatprep.subr.bf16.mxu0 %v22548_v62  ;;  %v20829_v15 = vpop.permute.xlu0 %10894 }
 0x8ce   : > { %v20811_v47 = vpop.permute.xlu1 %10938  ;;  %22580 = vst [vmem:[#allocation40_spill] sm:$0xff] %v20829_v15 }
 0x8d2   : > { %v20813_v39 = vpop.permute.xlu1 %10892 }
 0x8d3   : > { %22575 = vst [vmem:[#allocation42_spill] sm:$0xff] %v20813_v39 }
 0x8d6   : > { %v20819_v40 = vpop.permute.xlu1 %10940 }
 0x8d7   : > { %22576 = vst [vmem:[#allocation43_spill] sm:$0xff] %v20819_v40 }
 0x8da   : > { %v20823_v7 = vpop.permute.xlu1 %10918 }
 0x8db   : > { %22577 = vst [vmem:[#allocation35_spill] sm:$0xff] %v20823_v7 }
 0x8dc   : > { %v20692_v21 = vpop.f32.mrb[72].mxu0 }
 0x8dd   : > { %22560 = vst [vmem:[#allocation36_spill] sm:$0xff] %v20692_v21  ;;  %v20694_v50 = vpop.f32.mrb[73].mxu0 }
 0x8de   : > { %22561 = vst [vmem:[#allocation37_spill] sm:$0xff] %v20694_v50  ;;  %v20696_v42 = vpop.f32.mrb[74].mxu0  ;;  %v20827_v22 = vpop.permute.xlu1 %10942 }
 0x8df   : > { %22562 = vst [vmem:[#allocation44_spill] sm:$0xff] %v20696_v42  ;;  %v20698_v17 = vpop.f32.mrb[75].mxu0  ;;  %22579 = vst [vmem:[#allocation41_spill] sm:$0xff] %v20827_v22 }
 0x8e0   : > { %22563 = vst [vmem:[#allocation46_spill] sm:$0xff] %v20698_v17 }
 0x904   : > { %v20700_v1 = vpop.f32.mrb[76].mxu0 }
 0x905   : > { %22564 = vst [vmem:[#allocation45_spill] sm:$0xff] %v20700_v1  ;;  %v20702_v3 = vpop.f32.mrb[77].mxu0 }
 0x906   : > { %22565 = vst [vmem:[#allocation24_spill] sm:$0xff] %v20702_v3  ;;  %v20704_v60 = vpop.f32.mrb[78].mxu0 }
 0x907   : > { %22566 = vst [vmem:[#allocation25_spill] sm:$0xff] %v20704_v60  ;;  %v20706_v33 = vpop.f32.mrb[79].mxu0 }
 0x908   : > { %22567 = vst [vmem:[#allocation30_spill] sm:$0xff] %v20706_v33 }
 0x987   : > { %v16304_v57 = vpop.f32.mrb[80].mxu0 }
 0x988   : > { %v20731_v26 = vadd.f32 %v16304_v57, %v15784_v61  ;;  %v9877_v10 = vpop.f32.mrb[81].mxu0 }
 0x989   : > { %v16305_v31 = vpop.f32.mrb[82].mxu0  ;;  %v20751_v6 = vadd.f32 %v15784_v61, %v9877_v10 }
 0x98a   : > { %9912 = vrot.lane.b32.xlu1 %v20731_v26, %s17388_s28  ;;  %9900 = vrot.lane.b32.xlu0 %v20731_v26, %s17387_s21  ;;  %v9880_v49 = vpop.f32.mrb[83].mxu0  ;;  %v20765_v53 = vadd.f32 %v16305_v31, %v15784_v61 }
 0x98b   : > { %v20783_v54 = vadd.f32 %v15784_v61, %v9880_v49 }
 0x98e   : > { %9936 = vrot.lane.b32.xlu1 %v20731_v26, %s22571_s15  ;;  %9924 = vrot.lane.b32.xlu0 %v20731_v26, %s17389_s3 }
 0x992   : > { %9960 = vrot.lane.b32.xlu1 %v20731_v26, %s22572_s0  ;;  %9948 = vrot.lane.b32.xlu0 %v20731_v26, %s22573_s27 }
 0x996   : > { %9972 = vrot.lane.b32.xlu0 %v20731_v26, %s22574_s25  ;;  %9908 = vrot.lane.b32.xlu1 %v20751_v6, %s17388_s28 }
 0x99a   : > { %9932 = vrot.lane.b32.xlu1 %v20751_v6, %s22571_s15  ;;  %9896 = vrot.lane.b32.xlu0 %v20751_v6, %s17387_s21 }
 0x99e   : > { %9956 = vrot.lane.b32.xlu1 %v20751_v6, %s22572_s0  ;;  %9920 = vrot.lane.b32.xlu0 %v20751_v6, %s17389_s3 }
 0x9a2   : > { %9914 = vrot.lane.b32.xlu1 %v20765_v53, %s17388_s28  ;;  %9944 = vrot.lane.b32.xlu0 %v20751_v6, %s22573_s27 }
 0x9a6   : > { %9926 = vrot.lane.b32.xlu1 %v20765_v53, %s17389_s3  ;;  %9968 = vrot.lane.b32.xlu0 %v20751_v6, %s22574_s25 }
 0x9aa   : > { %9950 = vrot.lane.b32.xlu1 %v20765_v53, %s22573_s27  ;;  %9902 = vrot.lane.b32.xlu0 %v20765_v53, %s17387_s21 }
 0x9ae   : > { %9974 = vrot.lane.b32.xlu1 %v20765_v53, %s22574_s25  ;;  %9938 = vrot.lane.b32.xlu0 %v20765_v53, %s22571_s15 }
 0x9b2   : > { %9898 = vrot.lane.b32.xlu1 %v20783_v54, %s17387_s21  ;;  %9962 = vrot.lane.b32.xlu0 %v20765_v53, %s22572_s0 }
 0x9b6   : > { %9922 = vrot.lane.b32.xlu1 %v20783_v54, %s17389_s3  ;;  %9910 = vrot.lane.b32.xlu0 %v20783_v54, %s17388_s28 }
 0x9ba   : > { %9946 = vrot.lane.b32.xlu1 %v20783_v54, %s22573_s27  ;;  %9934 = vrot.lane.b32.xlu0 %v20783_v54, %s22571_s15  ;;  %s17398_s27 = smov 64  }
 0x9be   : > { %9970 = vrot.lane.b32.xlu1 %v20783_v54, %s22574_s25  ;;  %9958 = vrot.lane.b32.xlu0 %v20783_v54, %s22572_s0  ;;  %s22639_s0 = sld [smem:[#allocation61_spill]]  ;;  %s17399_s25 = smov 32  }
 0x9fc   : > { %v9913_v30 = vpop.permute.xlu1 %9912  ;;  %v9901_v36 = vpop.permute.xlu0 %9900 }
 0x9fd   : > { %v10252_v44 = vcombine.low %v20731_v26, %v9913_v30  ;;  %v10253_v57 = vcombine.high %v20731_v26, %v9913_v30 }
 0x9ff   : > { %v10260_v23 = vrot.slane %v10252_v44, %v17791_v41 }
 0xa00   : > { %v9937_v14 = vpop.permute.xlu1 %9936  ;;  %v9925_v37 = vpop.permute.xlu0 %9924 }
 0xa01   : > { %v10268_v35 = vcombine.low %v9901_v36, %v9925_v37  ;;  %v10269_v2 = vcombine.high %v9901_v36, %v9925_v37  ;;  %v10267_v37 = vrot.slane %v10253_v57, %v17791_v41 }
 0xa03   : > { %v10276_v43 = vrot.slane %v10268_v35, %v17791_v41  ;;  %v10283_v49 = vrot.slane %v10269_v2, %v17791_v41 }
 0xa04   : > { %v9961_v13 = vpop.permute.xlu1 %9960  ;;  %v9949_v63 = vpop.permute.xlu0 %9948 }
 0xa05   : > { %v10284_v18 = vcombine.low %v9937_v14, %v9961_v13  ;;  %v10285_v45 = vcombine.high %v9937_v14, %v9961_v13  ;;  %v10316_v24 = vcombine.low %v10260_v23, %v10276_v43  ;;  %v10317_v35 = vcombine.high %v10260_v23, %v10276_v43 }
 0xa07   : > { %v10292_v5 = vrot.slane %v10284_v18, %v17791_v41  ;;  %v10299_v36 = vrot.slane %v10285_v45, %v17791_v41  ;;  %v10332_v18 = vcombine.low %v10267_v37, %v10283_v49  ;;  %v10331_v43 = vrot.slane %v10317_v35, %v17794_v48 }
 0xa08   : > { %v9973_v16 = vpop.permute.xlu0 %9972  ;;  %v20833_v58 = vpop.permute.xlu1 %9908 }
 0xa09   : > { %v10300_v55 = vcombine.low %v9949_v63, %v9973_v16  ;;  %v10301_v34 = vcombine.high %v9949_v63, %v9973_v16  ;;  %v10324_v63 = vrot.slane %v10316_v24, %v17794_v48  ;;  %v9980_v23 = vcombine.low %v20751_v6, %v20833_v58 }
 0xa0a   : > { %v10340_v35 = vrot.slane %v10332_v18, %v17794_v48 }
 0xa0b   : > { %v10308_v61 = vrot.slane %v10300_v55, %v17791_v41  ;;  %v10315_v12 = vrot.slane %v10301_v34, %v17791_v41 }
 0xa0c   : > { %v20840_v10 = vpop.permute.xlu1 %9932  ;;  %v20842_v31 = vpop.permute.xlu0 %9896 }
 0xa0d   : > { %v10348_v20 = vcombine.low %v10292_v5, %v10308_v61  ;;  %v10349_v59 = vcombine.high %v10292_v5, %v10308_v61  ;;  %v10364_v13 = vcombine.low %v10299_v36, %v10315_v12  ;;  %v10365_v34 = vcombine.high %v10299_v36, %v10315_v12 }
 0xa0f   : > { %v10356_v14 = vrot.slane %v10348_v20, %v17794_v48  ;;  %v10363_v44 = vrot.slane %v10349_v59, %v17794_v48  ;;  %v10372_v20 = vrot.slane %v10364_v13, %v17794_v48  ;;  %v10333_v59 = vcombine.high %v10267_v37, %v10283_v49 }
 0xa10   : > { %v9957_v26 = vpop.permute.xlu1 %9956  ;;  %v9921_v30 = vpop.permute.xlu0 %9920 }
 0xa11   : > { %v20850_v16 = vcombine.low %v10324_v63, %v10356_v14  ;;  %v20852_v55 = vcombine.high %v10324_v63, %v10356_v14  ;;  %v9996_v2 = vcombine.low %v20842_v31, %v9921_v30  ;;  %v20864_v24 = vcombine.low %v10331_v43, %v10363_v44 }
 0xa12   : > { %v20867_v12 = vcombine.high %v10331_v43, %v10363_v44  ;;  %v10012_v36 = vcombine.low %v20840_v10, %v9957_v26  ;;  %v9988_v63 = vrot.slane %v9980_v23, %v17791_v41  ;;  %v20877_v13 = vcombine.low %v10340_v35, %v10372_v20 }
 0xa13   : > { %v10572_v45 = vsel %vm2636_vm4, %v20850_v16, -inf  ;;  %v10575_v61 = vsel %vm2636_vm4, %v20852_v55, -inf  ;;  %v10004_v14 = vrot.slane %v9996_v2, %v17791_v41  ;;  %v10578_v60 = vsel %vm2636_vm4, %v20864_v24, -inf }
 0xa14   : > { %v20860_v5 = vpop.permute.xlu1 %9914  ;;  %v9945_v57 = vpop.permute.xlu0 %9944  ;;  %10573 = vmax.xlane.f32.xlu1 %v10572_v45  ;;  %10576 = vmax.xlane.f32.xlu0 %v10575_v61  ;;  %v10379_v44 = vrot.slane %v10365_v34, %v17794_v48  ;;  %v10581_v49 = vsel %vm2636_vm4, %v20867_v12, -inf  ;;  %v20882_v43 = vcombine.high %v10340_v35, %v10372_v20  ;;  %v10013_v23 = vcombine.high %v20840_v10, %v9957_v26 }
 0xa15   : > { %v9997_v2 = vcombine.high %v20842_v31, %v9921_v30  ;;  %v10347_v45 = vrot.slane %v10333_v59, %v17794_v48  ;;  %v10020_v61 = vrot.slane %v10012_v36, %v17791_v41  ;;  %v10044_v3 = vcombine.low %v9988_v63, %v10004_v14 }
 0xa16   : > { %v10587_v20 = vsel %vm2636_vm4, %v20882_v43, -inf  ;;  %v10045_v35 = vcombine.high %v9988_v63, %v10004_v14 }
 0xa17   : > { %v20898_v31 = vcombine.low %v10347_v45, %v10379_v44  ;;  %v20902_v59 = vcombine.high %v10347_v45, %v10379_v44  ;;  %v10052_v36 = vrot.slane %v10044_v3, %v17794_v48  ;;  %v10388_v45 = vcombine.low %v20765_v53, %v20860_v5 }
 0xa18   : > { %v20875_v1 = vpop.permute.xlu1 %9926  ;;  %v9969_v33 = vpop.permute.xlu0 %9968  ;;  %10579 = vmax.xlane.f32.xlu1 %v10578_v60  ;;  %10582 = vmax.xlane.f32.xlu0 %v10581_v49  ;;  %v9981_v60 = vcombine.high %v20751_v6, %v20833_v58  ;;  %v10027_v6 = vrot.slane %v10013_v23, %v17791_v41  ;;  %v10011_v58 = vrot.slane %v9997_v2, %v17791_v41 }
 0xa19   : > { %v10028_v37 = vcombine.low %v9945_v57, %v9969_v33  ;;  %v10029_v18 = vcombine.high %v9945_v57, %v9969_v33  ;;  %v10584_v33 = vsel %vm2636_vm4, %v20877_v13, -inf  ;;  %v10593_v14 = vsel %vm2636_vm4, %v20902_v59, -inf }
 0xa1a   : > { %v10396_v22 = vrot.slane %v10388_v45, %v17791_v41 }
 0xa1b   : > { %v10036_v34 = vrot.slane %v10028_v37, %v17791_v41  ;;  %v10043_v17 = vrot.slane %v10029_v18, %v17791_v41  ;;  %v9995_v37 = vrot.slane %v9981_v60, %v17791_v41  ;;  %v10059_v60 = vrot.slane %v10045_v35, %v17794_v48 }
 0xa1c   : > { %v20894_v57 = vpop.permute.xlu1 %9950  ;;  %v20896_v10 = vpop.permute.xlu0 %9902  ;;  %10585 = vmax.xlane.f32.xlu1 %v10584_v33  ;;  %10588 = vmax.xlane.f32.xlu0 %v10587_v20 }
 0xa1d   : > { %v10076_v26 = vcombine.low %v10020_v61, %v10036_v34  ;;  %v10077_v30 = vcombine.high %v10020_v61, %v10036_v34  ;;  %v10092_v18 = vcombine.low %v10027_v6, %v10043_v17  ;;  %v10590_v61 = vsel %vm2636_vm4, %v20898_v31, -inf }
 0xa1e   : > { %v10404_v23 = vcombine.low %v20896_v10, %v20875_v1  ;;  %v10060_v2 = vcombine.low %v9995_v37, %v10011_v58  ;;  %v10061_v15 = vcombine.high %v9995_v37, %v10011_v58 }
 0xa1f   : > { %v10084_v49 = vrot.slane %v10076_v26, %v17794_v48  ;;  %v10091_v44 = vrot.slane %v10077_v30, %v17794_v48  ;;  %v10100_v50 = vrot.slane %v10092_v18, %v17794_v48 }
 0xa20   : > { %v9975_v34 = vpop.permute.xlu1 %9974  ;;  %v9939_v33 = vpop.permute.xlu0 %9938  ;;  %10591 = vmax.xlane.f32.xlu1 %v10590_v61  ;;  %10594 = vmax.xlane.f32.xlu0 %v10593_v14  ;;  %v10093_v61 = vcombine.high %v10027_v6, %v10043_v17  ;;  %v10412_v14 = vrot.slane %v10404_v23, %v17791_v41  ;;  %v10068_v38 = vrot.slane %v10060_v2, %v17794_v48 }
 0xa21   : > { %v20916_v3 = vcombine.high %v10052_v36, %v10084_v49  ;;  %v20918_v63 = vcombine.low %v10052_v36, %v10084_v49  ;;  %v10436_v26 = vcombine.low %v20894_v57, %v9975_v34  ;;  %v20930_v49 = vcombine.high %v10059_v60, %v10091_v44 }
 0xa22   : > { %v20934_v21 = vcombine.low %v10059_v60, %v10091_v44  ;;  %v10405_v17 = vcombine.high %v20896_v10, %v20875_v1  ;;  %v10437_v23 = vcombine.high %v20894_v57, %v9975_v34  ;;  %v20949_v44 = vcombine.high %v10068_v38, %v10100_v50 }
 0xa23   : > { %v10527_v30 = vsel %vm2636_vm4, %v20916_v3, -inf  ;;  %v10524_v20 = vsel %vm2636_vm4, %v20918_v63, -inf  ;;  %v10444_v6 = vrot.slane %v10436_v26, %v17791_v41  ;;  %v10533_v58 = vsel %vm2636_vm4, %v20930_v49, -inf }
 0xa24   : > { %v20928_v42 = vpop.permute.xlu1 %9898  ;;  %v9963_v36 = vpop.permute.xlu0 %9962  ;;  %10525 = vmax.xlane.f32.xlu1 %v10524_v20  ;;  %10528 = vmax.xlane.f32.xlu0 %v10527_v30  ;;  %v10107_v2 = vrot.slane %v10093_v61, %v17794_v48  ;;  %v10452_v45 = vcombine.low %v10396_v22, %v10412_v14  ;;  %v10530_v10 = vsel %vm2636_vm4, %v20934_v21, -inf  ;;  %v10389_v57 = vcombine.high %v20765_v53, %v20860_v5 }
 0xa25   : > { %v10420_v35 = vcombine.low %v9939_v33, %v9963_v36  ;;  %v10421_v7 = vcombine.high %v9939_v33, %v9963_v36  ;;  %v20954_v33 = vcombine.low %v10068_v38, %v10100_v50  ;;  %v10075_v34 = vrot.slane %v10061_v15, %v17794_v48 }
 0xa26   : > { %v10419_v61 = vrot.slane %v10405_v17, %v17791_v41  ;;  %v10453_v53 = vcombine.high %v10396_v22, %v10412_v14  ;;  %v10451_v5 = vrot.slane %v10437_v23, %v17791_v41  ;;  %v10460_v15 = vrot.slane %v10452_v45, %v17794_v48 }
 0xa27   : > { %v10428_v18 = vrot.slane %v10420_v35, %v17791_v41  ;;  %v10435_v60 = vrot.slane %v10421_v7, %v17791_v41  ;;  %v10539_v35 = vsel %vm2636_vm4, %v20949_v44, -inf  ;;  %v20964_v38 = vcombine.low %v10075_v34, %v10107_v2 }
 0xa28   : > { %v20943_v20 = vpop.permute.xlu1 %9922  ;;  %v20947_v37 = vpop.permute.xlu0 %9910  ;;  %10534 = vmax.xlane.f32.xlu1 %v10533_v58  ;;  %10531 = vmax.xlane.f32.xlu0 %v10530_v10  ;;  %v20966_v50 = vcombine.high %v10075_v34, %v10107_v2  ;;  %v10536_v7 = vsel %vm2636_vm4, %v20954_v33, -inf  ;;  %v10403_v17 = vrot.slane %v10389_v57, %v17791_v41  ;;  %v10467_v57 = vrot.slane %v10453_v53, %v17794_v48 }
 0xa29   : > { %v10484_v1 = vcombine.low %v10428_v18, %v10444_v6  ;;  %v10485_v26 = vcombine.high %v10428_v18, %v10444_v6  ;;  %v10500_v6 = vcombine.low %v10435_v60, %v10451_v5  ;;  %v10542_v22 = vsel %vm2636_vm4, %v20964_v38, -inf }
 0xa2a   : > { %v10468_v10 = vcombine.low %v10403_v17, %v10419_v61  ;;  %v10545_v14 = vsel %vm2636_vm4, %v20966_v50, -inf  ;;  %v10501_v19 = vcombine.high %v10435_v60, %v10451_v5  ;;  %v10469_v62 = vcombine.high %v10403_v17, %v10419_v61 }
 0xa2b   : > { %v10492_v30 = vrot.slane %v10484_v1, %v17794_v48  ;;  %v10499_v1 = vrot.slane %v10485_v26, %v17794_v48  ;;  %v10116_v26 = vcombine.low %v20783_v54, %v20947_v37  ;;  %v10133_v5 = vcombine.high %v20928_v42, %v20943_v20 }
 0xa2c   : > { %v9947_v36 = vpop.permute.xlu1 %9946  ;;  %v9935_v58 = vpop.permute.xlu0 %9934  ;;  %10540 = vmax.xlane.f32.xlu1 %v10539_v35  ;;  %10537 = vmax.xlane.f32.xlu0 %v10536_v7  ;;  %v10132_v7 = vcombine.low %v20928_v42, %v20943_v20  ;;  %v10476_v60 = vrot.slane %v10468_v10, %v17794_v48 }
 0xa2d   : > { %v20973_v18 = vcombine.low %v10460_v15, %v10492_v30  ;;  %v20980_v35 = vcombine.high %v10460_v15, %v10492_v30  ;;  %v20989_v40 = vcombine.high %v10467_v57, %v10499_v1 }
 0xa2f   : > { %v10596_v39 = vsel %vm2636_vm4, %v20973_v18, -inf  ;;  %v10599_v29 = vsel %vm2636_vm4, %v20980_v35, -inf  ;;  %v10605_v61 = vsel %vm2636_vm4, %v20989_v40, -inf }
 0xa30   : > { %v9971_v2 = vpop.permute.xlu1 %9970  ;;  %v9959_v23 = vpop.permute.xlu0 %9958  ;;  %10546 = vmax.xlane.f32.xlu1 %v10545_v14  ;;  %10543 = vmax.xlane.f32.xlu0 %v10542_v22  ;;  %v10508_v14 = vrot.slane %v10500_v6, %v17794_v48  ;;  %v20996_v22 = vcombine.low %v10467_v57, %v10499_v1  ;;  %v10140_v6 = vrot.slane %v10132_v7, %v17791_v41 }
 0xa31   : > { %v10164_v34 = vcombine.low %v9947_v36, %v9971_v2  ;;  %v10148_v45 = vcombine.low %v9935_v58, %v9959_v23  ;;  %v10165_v11 = vcombine.high %v9947_v36, %v9971_v2  ;;  %v10149_v15 = vcombine.high %v9935_v58, %v9959_v23 }
 0xa32   : > { %v10117_v36 = vcombine.high %v20783_v54, %v20947_v37  ;;  %v10124_v58 = vrot.slane %v10116_v26, %v17791_v41  ;;  %v21010_v2 = vcombine.high %v10476_v60, %v10508_v14  ;;  %v10602_v42 = vsel %vm2636_vm4, %v20996_v22, -inf }
 0xa33   : > { %v10172_v30 = vrot.slane %v10164_v34, %v17791_v41  ;;  %v10156_v53 = vrot.slane %v10148_v45, %v17791_v41  ;;  %v10179_v17 = vrot.slane %v10165_v11, %v17791_v41  ;;  %v10163_v1 = vrot.slane %v10149_v15, %v17791_v41 }
 0xa34   : > { %10597 = vmax.xlane.f32.xlu1 %v10596_v39  ;;  %10600 = vmax.xlane.f32.xlu0 %v10599_v29  ;;  %v10515_v39 = vrot.slane %v10501_v19, %v17794_v48  ;;  %v21014_v54 = vcombine.low %v10476_v60, %v10508_v14  ;;  %v10147_v29 = vrot.slane %v10133_v5, %v17791_v41  ;;  %v10611_v23 = vsel %vm2636_vm4, %v21010_v2, -inf }
 0xa35   : > { %v10212_v10 = vcombine.low %v10156_v53, %v10172_v30  ;;  %v10131_v20 = vrot.slane %v10117_v36, %v17791_v41  ;;  %v10180_v37 = vcombine.low %v10124_v58, %v10140_v6  ;;  %v10483_v19 = vrot.slane %v10469_v62, %v17794_v48 }
 0xa36   : > { %v10228_v11 = vcombine.low %v10163_v1, %v10179_v17  ;;  %v10213_v57 = vcombine.high %v10156_v53, %v10172_v30  ;;  %v10608_v7 = vsel %vm2636_vm4, %v21014_v54, -inf  ;;  %v10181_v62 = vcombine.high %v10124_v58, %v10140_v6 }
 0xa37   : > { %v21021_v34 = vcombine.low %v10483_v19, %v10515_v39  ;;  %v10220_v45 = vrot.slane %v10212_v10, %v17794_v48  ;;  %v21026_v26 = vcombine.high %v10483_v19, %v10515_v39  ;;  %v10196_v14 = vcombine.low %v10131_v20, %v10147_v29 }
 0xa38   : > { %10606 = vmax.xlane.f32.xlu1 %v10605_v61  ;;  %10603 = vmax.xlane.f32.xlu0 %v10602_v42  ;;  %v10188_v15 = vrot.slane %v10180_v37, %v17794_v48  ;;  %v10236_v36 = vrot.slane %v10228_v11, %v17794_v48  ;;  %v10227_v61 = vrot.slane %v10213_v57, %v17794_v48 }
 0xa39   : > { %v10614_v60 = vsel %vm2636_vm4, %v21021_v34, -inf  ;;  %v10617_v30 = vsel %vm2636_vm4, %v21026_v26, -inf  ;;  %v10204_v39 = vrot.slane %v10196_v14, %v17794_v48  ;;  %v10195_v6 = vrot.slane %v10181_v62, %v17794_v48 }
 0xa3a   : > { %v21031_v5 = vcombine.high %v10188_v15, %v10220_v45  ;;  %v21036_v53 = vcombine.low %v10188_v15, %v10220_v45  ;;  %v10229_v11 = vcombine.high %v10163_v1, %v10179_v17  ;;  %v10197_v57 = vcombine.high %v10131_v20, %v10147_v29  ;;  %v22581_v29 = vld [vmem:[#allocation33_spill] sm:$0xff] }
 0xa3b   : > { %v21043_v10 = vcombine.low %v10204_v39, %v10236_v36  ;;  %v21047_v37 = vcombine.low %v10195_v6, %v10227_v61  ;;  %v21053_v45 = vcombine.high %v10195_v6, %v10227_v61  ;;  %v21057_v14 = vcombine.high %v10204_v39, %v10236_v36 }
 0xa3c   : > { %10612 = vmax.xlane.f32.xlu1 %v10611_v23  ;;  %10609 = vmax.xlane.f32.xlu0 %v10608_v7  ;;  %v10551_v58 = vsel %vm2636_vm4, %v21031_v5, -inf  ;;  %v10548_v42 = vsel %vm2636_vm4, %v21036_v53, -inf  ;;  %v10243_v15 = vrot.slane %v10229_v11, %v17794_v48  ;;  %v10211_v62 = vrot.slane %v10197_v57, %v17794_v48 }
 0xa3d   : > { %v10560_v19 = vsel %vm2636_vm4, %v21043_v10, -inf  ;;  %v10554_v23 = vsel %vm2636_vm4, %v21047_v37, -inf  ;;  %v10557_v7 = vsel %vm2636_vm4, %v21053_v45, -inf  ;;  %v10563_v17 = vsel %vm2636_vm4, %v21057_v14, -inf }
 0xa3e   : > { %v21063_v1 = vcombine.high %v10211_v62, %v10243_v15  ;;  %v21069_v20 = vcombine.low %v10211_v62, %v10243_v15 }
 0xa40   : > { %10615 = vmax.xlane.f32.xlu1 %v10614_v60  ;;  %10618 = vmax.xlane.f32.xlu0 %v10617_v30  ;;  %v10569_v60 = vsel %vm2636_vm4, %v21063_v1, -inf  ;;  %v10566_v36 = vsel %vm2636_vm4, %v21069_v20, -inf }
 0xa44   : > { %10552 = vmax.xlane.f32.xlu1 %v10551_v58  ;;  %10549 = vmax.xlane.f32.xlu0 %v10548_v42 }
 0xa48   : > { %10561 = vmax.xlane.f32.xlu1 %v10560_v19  ;;  %10555 = vmax.xlane.f32.xlu0 %v10554_v23 }
 0xa4c   : > { %10558 = vmax.xlane.f32.xlu0 %v10557_v7 }
 0xa50   : > { %10564 = vmax.xlane.f32.xlu0 %v10563_v17 }
 0xa54   : > { %10570 = vmax.xlane.f32.xlu0 %v10569_v60 }
 0xa59   : > { %10896 = vrot.lane.b32.xlu1 %v22581_v29, %s17387_s21 }
 0xa7d   : > { %10567 = vmax.xlane.f32.xlu1 %v10566_v36 }
 0xaa1   : > { %v10574_v30 = vpop.xlane.xlu1 %10573  ;;  %v10577_v39 = vpop.xlane.xlu0 %10576 }
 0xaa2   : > { %v10636_v61 = vsub.f32 %v20850_v16, %v10574_v30  ;;  %v10637_v6 = vsub.f32 %v20852_v55, %v10577_v39 }
 0xaa4   : > { %v10684_v58 = vmul.f32 1.442695, %v10636_v61  ;;  %v10686_v42 = vmul.f32 1.442695, %v10637_v6 }
 0xaa5   : > { %v10580_v19 = vpop.xlane.xlu1 %10579  ;;  %v10583_v23 = vpop.xlane.xlu0 %10582 }
 0xaa6   : > { %17057 = vpow2.f32 %v10684_v58  ;;  %v10638_v11 = vsub.f32 %v20864_v24, %v10580_v19  ;;  %v10639_v57 = vsub.f32 %v20867_v12, %v10583_v23 }
 0xaa7   : > { %17059 = vpow2.f32 %v10686_v42 }
 0xaa8   : > { %v10688_v7 = vmul.f32 1.442695, %v10638_v11  ;;  %v10690_v15 = vmul.f32 1.442695, %v10639_v57 }
 0xaa9   : > { %v10586_v62 = vpop.xlane.xlu1 %10585  ;;  %v10589_v16 = vpop.xlane.xlu0 %10588 }
 0xaaa   : > { %17061 = vpow2.f32 %v10688_v7  ;;  %v10640_v17 = vsub.f32 %v20877_v13, %v10586_v62  ;;  %v10641_v60 = vsub.f32 %v20882_v43, %v10589_v16 }
 0xaab   : > { %17063 = vpow2.f32 %v10690_v15 }
 0xaac   : > { %v10692_v55 = vmul.f32 1.442695, %v10640_v17  ;;  %v10694_v36 = vmul.f32 1.442695, %v10641_v60 }
 0xaad   : > { %v10592_v30 = vpop.xlane.xlu1 %10591  ;;  %v10595_v24 = vpop.xlane.xlu0 %10594 }
 0xaae   : > { %v10642_v61 = vsub.f32 %v20898_v31, %v10592_v30  ;;  %17065 = vpow2.f32 %v10694_v36  ;;  %v10643_v12 = vsub.f32 %v20902_v59, %v10595_v24 }
 0xaaf   : > { %17067 = vpow2.f32 %v10692_v55 }
 0xab0   : > { %v21081_v39 = vpop.eup %17057  ;;  %v10696_v6 = vmul.f32 1.442695, %v10642_v61  ;;  %v10698_v58 = vmul.f32 1.442695, %v10643_v12 }
 0xab1   : > { %v10526_v42 = vpop.xlane.xlu1 %10525  ;;  %v10764_v13 = vsel %vm2636_vm4, %v21081_v39, 0.0  ;;  %v21085_v43 = vpop.eup %17059 }
 0xab2   : > { %v10620_v19 = vsub.f32 %v20918_v63, %v10526_v42  ;;  %v10529_v11 = vpop.xlane.xlu0 %10528  ;;  %10765 = vadd.xlane.f32.xlu0 %v10764_v13  ;;  %17069 = vpow2.f32 %v10698_v58  ;;  %v10767_v62 = vsel %vm2636_vm4, %v21085_v43, 0.0 }
 0xab3   : > { %v10621_v31 = vsub.f32 %v20916_v3, %v10529_v11  ;;  %17071 = vpow2.f32 %v10696_v6 }
 0xab4   : > { %v21089_v23 = vpop.eup %17061  ;;  %v10652_v59 = vmul.f32 1.442695, %v10620_v19 }
 0xab5   : > { %v10654_v57 = vmul.f32 1.442695, %v10621_v31  ;;  %v10535_v7 = vpop.xlane.xlu1 %10534  ;;  %v10770_v15 = vsel %vm2636_vm4, %v21089_v23, 0.0  ;;  %v21095_v17 = vpop.eup %17063 }
 0xab6   : > { %22582 = vst [vmem:[#allocation50_spill] sm:$0xff] %v21095_v17  ;;  %17073 = vpow2.f32 %v10652_v59  ;;  %v10623_v63 = vsub.f32 %v20930_v49, %v10535_v7  ;;  %v10532_v16 = vpop.xlane.xlu0 %10531  ;;  %10771 = vadd.xlane.f32.xlu1 %v10770_v15  ;;  %10768 = vadd.xlane.f32.xlu0 %v10767_v62  ;;  %v10773_v61 = vsel %vm2636_vm4, %v21095_v17, 0.0 }
 0xab7   : > { %v10622_v3 = vsub.f32 %v20934_v21, %v10532_v16  ;;  %17075 = vpow2.f32 %v10654_v57 }
 0xab8   : > { %v10658_v60 = vmul.f32 1.442695, %v10623_v63  ;;  %v21099_v55 = vpop.eup %17065 }
 0xab9   : > { %22583 = vst [vmem:[#allocation20_spill] sm:$0xff] %v21099_v55  ;;  %v10656_v36 = vmul.f32 1.442695, %v10622_v3  ;;  %v10541_v30 = vpop.xlane.xlu1 %10540  ;;  %v21103_v24 = vpop.eup %17067  ;;  %v10779_v6 = vsel %vm2636_vm4, %v21099_v55, 0.0 }
 0xaba   : > { %22584 = vst [vmem:[#allocation22_spill] sm:$0xff] %v21103_v24  ;;  %17077 = vpow2.f32 %v10658_v60  ;;  %v10625_v12 = vsub.f32 %v20949_v44, %v10541_v30  ;;  %v10538_v49 = vpop.xlane.xlu0 %10537  ;;  %10774 = vadd.xlane.f32.xlu0 %v10773_v61  ;;  %10780 = vadd.xlane.f32.xlu1 %v10779_v6  ;;  %v10776_v11 = vsel %vm2636_vm4, %v21103_v24, 0.0 }
 0xabb   : > { %v10624_v21 = vsub.f32 %v20954_v33, %v10538_v49  ;;  %17079 = vpow2.f32 %v10656_v36 }
 0xabc   : > { %v10662_v58 = vmul.f32 1.442695, %v10625_v12  ;;  %v21109_v42 = vpop.eup %17069 }
 0xabd   : > { %22585 = vst [vmem:[#allocation28_spill] sm:$0xff] %v21109_v42  ;;  %v10660_v13 = vmul.f32 1.442695, %v10624_v21  ;;  %v10547_v19 = vpop.xlane.xlu1 %10546  ;;  %v21113_v31 = vpop.eup %17071  ;;  %v10785_v59 = vsel %vm2636_vm4, %v21109_v42, 0.0 }
 0xabe   : > { %22586 = vst [vmem:[#allocation34_spill] sm:$0xff] %v21113_v31  ;;  %17081 = vpow2.f32 %v10662_v58  ;;  %v10544_v44 = vpop.xlane.xlu0 %10543  ;;  %10777 = vadd.xlane.f32.xlu0 %v10776_v11  ;;  %10786 = vadd.xlane.f32.xlu1 %v10785_v59  ;;  %v10627_v7 = vsub.f32 %v20966_v50, %v10547_v19  ;;  %v10782_v63 = vsel %vm2636_vm4, %v21113_v31, 0.0 }
 0xabf   : > { %v10626_v33 = vsub.f32 %v20964_v38, %v10544_v44  ;;  %17083 = vpow2.f32 %v10660_v13 }
 0xac0   : > { %v21118_v57 = vpop.eup %17073  ;;  %v10666_v36 = vmul.f32 1.442695, %v10627_v7 }
 0xac1   : > { %v10664_v15 = vmul.f32 1.442695, %v10626_v33  ;;  %v10598_v62 = vpop.xlane.xlu1 %10597  ;;  %v10716_v16 = vsel %vm2636_vm4, %v21118_v57, 0.0  ;;  %v21125_v3 = vpop.eup %17075 }
 0xac2   : > { %v10601_v60 = vpop.xlane.xlu0 %10600  ;;  %10783 = vadd.xlane.f32.xlu0 %v10782_v63  ;;  %10717 = vadd.xlane.f32.xlu1 %v10716_v16  ;;  %v10644_v30 = vsub.f32 %v20973_v18, %v10598_v62  ;;  %v10719_v12 = vsel %vm2636_vm4, %v21125_v3, 0.0 }
 0xac3   : > { %17085 = vpow2.f32 %v10664_v15  ;;  %v10645_v18 = vsub.f32 %v20980_v35, %v10601_v60 }
 0xac4   : > { %v21127_v38 = vpop.eup %17077  ;;  %17087 = vpow2.f32 %v10666_v36  ;;  %v10700_v58 = vmul.f32 1.442695, %v10644_v30 }
 0xac5   : > { %v21130_v50 = vpop.xlane.xlu1 %10606  ;;  %v10725_v61 = vsel %vm2636_vm4, %v21127_v38, 0.0  ;;  %v21136_v49 = vpop.eup %17079  ;;  %v10702_v33 = vmul.f32 1.442695, %v10645_v18 }
 0xac6   : > { %v21138_v6 = vpop.xlane.xlu0 %10603  ;;  %10720 = vadd.xlane.f32.xlu0 %v10719_v12  ;;  %10726 = vadd.xlane.f32.xlu1 %v10725_v61  ;;  %v10722_v11 = vsel %vm2636_vm4, %v21136_v49, 0.0  ;;  %17089 = vpow2.f32 %v10700_v58 }
 0xac7   : > { %17091 = vpow2.f32 %v10702_v33 }
 0xac8   : > { %v21140_v21 = vpop.eup %17081 }
 0xac9   : > { %v21143_v13 = vpop.xlane.xlu1 %10612  ;;  %v10731_v19 = vsel %vm2636_vm4, %v21140_v21, 0.0  ;;  %v21149_v44 = vpop.eup %17083 }
 0xaca   : > { %v21151_v59 = vpop.xlane.xlu0 %10609  ;;  %10723 = vadd.xlane.f32.xlu0 %v10722_v11  ;;  %10732 = vadd.xlane.f32.xlu1 %v10731_v19  ;;  %v10728_v35 = vsel %vm2636_vm4, %v21149_v44, 0.0 }
 0xacd   : > { %v21153_v7 = vpop.xlane.xlu1 %10615  ;;  %v21157_v15 = vpop.eup %17085 }
 0xace   : > { %v21159_v62 = vpop.xlane.xlu0 %10618  ;;  %10729 = vadd.xlane.f32.xlu0 %v10728_v35  ;;  %v10734_v16 = vsel %vm2636_vm4, %v21157_v15, 0.0  ;;  %v21163_v60 = vpop.eup %17087 }
 0xacf   : > { %v10737_v18 = vsel %vm2636_vm4, %v21163_v60, 0.0 }
 0xad0   : > { %v21169_v19 = vpop.eup %17089 }
 0xad1   : > { %v10553_v63 = vpop.xlane.xlu1 %10552  ;;  %22587 = vst [vmem:[#allocation21_spill] sm:$0xff] %v21169_v19 }
 0xad2   : > { %v10629_v36 = vsub.f32 %v21031_v5, %v10553_v63  ;;  %v10550_v30 = vpop.xlane.xlu0 %10549  ;;  %10735 = vadd.xlane.f32.xlu0 %v10734_v16  ;;  %v21175_v16 = vpop.eup %17091 }
 0xad3   : > { %v10628_v61 = vsub.f32 %v21036_v53, %v10550_v30  ;;  %v10788_v53 = vsel %vm2636_vm4, %v21169_v19, 0.0  ;;  %22588 = vst [vmem:[#allocation33_spill] sm:$0xff] %v21175_v16 }
 0xad4   : > { %v10670_v12 = vmul.f32 1.442695, %v10629_v36 }
 0xad5   : > { %v10668_v58 = vmul.f32 1.442695, %v10628_v61  ;;  %v10562_v11 = vpop.xlane.xlu1 %10561 }
 0xad6   : > { %17093 = vpow2.f32 %v10670_v12  ;;  %v10556_v33 = vpop.xlane.xlu0 %10555  ;;  %10738 = vadd.xlane.f32.xlu0 %v10737_v18  ;;  %v10632_v5 = vsub.f32 %v21043_v10, %v10562_v11 }
 0xad7   : > { %17095 = vpow2.f32 %v10668_v58  ;;  %v10630_v35 = vsub.f32 %v21047_v37, %v10556_v33  ;;  %v10791_v58 = vsel %vm2636_vm4, %v21175_v16, 0.0 }
 0xad8   : > { %v10676_v61 = vmul.f32 1.442695, %v10632_v5 }
 0xad9   : > { %v10672_v63 = vmul.f32 1.442695, %v10630_v35 }
 0xada   : > { %v10559_v36 = vpop.xlane.xlu0 %10558  ;;  %10789 = vadd.xlane.f32.xlu0 %v10788_v53 }
 0xadb   : > { %17097 = vpow2.f32 %v10672_v63  ;;  %v10631_v30 = vsub.f32 %v21053_v45, %v10559_v36 }
 0xadd   : > { %v10674_v12 = vmul.f32 1.442695, %v10631_v30 }
 0xade   : > { %v10565_v18 = vpop.xlane.xlu0 %10564  ;;  %10792 = vadd.xlane.f32.xlu0 %v10791_v58  ;;  %v21207_v58 = vpop.permute.xlu1 %10896 }
 0xadf   : > { %17099 = vpow2.f32 %v10674_v12  ;;  %v10633_v10 = vsub.f32 %v21057_v14, %v10565_v18 }
 0xae0   : > { %v21181_v37 = vpop.eup %17093  ;;  %17101 = vpow2.f32 %v10676_v61 }
 0xae1   : > { %v21183_v11 = vpop.eup %17095  ;;  %v10678_v33 = vmul.f32 1.442695, %v10633_v10  ;;  %v10743_v35 = vsel %vm2636_vm4, %v21181_v37, 0.0 }
 0xae2   : > { %10744 = vadd.xlane.f32.xlu0 %v10743_v35  ;;  %v10740_v45 = vsel %vm2636_vm4, %v21183_v11, 0.0  ;;  %v10571_v10 = vpop.xlane.xlu0 %10570 }
 0xae3   : > { %17103 = vpow2.f32 %v10678_v33  ;;  %10741 = vadd.xlane.f32.xlu1 %v10740_v45  ;;  %v10635_v45 = vsub.f32 %v21063_v1, %v10571_v10 }
 0xae5   : > { %v21189_v5 = vpop.eup %17097 }
 0xae6   : > { %v10746_v14 = vsel %vm2636_vm4, %v21189_v5, 0.0 }
 0xae7   : > { %10747 = vadd.xlane.f32.xlu1 %v10746_v14  ;;  %v10646_v14 = vsub.f32 %v20996_v22, %v21138_v6 }
 0xae9   : > { %v21193_v63 = vpop.eup %17099  ;;  %v10704_v16 = vmul.f32 1.442695, %v10646_v14 }
 0xaea   : > { %v10749_v53 = vsel %vm2636_vm4, %v21193_v63, 0.0  ;;  %v21197_v36 = vpop.eup %17101 }
 0xaeb   : > { %10750 = vadd.xlane.f32.xlu0 %v10749_v53  ;;  %v10752_v61 = vsel %vm2636_vm4, %v21197_v36, 0.0  ;;  %v10682_v53 = vmul.f32 1.442695, %v10635_v45  ;;  %v11040_v45 = vcombine.low %v20815_v32, %v20803_v9 }
 0xaed   : > { %v21199_v30 = vpop.eup %17103 }
 0xaee   : > { %v10755_v12 = vsel %vm2636_vm4, %v21199_v30, 0.0 }
 0xaef   : > { %10753 = vadd.xlane.f32.xlu0 %v10752_v61  ;;  %10756 = vadd.xlane.f32.xlu1 %v10755_v12  ;;  %v10649_v61 = vsub.f32 %v21010_v2, %v21143_v13 }
 0xaf1   : > { %v10710_v42 = vmul.f32 1.442695, %v10649_v61 }
 0xb00   : > { %10944 = vrot.lane.b32.xlu1 %v22581_v29, %s17389_s3 }
 0xb0a   : > { %v10568_v18 = vpop.xlane.xlu1 %10567 }
 0xb0b   : > { %v10634_v33 = vsub.f32 %v21069_v20, %v10568_v18  ;;  %v22591_v18 = vld [vmem:[#allocation48_spill] sm:$0xff] }
 0xb0d   : > { %v10680_v35 = vmul.f32 1.442695, %v10634_v33  ;;  %v10648_v33 = vsub.f32 %v21014_v54, %v21151_v59 }
 0xb0f   : > { %17105 = vpow2.f32 %v10680_v35  ;;  %v11024_v35 = vcombine.low %v22555_v0, %v20801_v28  ;;  %v11048_v0 = vrot.slane %v11040_v45, %v17791_v41 }
 0xb10   : > { %17107 = vpow2.f32 %v10682_v53  ;;  %v22592_v53 = vld [vmem:[#allocation32_spill] sm:$0xff] }
 0xb11   : > { %17109 = vpow2.f32 %v10704_v16  ;;  %v15789_v61 = vcombine.high %v22592_v53, %v20801_v28  ;;  %v11032_v54 = vrot.slane %v11024_v35, %v17791_v41 }
 0xb12   : > { %17111 = vpow2.f32 %v10710_v42  ;;  %v10647_v42 = vsub.f32 %v20989_v40, %v21130_v50  ;;  %v11041_v40 = vcombine.high %v20815_v32, %v20803_v9  ;;  %v10708_v50 = vmul.f32 1.442695, %v10648_v33 }
 0xb13   : > { %v11057_v9 = vcombine.high %v11032_v54, %v11048_v0 }
 0xb14   : > { %v10706_v10 = vmul.f32 1.442695, %v10647_v42  ;;  %v11055_v28 = vrot.slane %v11041_v40, %v17791_v41 }
 0xb15   : > { %v11071_v35 = vrot.slane %v11057_v9, %v17794_v48  ;;  %v11109_v9 = vcombine.high %v20805_v52, %v20807_v51 }
 0xb16   : > { %17113 = vpow2.f32 %v10706_v10 }
 0xb17   : > { %17115 = vpow2.f32 %v10708_v50 }
 0xb19   : > { %v21215_v12 = vpop.eup %17105 }
 0xb1a   : > { %v10758_v20 = vsel %vm2636_vm4, %v21215_v12, 0.0  ;;  %v21219_v1 = vpop.eup %17107 }
 0xb1b   : > { %10759 = vadd.xlane.f32.xlu0 %v10758_v20  ;;  %v10761_v22 = vsel %vm2636_vm4, %v21219_v1, 0.0  ;;  %v21223_v6 = vpop.eup %17109 }
 0xb1c   : > { %22589 = vst [vmem:[#allocation51_spill] sm:$0xff] %v21223_v6  ;;  %v10794_v2 = vsel %vm2636_vm4, %v21223_v6, 0.0  ;;  %v21227_v13 = vpop.eup %17111 }
 0xb1d   : > { %22590 = vst [vmem:[#allocation52_spill] sm:$0xff] %v21227_v13  ;;  %v10803_v16 = vsel %vm2636_vm4, %v21227_v13, 0.0 }
 0xb20   : > { %v21267_v53 = vpop.eup %17113 }
 0xb21   : > { %22593 = vst [vmem:[#allocation48_spill] sm:$0xff] %v21267_v53  ;;  %v21287_v6 = vpop.eup %17115 }
 0xb24   : > { %10762 = vadd.xlane.f32.xlu1 %v10761_v22  ;;  %v11039_v22 = vrot.slane %v15789_v61, %v17791_v41 }
 0xb26   : > { %v11073_v42 = vcombine.high %v11039_v22, %v11055_v28 }
 0xb28   : > { %10795 = vadd.xlane.f32.xlu1 %v10794_v2  ;;  %v11056_v2 = vcombine.low %v11032_v54, %v11048_v0  ;;  %v11087_v40 = vrot.slane %v11073_v42, %v17794_v48  ;;  %v11108_v54 = vcombine.low %v20805_v52, %v20807_v51  ;;  %v22595_v0 = vld [vmem:[#allocation27_spill] sm:$0xff]  ;;  %v10797_v42 = vsel %vm2636_vm4, %v21267_v53, 0.0 }
 0xb29   : > { %22596 = vst [vmem:[#allocation27_spill] sm:$0xff] %v21287_v6  ;;  %v10800_v53 = vsel %vm2636_vm4, %v21287_v6, 0.0 }
 0xb2a   : > { %v11064_v33 = vrot.slane %v11056_v2, %v17794_v48 }
 0xb2c   : > { %10804 = vadd.xlane.f32.xlu1 %v10803_v16  ;;  %v11072_v16 = vcombine.low %v11039_v22, %v11055_v28  ;;  %v15790_v22 = vcombine.low %v22595_v0, %v20817_v27  ;;  %v10651_v28 = vsub.f32 %v21026_v26, %v21159_v62  ;;  %v11568_v2 = vcombine.low %v11064_v33, %v11071_v35 }
 0xb2d   : > { %v15798_v19 = vcombine.high %v11064_v33, %v11071_v35  ;;  %v11116_v26 = vrot.slane %v11108_v54, %v17791_v41 }
 0xb2e   : > { %v11080_v61 = vrot.slane %v11072_v16, %v17794_v48  ;;  %v11093_v16 = vcombine.high %v22556_v25, %v20817_v27  ;;  %v11100_v62 = vrot.slane %v15790_v22, %v17791_v41  ;;  %v10714_v52 = vmul.f32 1.442695, %v10651_v28 }
 0xb2f   : > { %v11123_v25 = vrot.slane %v11109_v9, %v17791_v41  ;;  %v21296_v33 = vrot.slane %v11568_v2, %v17791_v41 }
 0xb30   : > { %v11584_v55 = vcombine.low %v11080_v61, %v11087_v40  ;;  %v15799_v0 = vcombine.high %v11080_v61, %v11087_v40  ;;  %v11107_v51 = vrot.slane %v11093_v16, %v17791_v41  ;;  %v21299_v61 = vrot.slane %v15798_v19, %v17791_v41 }
 0xb31   : > { %10920 = vrot.lane.b32.xlu0 %v22581_v29, %s17388_s28  ;;  %v11124_v54 = vcombine.low %v11100_v62, %v11116_v26  ;;  %v11125_v22 = vcombine.high %v11100_v62, %v11116_v26 }
 0xb32   : > { %v21305_v40 = vrot.slane %v15799_v0, %v17791_v41  ;;  %v11140_v28 = vcombine.low %v11107_v51, %v11123_v25  ;;  %v11141_v9 = vcombine.high %v11107_v51, %v11123_v25  ;;  %v12078_v25 = vpack.c.bf16 %v20739_v8, %v20739_v8  ;;  %v22597_v51 = vld [vmem:[#allocation26_spill] sm:$0xff] }
 0xb33   : > { %v11139_v16 = vrot.slane %v11125_v22, %v17794_v48 }
 0xb34   : > { %v11148_v26 = vrot.slane %v11140_v28, %v17794_v48  ;;  %v11155_v62 = vrot.slane %v11141_v9, %v17794_v48  ;;  %v11176_v28 = vcombine.low %v20821_v4, %v20811_v47 }
 0xb3d   : > { %10922 = vrot.lane.b32.xlu1 %v22591_v18, %s17388_s28  ;;  %s22638_s28 = sld [smem:[#allocation59_spill]] }
 0xb3f   : > { %v21243_v14 = vpop.xlane.xlu0 %10765 }
 0xb41   : > { %10946 = vrot.lane.b32.xlu1 %v22591_v18, %s17389_s3  ;;  %s22625_s3 = smov 24  }
 0xb43   : > { %v21253_v59 = vpop.xlane.xlu1 %10771  ;;  %v21255_v20 = vpop.xlane.xlu0 %10768 }
 0xb47   : > { %v21259_v32 = vpop.xlane.xlu0 %10774  ;;  %v21261_v10 = vpop.xlane.xlu1 %10780 }
 0xb4b   : > { %v21265_v45 = vpop.xlane.xlu0 %10777  ;;  %v21271_v50 = vpop.xlane.xlu1 %10786 }
 0xb4c   : > { %22594 = vst [vmem:[#allocation32_spill] sm:$0xff] %v21271_v50 }
 0xb4f   : > { %v21283_v13 = vpop.xlane.xlu0 %10783  ;;  %v10718_v31 = vpop.xlane.xlu1 %10717 }
 0xb50   : > { %10798 = vadd.xlane.f32.xlu0 %v10797_v42  ;;  %17117 = vrcp.f32 %v10718_v31  ;;  %v21302_v31 = vrot.slane %v11584_v55, %v17791_v41  ;;  %v11132_v55 = vrot.slane %v11124_v54, %v17794_v48  ;;  %v11160_v42 = vcombine.low %v22557_v56, %v20809_v46 }
 0xb52   : > { %v11616_v19 = vcombine.low %v21302_v31, %v21305_v40  ;;  %v21325_v56 = vrot.slane %v11160_v42, %v17791_v41  ;;  %v15800_v8 = vcombine.high %v11132_v55, %v11139_v16  ;;  %v12204_v42 = vsel %vm4945_vm9, %v12078_v25, 0 }
 0xb53   : > { %v10721_v27 = vpop.xlane.xlu0 %10720  ;;  %v10727_v35 = vpop.xlane.xlu1 %10726 }
 0xb54   : > { %17119 = vrcp.f32 %v10721_v27  ;;  %10801 = vadd.xlane.f32.xlu0 %v10800_v53  ;;  %v11600_v53 = vcombine.low %v21296_v33, %v21299_v61  ;;  %v15791_v27 = vcombine.high %v22597_v51, %v20809_v46  ;;  %v11624_v22 = vrot.slane %v11616_v19, %v17794_v48 }
 0xb55   : > { %17121 = vpow2.f32 %v10714_v52  ;;  %v11177_v46 = vcombine.high %v20821_v4, %v20811_v47  ;;  %v15801_v19 = vcombine.high %v11148_v26, %v11155_v62  ;;  %v11601_v47 = vcombine.high %v21296_v33, %v21299_v61 }
 0xb56   : > { %17123 = vrcp.f32 %v10727_v35  ;;  %v11608_v54 = vrot.slane %v11600_v53, %v17794_v48  ;;  %v11617_v4 = vcombine.high %v21302_v31, %v21305_v40 }
 0xb57   : > { %v10724_v2 = vpop.xlane.xlu0 %10723  ;;  %v10733_v9 = vpop.xlane.xlu1 %10732  ;;  %v11191_v25 = vrot.slane %v11177_v46, %v17791_v41 }
 0xb58   : > { %17125 = vrcp.f32 %v10724_v2  ;;  %v11636_v2 = vcombine.low %v11132_v55, %v11139_v16  ;;  %v11632_v55 = vcombine.low %v11608_v54, %v11624_v22  ;;  %v11633_v33 = vcombine.high %v11608_v54, %v11624_v22 }
 0xb5a   : > { %v17118_v0 = vpop.eup %17117  ;;  %v21350_v61 = vrot.slane %v11636_v2, %v17791_v41  ;;  %v12080_v22 = vpack.c.bf16 %v11632_v55, %v11632_v55  ;;  %v11631_v2 = vrot.slane %v11617_v4, %v17794_v48 }
 0xb5b   : > { %v10730_v52 = vpop.xlane.xlu0 %10729  ;;  %v10844_v35 = vmul.f32 %v17118_v0, %v21118_v57  ;;  %v22598_v57 = vld [vmem:[#allocation31_spill] sm:$0xff]  ;;  %v11652_v0 = vcombine.low %v11148_v26, %v11155_v62  ;;  %v11175_v26 = vrot.slane %v15791_v27, %v17791_v41  ;;  %v22599_v62 = vmov 0.0  }
 0xb5c   : > { %17127 = vrcp.f32 %v10730_v52  ;;  %v12079_v53 = vpack.c.bf16 %v22598_v57, %v22598_v57  ;;  %v12296_v55 = vsel %vm4945_vm9, %v12080_v22, 0 }
 0xb5d   : > { %v12044_v51 = vpack.c.bf16 %v10844_v35, %v10844_v35  ;;  %17129 = vrcp.f32 %v10733_v9  ;;  %v21358_v27 = vrot.slane %v11652_v0, %v17791_v41 }
 0xb5e   : > { %v17120_v6 = vpop.eup %17119  ;;  %v12250_v35 = vsel %vm4945_vm9, %v12079_v53, 0  ;;  %v11208_v53 = vcombine.low %v11175_v26, %v11191_v25 }
 0xb5f   : > { %v10845_v50 = vmul.f32 %v17120_v6, %v21125_v3  ;;  %v10736_v17 = vpop.xlane.xlu0 %10735  ;;  %v21335_v24 = vpop.eup %17121  ;;  %16309 = vmatmul.mubr.msk.bf16.vlgmr.msra.gmra.mrb[76].mxu1 %vm2636_vm4, %v12044_v51  ;;  %v11184_v3 = vrot.slane %v11176_v28, %v17791_v41  ;;  %v21361_v28 = vrot.slane %v15801_v19, %v17791_v41  ;;  %v12081_v19 = vpack.c.bf16 %v11633_v33, %v11633_v33 }
 0xb60   : > { %v17124_v16 = vpop.eup %17123  ;;  %16319 = vmatpush3.bf16.msra.mxu1 %v12204_v42  ;;  %16320 = vmatprep.mubr.msk.bf16.mxu1 %vm17395_vm10, %v22599_v62  ;;  %v10809_v54 = vsel %vm2636_vm4, %v21335_v24, 0.0  ;;  %17131 = vrcp.f32 %v10736_v17  ;;  %v11209_v17 = vcombine.high %v11175_v26, %v11191_v25 }
 0xb61   : > { %v12045_v6 = vpack.c.bf16 %v10845_v50, %v10845_v50  ;;  %16330 = vmatprep.subr.bf16.mxu1 %v22599_v62  ;;  %v21355_v50 = vrot.slane %v15800_v8, %v17791_v41  ;;  %v10847_v9 = vmul.f32 %v17124_v16, %v21127_v38  ;;  %v11192_v46 = vcombine.low %v21325_v56, %v11184_v3 }
 0xb62   : > { %v17126_v52 = vpop.eup %17125  ;;  %v11193_v51 = vcombine.high %v21325_v56, %v11184_v3  ;;  %v11684_v38 = vcombine.low %v21358_v27, %v21361_v28 }
 0xb63   : > { %v10846_v31 = vmul.f32 %v17126_v52, %v21136_v49  ;;  %16315 = vmatmul.mubr.msk.bf16.vlgmr.msra.gmra.mrb[84].mxu0 %vm2636_vm4, %v12045_v6  ;;  %v10739_v40 = vpop.xlane.xlu0 %10738  ;;  %v11615_v49 = vrot.slane %v11601_v47, %v17794_v48  ;;  %v11668_v42 = vcombine.low %v21350_v61, %v21355_v50  ;;  %v12047_v56 = vpack.c.bf16 %v10847_v9, %v10847_v9 }
 0xb64   : > { %16325 = vmatpush3.bf16.msra.mxu0 %v12250_v35  ;;  %16326 = vmatprep.mubr.msk.bf16.mxu0 %vm17395_vm10, %v22599_v62  ;;  %17133 = vrcp.f32 %v10739_v40  ;;  %v11200_v16 = vrot.slane %v11192_v46, %v17794_v48  ;;  %v11207_v6 = vrot.slane %v11193_v51, %v17794_v48  ;;  %v12342_v52 = vsel %vm4945_vm9, %v12081_v19, 0 }
 0xb65   : > { %10810 = vadd.xlane.f32.xlu1 %v10809_v54  ;;  %v12046_v8 = vpack.c.bf16 %v10846_v31, %v10846_v31  ;;  %16336 = vmatprep.subr.bf16.mxu0 %v22599_v62  ;;  %v11634_v47 = vcombine.low %v11615_v49, %v11631_v2  ;;  %v11635_v26 = vcombine.high %v11615_v49, %v11631_v2 }
 0xb66   : > { %v17128_v57 = vpop.eup %17127  ;;  %v11676_v35 = vrot.slane %v11668_v42, %v17794_v48  ;;  %v11692_v33 = vrot.slane %v11684_v38, %v17794_v48  ;;  %v11223_v31 = vrot.slane %v11209_v17, %v17794_v48  ;;  %v11669_v2 = vcombine.high %v21350_v61, %v21355_v50 }
 0xb67   : > { %v21373_v0 = vpop.xlane.xlu0 %10789  ;;  %16321 = vmatmul.mubr.msk.bf16.vlgmr.msra.gmra.mrb[80].mxu1 %vm2636_vm4, %v12046_v8  ;;  %v17130_v4 = vpop.eup %17129  ;;  %v10848_v3 = vmul.f32 %v17128_v57, %v21149_v44  ;;  %v11216_v44 = vrot.slane %v11208_v53, %v17794_v48  ;;  %v12082_v40 = vpack.c.bf16 %v11634_v47, %v11634_v47  ;;  %v12083_v49 = vpack.c.bf16 %v11635_v26, %v11635_v26 }
 0xb68   : > { %16331 = vmatpush3.bf16.msra.mxu1 %v12296_v55  ;;  %16332 = vmatprep.mubr.msk.bf16.mxu1 %vm17395_vm10, %v22599_v62  ;;  %v10849_v54 = vmul.f32 %v17130_v4, %v21140_v21  ;;  %v11685_v9 = vcombine.high %v21358_v27, %v21361_v28  ;;  %v11704_v46 = vcombine.low %v11200_v16, %v11207_v6 }
 0xb69   : > { %16342 = vmatprep.subr.bf16.mxu1 %v22599_v62  ;;  %v12048_v22 = vpack.c.bf16 %v10848_v3, %v10848_v3  ;;  %v15802_v51 = vcombine.high %v11200_v16, %v11207_v6  ;;  %v11700_v53 = vcombine.low %v11676_v35, %v11692_v33  ;;  %v11720_v19 = vcombine.low %v11216_v44, %v11223_v31 }
 0xb6a   : > { %10898 = vrot.lane.b32.xlu0 %v22591_v18, %s17387_s21  ;;  %v17132_v8 = vpop.eup %17131  ;;  %v15803_v42 = vcombine.high %v11216_v44, %v11223_v31  ;;  %v12388_v21 = vsel %vm4945_vm9, %v12082_v40, 0  ;;  %v12049_v17 = vpack.c.bf16 %v10849_v54, %v10849_v54  ;;  %v12434_v27 = vsel %vm4945_vm9, %v12083_v49, 0  ;;  %s22637_s21 = sld [smem:[#allocation60_spill]] }
 0xb6b   : > { %16327 = vmatmul.mubr.msk.bf16.vlgmr.msra.gmra.mrb[88].mxu0 %vm2636_vm4, %v12047_v56  ;;  %v21391_v25 = vpop.xlane.xlu0 %10792  ;;  %v10850_v50 = vmul.f32 %v17132_v8, %v21157_v15  ;;  %v11683_v28 = vrot.slane %v11669_v2, %v17794_v48  ;;  %v11699_v55 = vrot.slane %v11685_v9, %v17794_v48  ;;  %v10650_v47 = vsub.f32 %v21021_v34, %v21153_v7 }
 0xb6c   : > { %16337 = vmatpush3.bf16.msra.mxu0 %v12342_v52  ;;  %16338 = vmatprep.mubr.msk.bf16.mxu0 %vm17395_vm10, %v22599_v62  ;;  %v12084_v56 = vpack.c.bf16 %v11700_v53, %v11700_v53  ;;  %v11701_v4 = vcombine.high %v11676_v35, %v11692_v33  ;;  %v21418_v16 = vrot.slane %v11704_v46, %v17791_v41 }
 0xb6d   : > { %16348 = vmatprep.subr.bf16.mxu0 %v22599_v62  ;;  %v11719_v15 = vrot.slane %v15802_v51, %v17791_v41  ;;  %v11727_v26 = vrot.slane %v11720_v19, %v17791_v41  ;;  %v11735_v6 = vrot.slane %v15803_v42, %v17791_v41  ;;  %v12050_v7 = vpack.c.bf16 %v10850_v50, %v10850_v50 }
 0xb6e   : > { %v17134_v61 = vpop.eup %17133  ;;  %v10712_v52 = vmul.f32 1.442695, %v10650_v47  ;;  %v12085_v35 = vpack.c.bf16 %v11701_v4, %v11701_v4  ;;  %v11702_v33 = vcombine.low %v11683_v28, %v11699_v55  ;;  %v12480_v44 = vsel %vm4945_vm9, %v12084_v56, 0 }
 0xb6f   : > { %v10745_v57 = vpop.xlane.xlu0 %10744  ;;  %16333 = vmatmul.mubr.msk.bf16.vlgmr.msra.gmra.mrb[84].mxu1 %vm2636_vm4, %v12048_v22  ;;  %v10851_v34 = vmul.f32 %v17134_v61, %v21163_v60  ;;  %v11736_v40 = vcombine.low %v21418_v16, %v11719_v15  ;;  %v11752_v54 = vcombine.low %v11727_v26, %v11735_v6  ;;  %v11703_v8 = vcombine.high %v11683_v28, %v11699_v55 }
 0xb70   : > { %v10742_v38 = vpop.xlane.xlu1 %10741  ;;  %17135 = vrcp.f32 %v10745_v57  ;;  %16343 = vmatpush3.bf16.msra.mxu1 %v12388_v21  ;;  %16344 = vmatprep.mubr.msk.bf16.mxu1 %vm17395_vm10, %v22599_v62  ;;  %v12526_v2 = vsel %vm4945_vm9, %v12085_v35, 0  ;;  %v12086_v9 = vpack.c.bf16 %v11702_v33, %v11702_v33  ;;  %v11737_v50 = vcombine.high %v21418_v16, %v11719_v15 }
 0xb71   : > { %17137 = vrcp.f32 %v10742_v38  ;;  %16354 = vmatprep.subr.bf16.mxu1 %v22599_v62  ;;  %v12051_v22 = vpack.c.bf16 %v10851_v34, %v10851_v34  ;;  %v11744_v57 = vrot.slane %v11736_v40, %v17794_v48  ;;  %v11760_v53 = vrot.slane %v11752_v54, %v17794_v48 }
 0xb72   : > { %v11751_v16 = vrot.slane %v11737_v50, %v17794_v48 }
 0xb73   : > { %16339 = vmatmul.mubr.msk.bf16.vlgmr.msra.gmra.mrb[92].mxu0 %vm2636_vm4, %v12049_v17  ;;  %v12572_v17 = vsel %vm4945_vm9, %v12086_v9, 0  ;;  %v11768_v61 = vcombine.low %v11744_v57, %v11760_v53  ;;  %v11769_v56 = vcombine.high %v11744_v57, %v11760_v53  ;;  %v22602_v9 = vld [vmem:[#allocation43_spill] sm:$0xff]  ;;  %v22604_v57 = vld [vmem:[#allocation49_spill] sm:$0xff] }
 0xb74   : > { %v10748_v3 = vpop.xlane.xlu1 %10747  ;;  %16349 = vmatpush3.bf16.msra.mxu0 %v12434_v27  ;;  %16350 = vmatprep.mubr.msk.bf16.mxu0 %vm17395_vm10, %v22599_v62  ;;  %v11753_v27 = vcombine.high %v11727_v26, %v11735_v6 }
 0xb75   : > { %17139 = vrcp.f32 %v10748_v3  ;;  %16360 = vmatprep.subr.bf16.mxu0 %v22599_v62  ;;  %v12088_v4 = vpack.c.bf16 %v11768_v61, %v11768_v61  ;;  %v12089_v6 = vpack.c.bf16 %v11769_v56, %v11769_v56 }
 0xb76   : > { %v11767_v3 = vrot.slane %v11753_v27, %v17794_v48 }
 0xb77   : > { %16345 = vmatmul.mubr.msk.bf16.vlgmr.msra.gmra.mrb[88].mxu1 %vm2636_vm4, %v12050_v7  ;;  %v12664_v7 = vsel %vm4945_vm9, %v12088_v4, 0 }
 0xb78   : > { %v10751_v31 = vpop.xlane.xlu0 %10750  ;;  %16355 = vmatpush3.bf16.msra.mxu1 %v12480_v44  ;;  %16356 = vmatprep.mubr.msk.bf16.mxu1 %vm17395_vm10, %v22599_v62  ;;  %v11770_v35 = vcombine.low %v11751_v16, %v11767_v3  ;;  %v11771_v40 = vcombine.high %v11751_v16, %v11767_v3  ;;  %v22605_v16 = vld [vmem:[#allocation35_spill] sm:$0xff] }
 0xb79   : > { %17141 = vrcp.f32 %v10751_v31  ;;  %16366 = vmatprep.subr.bf16.mxu1 %v22599_v62  ;;  %v22606_v3 = vld [vmem:[#allocation19_spill] sm:$0xff] }
 0xb7a   : > { %v17136_v60 = vpop.eup %17135  ;;  %17143 = vpow2.f32 %v10712_v52  ;;  %v12090_v54 = vpack.c.bf16 %v11770_v35, %v11770_v35 }
 0xb7b   : > { %v17138_v49 = vpop.eup %17137  ;;  %16351 = vmatmul.mubr.msk.bf16.vlgmr.msra.gmra.mrb[96].mxu0 %vm2636_vm4, %v12051_v22  ;;  %v10853_v19 = vmul.f32 %v17136_v60, %v21181_v37  ;;  %v22601_v60 = vld [vmem:[#allocation47_spill] sm:$0xff] }
 0xb7c   : > { %v10852_v46 = vmul.f32 %v17138_v49, %v21183_v11  ;;  %16361 = vmatpush3.bf16.msra.mxu0 %v12526_v2  ;;  %v10754_v51 = vpop.xlane.xlu0 %10753  ;;  %16362 = vmatprep.mubr.msk.bf16.mxu0 %vm17395_vm10, %v22599_v62  ;;  %v10757_v42 = vpop.xlane.xlu1 %10756  ;;  %v12087_v11 = vpack.c.bf16 %v11703_v8, %v11703_v8  ;;  %v22603_v8 = vld [vmem:[#allocation42_spill] sm:$0xff] }
 0xb7d   : > { %16372 = vmatprep.subr.bf16.mxu0 %v22599_v62  ;;  %17145 = vrcp.f32 %v10754_v51  ;;  %v12053_v28 = vpack.c.bf16 %v10853_v19, %v10853_v19  ;;  %v11245_v51 = vcombine.high %v22603_v8, %v22602_v9  ;;  %v12091_v19 = vpack.c.bf16 %v11771_v40, %v11771_v40 }
 0xb7e   : > { %v12052_v38 = vpack.c.bf16 %v10852_v46, %v10852_v46  ;;  %17147 = vrcp.f32 %v10757_v42  ;;  %v12618_v47 = vsel %vm4945_vm9, %v12087_v11, 0  ;;  %v11244_v46 = vcombine.low %v22603_v8, %v22602_v9 }
 0xb7f   : > { %v17140_v21 = vpop.eup %17139  ;;  %v12802_v61 = vsel %vm4945_vm9, %v12091_v19, 0 }
 0xb80   : > { %16357 = vmatmul.mubr.msk.bf16.vlgmr.msra.gmra.mrb[92].mxu1 %vm2636_vm4, %v12052_v38  ;;  %v10854_v37 = vmul.f32 %v17140_v21, %v21189_v5  ;;  %v11252_v21 = vrot.slane %v11244_v46, %v17791_v41 }
 0xb81   : > { %16367 = vmatpush3.bf16.msra.mxu1 %v12572_v17  ;;  %16368 = vmatprep.mubr.msk.bf16.mxu1 %vm17395_vm10, %v22599_v62  ;;  %v11259_v17 = vrot.slane %v11245_v51, %v17791_v41 }
 0xb82   : > { %16378 = vmatprep.subr.bf16.mxu1 %v22599_v62  ;;  %v12054_v26 = vpack.c.bf16 %v10854_v37, %v10854_v37 }
 0xb83   : > { %v17142_v55 = vpop.eup %17141  ;;  %16363 = vmatmul.mubr.msk.bf16.vlgmr.msra.gmra.mrb[100].mxu0 %vm2636_vm4, %v12053_v28 }
 0xb84   : > { %16373 = vmatpush3.bf16.msra.mxu0 %v12618_v47  ;;  %16374 = vmatprep.mubr.msk.bf16.mxu0 %vm17395_vm10, %v22599_v62  ;;  %v21455_v15 = vpop.eup %17143  ;;  %v10855_v5 = vmul.f32 %v17142_v55, %v21193_v63  ;;  %v12710_v63 = vsel %vm4945_vm9, %v12089_v6, 0 }
 0xb85   : > { %16384 = vmatprep.subr.bf16.mxu0 %v22599_v62  ;;  %v10806_v52 = vsel %vm2636_vm4, %v21455_v15, 0.0 }
 0xb86   : > { %v12055_v33 = vpack.c.bf16 %v10855_v5, %v10855_v5  ;;  %v11296_v5 = vcombine.low %v22606_v3, %v22605_v16  ;;  %v22610_v3 = vld [vmem:[#allocation39_spill] sm:$0xff] }
 0xb87   : > { %v17146_v34 = vpop.eup %17145 }
 0xb88   : > { %16369 = vmatmul.mubr.msk.bf16.vlgmr.msra.gmra.mrb[96].mxu1 %vm2636_vm4, %v12054_v26  ;;  %v17148_v44 = vpop.eup %17147  ;;  %v10856_v31 = vmul.f32 %v17146_v34, %v21197_v36  ;;  %v22600_v36 = vld [vmem:[#allocation23_spill] sm:$0xff]  ;;  %v22607_v26 = vld [vmem:[#allocation29_spill] sm:$0xff]  ;;  %v11304_v40 = vrot.slane %v11296_v5, %v17791_v41 }
 0xb89   : > { %16379 = vmatpush3.bf16.msra.mxu1 %v12664_v7  ;;  %10807 = vadd.xlane.f32.xlu0 %v10806_v52  ;;  %v10857_v22 = vmul.f32 %v17148_v44, %v21199_v30  ;;  %v15792_v49 = vcombine.low %v22601_v60, %v22600_v36  ;;  %v11229_v53 = vcombine.high %v22604_v57, %v22600_v36  ;;  %v12756_v30 = vsel %vm4945_vm9, %v12090_v54, 0  ;;  %v22608_v34 = vld [vmem:[#allocation41_spill] sm:$0xff]  ;;  %v22609_v7 = vld [vmem:[#allocation40_spill] sm:$0xff] }
 0xb8a   : > { %16380 = vmatprep.mubr.msk.bf16.mxu1 %vm17395_vm10, %v22599_v62  ;;  %16390 = vmatprep.subr.bf16.mxu1 %v22599_v62  ;;  %v12056_v2 = vpack.c.bf16 %v10856_v31, %v10856_v31  ;;  %v15793_v6 = vcombine.high %v22607_v26, %v22605_v16  ;;  %v11312_v52 = vcombine.low %v22609_v7, %v22608_v34 }
 0xb8b   : > { %16375 = vmatmul.mubr.msk.bf16.vlgmr.msra.gmra.mrb[104].mxu0 %vm2636_vm4, %v12055_v33  ;;  %v12057_v42 = vpack.c.bf16 %v10857_v22, %v10857_v22  ;;  %v11236_v38 = vrot.slane %v15792_v49, %v17791_v41  ;;  %v11243_v11 = vrot.slane %v11229_v53, %v17791_v41  ;;  %v11313_v35 = vcombine.high %v22609_v7, %v22608_v34 }
 0xb8c   : > { %16385 = vmatpush3.bf16.msra.mxu0 %v12710_v63  ;;  %16386 = vmatprep.mubr.msk.bf16.mxu0 %vm17395_vm10, %v22599_v62  ;;  %v11311_v54 = vrot.slane %v15793_v6, %v17791_v41  ;;  %v11320_v22 = vrot.slane %v11312_v52, %v17791_v41 }
 0xb8d   : > { %16396 = vmatprep.subr.bf16.mxu0 %v22599_v62  ;;  %v11260_v50 = vcombine.low %v11236_v38, %v11252_v21  ;;  %v11261_v27 = vcombine.high %v11236_v38, %v11252_v21  ;;  %v11276_v28 = vcombine.low %v11243_v11, %v11259_v17  ;;  %v11277_v37 = vcombine.high %v11243_v11, %v11259_v17 }
 0xb8e   : > { %v11327_v36 = vrot.slane %v11313_v35, %v17791_v41  ;;  %v11328_v8 = vcombine.low %v11304_v40, %v11320_v22  ;;  %v11329_v46 = vcombine.high %v11304_v40, %v11320_v22 }
 0xb8f   : > { %v11268_v55 = vrot.slane %v11260_v50, %v17794_v48  ;;  %v11275_v47 = vrot.slane %v11261_v27, %v17794_v48  ;;  %v11284_v56 = vrot.slane %v11276_v28, %v17794_v48  ;;  %v11291_v4 = vrot.slane %v11277_v37, %v17794_v48  ;;  %v10945_v50 = vpop.permute.xlu1 %10944 }
 0xb90   : > { %16381 = vmatmul.mubr.msk.bf16.vlgmr.msra.gmra.mrb[100].mxu1 %vm2636_vm4, %v12056_v2  ;;  %v11344_v51 = vcombine.low %v11311_v54, %v11327_v36  ;;  %v11345_v57 = vcombine.high %v11311_v54, %v11327_v36  ;;  %v11343_v38 = vrot.slane %v11329_v46, %v17794_v48  ;;  %v11381_v52 = vcombine.high %v21207_v58, %v10945_v50 }
 0xb91   : > { %16391 = vmatpush3.bf16.msra.mxu1 %v12756_v30  ;;  %16392 = vmatprep.mubr.msk.bf16.mxu1 %vm17395_vm10, %v22599_v62  ;;  %v11772_v33 = vcombine.low %v11268_v55, %v11275_v47  ;;  %v15804_v44 = vcombine.high %v11268_v55, %v11275_v47  ;;  %v11788_v31 = vcombine.low %v11284_v56, %v11291_v4 }
 0xb92   : > { %16402 = vmatprep.subr.bf16.mxu1 %v22599_v62  ;;  %v15805_v63 = vcombine.high %v11284_v56, %v11291_v4  ;;  %v11352_v21 = vrot.slane %v11344_v51, %v17794_v48  ;;  %v11359_v17 = vrot.slane %v11345_v57, %v17794_v48  ;;  %v11395_v36 = vrot.slane %v11381_v52, %v17791_v41 }
 0xb93   : > { %16387 = vmatmul.mubr.msk.bf16.vlgmr.msra.gmra.mrb[108].mxu0 %vm2636_vm4, %v12057_v42  ;;  %v11779_v60 = vrot.slane %v11772_v33, %v17791_v41  ;;  %v11787_v49 = vrot.slane %v15804_v44, %v17791_v41  ;;  %v11795_v2 = vrot.slane %v11788_v31, %v17791_v41  ;;  %v11336_v42 = vrot.slane %v11328_v8, %v17794_v48 }
 0xb94   : > { %16397 = vmatpush3.bf16.msra.mxu0 %v12802_v61  ;;  %16398 = vmatprep.mubr.msk.bf16.mxu0 %vm17395_vm10, %v22599_v62  ;;  %v11803_v9 = vrot.slane %v15805_v63, %v17791_v41  ;;  %v11856_v56 = vcombine.low %v11352_v21, %v11359_v17  ;;  %v15807_v4 = vcombine.high %v11352_v21, %v11359_v17 }
 0xb95   : > { %16408 = vmatprep.subr.bf16.mxu0 %v22599_v62  ;;  %v11804_v53 = vcombine.low %v11779_v60, %v11787_v49  ;;  %v11805_v28 = vcombine.high %v11779_v60, %v11787_v49  ;;  %v11840_v55 = vcombine.low %v11336_v42, %v11343_v38  ;;  %v15806_v47 = vcombine.high %v11336_v42, %v11343_v38 }
 0xb96   : > { %v11820_v19 = vcombine.low %v11795_v2, %v11803_v9  ;;  %v11821_v37 = vcombine.high %v11795_v2, %v11803_v9  ;;  %v21531_v63 = vrot.slane %v11856_v56, %v17791_v41 }
 0xb97   : > { %v11812_v11 = vrot.slane %v11804_v53, %v17794_v48  ;;  %v11819_v34 = vrot.slane %v11805_v28, %v17794_v48  ;;  %v11847_v35 = vrot.slane %v11840_v55, %v17791_v41  ;;  %v11855_v31 = vrot.slane %v15806_v47, %v17791_v41 }
 0xb98   : > { %v11828_v61 = vrot.slane %v11820_v19, %v17794_v48  ;;  %v11835_v7 = vrot.slane %v11821_v37, %v17794_v48 }
 0xb99   : > { %v11872_v8 = vcombine.low %v11847_v35, %v11855_v31  ;;  %v11873_v28 = vcombine.high %v11847_v35, %v11855_v31 }
 0xb9a   : > { %v11836_v16 = vcombine.low %v11812_v11, %v11828_v61  ;;  %v11838_v9 = vcombine.low %v11819_v34, %v11835_v7 }
 0xb9c   : > { %v12092_v44 = vpack.c.bf16 %v11836_v16, %v11836_v16  ;;  %v12094_v19 = vpack.c.bf16 %v11838_v9, %v11838_v9 }
 0xb9e   : > { %v12848_v2 = vsel %vm4945_vm9, %v12092_v44, 0  ;;  %v12940_v47 = vsel %vm4945_vm9, %v12094_v19, 0 }
 0xba8   : > { %v10760_v30 = vpop.xlane.xlu0 %10759 }
 0xba9   : > { %17149 = vrcp.f32 %v10760_v30  ;;  %v11880_v30 = vrot.slane %v11872_v8, %v17794_v48 }
 0xbaa   : > { %17151 = vrcp.f32 %v21243_v14  ;;  %v11380_v14 = vcombine.low %v21207_v58, %v10945_v50 }
 0xbac   : > { %v10921_v27 = vpop.permute.xlu0 %10920  ;;  %v11388_v58 = vrot.slane %v11380_v14, %v17791_v41  ;;  %v11887_v14 = vrot.slane %v11873_v28, %v17794_v48 }
 0xbad   : > { %v15794_v5 = vcombine.low %v22610_v3, %v10921_v27  ;;  %v11365_v26 = vcombine.high %v22581_v29, %v10921_v27  ;;  %v11871_v29 = vrot.slane %v15807_v4, %v17791_v41 }
 0xbaf   : > { %v11372_v54 = vrot.slane %v15794_v5, %v17791_v41  ;;  %v11379_v22 = vrot.slane %v11365_v26, %v17791_v41  ;;  %v11889_v4 = vcombine.high %v21531_v63, %v11871_v29 }
 0xbb1   : > { %v10763_v6 = vpop.xlane.xlu1 %10762  ;;  %v11396_v46 = vcombine.low %v11372_v54, %v11388_v58  ;;  %v11397_v51 = vcombine.high %v11372_v54, %v11388_v58  ;;  %v11412_v57 = vcombine.low %v11379_v22, %v11395_v36  ;;  %v11413_v53 = vcombine.high %v11379_v22, %v11395_v36 }
 0xbb2   : > { %17153 = vrcp.f32 %v10763_v6 }
 0xbb3   : > { %v17150_v33 = vpop.eup %17149  ;;  %17155 = vrcp.f32 %v21253_v59  ;;  %v11837_v59 = vcombine.high %v11812_v11, %v11828_v61  ;;  %v11404_v21 = vrot.slane %v11396_v46, %v17794_v48  ;;  %v11411_v17 = vrot.slane %v11397_v51, %v17794_v48 }
 0xbb4   : > { %v10858_v40 = vmul.f32 %v17150_v33, %v21215_v12  ;;  %17157 = vrcp.f32 %v21255_v20  ;;  %v17152_v49 = vpop.eup %17151  ;;  %v11888_v12 = vcombine.low %v21531_v63, %v11871_v29  ;;  %v11420_v50 = vrot.slane %v11412_v57, %v17794_v48  ;;  %v22613_v57 = vld [vmem:[#allocation32_spill] sm:$0xff] }
 0xbb5   : > { %v10860_v20 = vmul.f32 %v17152_v49, %v21081_v39  ;;  %v11427_v27 = vrot.slane %v11413_v53, %v17794_v48  ;;  %17159 = vrcp.f32 %v21265_v45  ;;  %v12093_v11 = vpack.c.bf16 %v11837_v59, %v11837_v59  ;;  %v22611_v49 = vld [vmem:[#allocation22_spill] sm:$0xff] }
 0xbb6   : > { %v12058_v60 = vpack.c.bf16 %v10858_v40, %v10858_v40  ;;  %v11896_v42 = vrot.slane %v11888_v12, %v17794_v48  ;;  %17161 = vrcp.f32 %v21259_v32  ;;  %v11908_v3 = vcombine.low %v11404_v21, %v11411_v17 }
 0xbb7   : > { %v12060_v61 = vpack.c.bf16 %v10860_v20, %v10860_v20  ;;  %v15808_v5 = vcombine.high %v11404_v21, %v11411_v17  ;;  %v11924_v26 = vcombine.low %v11420_v50, %v11427_v27  ;;  %v15809_v6 = vcombine.high %v11420_v50, %v11427_v27  ;;  %v22614_v50 = vld [vmem:[#allocation34_spill] sm:$0xff] }
 0xbb8   : > { %16393 = vmatmul.mubr.msk.bf16.vlgmr.msra.gmra.mrb[104].mxu1 %vm2636_vm4, %v12058_v60  ;;  %v11904_v56 = vcombine.low %v11880_v30, %v11896_v42  ;;  %v11839_v32 = vcombine.high %v11819_v34, %v11835_v7  ;;  %v11903_v33 = vrot.slane %v11889_v4, %v17794_v48  ;;  %v11915_v34 = vrot.slane %v11908_v3, %v17791_v41 }
 0xbb9   : > { %16403 = vmatpush3.bf16.msra.mxu1 %v12848_v2  ;;  %16404 = vmatprep.mubr.msk.bf16.mxu1 %vm17395_vm10, %v22599_v62  ;;  %v11931_v7 = vrot.slane %v11924_v26, %v17791_v41  ;;  %v11939_v44 = vrot.slane %v15809_v6, %v17791_v41  ;;  %17163 = vrcp.f32 %v21283_v13  ;;  %v11905_v13 = vcombine.high %v11880_v30, %v11896_v42 }
 0xbba   : > { %16414 = vmatprep.subr.bf16.mxu1 %v22599_v62  ;;  %v12096_v35 = vpack.c.bf16 %v11904_v56, %v11904_v56  ;;  %17165 = vrcp.f32 %v21261_v10  ;;  %v11906_v22 = vcombine.low %v11887_v14, %v11903_v33  ;;  %v22612_v10 = vld [vmem:[#allocation50_spill] sm:$0xff] }
 0xbbb   : > { %v11956_v36 = vcombine.low %v11931_v7, %v11939_v44  ;;  %17167 = vrcp.f32 %v21373_v0  ;;  %v12097_v51 = vpack.c.bf16 %v11905_v13, %v11905_v13  ;;  %v11957_v21 = vcombine.high %v11931_v7, %v11939_v44 }
 0xbbc   : > { %v17154_v38 = vpop.eup %17153  ;;  %v13032_v54 = vsel %vm4945_vm9, %v12096_v35, 0  ;;  %v12098_v8 = vpack.c.bf16 %v11906_v22, %v11906_v22  ;;  %17169 = vrcp.f32 %v22613_v57  ;;  %v11907_v0 = vcombine.high %v11887_v14, %v11903_v33  ;;  %v22618_v22 = vld [vmem:[#allocation51_spill] sm:$0xff] }
 0xbbd   : > { %v10859_v39 = vmul.f32 %v17154_v38, %v21219_v1  ;;  %v17156_v37 = vpop.eup %17155  ;;  %v12894_v1 = vsel %vm4945_vm9, %v12093_v11, 0  ;;  %v11964_v46 = vrot.slane %v11956_v36, %v17794_v48  ;;  %v13078_v17 = vsel %vm4945_vm9, %v12097_v51, 0  ;;  %v22615_v11 = vld [vmem:[#allocation20_spill] sm:$0xff]  ;;  %v22619_v36 = vld [vmem:[#allocation33_spill] sm:$0xff] }
 0xbbe   : > { %v17158_v16 = vpop.eup %17157  ;;  %v10862_v45 = vmul.f32 %v17156_v37, %v21089_v23  ;;  %v11923_v23 = vrot.slane %v15808_v5, %v17791_v41  ;;  %v13124_v30 = vsel %vm4945_vm9, %v12098_v8, 0 }
 0xbbf   : > { %v12059_v55 = vpack.c.bf16 %v10859_v39, %v10859_v39  ;;  %v10861_v52 = vmul.f32 %v17158_v16, %v21085_v43  ;;  %v12095_v43 = vpack.c.bf16 %v11839_v32, %v11839_v32  ;;  %v17160_v63 = vpop.eup %17159  ;;  %v10796_v39 = vpop.xlane.xlu1 %10795  ;;  %v22616_v32 = vld [vmem:[#allocation21_spill] sm:$0xff] }
 0xbc0   : > { %16405 = vmatmul.mubr.msk.bf16.vlgmr.msra.gmra.mrb[108].mxu1 %vm2636_vm4, %v12060_v61  ;;  %v12062_v31 = vpack.c.bf16 %v10862_v45, %v10862_v45  ;;  %v17162_v40 = vpop.eup %17161  ;;  %v11940_v58 = vcombine.low %v11915_v34, %v11923_v23  ;;  %v10864_v2 = vmul.f32 %v17160_v63, %v22611_v49  ;;  %v11941_v38 = vcombine.high %v11915_v34, %v11923_v23  ;;  %v22620_v49 = vld [vmem:[#allocation38_spill] sm:$0xff] }
 0xbc1   : > { %16399 = vmatmul.mubr.msk.bf16.vlgmr.msra.gmra.mrb[112].mxu0 %vm2636_vm4, %v12059_v55  ;;  %16415 = vmatpush3.bf16.msra.mxu1 %v12940_v47  ;;  %v12061_v29 = vpack.c.bf16 %v10861_v52, %v10861_v52  ;;  %v12986_v60 = vsel %vm4945_vm9, %v12095_v43, 0  ;;  %v10863_v9 = vmul.f32 %v17162_v40, %v22612_v10  ;;  %v11971_v55 = vrot.slane %v11957_v21, %v17794_v48 }
 0xbc2   : > { %16409 = vmatpush3.bf16.msra.mxu0 %v12894_v1  ;;  %16410 = vmatprep.mubr.msk.bf16.mxu0 %vm17395_vm10, %v22599_v62  ;;  %v11948_v12 = vrot.slane %v11940_v58, %v17794_v48  ;;  %v12064_v53 = vpack.c.bf16 %v10864_v2, %v10864_v2  ;;  %v11955_v37 = vrot.slane %v11941_v38, %v17794_v48  ;;  %17171 = vrcp.f32 %v10796_v39 }
 0xbc3   : > { %16416 = vmatprep.mubr.msk.bf16.mxu1 %vm17395_vm10, %v22599_v62  ;;  %16420 = vmatprep.subr.bf16.mxu0 %v22599_v62  ;;  %v17164_v59 = vpop.eup %17163  ;;  %v12063_v20 = vpack.c.bf16 %v10863_v9, %v10863_v9  ;;  %v12099_v47 = vpack.c.bf16 %v11907_v0, %v11907_v0  ;;  %17173 = vrcp.f32 %v21391_v25  ;;  %v22617_v25 = vld [vmem:[#allocation28_spill] sm:$0xff]  ;;  %v10805_v52 = vpop.xlane.xlu1 %10804 }
 0xbc4   : > { %16426 = vmatprep.subr.bf16.mxu1 %v22599_v62  ;;  %v17166_v19 = vpop.eup %17165  ;;  %v11972_v42 = vcombine.low %v11948_v12, %v11964_v46  ;;  %v10866_v27 = vmul.f32 %v17164_v59, %v22614_v50  ;;  %v11974_v26 = vcombine.low %v11955_v37, %v11971_v55  ;;  %v11973_v1 = vcombine.high %v11948_v12, %v11964_v46  ;;  %v22621_v0 = vld [vmem:[#allocation48_spill] sm:$0xff] }
 0xbc5   : > { %v10865_v61 = vmul.f32 %v17166_v19, %v22615_v11  ;;  %v17168_v4 = vpop.eup %17167  ;;  %v13170_v6 = vsel %vm4945_vm9, %v12099_v47, 0 }
 0xbc6   : > { %v12100_v28 = vpack.c.bf16 %v11972_v42, %v11972_v42  ;;  %v12066_v56 = vpack.c.bf16 %v10866_v27, %v10866_v27  ;;  %v17170_v3 = vpop.eup %17169  ;;  %v10868_v45 = vmul.f32 %v17168_v4, %v22616_v32  ;;  %v12102_v35 = vpack.c.bf16 %v11974_v26, %v11974_v26 }
 0xbc7   : > { %v12065_v16 = vpack.c.bf16 %v10865_v61, %v10865_v61  ;;  %v10867_v14 = vmul.f32 %v17170_v3, %v22617_v25  ;;  %v12101_v34 = vpack.c.bf16 %v11973_v1, %v11973_v1  ;;  %v10923_v44 = vpop.permute.xlu1 %10922 }
 0xbc8   : > { %16417 = vmatmul.mubr.msk.bf16.vlgmr.msra.gmra.mrb[112].mxu1 %vm2636_vm4, %v12062_v31  ;;  %v13216_v5 = vsel %vm4945_vm9, %v12100_v28, 0  ;;  %v12068_v23 = vpack.c.bf16 %v10868_v45, %v10868_v45  ;;  %v13308_v63 = vsel %vm4945_vm9, %v12102_v35, 0  ;;  %v11432_v13 = vcombine.low %v22591_v18, %v10923_v44 }
 0xbc9   : > { %16411 = vmatmul.mubr.msk.bf16.vlgmr.msra.gmra.mrb[116].mxu0 %vm2636_vm4, %v12061_v29  ;;  %16427 = vmatpush3.bf16.msra.mxu1 %v13032_v54  ;;  %v12067_v43 = vpack.c.bf16 %v10867_v14, %v10867_v14  ;;  %v13262_v29 = vsel %vm4945_vm9, %v12101_v34, 0  ;;  %v11975_v54 = vcombine.high %v11955_v37, %v11971_v55  ;;  %v15795_v2 = vcombine.high %v22620_v49, %v10923_v44 }
 0xbca   : > { %16421 = vmatpush3.bf16.msra.mxu0 %v12986_v60  ;;  %16422 = vmatprep.mubr.msk.bf16.mxu0 %vm17395_vm10, %v22599_v62  ;;  %v11440_v59 = vrot.slane %v11432_v13, %v17791_v41 }
 0xbcb   : > { %16428 = vmatprep.mubr.msk.bf16.mxu1 %vm17395_vm10, %v22599_v62  ;;  %16432 = vmatprep.subr.bf16.mxu0 %v22599_v62  ;;  %v10947_v10 = vpop.permute.xlu1 %10946  ;;  %v12103_v8 = vpack.c.bf16 %v11975_v54, %v11975_v54 }
 0xbcc   : > { %16438 = vmatprep.subr.bf16.mxu1 %v22599_v62  ;;  %v17172_v7 = vpop.eup %17171 }
 0xbcd   : > { %v17174_v31 = vpop.eup %17173  ;;  %v10870_v58 = vmul.f32 %v17172_v7, %v22618_v22 }
 0xbce   : > { %v10869_v60 = vmul.f32 %v17174_v31, %v22619_v36  ;;  %v22622_v31 = vld [vmem:[#allocation52_spill] sm:$0xff] }
 0xbcf   : > { %v12070_v51 = vpack.c.bf16 %v10870_v58, %v10870_v58 }
 0xbd0   : > { %16429 = vmatmul.mubr.msk.bf16.vlgmr.msra.gmra.mrb[116].mxu1 %vm2636_vm4, %v12064_v53  ;;  %v12069_v57 = vpack.c.bf16 %v10869_v60, %v10869_v60 }
 0xbd1   : > { %16423 = vmatmul.mubr.msk.bf16.vlgmr.msra.gmra.mrb[120].mxu0 %vm2636_vm4, %v12063_v20  ;;  %16439 = vmatpush3.bf16.msra.mxu1 %v13124_v30  ;;  %v11447_v20 = vrot.slane %v15795_v2, %v17791_v41  ;;  %v13354_v30 = vsel %vm4945_vm9, %v12103_v8, 0 }
 0xbd2   : > { %16433 = vmatpush3.bf16.msra.mxu0 %v13078_v17  ;;  %16434 = vmatprep.mubr.msk.bf16.mxu0 %vm17395_vm10, %v22599_v62 }
 0xbd3   : > { %16440 = vmatprep.mubr.msk.bf16.mxu1 %vm17395_vm10, %v22599_v62  ;;  %16444 = vmatprep.subr.bf16.mxu0 %v22599_v62 }
 0xbd4   : > { %16450 = vmatprep.subr.bf16.mxu1 %v22599_v62 }
 0xbd8   : > { %16441 = vmatmul.mubr.msk.bf16.vlgmr.msra.gmra.mrb[120].mxu1 %vm2636_vm4, %v12066_v56 }
 0xbd9   : > { %16435 = vmatmul.mubr.msk.bf16.vlgmr.msra.gmra.mrb[124].mxu0 %vm2636_vm4, %v12065_v16  ;;  %16451 = vmatpush3.bf16.msra.mxu1 %v13216_v5 }
 0xbda   : > { %16445 = vmatpush3.bf16.msra.mxu0 %v13170_v6  ;;  %16446 = vmatprep.mubr.msk.bf16.mxu0 %vm17395_vm10, %v22599_v62 }
 0xbdb   : > { %16452 = vmatprep.mubr.msk.bf16.mxu1 %vm17395_vm10, %v22599_v62  ;;  %16456 = vmatprep.subr.bf16.mxu0 %v22599_v62 }
 0xbdc   : > { %16462 = vmatprep.subr.bf16.mxu1 %v22599_v62 }
 0xbdd   : > { %v10799_v33 = vpop.xlane.xlu0 %10798 }
 0xbde   : > { %17175 = vrcp.f32 %v10799_v33 }
 0xbdf   : > { %17177 = vrcp.f32 %v10805_v52 }
 0xbe0   : > { %16453 = vmatmul.mubr.msk.bf16.vlgmr.msra.gmra.mrb[124].mxu1 %vm2636_vm4, %v12068_v23 }
 0xbe1   : > { %16447 = vmatmul.mubr.msk.bf16.vlgmr.msra.gmra.mrb[128].mxu0 %vm2636_vm4, %v12067_v43  ;;  %16463 = vmatpush3.bf16.msra.mxu1 %v13308_v63  ;;  %v10802_v40 = vpop.xlane.xlu0 %10801 }
 0xbe2   : > { %16457 = vmatpush3.bf16.msra.mxu0 %v13262_v29  ;;  %16458 = vmatprep.mubr.msk.bf16.mxu0 %vm17395_vm10, %v22599_v62  ;;  %17179 = vrcp.f32 %v10802_v40  ;;  %v22623_v29 = vld [vmem:[#allocation27_spill] sm:$0xff] }
 0xbe3   : > { %16464 = vmatprep.mubr.msk.bf16.mxu1 %vm17395_vm10, %v22599_v62  ;;  %16468 = vmatprep.subr.bf16.mxu0 %v22599_v62 }
 0xbe4   : > { %16474 = vmatprep.subr.bf16.mxu1 %v22599_v62 }
 0xbe5   : > { %v10899_v9 = vpop.permute.xlu0 %10898 }
 0xbe6   : > { %v11448_v12 = vcombine.low %v10899_v9, %v10947_v10  ;;  %v11449_v46 = vcombine.high %v10899_v9, %v10947_v10 }
 0xbe8   : > { %v17176_v53 = vpop.eup %17175  ;;  %v11456_v19 = vrot.slane %v11448_v12, %v17791_v41  ;;  %v11463_v18 = vrot.slane %v11449_v46, %v17791_v41  ;;  %16465 = vmatmul.mubr.msk.bf16.vlgmr.msra.gmra.mrb[128].mxu1 %vm2636_vm4, %v12070_v51  ;;  %v22624_v51 = vld [vmem:[#allocation14_spill] sm:$0xff] }
 0xbe9   : > { %16459 = vmatmul.mubr.msk.bf16.vlgmr.msra.gmra.mrb[132].mxu0 %vm2636_vm4, %v12069_v57  ;;  %16476 = vmatprep.mubr.msk.bf16.mxu1 %vm17395_vm10, %v22599_v62  ;;  %v10871_v50 = vmul.f32 %v17176_v53, %v22621_v0  ;;  %v17178_v25 = vpop.eup %17177 }
 0xbea   : > { %v11464_v42 = vcombine.low %v11440_v59, %v11456_v19  ;;  %v11465_v38 = vcombine.high %v11440_v59, %v11456_v19  ;;  %v11480_v21 = vcombine.low %v11447_v20, %v11463_v18  ;;  %v11481_v17 = vcombine.high %v11447_v20, %v11463_v18  ;;  %16469 = vmatpush3.bf16.msra.mxu0 %v13354_v30 }
 0xbeb   : > { %16470 = vmatprep.mubr.msk.bf16.mxu0 %vm17395_vm10, %v22599_v62  ;;  %16480 = vmatprep.subr.bf16.mxu0 %v22599_v62  ;;  %v12071_v56 = vpack.c.bf16 %v10871_v50, %v10871_v50  ;;  %v10873_v63 = vmul.f32 %v17178_v25, %v22622_v31 }
 0xbec   : > { %v11472_v27 = vrot.slane %v11464_v42, %v17794_v48  ;;  %v11479_v39 = vrot.slane %v11465_v38, %v17794_v48  ;;  %v11488_v11 = vrot.slane %v11480_v21, %v17794_v48  ;;  %v11495_v61 = vrot.slane %v11481_v17, %v17794_v48  ;;  %v17180_v34 = vpop.eup %17179 }
 0xbed   : > { %v10872_v40 = vmul.f32 %v17180_v34, %v22623_v29  ;;  %v12073_v2 = vpack.c.bf16 %v10873_v63, %v10873_v63 }
 0xbee   : > { %v11976_v28 = vcombine.low %v11472_v27, %v11479_v39  ;;  %v15810_v37 = vcombine.high %v11472_v27, %v11479_v39  ;;  %v11992_v55 = vcombine.low %v11488_v11, %v11495_v61  ;;  %v15811_v47 = vcombine.high %v11488_v11, %v11495_v61 }
 0xbef   : > { %v12072_v49 = vpack.c.bf16 %v10872_v40, %v10872_v40 }
 0xbf0   : > { %v11983_v4 = vrot.slane %v11976_v28, %v17791_v41  ;;  %v11991_v16 = vrot.slane %v15810_v37, %v17791_v41  ;;  %v11999_v3 = vrot.slane %v11992_v55, %v17791_v41  ;;  %v12007_v5 = vrot.slane %v15811_v47, %v17791_v41 }
 0xbf1   : > { %16471 = vmatmul.mubr.msk.bf16.vlgmr.msra.gmra.mrb[136].mxu0 %vm2636_vm4, %v12071_v56 }
 0xbf2   : > { %v10811_v26 = vpop.xlane.xlu1 %10810  ;;  %v12008_v6 = vcombine.low %v11983_v4, %v11991_v16  ;;  %v12024_v1 = vcombine.low %v11999_v3, %v12007_v5  ;;  %16482 = vmatprep.mubr.msk.bf16.mxu0 %vm17395_vm10, %v22599_v62  ;;  %v12009_v32 = vcombine.high %v11983_v4, %v11991_v16  ;;  %v12025_v45 = vcombine.high %v11999_v3, %v12007_v5 }
 0xbf3   : > { %17181 = vrcp.f32 %v10811_v26 }
 0xbf4   : > { %v12016_v14 = vrot.slane %v12008_v6, %v17794_v48  ;;  %v12032_v52 = vrot.slane %v12024_v1, %v17794_v48  ;;  %v12023_v35 = vrot.slane %v12009_v32, %v17794_v48  ;;  %v12039_v33 = vrot.slane %v12025_v45, %v17794_v48 }
 0xbf6   : > { %v12040_v23 = vcombine.low %v12016_v14, %v12032_v52  ;;  %v12041_v7 = vcombine.high %v12016_v14, %v12032_v52  ;;  %v12042_v44 = vcombine.low %v12023_v35, %v12039_v33  ;;  %v12043_v43 = vcombine.high %v12023_v35, %v12039_v33 }
 0xbf8   : > { %v12104_v54 = vpack.c.bf16 %v12040_v23, %v12040_v23  ;;  %v12105_v22 = vpack.c.bf16 %v12041_v7, %v12041_v7  ;;  %v12106_v60 = vpack.c.bf16 %v12042_v44, %v12042_v44  ;;  %v12107_v13 = vpack.c.bf16 %v12043_v43, %v12043_v43 }
 0xbfa   : > { %v13400_v58 = vsel %vm4945_vm9, %v12104_v54, 0  ;;  %v13446_v36 = vsel %vm4945_vm9, %v12105_v22, 0  ;;  %v13492_v9 = vsel %vm4945_vm9, %v12106_v60, 0  ;;  %v13538_v8 = vsel %vm4945_vm9, %v12107_v13, 0 }
 0xbfb   : > { %16475 = vmatpush3.bf16.msra.mxu1 %v13400_v58  ;;  %16481 = vmatpush3.bf16.msra.mxu0 %v13446_v36 }
 0xbfc   : > { %16486 = vmatprep.subr.bf16.mxu1 %v22599_v62  ;;  %16492 = vmatprep.subr.bf16.mxu0 %v22599_v62 }
 0xbfd   : > { %v17182_v10 = vpop.eup %17181 }
 0xbfe   : > { %16477 = vmatmul.mubr.msk.bf16.vlgmr.msra.gmra.mrb[132].mxu1 %vm2636_vm4, %v12072_v49  ;;  %16483 = vmatmul.mubr.msk.bf16.vlgmr.msra.gmra.mrb[140].mxu0 %vm2636_vm4, %v12073_v2  ;;  %v10875_v12 = vmul.f32 %v17182_v10, %v21335_v24 }
 0xbff   : > { %16487 = vmatpush3.bf16.msra.mxu1 %v13492_v9  ;;  %16493 = vmatpush3.bf16.msra.mxu0 %v13538_v8 }
 0xc00   : > { %16494 = vmatprep.mubr.msk.bf16.mxu0 %vm17395_vm10, %v22599_v62  ;;  %16488 = vmatprep.mubr.msk.bf16.mxu1 %vm17395_vm10, %v22599_v62  ;;  %v12075_v46 = vpack.c.bf16 %v10875_v12, %v10875_v12 }
 0xc06   : > { %16495 = vmatmul.mubr.msk.bf16.vlgmr.msra.gmra.mrb[144].mxu0 %vm2636_vm4, %v12075_v46 }
 0xc07   : > { %16514 = vmatprep.mubr.msk.bf16.mxu0 %vm719_vm0, %v22624_v51 }
 0xc16   : > { %v10808_v57 = vpop.xlane.xlu0 %10807 }
 0xc17   : > { %17183 = vrcp.f32 %v10808_v57 }
 0xc21   : > { %v17184_v53 = vpop.eup %17183 }
 0xc22   : > { %v10874_v59 = vmul.f32 %v17184_v53, %v21455_v15 }
 0xc24   : > { %v12074_v20 = vpack.c.bf16 %v10874_v59, %v10874_v59 }
 0xc26   : > { %16489 = vmatmul.mubr.msk.bf16.vlgmr.msra.gmra.mrb[136].mxu1 %vm2636_vm4, %v12074_v20 }
 0xc32   : > { %v12148_v24 = vpop.f32.mrb[76].mxu1 }
 0xc33   : > { %v16310_v19 = vpop.f32.mrb[77].mxu1 }
 0xc34   : > { %v12151_v18 = vpop.f32.mrb[78].mxu1 }
 0xc35   : > { %v16311_v30 = vpop.f32.mrb[79].mxu1 }
 0xc36   : > { %v12194_v42 = vpop.f32.mrb[84].mxu0 }
 0xc37   : > { %v16316_v38 = vpop.f32.mrb[85].mxu0 }
 0xc38   : > { %v12197_v21 = vpop.f32.mrb[86].mxu0 }
 0xc39   : > { %v16317_v17 = vpop.f32.mrb[87].mxu0 }
 0xc3a   : > { %v12240_v0 = vpop.f32.mrb[80].mxu1 }
 0xc3b   : > { %v13580_v50 = vcombine.low %v12148_v24, %v12240_v0  ;;  %v13581_v27 = vcombine.high %v12148_v24, %v12240_v0  ;;  %v16322_v39 = vpop.f32.mrb[81].mxu1 }
 0xc3c   : > { %v12243_v11 = vpop.f32.mrb[82].mxu1 }
 0xc3d   : > { %v16323_v61 = vpop.f32.mrb[83].mxu1  ;;  %v13588_v56 = vrot.slane %v13580_v50, %v17791_v41  ;;  %v13595_v4 = vrot.slane %v13581_v27, %v17791_v41 }
 0xc3e   : > { %v12286_v28 = vpop.f32.mrb[88].mxu0 }
 0xc3f   : > { %v13596_v37 = vcombine.low %v12194_v42, %v12286_v28  ;;  %v13597_v15 = vcombine.high %v12194_v42, %v12286_v28  ;;  %v16328_v55 = vpop.f32.mrb[89].mxu0 }
 0xc40   : > { %v12289_v47 = vpop.f32.mrb[90].mxu0 }
 0xc41   : > { %v13604_v16 = vrot.slane %v13596_v37, %v17791_v41  ;;  %v13611_v3 = vrot.slane %v13597_v15, %v17791_v41  ;;  %v16329_v5 = vpop.f32.mrb[91].mxu0 }
 0xc42   : > { %v12332_v45 = vpop.f32.mrb[84].mxu1 }
 0xc43   : > { %v13612_v26 = vcombine.low %v13588_v56, %v13604_v16  ;;  %v13613_v6 = vcombine.high %v13588_v56, %v13604_v16  ;;  %v13628_v1 = vcombine.low %v13595_v4, %v13611_v3  ;;  %v13629_v32 = vcombine.high %v13595_v4, %v13611_v3  ;;  %v16334_v25 = vpop.f32.mrb[85].mxu1 }
 0xc44   : > { %v12335_v34 = vpop.f32.mrb[86].mxu1 }
 0xc45   : > { %v13620_v14 = vrot.slane %v13612_v26, %v17794_v48  ;;  %v13627_v52 = vrot.slane %v13613_v6, %v17794_v48  ;;  %v13636_v35 = vrot.slane %v13628_v1, %v17794_v48  ;;  %v13643_v33 = vrot.slane %v13629_v32, %v17794_v48  ;;  %v16335_v23 = vpop.f32.mrb[87].mxu1 }
 0xc46   : > { %v12378_v7 = vpop.f32.mrb[92].mxu0 }
 0xc47   : > { %v14124_v44 = vcombine.low %v13620_v14, %v13627_v52  ;;  %v15844_v43 = vcombine.high %v13620_v14, %v13627_v52  ;;  %v14140_v31 = vcombine.low %v13636_v35, %v13643_v33  ;;  %v15845_v63 = vcombine.high %v13636_v35, %v13643_v33  ;;  %v16340_v29 = vpop.f32.mrb[93].mxu0 }
 0xc48   : > { %v12381_v40 = vpop.f32.mrb[94].mxu0 }
 0xc49   : > { %v14131_v54 = vrot.slane %v14124_v44, %v17791_v41  ;;  %v14139_v22 = vrot.slane %v15844_v43, %v17791_v41  ;;  %v14147_v58 = vrot.slane %v14140_v31, %v17791_v41  ;;  %v14155_v36 = vrot.slane %v15845_v63, %v17791_v41  ;;  %v16341_v60 = vpop.f32.mrb[95].mxu0 }
 0xc4a   : > { %v12424_v13 = vpop.f32.mrb[88].mxu1 }
 0xc4b   : > { %v14156_v49 = vcombine.low %v14131_v54, %v14139_v22  ;;  %v14172_v2 = vcombine.low %v14147_v58, %v14155_v36  ;;  %v14157_v10 = vcombine.high %v14131_v54, %v14139_v22  ;;  %v14173_v9 = vcombine.high %v14147_v58, %v14155_v36  ;;  %v16346_v46 = vpop.f32.mrb[89].mxu1 }
 0xc4c   : > { %v13648_v8 = vcombine.low %v12332_v45, %v12424_v13  ;;  %v13649_v12 = vcombine.high %v12332_v45, %v12424_v13  ;;  %v12427_v51 = vpop.f32.mrb[90].mxu1 }
 0xc4d   : > { %v21696_v57 = vrot.slane %v14156_v49, %v17794_v48  ;;  %v21699_v53 = vrot.slane %v14172_v2, %v17794_v48  ;;  %v21702_v59 = vrot.slane %v14157_v10, %v17794_v48  ;;  %v21705_v20 = vrot.slane %v14173_v9, %v17794_v48  ;;  %v16347_v24 = vpop.f32.mrb[91].mxu1 }
 0xc4e   : > { %v12470_v19 = vpop.f32.mrb[96].mxu0  ;;  %v13656_v27 = vrot.slane %v13648_v8, %v17791_v41  ;;  %v13663_v39 = vrot.slane %v13649_v12, %v17791_v41 }
 0xc4f   : > { %v13664_v18 = vcombine.low %v12378_v7, %v12470_v19  ;;  %v13665_v30 = vcombine.high %v12378_v7, %v12470_v19  ;;  %v16352_v42 = vpop.f32.mrb[97].mxu0  ;;  %v14189_v38 = vcombine.high %v21696_v57, %v21699_v53  ;;  %v14190_v21 = vcombine.low %v21702_v59, %v21705_v20 }
 0xc50   : > { %v12473_v17 = vpop.f32.mrb[98].mxu0  ;;  %v14191_v0 = vcombine.high %v21702_v59, %v21705_v20  ;;  %v14188_v50 = vcombine.low %v21696_v57, %v21699_v53 }
 0xc51   : > { %v13672_v11 = vrot.slane %v13664_v18, %v17791_v41  ;;  %v13679_v61 = vrot.slane %v13665_v30, %v17791_v41  ;;  %v16353_v28 = vpop.f32.mrb[99].mxu0 }
 0xc53   : > { %v13680_v37 = vcombine.low %v13656_v27, %v13672_v11  ;;  %v13681_v15 = vcombine.high %v13656_v27, %v13672_v11  ;;  %v13696_v55 = vcombine.low %v13663_v39, %v13679_v61  ;;  %v13697_v47 = vcombine.high %v13663_v39, %v13679_v61  ;;  %v12516_v56 = vpop.f32.mrb[92].mxu1 }
 0xc54   : > { %v16358_v4 = vpop.f32.mrb[93].mxu1 }
 0xc55   : > { %v13688_v16 = vrot.slane %v13680_v37, %v17794_v48  ;;  %v13695_v3 = vrot.slane %v13681_v15, %v17794_v48  ;;  %v13704_v5 = vrot.slane %v13696_v55, %v17794_v48  ;;  %v13711_v26 = vrot.slane %v13697_v47, %v17794_v48  ;;  %v12519_v6 = vpop.f32.mrb[94].mxu1 }
 0xc56   : > { %v16359_v1 = vpop.f32.mrb[95].mxu1  ;;  %v12562_v32 = vpop.f32.mrb[100].mxu0 }
 0xc57   : > { %v14192_v45 = vcombine.low %v13688_v16, %v13695_v3  ;;  %v15846_v25 = vcombine.high %v13688_v16, %v13695_v3  ;;  %v14208_v14 = vcombine.low %v13704_v5, %v13711_v26  ;;  %v15847_v52 = vcombine.high %v13704_v5, %v13711_v26  ;;  %v16364_v35 = vpop.f32.mrb[101].mxu0 }
 0xc58   : > { %v12565_v33 = vpop.f32.mrb[102].mxu0 }
 0xc59   : > { %v14199_v34 = vrot.slane %v14192_v45, %v17791_v41  ;;  %v14207_v23 = vrot.slane %v15846_v25, %v17791_v41  ;;  %v14215_v7 = vrot.slane %v14208_v14, %v17791_v41  ;;  %v14223_v44 = vrot.slane %v15847_v52, %v17791_v41  ;;  %v16365_v43 = vpop.f32.mrb[103].mxu0 }
 0xc5b   : > { %v12608_v31 = vpop.f32.mrb[96].mxu1  ;;  %v14224_v63 = vcombine.low %v14199_v34, %v14207_v23  ;;  %v14240_v29 = vcombine.low %v14215_v7, %v14223_v44  ;;  %v14225_v40 = vcombine.high %v14199_v34, %v14207_v23  ;;  %v14241_v54 = vcombine.high %v14215_v7, %v14223_v44 }
 0xc5c   : > { %v13716_v22 = vcombine.low %v12516_v56, %v12608_v31  ;;  %v13717_v58 = vcombine.high %v12516_v56, %v12608_v31  ;;  %v16370_v36 = vpop.f32.mrb[97].mxu1 }
 0xc5d   : > { %v12611_v60 = vpop.f32.mrb[98].mxu1  ;;  %v21728_v13 = vrot.slane %v14224_v63, %v17794_v48  ;;  %v21731_v49 = vrot.slane %v14240_v29, %v17794_v48  ;;  %v14239_v2 = vrot.slane %v14225_v40, %v17794_v48  ;;  %v14255_v10 = vrot.slane %v14241_v54, %v17794_v48 }
 0xc5e   : > { %v16371_v9 = vpop.f32.mrb[99].mxu1  ;;  %v12654_v8 = vpop.f32.mrb[104].mxu0  ;;  %v13724_v24 = vrot.slane %v13716_v22, %v17791_v41  ;;  %v13731_v19 = vrot.slane %v13717_v58, %v17791_v41 }
 0xc5f   : > { %v13732_v12 = vcombine.low %v12562_v32, %v12654_v8  ;;  %v13733_v46 = vcombine.high %v12562_v32, %v12654_v8  ;;  %v16376_v51 = vpop.f32.mrb[105].mxu0  ;;  %v14257_v59 = vcombine.high %v21728_v13, %v21731_v49  ;;  %v14258_v20 = vcombine.low %v14239_v2, %v14255_v10 }
 0xc60   : > { %v12657_v18 = vpop.f32.mrb[106].mxu0  ;;  %v14259_v30 = vcombine.high %v14239_v2, %v14255_v10  ;;  %v14256_v42 = vcombine.low %v21728_v13, %v21731_v49 }
 0xc61   : > { %v13740_v17 = vrot.slane %v13732_v12, %v17791_v41  ;;  %v13747_v27 = vrot.slane %v13733_v46, %v17791_v41  ;;  %v16377_v39 = vpop.f32.mrb[107].mxu0  ;;  %v16845_v11 = vpack.i.bf16 %v14257_v59, %v14189_v38  ;;  %v16850_v61 = vpack.i.bf16 %v14258_v20, %v14190_v21 }
 0xc62   : > { %v16855_v28 = vpack.i.bf16 %v14259_v30, %v14191_v0 }
 0xc63   : > { %v13748_v37 = vcombine.low %v13724_v24, %v13740_v17  ;;  %v13749_v15 = vcombine.high %v13724_v24, %v13740_v17  ;;  %v13764_v55 = vcombine.low %v13731_v19, %v13747_v27  ;;  %v13765_v47 = vcombine.high %v13731_v19, %v13747_v27  ;;  %v12700_v56 = vpop.f32.mrb[100].mxu1  ;;  %16846 = vrot.lane.b32.xlu0 %v16845_v11, %s22384_s17 }
 0xc64   : > { %v16382_v4 = vpop.f32.mrb[101].mxu1 }
 0xc65   : > { %v13756_v16 = vrot.slane %v13748_v37, %v17794_v48  ;;  %v13763_v3 = vrot.slane %v13749_v15, %v17794_v48  ;;  %v13772_v5 = vrot.slane %v13764_v55, %v17794_v48  ;;  %v13779_v26 = vrot.slane %v13765_v47, %v17794_v48  ;;  %v12703_v6 = vpop.f32.mrb[102].mxu1 }
 0xc66   : > { %v16383_v38 = vpop.f32.mrb[103].mxu1  ;;  %v12746_v21 = vpop.f32.mrb[108].mxu0 }
 0xc67   : > { %v14260_v0 = vcombine.low %v13756_v16, %v13763_v3  ;;  %v15848_v1 = vcombine.high %v13756_v16, %v13763_v3  ;;  %v14276_v32 = vcombine.low %v13772_v5, %v13779_v26  ;;  %v15849_v45 = vcombine.high %v13772_v5, %v13779_v26  ;;  %16851 = vrot.lane.b32.xlu0 %v16850_v61, %s17396_s30  ;;  %v16388_v25 = vpop.f32.mrb[109].mxu0 }
 0xc68   : > { %v12749_v14 = vpop.f32.mrb[110].mxu0 }
 0xc69   : > { %v14267_v52 = vrot.slane %v14260_v0, %v17791_v41  ;;  %v14275_v35 = vrot.slane %v15848_v1, %v17791_v41  ;;  %v14283_v33 = vrot.slane %v14276_v32, %v17791_v41  ;;  %v14291_v34 = vrot.slane %v15849_v45, %v17791_v41  ;;  %v16389_v23 = vpop.f32.mrb[111].mxu0 }
 0xc6b   : > { %16856 = vrot.lane.b32.xlu0 %v16855_v28, %s22625_s3  ;;  %v14292_v7 = vcombine.low %v14267_v52, %v14275_v35  ;;  %v14308_v44 = vcombine.low %v14283_v33, %v14291_v34  ;;  %v14293_v43 = vcombine.high %v14267_v52, %v14275_v35  ;;  %v14309_v31 = vcombine.high %v14283_v33, %v14291_v34 }
 0xc6d   : > { %v21755_v63 = vrot.slane %v14292_v7, %v17794_v48  ;;  %v21758_v29 = vrot.slane %v14308_v44, %v17794_v48  ;;  %v21761_v40 = vrot.slane %v14293_v43, %v17794_v48  ;;  %v21764_v54 = vrot.slane %v14309_v31, %v17794_v48 }
 0xc6f   : > { %v14325_v22 = vcombine.high %v21755_v63, %v21758_v29  ;;  %v14326_v58 = vcombine.low %v21761_v40, %v21764_v54  ;;  %v14327_v36 = vcombine.high %v21761_v40, %v21764_v54  ;;  %v14324_v60 = vcombine.low %v21755_v63, %v21758_v29 }
 0xc8b   : > { %v12792_v2 = vpop.f32.mrb[104].mxu1 }
 0xc8c   : > { %v13784_v10 = vcombine.low %v12700_v56, %v12792_v2  ;;  %v13785_v9 = vcombine.high %v12700_v56, %v12792_v2  ;;  %v16394_v8 = vpop.f32.mrb[105].mxu1 }
 0xc8d   : > { %v12795_v12 = vpop.f32.mrb[106].mxu1  ;;  %v16921_v8 = vld [vmem:[%s22256_s5] sm:$0xff]  }
 0xc8e   : > { %v16395_v46 = vpop.f32.mrb[107].mxu1  ;;  %v13792_v39 = vrot.slane %v13784_v10, %v17791_v41  ;;  %v13799_v11 = vrot.slane %v13785_v9, %v17791_v41  ;;  %16498 = vmatprep.subr.bf16.mxu1 %v16921_v8 }
 0xc8f   : > { %16499 = vmatpush3.bf16.msra.mxu1 %v16921_v8 }
 0xc93   : > { %v12884_v51 = vpop.f32.mrb[108].mxu1 }
 0xc94   : > { %v12838_v59 = vpop.f32.mrb[112].mxu0  ;;  %v16406_v20 = vpop.f32.mrb[109].mxu1 }
 0xc95   : > { %v13800_v24 = vcombine.low %v12746_v21, %v12838_v59  ;;  %v13801_v19 = vcombine.high %v12746_v21, %v12838_v59  ;;  %v16400_v18 = vpop.f32.mrb[113].mxu0  ;;  %v12887_v30 = vpop.f32.mrb[110].mxu1 }
 0xc96   : > { %v12841_v17 = vpop.f32.mrb[114].mxu0  ;;  %v16407_v27 = vpop.f32.mrb[111].mxu1 }
 0xc97   : > { %v13808_v61 = vrot.slane %v13800_v24, %v17791_v41  ;;  %v13815_v28 = vrot.slane %v13801_v19, %v17791_v41  ;;  %v16401_v37 = vpop.f32.mrb[115].mxu0 }
 0xc99   : > { %v13816_v15 = vcombine.low %v13792_v39, %v13808_v61  ;;  %v13817_v55 = vcombine.high %v13792_v39, %v13808_v61  ;;  %v13832_v47 = vcombine.low %v13799_v11, %v13815_v28  ;;  %v13833_v56 = vcombine.high %v13799_v11, %v13815_v28 }
 0xc9b   : > { %v13824_v4 = vrot.slane %v13816_v15, %v17794_v48  ;;  %v13831_v16 = vrot.slane %v13817_v55, %v17794_v48  ;;  %v13840_v3 = vrot.slane %v13832_v47, %v17794_v48  ;;  %v13847_v5 = vrot.slane %v13833_v56, %v17794_v48  ;;  %v12976_v26 = vpop.f32.mrb[112].mxu1 }
 0xc9c   : > { %v12930_v6 = vpop.f32.mrb[116].mxu0  ;;  %v13852_v38 = vcombine.low %v12884_v51, %v12976_v26  ;;  %v13853_v21 = vcombine.high %v12884_v51, %v12976_v26  ;;  %v16418_v0 = vpop.f32.mrb[113].mxu1  ;;  %v16922_v26 = vld [vmem:[%s22256_s5 + $0x8] sm:$0xff]  }
 0xc9d   : > { %v14328_v1 = vcombine.low %v13824_v4, %v13831_v16  ;;  %v15850_v32 = vcombine.high %v13824_v4, %v13831_v16  ;;  %v14344_v45 = vcombine.low %v13840_v3, %v13847_v5  ;;  %v15851_v25 = vcombine.high %v13840_v3, %v13847_v5  ;;  %v16412_v14 = vpop.f32.mrb[117].mxu0  ;;  %v12979_v52 = vpop.f32.mrb[114].mxu1  ;;  %16500 = vmatprep.subr.bf16.mxu1 %v16922_v26 }
 0xc9e   : > { %v12933_v35 = vpop.f32.mrb[118].mxu0  ;;  %v16419_v33 = vpop.f32.mrb[115].mxu1  ;;  %v13860_v61 = vrot.slane %v13852_v38, %v17791_v41  ;;  %v13867_v28 = vrot.slane %v13853_v21, %v17791_v41  ;;  %16501 = vmatpush3.bf16.msra.mxu1 %v16922_v26 }
 0xc9f   : > { %v14335_v34 = vrot.slane %v14328_v1, %v17791_v41  ;;  %v14343_v23 = vrot.slane %v15850_v32, %v17791_v41  ;;  %v14351_v7 = vrot.slane %v14344_v45, %v17791_v41  ;;  %v14359_v44 = vrot.slane %v15851_v25, %v17791_v41  ;;  %v16413_v43 = vpop.f32.mrb[119].mxu0  ;;  %16522 = vmatprep.subr.bf16.mxu1 %v22599_v62 }
 0xca1   : > { %v14360_v31 = vcombine.low %v14335_v34, %v14343_v23  ;;  %v14376_v2 = vcombine.low %v14351_v7, %v14359_v44  ;;  %v14361_v10 = vcombine.high %v14335_v34, %v14343_v23  ;;  %v14377_v9 = vcombine.high %v14351_v7, %v14359_v44 }
 0xca3   : > { %v21789_v12 = vpop.f32.mrb[116].mxu1  ;;  %v21792_v46 = vrot.slane %v14360_v31, %v17794_v48  ;;  %v21795_v51 = vrot.slane %v14376_v2, %v17794_v48  ;;  %v14375_v59 = vrot.slane %v14361_v10, %v17794_v48  ;;  %v14391_v20 = vrot.slane %v14377_v9, %v17794_v48 }
 0xca4   : > { %v13022_v24 = vpop.f32.mrb[120].mxu0  ;;  %v16430_v19 = vpop.f32.mrb[117].mxu1 }
 0xca5   : > { %v13868_v18 = vcombine.low %v12930_v6, %v13022_v24  ;;  %v13869_v30 = vcombine.high %v12930_v6, %v13022_v24  ;;  %v16424_v17 = vpop.f32.mrb[121].mxu0  ;;  %v13071_v27 = vpop.f32.mrb[118].mxu1  ;;  %v14393_v39 = vcombine.high %v21792_v46, %v21795_v51  ;;  %v14394_v11 = vcombine.low %v14375_v59, %v14391_v20 }
 0xca6   : > { %v13025_v37 = vpop.f32.mrb[122].mxu0  ;;  %v16431_v15 = vpop.f32.mrb[119].mxu1  ;;  %v14395_v55 = vcombine.high %v14375_v59, %v14391_v20  ;;  %v14392_v47 = vcombine.low %v21792_v46, %v21795_v51 }
 0xca7   : > { %v13876_v56 = vrot.slane %v13868_v18, %v17791_v41  ;;  %v13883_v4 = vrot.slane %v13869_v30, %v17791_v41  ;;  %v16425_v16 = vpop.f32.mrb[123].mxu0  ;;  %v16860_v3 = vpack.i.bf16 %v14393_v39, %v14325_v22  ;;  %v16865_v5 = vpack.i.bf16 %v14394_v11, %v14326_v58 }
 0xca8   : > { %v16870_v6 = vpack.i.bf16 %v14395_v55, %v14327_v36 }
 0xca9   : > { %v13884_v38 = vcombine.low %v13860_v61, %v13876_v56  ;;  %v13885_v21 = vcombine.high %v13860_v61, %v13876_v56  ;;  %v13900_v0 = vcombine.low %v13867_v28, %v13883_v4  ;;  %v13901_v1 = vcombine.high %v13867_v28, %v13883_v4  ;;  %16861 = vrot.lane.b32.xlu1 %v16860_v3, %s22384_s17 }
 0xcab   : > { %v13892_v22 = vrot.slane %v13884_v38, %v17794_v48  ;;  %v13899_v32 = vrot.slane %v13885_v21, %v17794_v48  ;;  %v13908_v58 = vrot.slane %v13900_v0, %v17794_v48  ;;  %v13915_v45 = vrot.slane %v13901_v1, %v17794_v48  ;;  %v13160_v25 = vpop.f32.mrb[120].mxu1 }
 0xcac   : > { %v13114_v14 = vpop.f32.mrb[124].mxu0  ;;  %v13920_v40 = vcombine.low %v21789_v12, %v13160_v25  ;;  %v13921_v54 = vcombine.high %v21789_v12, %v13160_v25  ;;  %v16442_v36 = vpop.f32.mrb[121].mxu1 }
 0xcad   : > { %v14396_v52 = vcombine.low %v13892_v22, %v13899_v32  ;;  %v15852_v35 = vcombine.high %v13892_v22, %v13899_v32  ;;  %v14412_v33 = vcombine.low %v13908_v58, %v13915_v45  ;;  %v15853_v34 = vcombine.high %v13908_v58, %v13915_v45  ;;  %v16436_v23 = vpop.f32.mrb[125].mxu0  ;;  %16866 = vrot.lane.b32.xlu1 %v16865_v5, %s17396_s30  ;;  %v13163_v7 = vpop.f32.mrb[122].mxu1 }
 0xcae   : > { %v13117_v44 = vpop.f32.mrb[126].mxu0  ;;  %v16443_v43 = vpop.f32.mrb[123].mxu1  ;;  %v13928_v26 = vrot.slane %v13920_v40, %v17791_v41 }
 0xcaf   : > { %v14403_v31 = vrot.slane %v14396_v52, %v17791_v41  ;;  %v14411_v2 = vrot.slane %v15852_v35, %v17791_v41  ;;  %v14419_v10 = vrot.slane %v14412_v33, %v17791_v41  ;;  %v14427_v9 = vrot.slane %v15853_v34, %v17791_v41  ;;  %v16437_v8 = vpop.f32.mrb[127].mxu0 }
 0xcb1   : > { %16871 = vrot.lane.b32.xlu1 %v16870_v6, %s22625_s3  ;;  %v14428_v12 = vcombine.low %v14403_v31, %v14411_v2  ;;  %v14444_v59 = vcombine.low %v14419_v10, %v14427_v9  ;;  %v14429_v20 = vcombine.high %v14403_v31, %v14411_v2  ;;  %v14445_v24 = vcombine.high %v14419_v10, %v14427_v9 }
 0xcb2   : > { %v13935_v6 = vrot.slane %v13921_v54, %v17791_v41 }
 0xcb3   : > { %v21833_v19 = vpop.f32.mrb[124].mxu1  ;;  %v21836_v18 = vrot.slane %v14428_v12, %v17794_v48  ;;  %v21839_v30 = vrot.slane %v14444_v59, %v17794_v48  ;;  %v21842_v17 = vrot.slane %v14429_v20, %v17794_v48  ;;  %v21845_v27 = vrot.slane %v14445_v24, %v17794_v48 }
 0xcb4   : > { %v13206_v39 = vpop.f32.mrb[128].mxu0  ;;  %v16454_v11 = vpop.f32.mrb[125].mxu1 }
 0xcb5   : > { %v13936_v61 = vcombine.low %v13114_v14, %v13206_v39  ;;  %v13937_v28 = vcombine.high %v13114_v14, %v13206_v39  ;;  %v16448_v37 = vpop.f32.mrb[129].mxu0  ;;  %v13255_v15 = vpop.f32.mrb[126].mxu1  ;;  %v14461_v55 = vcombine.high %v21836_v18, %v21839_v30  ;;  %v14462_v56 = vcombine.low %v21842_v17, %v21845_v27 }
 0xcb6   : > { %v13209_v4 = vpop.f32.mrb[130].mxu0  ;;  %v16455_v16 = vpop.f32.mrb[127].mxu1  ;;  %v14463_v3 = vcombine.high %v21842_v17, %v21845_v27  ;;  %v14460_v5 = vcombine.low %v21836_v18, %v21839_v30 }
 0xcb7   : > { %v13944_v38 = vrot.slane %v13936_v61, %v17791_v41  ;;  %v13951_v21 = vrot.slane %v13937_v28, %v17791_v41  ;;  %v16449_v0 = vpop.f32.mrb[131].mxu0 }
 0xcb9   : > { %v13952_v1 = vcombine.low %v13928_v26, %v13944_v38  ;;  %v13953_v22 = vcombine.high %v13928_v26, %v13944_v38  ;;  %v13968_v32 = vcombine.low %v13935_v6, %v13951_v21  ;;  %v13969_v58 = vcombine.high %v13935_v6, %v13951_v21 }
 0xcbb   : > { %v13960_v45 = vrot.slane %v13952_v1, %v17794_v48  ;;  %v13967_v25 = vrot.slane %v13953_v22, %v17794_v48  ;;  %v13976_v14 = vrot.slane %v13968_v32, %v17794_v48  ;;  %v13983_v36 = vrot.slane %v13969_v58, %v17794_v48  ;;  %v13344_v40 = vpop.f32.mrb[128].mxu1 }
 0xcbc   : > { %v13298_v52 = vpop.f32.mrb[132].mxu0  ;;  %v13988_v54 = vcombine.low %v21833_v19, %v13344_v40  ;;  %v13989_v35 = vcombine.high %v21833_v19, %v13344_v40  ;;  %v16466_v33 = vpop.f32.mrb[129].mxu1 }
 0xcbd   : > { %v14464_v34 = vcombine.low %v13960_v45, %v13967_v25  ;;  %v15854_v23 = vcombine.high %v13960_v45, %v13967_v25  ;;  %v14480_v7 = vcombine.low %v13976_v14, %v13983_v36  ;;  %v15855_v44 = vcombine.high %v13976_v14, %v13983_v36  ;;  %v16460_v43 = vpop.f32.mrb[133].mxu0  ;;  %v13347_v31 = vpop.f32.mrb[130].mxu1 }
 0xcbe   : > { %v13301_v2 = vpop.f32.mrb[134].mxu0  ;;  %v16467_v10 = vpop.f32.mrb[131].mxu1  ;;  %v13996_v38 = vrot.slane %v13988_v54, %v17791_v41  ;;  %v14003_v21 = vrot.slane %v13989_v35, %v17791_v41 }
 0xcbf   : > { %v14471_v9 = vrot.slane %v14464_v34, %v17791_v41  ;;  %v14479_v8 = vrot.slane %v15854_v23, %v17791_v41  ;;  %v14487_v12 = vrot.slane %v14480_v7, %v17791_v41  ;;  %v14495_v59 = vrot.slane %v15855_v44, %v17791_v41  ;;  %v16461_v20 = vpop.f32.mrb[135].mxu0 }
 0xcc1   : > { %v14496_v24 = vcombine.low %v14471_v9, %v14479_v8  ;;  %v14512_v19 = vcombine.low %v14487_v12, %v14495_v59  ;;  %v14497_v17 = vcombine.high %v14471_v9, %v14479_v8  ;;  %v14513_v27 = vcombine.high %v14487_v12, %v14495_v59 }
 0xcc3   : > { %v21870_v39 = vrot.slane %v14496_v24, %v17794_v48  ;;  %v21873_v11 = vrot.slane %v14512_v19, %v17794_v48  ;;  %v14511_v61 = vrot.slane %v14497_v17, %v17794_v48  ;;  %v14527_v28 = vrot.slane %v14513_v27, %v17794_v48 }
 0xcc4   : > { %v13390_v37 = vpop.f32.mrb[136].mxu0 }
 0xcc5   : > { %v14004_v15 = vcombine.low %v13298_v52, %v13390_v37  ;;  %v14005_v4 = vcombine.high %v13298_v52, %v13390_v37  ;;  %v16472_v16 = vpop.f32.mrb[137].mxu0  ;;  %v14529_v26 = vcombine.high %v21870_v39, %v21873_v11  ;;  %v14530_v6 = vcombine.low %v14511_v61, %v14527_v28 }
 0xcc6   : > { %v13393_v0 = vpop.f32.mrb[138].mxu0  ;;  %v14531_v1 = vcombine.high %v14511_v61, %v14527_v28  ;;  %v14528_v22 = vcombine.low %v21870_v39, %v21873_v11 }
 0xcc7   : > { %v14012_v32 = vrot.slane %v14004_v15, %v17791_v41  ;;  %v14019_v58 = vrot.slane %v14005_v4, %v17791_v41  ;;  %v16473_v45 = vpop.f32.mrb[139].mxu0  ;;  %v16875_v25 = vpack.i.bf16 %v14529_v26, %v14461_v55  ;;  %v16880_v14 = vpack.i.bf16 %v14530_v6, %v14462_v56 }
 0xcc8   : > { %v16885_v36 = vpack.i.bf16 %v14531_v1, %v14463_v3 }
 0xcc9   : > { %v14020_v40 = vcombine.low %v13996_v38, %v14012_v32  ;;  %v14021_v52 = vcombine.high %v13996_v38, %v14012_v32  ;;  %v14036_v33 = vcombine.low %v14003_v21, %v14019_v58  ;;  %v14037_v34 = vcombine.high %v14003_v21, %v14019_v58  ;;  %16876 = vrot.lane.b32.xlu0 %v16875_v25, %s22384_s17 }
 0xccb   : > { %v14028_v54 = vrot.slane %v14020_v40, %v17794_v48  ;;  %v14035_v35 = vrot.slane %v14021_v52, %v17794_v48  ;;  %v14044_v23 = vrot.slane %v14036_v33, %v17794_v48  ;;  %v14051_v7 = vrot.slane %v14037_v34, %v17794_v48 }
 0xccd   : > { %v14532_v44 = vcombine.low %v14028_v54, %v14035_v35  ;;  %v15856_v43 = vcombine.high %v14028_v54, %v14035_v35  ;;  %v14548_v31 = vcombine.low %v14044_v23, %v14051_v7  ;;  %v15857_v55 = vcombine.high %v14044_v23, %v14051_v7  ;;  %16881 = vrot.lane.b32.xlu0 %v16880_v14, %s17396_s30 }
 0xccf   : > { %v14539_v56 = vrot.slane %v14532_v44, %v17791_v41  ;;  %v14547_v3 = vrot.slane %v15856_v43, %v17791_v41  ;;  %v14555_v2 = vrot.slane %v14548_v31, %v17791_v41  ;;  %v14563_v10 = vrot.slane %v15857_v55, %v17791_v41 }
 0xcd1   : > { %16886 = vrot.lane.b32.xlu0 %v16885_v36, %s22625_s3  ;;  %v13436_v9 = vpop.f32.mrb[132].mxu1  ;;  %v13482_v8 = vpop.f32.mrb[140].mxu0  ;;  %v14564_v12 = vcombine.low %v14539_v56, %v14547_v3  ;;  %v14580_v59 = vcombine.low %v14555_v2, %v14563_v10  ;;  %v14565_v20 = vcombine.high %v14539_v56, %v14547_v3  ;;  %v14581_v24 = vcombine.high %v14555_v2, %v14563_v10 }
 0xcd2   : > { %v16478_v19 = vpop.f32.mrb[133].mxu1  ;;  %v16484_v17 = vpop.f32.mrb[141].mxu0 }
 0xcd3   : > { %v13439_v27 = vpop.f32.mrb[134].mxu1  ;;  %v13485_v61 = vpop.f32.mrb[142].mxu0  ;;  %v21897_v28 = vrot.slane %v14564_v12, %v17794_v48  ;;  %v21900_v37 = vrot.slane %v14580_v59, %v17794_v48  ;;  %v21903_v15 = vrot.slane %v14565_v20, %v17794_v48  ;;  %v21906_v4 = vrot.slane %v14581_v24, %v17794_v48 }
 0xcd4   : > { %v16479_v16 = vpop.f32.mrb[135].mxu1  ;;  %v16485_v26 = vpop.f32.mrb[143].mxu0 }
 0xcd5   : > { %v16847_v6 = vpop.permute.xlu0 %16846  ;;  %v14597_v38 = vcombine.high %v21897_v28, %v21900_v37  ;;  %v14598_v21 = vcombine.low %v21903_v15, %v21906_v4  ;;  %v14599_v0 = vcombine.high %v21903_v15, %v21906_v4  ;;  %v14596_v1 = vcombine.low %v21897_v28, %v21900_v37  ;;  %v22626_v15 = vld [vmem:[#allocation15_spill] sm:$0xff]  ;;  %v22627_v4 = vld [vmem:[#allocation16_spill] sm:$0xff] }
 0xcd6   : > { %v16849_v45 = vunpack.i.h.bf16 %v16847_v6  ;;  %v16848_v25 = vunpack.i.l.bf16 %v16847_v6 }
 0xcd8   : > { %v14765_v23 = vsel %vm2636_vm4, %v14256_v42, %v16849_v45  ;;  %v14764_v7 = vsel %vm2636_vm4, %v14188_v50, %v16848_v25 }
 0xcd9   : > { %v13574_v32 = vpop.f32.mrb[144].mxu0  ;;  %v16852_v58 = vpop.permute.xlu0 %16851 }
 0xcda   : > { %v14072_v14 = vcombine.low %v13482_v8, %v13574_v32  ;;  %v14073_v36 = vcombine.high %v13482_v8, %v13574_v32  ;;  %v16496_v40 = vpop.f32.mrb[145].mxu0  ;;  %v16854_v52 = vunpack.i.h.bf16 %v16852_v58  ;;  %v16853_v33 = vunpack.i.l.bf16 %v16852_v58 }
 0xcdb   : > { %v13577_v34 = vpop.f32.mrb[146].mxu0 }
 0xcdc   : > { %v16497_v54 = vpop.f32.mrb[147].mxu0  ;;  %v14772_v31 = vsel %vm2670_vm8, %v14764_v7, %v16853_v33  ;;  %v14773_v55 = vsel %vm2670_vm8, %v14765_v23, %v16854_v52  ;;  %v14080_v53 = vrot.slane %v14072_v14, %v17791_v41  ;;  %v14087_v50 = vrot.slane %v14073_v36, %v17791_v41 }
 0xcdd   : > { %v16857_v35 = vpop.permute.xlu0 %16856 }
 0xcde   : > { %v16859_v44 = vunpack.i.h.bf16 %v16857_v35  ;;  %v16858_v43 = vunpack.i.l.bf16 %v16857_v35 }
 0xce0   : > { %v14780_v56 = vsel %vm7615_vm11, %v14772_v31, %v16858_v43  ;;  %v14781_v3 = vsel %vm7615_vm11, %v14773_v55, %v16859_v44 }
 0xce1   : > { %v14788_v2 = vpack.c.bf16 %v14781_v3, %v14780_v56 }
 0xce3   : > { %16502 = vmatprep.mubr.msk.bf16.mxu1 %vm719_vm0, %v14788_v2 }
 0xcf9   : > { %v13528_v13 = vpop.f32.mrb[136].mxu1 }
 0xcfa   : > { %v14056_v49 = vcombine.low %v13436_v9, %v13528_v13  ;;  %v14057_v42 = vcombine.high %v13436_v9, %v13528_v13  ;;  %v16490_v10 = vpop.f32.mrb[137].mxu1  ;;  %v16923_v13 = vld [vmem:[%s22264_s13] sm:$0xff]  }
 0xcfb   : > { %v13531_v57 = vpop.f32.mrb[138].mxu1  ;;  %16510 = vmatprep.subr.bf16.mxu0 %v16923_v13 }
 0xcfc   : > { %v14064_v8 = vrot.slane %v14056_v49, %v17791_v41  ;;  %v14071_v12 = vrot.slane %v14057_v42, %v17791_v41  ;;  %v16491_v59 = vpop.f32.mrb[139].mxu1  ;;  %v16924_v49 = vld [vmem:[%s22264_s13 + $0x8] sm:$0xff]   ;;  %16511 = vmatpush3.bf16.msra.mxu0 %v16923_v13 }
 0xcfd   : > { %16512 = vmatprep.subr.bf16.mxu0 %v16924_v49 }
 0xcfe   : > { %v14088_v20 = vcombine.low %v14064_v8, %v14080_v53  ;;  %v14089_v24 = vcombine.high %v14064_v8, %v14080_v53  ;;  %v14104_v19 = vcombine.low %v14071_v12, %v14087_v50  ;;  %v14105_v17 = vcombine.high %v14071_v12, %v14087_v50 }
 0xd00   : > { %v14096_v27 = vrot.slane %v14088_v20, %v17794_v48  ;;  %v14103_v61 = vrot.slane %v14089_v24, %v17794_v48  ;;  %v14112_v9 = vrot.slane %v14104_v19, %v17794_v48  ;;  %v14119_v16 = vrot.slane %v14105_v17, %v17794_v48  ;;  %16513 = vmatpush3.bf16.msra.mxu0 %v16924_v49 }
 0xd01   : > { %16530 = vmatprep.subr.bf16.mxu0 %v22599_v62 }
 0xd02   : > { %v14600_v26 = vcombine.low %v14096_v27, %v14103_v61  ;;  %v15858_v6 = vcombine.high %v14096_v27, %v14103_v61  ;;  %v14616_v32 = vcombine.low %v14112_v9, %v14119_v16  ;;  %v15859_v58 = vcombine.high %v14112_v9, %v14119_v16 }
 0xd03   : > { %16515 = vmatmul.mubr.msk.bf16.vlgmr.msra.gmra.mrb[148].mxu0 %vm719_vm0, %v22626_v15 }
 0xd04   : > { %v14607_v45 = vrot.slane %v14600_v26, %v17791_v41  ;;  %v14615_v25 = vrot.slane %v15858_v6, %v17791_v41  ;;  %v14623_v14 = vrot.slane %v14616_v32, %v17791_v41  ;;  %v14631_v36 = vrot.slane %v15859_v58, %v17791_v41  ;;  %16518 = vmatprep.mubr.msk.bf16.mxu0 %vm719_vm0, %v22627_v4 }
 0xd06   : > { %v14632_v40 = vcombine.low %v14607_v45, %v14615_v25  ;;  %v14648_v52 = vcombine.low %v14623_v14, %v14631_v36  ;;  %v14633_v33 = vcombine.high %v14607_v45, %v14615_v25  ;;  %v14649_v34 = vcombine.high %v14623_v14, %v14631_v36 }
 0xd08   : > { %v21942_v54 = vrot.slane %v14632_v40, %v17794_v48  ;;  %v21945_v35 = vrot.slane %v14648_v52, %v17794_v48  ;;  %v14647_v23 = vrot.slane %v14633_v33, %v17794_v48  ;;  %v14663_v7 = vrot.slane %v14649_v34, %v17794_v48 }
 0xd0a   : > { %v14665_v44 = vcombine.high %v21942_v54, %v21945_v35  ;;  %v14666_v43 = vcombine.low %v14647_v23, %v14663_v7  ;;  %v14667_v31 = vcombine.high %v14647_v23, %v14663_v7  ;;  %v14664_v55 = vcombine.low %v21942_v54, %v21945_v35 }
 0xd0c   : > { %v16890_v56 = vpack.i.bf16 %v14665_v44, %v14597_v38  ;;  %v16895_v3 = vpack.i.bf16 %v14666_v43, %v14598_v21  ;;  %v16900_v2 = vpack.i.bf16 %v14667_v31, %v14599_v0  ;;  %v22628_v21 = vld [vmem:[#allocation17_spill] sm:$0xff] }
 0xd0d   : > { %16519 = vmatmul.mubr.msk.bf16.gmra.mrb[152].mxu0 %vm719_vm0, %v22628_v21 }
 0xd0e   : > { %16891 = vrot.lane.b32.xlu1 %v16890_v56, %s22384_s17  ;;  %16532 = vmatprep.mubr.msk.bf16.mxu0 %vm17395_vm10, %v22599_v62 }
 0xd12   : > { %16896 = vrot.lane.b32.xlu1 %v16895_v3, %s17396_s30  ;;  %v15860_v3 = vld [vmem:[#allocation7] ss:$0 sm:$0xff] }
 0xd16   : > { %16901 = vrot.lane.b32.xlu1 %v16900_v2, %s22625_s3  ;;  %s22640_s3 = sld [smem:[#allocation62_spill]] }
 0xd1b   : > { %v16862_v38 = vpop.permute.xlu1 %16861 }
 0xd1c   : > { %v16864_v42 = vunpack.i.h.bf16 %v16862_v38  ;;  %v16863_v10 = vunpack.i.l.bf16 %v16862_v38 }
 0xd1e   : > { %v14766_v8 = vsel %vm2636_vm4, %v14324_v60, %v16863_v10  ;;  %v14767_v12 = vsel %vm2636_vm4, %v14392_v47, %v16864_v42 }
 0xd1f   : > { %v16867_v0 = vpop.permute.xlu1 %16866 }
 0xd20   : > { %v16869_v57 = vunpack.i.h.bf16 %v16867_v0  ;;  %v16868_v53 = vunpack.i.l.bf16 %v16867_v0 }
 0xd22   : > { %v14774_v24 = vsel %vm2670_vm8, %v14766_v8, %v16868_v53  ;;  %v14775_v19 = vsel %vm2670_vm8, %v14767_v12, %v16869_v57 }
 0xd23   : > { %v16872_v50 = vpop.permute.xlu1 %16871 }
 0xd24   : > { %v16874_v59 = vunpack.i.h.bf16 %v16872_v50  ;;  %v16873_v20 = vunpack.i.l.bf16 %v16872_v50 }
 0xd26   : > { %v14782_v17 = vsel %vm7615_vm11, %v14774_v24, %v16873_v20  ;;  %v14783_v27 = vsel %vm7615_vm11, %v14775_v19, %v16874_v59 }
 0xd27   : > { %v14789_v61 = vpack.c.bf16 %v14783_v27, %v14782_v17 }
 0xd29   : > { %16503 = vmatmul.mubr.msk.bf16.vlgmr.msra.gmra.mrb[140].mxu1 %vm719_vm0, %v14789_v61 }
 0xd3b   : > { %v16877_v63 = vpop.permute.xlu0 %16876 }
 0xd3c   : > { %v16879_v60 = vunpack.i.h.bf16 %v16877_v63  ;;  %v16878_v9 = vunpack.i.l.bf16 %v16877_v63  ;;  %v16925_v63 = vld [vmem:[%s22265_s14] sm:$0xff]  }
 0xd3d   : > { %16523 = vmatpush3.bf16.msra.mxu1 %v16925_v63 }
 0xd3e   : > { %v14769_v16 = vsel %vm2636_vm4, %v14528_v22, %v16879_v60  ;;  %v14768_v26 = vsel %vm2636_vm4, %v14460_v5, %v16878_v9  ;;  %16524 = vmatprep.subr.bf16.mxu1 %v22599_v62 }
 0xd3f   : > { %v16882_v29 = vpop.permute.xlu0 %16881 }
 0xd40   : > { %v16884_v46 = vunpack.i.h.bf16 %v16882_v29  ;;  %v16883_v51 = vunpack.i.l.bf16 %v16882_v29  ;;  %v16926_v29 = vld [vmem:[%s22265_s14 + $0x8] sm:$0xff]  }
 0xd41   : > { %16525 = vmatpush3.bf16.msra.mxu1 %v16926_v29 }
 0xd42   : > { %v14776_v58 = vsel %vm2670_vm8, %v14768_v26, %v16883_v51  ;;  %v14777_v45 = vsel %vm2670_vm8, %v14769_v16, %v16884_v46 }
 0xd43   : > { %v16887_v47 = vpop.permute.xlu0 %16886 }
 0xd44   : > { %v16889_v6 = vunpack.i.h.bf16 %v16887_v47  ;;  %v16888_v32 = vunpack.i.l.bf16 %v16887_v47 }
 0xd46   : > { %v14784_v25 = vsel %vm7615_vm11, %v14776_v58, %v16888_v32  ;;  %v14785_v14 = vsel %vm7615_vm11, %v14777_v45, %v16889_v6  ;;  %v15722_v45 = vld [vmem:[%s22263_s12] ss:$0 sm:$0xff] }
 0xd47   : > { %v14790_v36 = vpack.c.bf16 %v14785_v14, %v14784_v25 }
 0xd49   : > { %16506 = vmatprep.mubr.msk.bf16.mxu1 %vm719_vm0, %v14790_v36 }
 0xd80   : > { %v16892_v39 = vpop.permute.xlu1 %16891 }
 0xd81   : > { %v16894_v22 = vunpack.i.h.bf16 %v16892_v39  ;;  %v16893_v40 = vunpack.i.l.bf16 %v16892_v39 }
 0xd83   : > { %v14770_v52 = vsel %vm2636_vm4, %v14596_v1, %v16893_v40  ;;  %v14771_v33 = vsel %vm2636_vm4, %v14664_v55, %v16894_v22  ;;  %v22629_v22 = vld [vmem:[#allocation36_spill] sm:$0xff] }
 0xd84   : > { %v16897_v11 = vpop.permute.xlu1 %16896  ;;  %v22053_v40 = vadd.f32 %v22629_v22, %v15722_v45 }
 0xd85   : > { %v16899_v18 = vunpack.i.h.bf16 %v16897_v11  ;;  %v16898_v30 = vunpack.i.l.bf16 %v16897_v11 }
 0xd87   : > { %v14778_v35 = vsel %vm2670_vm8, %v14770_v52, %v16898_v30  ;;  %v14779_v23 = vsel %vm2670_vm8, %v14771_v33, %v16899_v18  ;;  %v22630_v33 = vld [vmem:[#allocation37_spill] sm:$0xff] }
 0xd88   : > { %v16902_v5 = vpop.permute.xlu1 %16901 }
 0xd89   : > { %v16904_v34 = vunpack.i.h.bf16 %v16902_v5  ;;  %v16903_v54 = vunpack.i.l.bf16 %v16902_v5 }
 0xd8b   : > { %v14786_v7 = vsel %vm7615_vm11, %v14778_v35, %v16903_v54  ;;  %v14787_v44 = vsel %vm7615_vm11, %v14779_v23, %v16904_v34  ;;  %v22056_v34 = vadd.f32 %v15722_v45, %v22630_v33  ;;  %v22631_v54 = vld [vmem:[#allocation44_spill] sm:$0xff] }
 0xd8c   : > { %v14791_v43 = vpack.c.bf16 %v14787_v44, %v14786_v7  ;;  %v22059_v35 = vadd.f32 %v22631_v54, %v15722_v45 }
 0xd8e   : > { %16507 = vmatmul.mubr.msk.bf16.gmra.mrb[144].mxu1 %vm719_vm0, %v14791_v43 }
 0xd8f   : > { %16526 = vmatprep.mubr.msk.bf16.mxu1 %vm17395_vm10, %v22599_v62 }
 0xdd6   : > { %v22018_v28 = vpop.f32.mrb[148].mxu0 }
 0xdd7   : > { %v22020_v37 = vpop.f32.mrb[149].mxu0 }
 0xdd8   : > { %v22022_v1 = vpop.f32.mrb[150].mxu0 }
 0xdd9   : > { %v22024_v31 = vpop.f32.mrb[151].mxu0 }
 0xde0   : > { %v22026_v55 = vpop.f32.mrb[152].mxu0 }
 0xde1   : > { %v22028_v56 = vpop.f32.mrb[153].mxu0 }
 0xde2   : > { %v22030_v13 = vpop.f32.mrb[154].mxu0 }
 0xde3   : > { %v22032_v4 = vpop.f32.mrb[155].mxu0 }
 0xdfc   : > { %v16504_v2 = vpop.f32.mrb[140].mxu1 }
 0xdfd   : > { %v14865_v49 = vadd.f32 %v16504_v2, %v15860_v3  ;;  %v14856_v15 = vpop.f32.mrb[141].mxu1  ;;  %v22632_v2 = vld [vmem:[#allocation46_spill] sm:$0xff] }
 0xdfe   : > { %v14857_v38 = vadd.f32 %v15860_v3, %v14856_v15  ;;  %v16505_v21 = vpop.f32.mrb[142].mxu1  ;;  %v22633_v15 = vld [vmem:[#allocation24_spill] sm:$0xff] }
 0xdff   : > { %v14868_v0 = vadd.f32 %v16505_v21, %v15860_v3  ;;  %v14859_v42 = vpop.f32.mrb[143].mxu1 }
 0xe00   : > { %v14887_v10 = vcombine.low %v14857_v38, %v14865_v49  ;;  %v14888_v57 = vcombine.high %v14857_v38, %v14865_v49  ;;  %v14860_v53 = vadd.f32 %v15860_v3, %v14859_v42  ;;  %v22068_v49 = vadd.f32 %v15722_v45, %v22632_v2 }
 0xe01   : > { %v22071_v38 = vadd.f32 %v15722_v45, %v22633_v15 }
 0xe02   : > { %v14903_v50 = vcombine.low %v14860_v53, %v14868_v0  ;;  %v14904_v8 = vcombine.high %v14860_v53, %v14868_v0  ;;  %v14895_v12 = vrot.slane %v14887_v10, %v17791_v41  ;;  %v14902_v59 = vrot.slane %v14888_v57, %v17791_v41 }
 0xe04   : > { %v14911_v20 = vrot.slane %v14903_v50, %v17791_v41  ;;  %v14918_v24 = vrot.slane %v14904_v8, %v17791_v41 }
 0xe06   : > { %v14951_v19 = vcombine.low %v14895_v12, %v14911_v20  ;;  %v14952_v17 = vcombine.high %v14895_v12, %v14911_v20  ;;  %v14967_v27 = vcombine.low %v14902_v59, %v14918_v24  ;;  %v14968_v61 = vcombine.high %v14902_v59, %v14918_v24 }
 0xe08   : > { %v14966_v23 = vrot.slane %v14952_v17, %v17794_v48  ;;  %v14959_v7 = vrot.slane %v14951_v19, %v17794_v48  ;;  %v14982_v21 = vrot.slane %v14968_v61, %v17794_v48  ;;  %v14975_v0 = vrot.slane %v14967_v27, %v17794_v48  ;;  %v22634_v17 = vld [vmem:[#allocation30_spill] sm:$0xff] }
 0xe09   : > { %v22100_v27 = vadd.f32 %v15722_v45, %v22634_v17  ;;  %v15148_v17 = vld [vmem:[%s22638_s28] sm:$0x1] }
 0xe61   : > { %v16508_v60 = vpop.f32.mrb[144].mxu1 }
 0xe62   : > { %v14881_v9 = vadd.f32 %v16508_v60, %v15860_v3  ;;  %v14872_v46 = vpop.f32.mrb[145].mxu1 }
 0xe63   : > { %v14873_v51 = vadd.f32 %v15860_v3, %v14872_v46  ;;  %v16509_v47 = vpop.f32.mrb[146].mxu1 }
 0xe64   : > { %v14884_v16 = vadd.f32 %v16509_v47, %v15860_v3  ;;  %v14875_v26 = vpop.f32.mrb[147].mxu1 }
 0xe65   : > { %v14919_v6 = vcombine.low %v14873_v51, %v14881_v9  ;;  %v14920_v32 = vcombine.high %v14873_v51, %v14881_v9  ;;  %v14876_v58 = vadd.f32 %v15860_v3, %v14875_v26  ;;  %v22635_v9 = vld [vmem:[#allocation45_spill] sm:$0xff] }
 0xe66   : > { %v22108_v46 = vadd.f32 %v22635_v9, %v15722_v45 }
 0xe67   : > { %v14935_v25 = vcombine.low %v14876_v58, %v14884_v16  ;;  %v14936_v14 = vcombine.high %v14876_v58, %v14884_v16  ;;  %v14927_v36 = vrot.slane %v14919_v6, %v17791_v41  ;;  %v14934_v62 = vrot.slane %v14920_v32, %v17791_v41  ;;  %v22636_v32 = vld [vmem:[#allocation25_spill] sm:$0xff] }
 0xe68   : > { %v22116_v58 = vadd.f32 %v22636_v32, %v15722_v45 }
 0xe69   : > { %v14943_v39 = vrot.slane %v14935_v25, %v17791_v41  ;;  %v14950_v11 = vrot.slane %v14936_v14, %v17791_v41 }
 0xe6b   : > { %v14983_v18 = vcombine.low %v14927_v36, %v14943_v39  ;;  %v14984_v30 = vcombine.high %v14927_v36, %v14943_v39  ;;  %v14999_v5 = vcombine.low %v14934_v62, %v14950_v11  ;;  %v15000_v52 = vcombine.high %v14934_v62, %v14950_v11 }
 0xe6d   : > { %v14998_v44 = vrot.slane %v14984_v30, %v17794_v48  ;;  %v14991_v41 = vrot.slane %v14983_v18, %v17794_v48  ;;  %v15014_v43 = vrot.slane %v15000_v52, %v17794_v48  ;;  %v15007_v3 = vrot.slane %v14999_v5, %v17794_v48 }
 0xe6f   : > { %v22075_v42 = vcombine.low %v14966_v23, %v14998_v44  ;;  %v22077_v10 = vcombine.low %v14959_v7, %v14991_v41  ;;  %v22079_v57 = vcombine.high %v14966_v23, %v14998_v44  ;;  %v22081_v53 = vcombine.high %v14959_v7, %v14991_v41 }
 0xe70   : > { %v22083_v50 = vcombine.low %v14982_v21, %v15014_v43  ;;  %v22085_v8 = vcombine.low %v14975_v0, %v15007_v3  ;;  %v22087_v12 = vcombine.high %v14982_v21, %v15014_v43  ;;  %v22089_v59 = vcombine.high %v14975_v0, %v15007_v3 }
 0xe71   : > { %v15106_v20 = vadd.f32 %v22075_v42, %v22053_v40  ;;  %v15104_v48 = vadd.f32 %v22077_v10, %v22056_v34  ;;  %v15107_v24 = vadd.f32 %v22079_v57, %v22059_v35  ;;  %v15105_v19 = vadd.f32 %v22081_v53, %v22068_v49 }
 0xe72   : > { %v15108_v60 = vadd.f32 %v22085_v8, %v22071_v38  ;;  %v15109_v26 = vadd.f32 %v22089_v59, %v22100_v27  ;;  %v15110_v14 = vadd.f32 %v22083_v50, %v22108_v46  ;;  %v15111_v11 = vadd.f32 %v22087_v12, %v22116_v58 }
 0xe73   : > { %v15114_v61 = vadd.f32 %v22018_v28, %v15106_v20  ;;  %v15112_v63 = vadd.f32 %v15104_v48, %v22020_v37  ;;  %v15113_v29 = vadd.f32 %v15105_v19, %v22024_v31  ;;  %v15115_v47 = vadd.f32 %v22022_v1, %v15107_v24  ;;  %v15214_v24 = vld [vmem:[%s22637_s21] sm:$0xf]  ;;  %s15890_s21 = sshll.u32 %s17528_s2, 10 }
 0xe74   : > { %v15116_v36 = vadd.f32 %v15108_v60, %v22028_v56  ;;  %v15117_v22 = vadd.f32 %v15109_v26, %v22032_v4  ;;  %v15118_v30 = vadd.f32 %v22026_v55, %v15110_v14  ;;  %v15119_v52 = vadd.f32 %v22030_v13, %v15111_v11 }
 0xe75   : > { %v15120_v51 = vsel %vm719_vm0, %v15112_v63, 0.0  ;;  %v15121_v16 = vsel %vm719_vm0, %v15113_v29, 0.0  ;;  %v15123_v25 = vsel %vm719_vm0, %v15114_v61, 0.0  ;;  %v15125_v39 = vsel %vm719_vm0, %v15115_v47, 0.0 }
 0xe76   : > { %v15122_v6 = vadd.f32 %v15121_v16, %v15120_v51  ;;  %v15127_v45 = vsel %vm719_vm0, %v15116_v36, 0.0  ;;  %v15129_v33 = vsel %vm719_vm0, %v15117_v22, 0.0  ;;  %v15131_v23 = vsel %vm719_vm0, %v15118_v30, 0.0 }
 0xe77   : > { %v15133_v44 = vsel %vm719_vm0, %v15119_v52, 0.0  ;;  %v15220_v19 = vsel %vm4945_vm9, %v15214_v24, 0 }
 0xe78   : > { %v15124_v62 = vadd.f32 %v15123_v25, %v15122_v6  ;;  %16531 = vmatpush3.bf16.msra.mxu0 %v15220_v19 }
 0xe7a   : > { %v15126_v18 = vadd.f32 %v15125_v39, %v15124_v62  ;;  %v15215_v39 = vld [vmem:[%s22639_s0] sm:$0x1]  ;;  %s22642_s0 = sld [smem:[#allocation63_spill]] }
 0xe7c   : > { %v15128_v5 = vadd.f32 %v15127_v45, %v15126_v18 }
 0xe7e   : > { %v15130_v54 = vadd.f32 %v15129_v33, %v15128_v5 }
 0xe80   : > { %v15132_v7 = vadd.f32 %v15131_v23, %v15130_v54 }
 0xe82   : > { %v15134_v41 = vadd.f32 %v15133_v44, %v15132_v7 }
 0xe84   : > { %v15135_v43 = vrot.slane %v15134_v41, 4 }
 0xe86   : > { %v15136_v3 = vadd.f32 %v15135_v43, %v15134_v41 }
 0xe88   : > { %v15137_v2 = vrot.slane %v15136_v3, 2 }
 0xe8a   : > { %v15138_v15 = vadd.f32 %v15137_v2, %v15136_v3 }
 0xe8c   : > { %v15139_v21 = vrot.slane %v15138_v15, 1 }
 0xe8e   : > { %v15140_v0 = vadd.f32 %v15139_v21, %v15138_v15 }
 0xe90   : > { %v15142_v20 = vmul.f32 0.015625, %v15140_v0 }
 0xe92   : > { %v15143_v48 = vpack.c.bf16 %v15142_v20, %v15142_v20 }
 0xe94   : > { %16527 = vmatmul.mubr.msk.bf16.vlgmr.msra.gmra.mrb[148].mxu1 %vm719_vm0, %v15143_v48 }
 0xf67   : > { %v15198_v61 = vpop.f32.mrb[148].mxu1 }
 0xf68   : > { %v15199_v63 = vadd.f32 %v15198_v61, %v15148_v17  ;;  %v16528_v29 = vpop.f32.mrb[149].mxu1 }
 0xf69   : > { %v15201_v60 = vpop.f32.mrb[150].mxu1  ;;  %v16927_v29 = vld [vmem:[%s22640_s3] sm:$0xff]  }
 0xf6a   : > { %v15204_v9 = vmul.f32 %v15199_v63, %v15199_v63  ;;  %v16529_v51 = vpop.f32.mrb[151].mxu1  ;;  %v16928_v60 = vld [vmem:[%s22640_s3 + $0x8] sm:$0xff]   ;;  %16536 = vmatprep.subr.bf16.mxu1 %v16927_v29 }
 0xf6b   : > { %16537 = vmatpush3.bf16.msra.mxu1 %v16927_v29 }
 0xf6c   : > { %v15205_v47 = vmul.f32 %v15204_v9, %v15199_v63  ;;  %16538 = vmatprep.subr.bf16.mxu1 %v16928_v60 }
 0xf6e   : > { %v15206_v16 = vmul.f32 0.044715, %v15205_v47  ;;  %v22641_v47 = vld [vmem:[#allocation18_spill] sm:$0xff] }
 0xf6f   : > { %16539 = vmatpush3.bf16.msra.mxu1 %v16928_v60 }
 0xf70   : > { %v15207_v26 = vadd.f32 %v15206_v16, %v15199_v63  ;;  %v15310_v16 = vsub.s32 0, %v22641_v47 }
 0xf72   : > { %v15208_v6 = vmul.f32 0.7978846, %v15207_v26 }
 0xf74   : > { %17185 = vtanh.f32 %v15208_v6 }
 0xf7e   : > { %v17186_v32 = vpop.eup %17185 }
 0xf7f   : > { %v15210_v25 = vadd.f32 1.0, %v17186_v32 }
 0xf81   : > { %v15211_v14 = vmul.f32 0.5, %v15210_v25 }
 0xf83   : > { %v15212_v36 = vmul.f32 %v15211_v14, %v15199_v63 }
 0xf85   : > { %v15213_v62 = vpack.c.bf16 %v15212_v36, %v15212_v36 }
 0xf87   : > { %16533 = vmatmul.mubr.msk.bf16.vlgmr.msra.gmra.mrb[156].mxu0 %vm2636_vm4, %v15213_v62 }
0x105a   : > { %v15256_v11 = vpop.f32.mrb[156].mxu0 }
0x105b   : > { %v15257_v22 = vadd.f32 %v15256_v11, %v15215_v39  ;;  %v16534_v18 = vpop.f32.mrb[157].mxu0 }
0x105c   : > { %v15259_v30 = vpop.f32.mrb[158].mxu0 }
0x105d   : > { %15267 = vrot.lane.b32.xlu1 %v15257_v22, %s17398_s27  ;;  %15263 = vrot.lane.b32.xlu0 %v15257_v22, %s22571_s15  ;;  %v16535_v45 = vpop.f32.mrb[159].mxu0 }
0x10cf   : > { %v15264_v5 = vpop.permute.xlu0 %15263  ;;  %v15268_v33 = vpop.permute.xlu1 %15267 }
0x10d0   : > { %v15266_v52 = vmax.f32 %v15257_v22, %v15264_v5 }
0x10d2   : > { %v15270_v54 = vmax.f32 %v15266_v52, %v15268_v33 }
0x10d4   : > { %15281 = vrot.lane.b32.xlu1 %v15270_v54, %s17398_s27  ;;  %15275 = vrot.lane.b32.xlu0 %v15270_v54, %s17399_s25  ;;  %v15271_v21 = vsub.f32 %v15257_v22, %v15270_v54 }
0x10d6   : > { %v15272_v0 = vmul.f32 1.442695, %v15271_v21 }
0x1146   : > { %v15282_v23 = vpop.permute.xlu1 %15281  ;;  %v15276_v7 = vpop.permute.xlu0 %15275 }
0x1147   : > { %v15284_v44 = vsub.f32 %v15257_v22, %v15282_v23  ;;  %v15278_v41 = vsub.f32 %v15257_v22, %v15276_v7 }
0x1149   : > { %v15285_v43 = vmul.f32 1.442695, %v15284_v44  ;;  %v15279_v3 = vmul.f32 1.442695, %v15278_v41 }
0x114b   : > { %17187 = vpow2.f32 %v15285_v43 }
0x114c   : > { %17189 = vpow2.f32 %v15279_v3 }
0x114d   : > { %17191 = vpow2.f32 %v15272_v0 }
0x1155   : > { %v17188_v2 = vpop.eup %17187 }
0x1156   : > { %v17190_v15 = vpop.eup %17189  ;;  %15293 = vrot.lane.b32.xlu1 %v17188_v2, %s17398_s27 }
0x1157   : > { %15288 = vrot.lane.b32.xlu0 %v17190_v15, %s22571_s15  ;;  %v17192_v20 = vpop.eup %17191 }
0x11c8   : > { %v15294_v19 = vpop.permute.xlu1 %15293 }
0x11c9   : > { %v15289_v48 = vpop.permute.xlu0 %15288 }
0x11ca   : > { %v15291_v24 = vadd.f32 %v17192_v20, %v15289_v48 }
0x11cc   : > { %v15296_v17 = vadd.f32 %v15294_v19, %v15291_v24 }
0x11ce   : > { %17193 = vrcp.f32 %v15296_v17 }
0x11d8   : > { %v17194_v61 = vpop.eup %17193 }
0x11d9   : > { %15304 = vrot.lane.b32.xlu1 %v17194_v61, %s17398_s27  ;;  %15300 = vrot.lane.b32.xlu0 %v17194_v61, %s17399_s25  ;;  %v15298_v63 = vmul.f32 %v17194_v61, %v17192_v20 }
0x11db   : > { %v15311_v14 = vrot.slane %v15298_v63, %v15310_v16 }
0x11dd   : > { %v15312_v36 = vmul.f32 %v15311_v14, %v22077_v10  ;;  %v15313_v62 = vmul.f32 %v15311_v14, %v22081_v53  ;;  %v15314_v39 = vmul.f32 %v15311_v14, %v22075_v42  ;;  %v15315_v11 = vmul.f32 %v15311_v14, %v22079_v57 }
0x11de   : > { %v15316_v30 = vmul.f32 %v15311_v14, %v22085_v8  ;;  %v15317_v45 = vmul.f32 %v15311_v14, %v22089_v59  ;;  %v15318_v5 = vmul.f32 %v15311_v14, %v22083_v50  ;;  %v15319_v52 = vmul.f32 %v15311_v14, %v22087_v12 }
0x124b   : > { %v15305_v9 = vpop.permute.xlu1 %15304  ;;  %v15301_v51 = vpop.permute.xlu0 %15300 }
0x124c   : > { %v15307_v26 = vmul.f32 %v17188_v2, %v15305_v9  ;;  %v15303_v6 = vmul.f32 %v17190_v15, %v15301_v51 }
0x124e   : > { %v15347_v32 = vrot.slane %v15307_v26, %v15310_v16  ;;  %v15323_v25 = vrot.slane %v15303_v6, %v15310_v16 }
0x1250   : > { %15349 = vrot.lane.b32.xlu1 %v15347_v32, %s17398_s27  ;;  %15325 = vrot.lane.b32.xlu0 %v15323_v25, %s22571_s15  ;;  %s22643_s27 = sshll.u32 %s17680_s16, 6  ;;  %s22644_s15 = sld [smem:[#allocation64_spill]] }
0x1251   : > { %s674_s25 = scalar_lea.vmem [#allocation8], %s22643_s27  ;;  %s17400_s27 = smov [#allocation8]  }
0x1252   : > { %s15494_s30 = sshll.u32 %s674_s25, 4  ;;  %s22204_s30 = int_to_ptr.vmem [resolvable:$true] %s15494_s30 }
0x1256   : > { %s22201_s19 = scalar_lea.hbm %s22644_s15, %s15890_s21  ;;  %s17300_s21 = sshll.u32 %s17400_s27, 4  ;;  %s17301_s21 = int_to_ptr.vmem [resolvable:$false] %s17300_s21 }
0x1257   : > { %s17302_s28 = scalar_lea.vmem %s17301_s21, 2048  ;;  %p17303_p7 = scmp.lt.s32.totalorder %s22204_s30, %s17301_s21 }
0x12c2   : > { %v15350_v22 = vpop.permute.xlu1 %15349  ;;  %v15326_v18 = vpop.permute.xlu0 %15325 }
0x12c3   : > { %v15354_v33 = vmul.f32 %v22018_v28, %v15350_v22  ;;  %v15355_v10 = vmul.f32 %v22022_v1, %v15350_v22  ;;  %v15330_v53 = vmul.f32 %v15326_v18, %v22053_v40  ;;  %v15331_v42 = vmul.f32 %v15326_v18, %v22059_v35 }
0x12c4   : > { %v15328_v57 = vmul.f32 %v15326_v18, %v22056_v34  ;;  %v15329_v54 = vmul.f32 %v15326_v18, %v22068_v49  ;;  %v15352_v8 = vmul.f32 %v15350_v22, %v22020_v37  ;;  %v15353_v59 = vmul.f32 %v15350_v22, %v22024_v31 }
0x12c5   : > { %v15338_v23 = vadd.f32 %v15330_v53, %v15314_v39  ;;  %v15339_v50 = vadd.f32 %v15331_v42, %v15315_v11  ;;  %v15332_v12 = vmul.f32 %v15326_v18, %v22071_v38  ;;  %v15333_v28 = vmul.f32 %v15326_v18, %v22100_v27 }
0x12c6   : > { %v15336_v7 = vadd.f32 %v15328_v57, %v15312_v36  ;;  %v15337_v1 = vadd.f32 %v15329_v54, %v15313_v62  ;;  %v15356_v40 = vmul.f32 %v15350_v22, %v22028_v56  ;;  %v15357_v35 = vmul.f32 %v15350_v22, %v22032_v4 }
0x12c7   : > { %v15362_v44 = vadd.f32 %v15354_v33, %v15338_v23  ;;  %v15363_v34 = vadd.f32 %v15355_v10, %v15339_v50  ;;  %v15340_v41 = vadd.f32 %v15332_v12, %v15316_v30  ;;  %v15341_v49 = vadd.f32 %v15333_v28, %v15317_v45 }
0x12c8   : > { %v15360_v43 = vadd.f32 %v15352_v8, %v15336_v7  ;;  %v15361_v37 = vadd.f32 %v15353_v59, %v15337_v1  ;;  %v15334_v31 = vmul.f32 %v15326_v18, %v22108_v46  ;;  %v15335_v3 = vmul.f32 %v15326_v18, %v22116_v58 }
0x12c9   : > { %v15369_v2 = vpack.c.bf16 %v15363_v34, %v15362_v44  ;;  %v15364_v38 = vadd.f32 %v15356_v40, %v15340_v41  ;;  %v15365_v15 = vadd.f32 %v15357_v35, %v15341_v49  ;;  %v15358_v27 = vmul.f32 %v22026_v55, %v15350_v22  ;;  %v15877_v55 = vld [vmem:[%s22642_s0] ss:$0 sm:$0xff]  ;;  %s17296_s0 = scalar_lea.vmem %s22204_s30, 1024 }
0x12ca   : > { %v15368_v21 = vpack.c.bf16 %v15361_v37, %v15360_v43  ;;  %v15342_v0 = vadd.f32 %v15334_v31, %v15318_v5  ;;  %v15343_v56 = vadd.f32 %v15335_v3, %v15319_v52  ;;  %v15359_v4 = vmul.f32 %v22030_v13, %v15350_v22  ;;  %p17297_p11 = scmp.ne.s32.totalorder %s22204_s30, %s17296_s0  ;;  %p17304_p9 = scmp.lt.s32.totalorder %s17302_s28, %s17296_s0 }
0x12cb   : > { %v15370_v20 = vpack.c.bf16 %v15365_v15, %v15364_v38 }
0x12cc   : > { %16540 = vmatprep.mubr.msk.bf16.mxu1 %vm719_vm0, %v15368_v21  ;;  %v15366_v48 = vadd.f32 %v15358_v27, %v15342_v0  ;;  %v15367_v24 = vadd.f32 %v15359_v4, %v15343_v56  ;;  %p17298_p1 = pnand %p17297_p11, %p22645_p0  ;;  %p17305_p12 = por %p17304_p9, %p17303_p7 }
0x12cd   : > { %16541 = vmatmul.mubr.msk.bf16.vlgmr.msra.gmra.mrb[152].mxu1 %vm719_vm0, %v15369_v2 }
0x12ce   : > { %16544 = vmatprep.mubr.msk.bf16.mxu1 %vm719_vm0, %v15370_v20  ;;  %v15371_v46 = vpack.c.bf16 %v15367_v24, %v15366_v48  ;;  %p17299_p3 = pneg %p17298_p1 }
0x12d0   : > { %p17306_p2 = pnand %p17305_p12, %p17299_p3 }
0x12d5   : > { %16545 = vmatmul.mubr.msk.bf16.gmra.mrb[156].mxu1 %vm719_vm0, %v15371_v46 }
0x13a0   : > { %v16542_v58 = vpop.f32.mrb[152].mxu1 }
0x13a1   : > { %v15450_v19 = vadd.f32 %v16542_v58, %v15877_v55  ;;  %v15441_v13 = vpop.f32.mrb[153].mxu1 }
0x13a2   : > { %v15442_v17 = vadd.f32 %v15877_v55, %v15441_v13  ;;  %v16543_v61 = vpop.f32.mrb[154].mxu1 }
0x13a3   : > { %15474 = vst.msk [vmem:[%s674_s25 + $0x10] sm:$0xff] %vm719_vm0, %v15450_v19  ;;  %v15453_v63 = vadd.f32 %v16543_v61, %v15877_v55  ;;  %v15444_v29 = vpop.f32.mrb[155].mxu1 }
0x13a4   : > { %15472 = vst.msk [vmem:[%s674_s25] sm:$0xff] %vm719_vm0, %v15442_v17  ;;  %v15445_v60 = vadd.f32 %v15877_v55, %v15444_v29 }
0x13a5   : > { %15475 = vst.msk [vmem:[%s674_s25 + $0x18] sm:$0xff] %vm719_vm0, %v15453_v63 }
0x13a6   : > { %15473 = vst.msk [vmem:[%s674_s25 + $0x8] sm:$0xff] %vm719_vm0, %v15445_v60 }
0x13a8   : > { %v16546_v9 = vpop.f32.mrb[156].mxu1 }
0x13a9   : > { %v15466_v51 = vadd.f32 %v16546_v9, %v15877_v55  ;;  %v15457_v47 = vpop.f32.mrb[157].mxu1 }
0x13aa   : > { %v15458_v16 = vadd.f32 %v15877_v55, %v15457_v47  ;;  %v16547_v26 = vpop.f32.mrb[158].mxu1 }
0x13ab   : > { %15478 = vst.msk [vmem:[%s674_s25 + $0x30] sm:$0xff] %vm719_vm0, %v15466_v51  ;;  %v15469_v6 = vadd.f32 %v16547_v26, %v15877_v55  ;;  %v15460_v32 = vpop.f32.mrb[159].mxu1 }
0x13ac   : > { %15476 = vst.msk [vmem:[%s674_s25 + $0x20] sm:$0xff] %vm719_vm0, %v15458_v16  ;;  %v15461_v25 = vadd.f32 %v15877_v55, %v15460_v32 }
0x13ad   : > { %15479 = vst.msk [vmem:[%s674_s25 + $0x38] sm:$0xff] %vm719_vm0, %v15469_v6 }
0x13ae   : > { %15477 = vst.msk [vmem:[%s674_s25 + $0x28] sm:$0xff] %vm719_vm0, %v15461_v25 }
0x13af   : > { %17309 = shalt.err (!%p17306_p2)
}
0x13b0   : > { %s17310_s25 = scalar_lea.hbm %s22201_s19, 1024  ;;  %s17314_s27 = scalar_lea.hbm %s22644_s15, 2048 }
0x13b1   : > { %p17311_p13 = scmp.ne.s32.totalorder %s22201_s19, %s17310_s25  ;;  %p17315_p4 = scmp.lt.u32.totalorder %s22201_s19, %s22644_s15 }
0x13b2   : > { %p17316_p5 = scmp.lt.u32.totalorder %s17314_s27, %s17310_s25  ;;  %p17318_p11 = scmp.lt.u32.totalorder %s17310_s25, %s22201_s19 }
0x13b3   : > { %p17312_p6 = pnand %p17311_p13, %p22645_p0 }
0x13b4   : > { %p17317_p8 = por %p17316_p5, %p17315_p4 }
0x13b5   : > { %p17313_p10 = pneg %p17312_p6 }
0x13b6   : > { %p17319_p1 = por %p17318_p11, %p17317_p8 }
0x13b8   : > { %p17320_p3 = pnand %p17319_p1, %p17313_p10 }
0x13ba   : > { %17323 = shalt.err (!%p17320_p3)
}
0x13bb   : > { %s17401_s0 = smov 128   ;;  %s22646_s28 = smov 8  }
0x13bc   : > { %s22647_s3 = scalar_lea.sflag [#allocation4], %s17680_s16 }
0x13bd   : > { %16558 = dma.vmem_to_hbm [thread:$0]  (%p22645_p0), %s22204_s30, 1024, %s22201_s19, %s22647_s3, %s17401_s0, %s17401_s0, %s22646_s28  }
0x13be PF: > { %s22648_s2 = sld [smem:[#allocation12_spill]]  ;;  %s22649_s6 = sld [smem:[#allocation13_spill]] }
0x13bf   : > { %p22651_p9 = scmp.ge.s32.totalorder %s17366_s24, 2 }
0x13c4   : > { %s15509_s17 = sand.u32 1, %s22648_s2   ;;  %p22650_p7 = scmp.ne.s32.totalorder %s22649_s6, 0 }
0x13c5   : > { %s15510_s25 = scalar_lea.sflag [#allocation4], %s15509_s17 }
0x13c6   : > { %p16572_p12 = pnand %p22651_p9, %p22650_p7 }
0x13c8   : > { %17349 = dma.done.wait (!%p16572_p12), %s15510_s25, 1024  }
0x13c9   : > { %17351 = vsyncadd (!%p16572_p12), %s15510_s25, 4294966272  ;;  %s22652_s20 = smov %s17634_s1  ;;  %p34_p2 = scmp.ge.s32.totalorder %s17618_s18, 4  }
0x13ca   : > { %s22653_s1 = smov %s17358_s22  ;;  %s22654_s22 = smov %s17362_s23 }
0x13cb   : > { %s22655_s23 = smov %s22652_s20  ;;  %s22656_s24 = smov %s17618_s18 }
0x13cc   :  { %36 = sbr.rel (!%p34_p2) target bundleno = 19 (0x13), region = 153 }
0x13d3   :  { %15515 = vsyncpa [#allocation3], 1 }
0x13d4   :  { %15517 = vsyncpa [#allocation3 + $0x1], 1 }
0x13d5   :  { %15518 = vsyncpa [#allocation6], 1 }
0x13d6   :  { %15519 = vsyncpa [#allocation4], 1 }
0x13d7   :  { %15521 = vsyncpa [#allocation4 + $0x1], 1 }

</bundles_post_ra>
